<compile_context>
chip_gen: v5e
topology: v5e:2x2
jax: 0.10.0
libtpu: 0.0.40
codegen_flags: <defaults>
</compile_context>

<pallas_src>
import functools
import math

import jax
import jax.numpy as jnp
from jax.experimental import pallas as pl
from jax.experimental.pallas import tpu as pltpu

SMEM = pltpu.MemorySpace.SMEM

_BN_EPS = 1e-5
_TEN_OVER_LN10 = 10.0 / math.log(10.0)      # 10*log10(x) = ln(x)*10/ln(10)

# static channel counts (Python ints)
CONVV_COUT = 204
CONVH_COUT = 153                            # 51 * 3
MID_COUT = 64
NUM_CLASSES = 9
DENSE_HIDDEN = 200

CPAD = 256                                  # padded width per front-end branch
MIDPAD = 128                                # padded mid-end width
FRONT_C = 3 * CPAD                          # 768  (m1 | m2 | m3+m4+m5)
FEAT_C = FRONT_C + 3 * MIDPAD               # 1152 (front | res1 | res2 | res3)
HPAD = 256                                  # dense hidden 200 -> 256
OPAD = 128                                  # classes 9 -> 128

CONV_V_SPECS = (("m1", 67), ("m2", 38))     # kf = int(0.7*96), int(0.4*96)
CONV_H_SPECS = ((51, 129), (51, 65), (51, 33))

# in-kernel time-chunk sizes (bound matmul operand / staging vreg footprint)
_DB_CHUNK = 128
_CONV_CHUNK = 128
_MID_CHUNK_WIDE = 32
_MID_CHUNK_NARROW = 128
_HEAD_ROW_CHUNK = 16


# ----------------------------- small utilities -----------------------------

@functools.lru_cache(maxsize=None)
def _vmem_limit_bytes():
    """Generation-dependent scoped-VMEM limit (v5e/v6e 128 MiB, v7x 64 MiB)."""
    cap = 128 * 1024 * 1024
    try:
        cap = int(pltpu.get_tpu_info().vmem_capacity_bytes)
    except Exception:
        pass
    return int(min(cap * 3 // 4, 100 * 1024 * 1024))


def _cparams(dim_sem):
    return pltpu.CompilerParams(dimension_semantics=dim_sem,
                                vmem_limit_bytes=_vmem_limit_bytes())


def _chunks(total, size):
    out = []
    t = 0
    while t < total:
        out.append((t, min(size, total - t)))
        t += size
    return tuple(out)


def _pick_t_tile(t, max_tile=256):
    """largest divisor of t that is a multiple of 8 and <= max_tile, else t."""
    if t <= max_tile:
        return t
    for tt in range(max_tile, 7, -1):
        if t % tt == 0 and tt % 8 == 0:
            return tt
    return t


# ------------------ dB + spec BatchNorm + frequency mean ------------------

def _db_specbn_kernel(x_ref, sc_ref, sh_ref, spec_ref, avg_ref, *, chunks):
    # AmplitudeToDB (power, top_db=None) fused with BatchNorm2d(1) (eval) and
    # the frequency average needed by the Conv_H branches.
    sc = sc_ref[0, 0]
    sh = sh_ref[0, 0]
    for t0, ts in chunks:
        x = jnp.maximum(x_ref[0, t0:t0 + ts, :], 1e-10)
        s = jnp.log(x) * (_TEN_OVER_LN10 * sc) + sh
        spec_ref[0, t0:t0 + ts, :] = s.astype(spec_ref.dtype)
        avg_ref[0, t0:t0 + ts, :] = jnp.mean(s, axis=1, keepdims=True)


def db_specbn(x_t, scale, shift):
    """x_t (B, T, 96) f32 -> (B, T, 96) bf16 dB spec, (B, T, 1) f32 freq-mean."""
    B, T, F = x_t.shape
    return pl.pallas_call(
        functools.partial(_db_specbn_kernel, chunks=_chunks(T, _DB_CHUNK)),
        out_shape=(jax.ShapeDtypeStruct((B, T, F), jnp.bfloat16),
                   jax.ShapeDtypeStruct((B, T, 1), jnp.float32)),
        grid=(B,),
        in_specs=[pl.BlockSpec((1, T, F), lambda b: (b, 0, 0)),
                  pl.BlockSpec((1, 1), lambda b: (0, 0), memory_space=SMEM),
                  pl.BlockSpec((1, 1), lambda b: (0, 0), memory_space=SMEM)],
        out_specs=(pl.BlockSpec((1, T, F), lambda b: (b, 0, 0)),
                   pl.BlockSpec((1, T, 1), lambda b: (b, 0, 0))),
        compiler_params=_cparams(("parallel",)),
    )(x_t, scale.reshape(1, 1), shift.reshape(1, 1))


# -------- Conv_V: 7 shifted matmuls + BN + ReLU + max-over-frequency --------

def _convv_kernel(p_ref, w_ref, sc_ref, sh_ref, o_ref, acc_ref, *, chunks):
    f = pl.program_id(1)
    nf = pl.num_programs(1)
    sc = sc_ref[...]
    sh = sh_ref[...]
    for t0, ts in chunks:
        # staged upcast of the halo'd time chunk (aligned bf16 load); the 7
        # time-tap slices come from the f32 staging value.
        xc = p_ref[0, 0, t0:t0 + ts + 6, :].astype(jnp.float32)
        y = jnp.dot(xc[0:ts, :].astype(jnp.bfloat16), w_ref[0],
                    preferred_element_type=jnp.float32)
        for dt in range(1, 7):
            y = y + jnp.dot(xc[dt:dt + ts, :].astype(jnp.bfloat16), w_ref[dt],
                            preferred_element_type=jnp.float32)
        y = jnp.maximum(y * sc + sh, 0.0)

        @pl.when(f == 0)
        def _():
            acc_ref[t0:t0 + ts, :] = y

        @pl.when(f > 0)
        def _():
            acc_ref[t0:t0 + ts, :] = jnp.maximum(acc_ref[t0:t0 + ts, :], y)

        @pl.when(f == nf - 1)
        def _():
            o_ref[0, t0:t0 + ts, :] = acc_ref[t0:t0 + ts, :].astype(o_ref.dtype)


def conv_v_maxfreq(patches, pp, T):
    """patches (B, Fout, T+6, kf) bf16 -> (B, T, CPAD) bf16."""
    B, Fout, Tp6, kf = patches.shape
    w = pp["w"]                                           # (7, kf, CPAD) bf16
    flops = 2 * B * Fout * T * 7 * kf * CPAD
    bytes_acc = patches.size * 2 + w.size * 2 + B * T * CPAD * 2 + 2 * CPAD * 4
    return pl.pallas_call(
        functools.partial(_convv_kernel, chunks=_chunks(T, _CONV_CHUNK)),
        out_shape=jax.ShapeDtypeStruct((B, T, CPAD), jnp.bfloat16),
        grid=(B, Fout),
        in_specs=[pl.BlockSpec((1, 1, Tp6, kf), lambda b, f: (b, f, 0, 0)),
                  pl.BlockSpec((7, kf, CPAD), lambda b, f: (0, 0, 0)),
                  pl.BlockSpec((1, CPAD), lambda b, f: (0, 0)),
                  pl.BlockSpec((1, CPAD), lambda b, f: (0, 0))],
        out_specs=pl.BlockSpec((1, T, CPAD), lambda b, f: (b, 0, 0)),
        scratch_shapes=[pltpu.VMEM((T, CPAD), jnp.float32)],
        compiler_params=_cparams(("parallel", "arbitrary")),
        cost_estimate=pl.CostEstimate(flops=int(flops), transcendentals=0,
                                      bytes_accessed=int(bytes_acc)),
    )(patches, w, pp["sc"], pp["sh"])


# ----------------- Conv_H (3 branches fused): matmul + BN + ReLU -----------------

def _convh_kernel(p_ref, w_ref, sc_ref, sh_ref, o_ref, *, chunks):
    sc = sc_ref[...]
    sh = sh_ref[...]
    for t0, ts in chunks:
        y = jnp.dot(p_ref[0, t0:t0 + ts, :], w_ref[...],
                    preferred_element_type=jnp.float32)
        o_ref[0, t0:t0 + ts, :] = jnp.maximum(y * sc + sh, 0.0).astype(o_ref.dtype)


def conv_h(patches, pp):
    """patches (B, T, 129) bf16 -> (B, T, CPAD) bf16 (m3|m4|m5 block-embedded)."""
    B, T, K = patches.shape
    w = pp["w"]                                           # (129, CPAD) bf16
    return pl.pallas_call(
        functools.partial(_convh_kernel, chunks=_chunks(T, _CONV_CHUNK)),
        out_shape=jax.ShapeDtypeStruct((B, T, CPAD), jnp.bfloat16),
        grid=(B,),
        in_specs=[pl.BlockSpec((1, T, K), lambda b: (b, 0, 0)),
                  pl.BlockSpec((K, CPAD), lambda b: (0, 0)),
                  pl.BlockSpec((1, CPAD), lambda b: (0, 0)),
                  pl.BlockSpec((1, CPAD), lambda b: (0, 0))],
        out_specs=pl.BlockSpec((1, T, CPAD), lambda b: (b, 0, 0)),
        compiler_params=_cparams(("parallel",)),
        cost_estimate=pl.CostEstimate(flops=int(2 * B * T * K * CPAD),
                                      transcendentals=0,
                                      bytes_accessed=int(patches.size * 2 + w.size * 2
                                                         + B * T * CPAD * 2)),
    )(patches, w, pp["sc"], pp["sh"])


# ---------- mid-end Conv_1d (k=7): in-kernel windowing, optional residual ----------

def _mid_conv_kernel(x_ref, w_ref, sc_ref, sh_ref, *rest, chunks, residual):
    if residual:
        r_ref, o_ref = rest
    else:
        (o_ref,) = rest
    sc = sc_ref[...]
    sh = sh_ref[...]
    for t0, ts in chunks:
        xc = x_ref[0, t0:t0 + ts + 6, :].astype(jnp.float32)
        y = jnp.dot(xc[0:ts, :].astype(jnp.bfloat16), w_ref[0],
                    preferred_element_type=jnp.float32)
        for dt in range(1, 7):
            y = y + jnp.dot(xc[dt:dt + ts, :].astype(jnp.bfloat16), w_ref[dt],
                            preferred_element_type=jnp.float32)
        y = jnp.maximum(y * sc + sh, 0.0)
        if residual:
            y = y + r_ref[0, t0:t0 + ts, :].astype(jnp.float32)
        o_ref[0, t0:t0 + ts, :] = y.astype(o_ref.dtype)


def mid_conv(x, pp, residual=None):
    """x (B, T, Cin) bf16 -> relu(bn(conv1d_k7(x))) [+ residual], (B, T, MIDPAD) bf16."""
    B, T, Cin = x.shape
    w = pp["w"]                                           # (7, Cin, MIDPAD) bf16
    xp = jnp.pad(x, ((0, 0), (3, 3), (0, 0)))
    chunk = _MID_CHUNK_WIDE if Cin > 256 else _MID_CHUNK_NARROW
    in_specs = [pl.BlockSpec((1, T + 6, Cin), lambda b: (b, 0, 0)),
                pl.BlockSpec((7, Cin, MIDPAD), lambda b: (0, 0, 0)),
                pl.BlockSpec((1, MIDPAD), lambda b: (0, 0)),
                pl.BlockSpec((1, MIDPAD), lambda b: (0, 0))]
    args = [xp, w, pp["sc"], pp["sh"]]
    if residual is not None:
        in_specs.append(pl.BlockSpec((1, T, MIDPAD), lambda b: (b, 0, 0)))
        args.append(residual)
    kern = functools.partial(_mid_conv_kernel, chunks=_chunks(T, chunk),
                             residual=residual is not None)
    return pl.pallas_call(
        kern,
        out_shape=jax.ShapeDtypeStruct((B, T, MIDPAD), jnp.bfloat16),
        grid=(B,),
        in_specs=in_specs,
        out_specs=pl.BlockSpec((1, T, MIDPAD), lambda b: (b, 0, 0)),
        compiler_params=_cparams(("parallel",)),
        cost_estimate=pl.CostEstimate(flops=int(2 * B * T * 7 * Cin * MIDPAD),
                                      transcendentals=0,
                                      bytes_accessed=int(xp.size * 2 + w.size * 2
                                                         + B * T * MIDPAD * 2)),
    )(*args)


# -------- head: global max/avg pool + dense1 + BN + ReLU + dense2 (fused) --------

def _head_kernel(feat_ref, w1a_ref, w1b_ref, sc_ref, sh_ref, w2_ref, b2_ref,
                 o_ref, max_acc, sum_acc, *, tt, t_total):
    k = pl.program_id(0)
    nt = pl.num_programs(0)

    tmax = None
    tsum = None
    t0 = 0
    while t0 < tt:
        ts = min(_HEAD_ROW_CHUNK, tt - t0)
        xc = feat_ref[:, t0:t0 + ts, :].astype(jnp.float32)
        cmax = jnp.max(xc, axis=1)
        csum = jnp.sum(xc, axis=1)
        if tmax is None:
            tmax, tsum = cmax, csum
        else:
            tmax = jnp.maximum(tmax, cmax)
            tsum = tsum + csum
        t0 += ts

    @pl.when(k == 0)
    def _():
        max_acc[...] = tmax
        sum_acc[...] = tsum

    @pl.when(k > 0)
    def _():
        max_acc[...] = jnp.maximum(max_acc[...], tmax)
        sum_acc[...] = sum_acc[...] + tsum

    @pl.when(k == nt - 1)
    def _():
        mp = max_acc[...]
        ap = sum_acc[...] * (1.0 / t_total)
        h = (jnp.dot(mp, w1a_ref[...], preferred_element_type=jnp.float32)
             + jnp.dot(ap, w1b_ref[...], preferred_element_type=jnp.float32))
        h = jnp.maximum(h * sc_ref[...] + sh_ref[...], 0.0)   # Dropout = identity (eval)
        o_ref[...] = (jnp.dot(h, w2_ref[...], preferred_element_type=jnp.float32)
                      + b2_ref[...])


def head_pool_dense(feat, pp):
    B, T, C = feat.shape
    tt = _pick_t_tile(T)
    return pl.pallas_call(
        functools.partial(_head_kernel, tt=tt, t_total=float(T)),
        out_shape=jax.ShapeDtypeStruct((B, OPAD), jnp.float32),
        grid=(T // tt,),
        in_specs=[pl.BlockSpec((B, tt, C), lambda k: (0, k, 0)),
                  pl.BlockSpec((C, HPAD), lambda k: (0, 0)),
                  pl.BlockSpec((C, HPAD), lambda k: (0, 0)),
                  pl.BlockSpec((1, HPAD), lambda k: (0, 0)),
                  pl.BlockSpec((1, HPAD), lambda k: (0, 0)),
                  pl.BlockSpec((HPAD, OPAD), lambda k: (0, 0)),
                  pl.BlockSpec((1, OPAD), lambda k: (0, 0))],
        out_specs=pl.BlockSpec((B, OPAD), lambda k: (0, 0)),
        scratch_shapes=[pltpu.VMEM((B, C), jnp.float32),
                        pltpu.VMEM((B, C), jnp.float32)],
        compiler_params=_cparams(("arbitrary",)),
    )(feat, pp["w1a"], pp["w1b"], pp["sc1"], pp["sh1"], pp["w2"], pp["b2"])


# ----------------------------- JAX glue: window builders -----------------------------

def conv_v_patches(spec_bt, kf):
    """spec_bt (B, T, 96) bf16 -> (B, Fout, T+6, kf) bf16 (freq windows, time halo)."""
    B, T, F = spec_bt.shape
    Fout = F - kf + 1
    sp = jnp.pad(spec_bt, ((0, 0), (3, 3), (0, 0)))
    return jnp.stack([sp[:, :, f0:f0 + kf] for f0 in range(Fout)], axis=1)


def conv_h_patches(avg, kmax=129):
    """avg (B, T) f32 -> (B, T, 129) bf16 centered time windows."""
    B, T = avg.shape
    p = kmax // 2
    ap = jnp.pad(avg, ((0, 0), (p, p)))
    idx = jnp.arange(T)[:, None] + jnp.arange(kmax)[None, :]
    return ap[:, idx].astype(jnp.bfloat16)


# ----------------------------- channel-layout maps -----------------------------

def _front_row_map_py():
    # original 561 = [m1 204 | m2 204 | m3 51 | m4 51 | m5 51]
    # padded  768 = [m1 @ 0 | m2 @ 256 | (m3,m4,m5) @ 512]
    idx = []
    for ci in range(561):
        if ci < 204:
            idx.append(ci)
        elif ci < 408:
            idx.append(256 + (ci - 204))
        else:
            idx.append(512 + (ci - 408))
    return idx


def _feat_row_map_py():
    idx = list(_front_row_map_py())
    for ci in range(561, 753):
        blk = (ci - 561) // 64
        idx.append(FRONT_C + blk * MIDPAD + (ci - 561) % 64)
    return idx


# ----------------------------- Parameters -----------------------------

def _init_bn(key, c):
    k1, k2, k3, k4 = jax.random.split(key, 4)
    gamma = 1.0 + 0.1 * jax.random.normal(k1, (c,), jnp.float32)
    beta = 0.1 * jax.random.normal(k2, (c,), jnp.float32)
    rmean = 0.1 * jax.random.normal(k3, (c,), jnp.float32)
    rvar = 1.0 + 0.1 * jax.random.uniform(k4, (c,), jnp.float32)
    return gamma, beta, rmean, rvar


def _fold_bn(bias, bn):
    gamma, beta, rmean, rvar = bn
    sc = gamma / jnp.sqrt(rvar + _BN_EPS)
    sh = (bias - rmean) * sc + beta
    return sc, sh


def _conv_v_params(key, cout, kf, kt=7, n_pad=CPAD):
    k1, k2, k3 = jax.random.split(key, 3)
    w = jax.random.normal(k1, (cout, kf, kt), jnp.float32) / math.sqrt(kf * kt)
    b = 0.01 * jax.random.normal(k2, (cout,), jnp.float32)
    sc, sh = _fold_bn(b, _init_bn(k3, cout))
    w_r = jnp.zeros((kt, kf, n_pad), jnp.float32)
    w_r = w_r.at[:, :, :cout].set(jnp.transpose(w, (2, 1, 0)))   # [dt, df, c]
    return dict(w=w_r.astype(jnp.bfloat16),
                sc=jnp.pad(sc, (0, n_pad - cout)).reshape(1, n_pad),
                sh=jnp.pad(sh, (0, n_pad - cout)).reshape(1, n_pad))


def _conv_h_params(keys, specs, kmax=129, n_pad=CPAD):
    total = sum(c for c, _ in specs)
    W = jnp.zeros((kmax, n_pad), jnp.float32)
    scs, shs = [], []
    col = 0
    for key, (cout, k) in zip(keys, specs):
        k1, k2, k3 = jax.random.split(key, 3)
        w = jax.random.normal(k1, (cout, k), jnp.float32) / math.sqrt(k)
        b = 0.01 * jax.random.normal(k2, (cout,), jnp.float32)
        sc, sh = _fold_bn(b, _init_bn(k3, cout))
        roff = kmax // 2 - k // 2
        W = W.at[roff:roff + k, col:col + cout].set(w.T)
        scs.append(sc)
        shs.append(sh)
        col += cout
    return dict(w=W.astype(jnp.bfloat16),
                sc=jnp.pad(jnp.concatenate(scs), (0, n_pad - total)).reshape(1, n_pad),
                sh=jnp.pad(jnp.concatenate(shs), (0, n_pad - total)).reshape(1, n_pad))


def _mid_params(key, cout, cin, cin_pad, row_map=None, k=7, n_pad=MIDPAD):
    k1, k2, k3 = jax.random.split(key, 3)
    w = jax.random.normal(k1, (cout, cin, k), jnp.float32) / math.sqrt(cin * k)
    b = 0.01 * jax.random.normal(k2, (cout,), jnp.float32)
    sc, sh = _fold_bn(b, _init_bn(k3, cout))
    wt = jnp.transpose(w, (2, 1, 0))                             # (k, cin, cout)
    w7 = jnp.zeros((k, cin_pad, n_pad), jnp.float32)
    if row_map is None:
        w7 = w7.at[:, :cin, :cout].set(wt)
    else:
        w7 = w7.at[:, jnp.asarray(row_map, jnp.int32), :cout].set(wt)
    return dict(w=w7.astype(jnp.bfloat16),
                sc=jnp.pad(sc, (0, n_pad - cout)).reshape(1, n_pad),
                sh=jnp.pad(sh, (0, n_pad - cout)).reshape(1, n_pad))


def _head_params(kd, feat=753, hidden=DENSE_HIDDEN, ncls=NUM_CLASSES,
                 cpad=FEAT_C, hpad=HPAD, opad=OPAD):
    k1, k2, k3, k4, k5 = jax.random.split(kd, 5)
    w1 = jax.random.normal(k1, (hidden, 2 * feat), jnp.float32) / math.sqrt(2.0 * feat)
    b1 = 0.01 * jax.random.normal(k2, (hidden,), jnp.float32)
    sc1, sh1 = _fold_bn(b1, _init_bn(k3, hidden))
    row_map = jnp.asarray(_feat_row_map_py(), jnp.int32)
    w1a = jnp.zeros((cpad, hpad), jnp.float32).at[row_map, :hidden].set(w1[:, :feat].T)
    w1b = jnp.zeros((cpad, hpad), jnp.float32).at[row_map, :hidden].set(w1[:, feat:].T)
    w2 = jax.random.normal(k4, (ncls, hidden), jnp.float32) / math.sqrt(float(hidden))
    b2 = 0.01 * jax.random.normal(k5, (ncls,), jnp.float32)
    W2 = jnp.zeros((hpad, opad), jnp.float32).at[:hidden, :ncls].set(w2.T)
    return dict(w1a=w1a, w1b=w1b,
                sc1=jnp.pad(sc1, (0, hpad - hidden)).reshape(1, hpad),
                sh1=jnp.pad(sh1, (0, hpad - hidden)).reshape(1, hpad),
                w2=W2,
                b2=jnp.pad(b2, (0, opad - ncls)).reshape(1, opad))


def init_params(key):
    ks = jax.random.split(key, 10)
    p = {}
    p["spec_bn"] = _fold_bn(jnp.zeros((1,), jnp.float32), _init_bn(ks[0], 1))
    p["m1"] = _conv_v_params(ks[1], CONVV_COUT, 67)      # int(0.7*96)=67
    p["m2"] = _conv_v_params(ks[2], CONVV_COUT, 38)      # int(0.4*96)=38
    p["convh"] = _conv_h_params((ks[3], ks[4], ks[5]), CONV_H_SPECS)
    p["layer1"] = _mid_params(ks[6], MID_COUT, 561, FRONT_C,
                              row_map=_front_row_map_py())
    p["layer2"] = _mid_params(ks[7], MID_COUT, MID_COUT, MIDPAD)
    p["layer3"] = _mid_params(ks[8], MID_COUT, MID_COUT, MIDPAD)
    p["head"] = _head_params(ks[9])
    return p


# ----------------------------- Forward pass -----------------------------

def net_forward(params, x):
    """x: (B, 96, T) power spectrogram -> (B, 9) scores."""
    B, F, T = x.shape

    sc0, sh0 = params["spec_bn"]
    x_t = jnp.transpose(x, (0, 2, 1))                    # (B, T, 96) f32, time-major
    spec, avg = db_specbn(x_t, sc0, sh0)                 # bf16 (B,T,96), f32 (B,T,1)
    avg = avg[..., 0]                                    # (B, T)

    outs = []
    # Conv_V branches: Conv2d(1->204,(kf,7)) + BN + ReLU + max over frequency.
    # Frequency is the innermost grid reduction; time taps are shifted matmuls
    # inside the kernel (no HBM im2col).
    for name, kf in CONV_V_SPECS:
        pp = params[name]
        patches = conv_v_patches(spec, kf)               # (B, Fout, T+6, kf) bf16
        outs.append(conv_v_maxfreq(patches, pp, T))      # (B, T, 256) bf16

    # Conv_H branches m3/m4/m5 fused into ONE matmul (block-embedded weights).
    hp = conv_h_patches(avg)                             # (B, T, 129) bf16
    outs.append(conv_h(hp, params["convh"]))             # (B, T, 256) bf16

    # 128-aligned concatenation only (no non-aligned slicing of channels).
    front = jnp.concatenate(outs, axis=-1)               # (B, T, 768) bf16

    # mid-end residual Conv_1d blocks (k=7, pooling=1 -> identity); padded
    # 64->128 out channels, zero-row weights absorb the padded front layout.
    res1 = mid_conv(front, params["layer1"])             # (B, T, 128)
    res2 = mid_conv(res1, params["layer2"], residual=res1)
    res3 = mid_conv(res2, params["layer3"], residual=res2)

    feat = jnp.concatenate([front, res1, res2, res3], axis=-1)   # (B, T, 1152)

    # fused: global max/avg pool over time + dense1 + BN + ReLU + dense2
    out = head_pool_dense(feat, params["head"])          # (B, 128) f32
    return out[:, :NUM_CLASSES]


# ----------------------------- Main -----------------------------

if __name__ == "__main__":
    key = jax.random.PRNGKey(0)
    kp, kx = jax.random.split(key)
    params = init_params(kp)

    # frequency_bins is fixed to 96 by the architecture; batch and time small.
    B, F, T = 2, 96, 16
    x = jax.random.uniform(kx, (B, F, T), jnp.float32, minval=1e-3, maxval=5.0)

    fwd = jax.jit(net_forward)
    out = jax.block_until_ready(fwd(params, x))

    assert out.shape == (B, NUM_CLASSES), out.shape
    assert out.dtype == jnp.float32
    assert bool(jnp.all(jnp.isfinite(out)))
    print("KERNEL_OK")
</pallas_src>

<mosaic_0001>
module attributes {stable_mosaic.version = 11 : i64} {
  func.func @_db_specbn_kernel(%arg0: i32, %arg1: memref<1x16x96xf32, #tpu.memory_space<vmem>>, %arg2: memref<1x1xf32, #tpu.memory_space<smem>>, %arg3: memref<1x1xf32, #tpu.memory_space<smem>>, %arg4: memref<1x16x96xbf16, #tpu.memory_space<vmem>>, %arg5: memref<1x16x1xf32, #tpu.memory_space<vmem>>) attributes {dimension_semantics = [#tpu.dimension_semantics<parallel>], iteration_bounds = array<i64: 2>, scalar_prefetch = 0 : i64, scratch_operands = 0 : i64, tpu.core_type = #tpu.core_type<tc>, window_params = [{transform_indices = @transform_0, window_bounds = array<i64: 1, 16, 96>}, {transform_indices = @transform_1, window_bounds = array<i64: 1, 1>}, {transform_indices = @transform_2, window_bounds = array<i64: 1, 1>}, {transform_indices = @transform_3, window_bounds = array<i64: 1, 16, 96>}, {transform_indices = @transform_4, window_bounds = array<i64: 1, 16, 1>}]} {
    %c0 = arith.constant 0 : index
    %c0_0 = arith.constant 0 : index
    %0 = memref.load %arg2[%c0, %c0_0] : memref<1x1xf32, #tpu.memory_space<smem>>
    %c0_1 = arith.constant 0 : index
    %c0_2 = arith.constant 0 : index
    %1 = memref.load %arg3[%c0_1, %c0_2] : memref<1x1xf32, #tpu.memory_space<smem>>
    %c0_3 = arith.constant 0 : index
    %c0_4 = arith.constant 0 : index
    %c0_5 = arith.constant 0 : index
    %2 = vector.load %arg1[%c0_3, %c0_4, %c0_5] : memref<1x16x96xf32, #tpu.memory_space<vmem>>, vector<1x16x96xf32>
    %3 = vector.shape_cast %2 : vector<1x16x96xf32> to vector<16x96xf32>
    %cst = arith.constant 1.000000e-10 : f32
    %4 = vector.broadcast %cst : f32 to vector<16x96xf32>
    %5 = arith.maximumf %3, %4 : vector<16x96xf32>
    %6 = math.log %5 : vector<16x96xf32>
    %cst_6 = arith.constant 4.34294462 : f32
    %7 = arith.mulf %cst_6, %0 : f32
    %8 = vector.broadcast %7 : f32 to vector<16x96xf32>
    %9 = arith.mulf %6, %8 : vector<16x96xf32>
    %10 = vector.broadcast %1 : f32 to vector<16x96xf32>
    %11 = arith.addf %9, %10 : vector<16x96xf32>
    %12 = arith.truncf %11 : vector<16x96xf32> to vector<16x96xbf16>
    %c0_7 = arith.constant 0 : index
    %c0_8 = arith.constant 0 : index
    %c0_9 = arith.constant 0 : index
    %13 = vector.load %arg4[%c0_7, %c0_8, %c0_9] : memref<1x16x96xbf16, #tpu.memory_space<vmem>>, vector<1x16x96xbf16>
    %14 = vector.shape_cast %13 : vector<1x16x96xbf16> to vector<16x96xbf16>
    %15 = vector.shape_cast %12 : vector<16x96xbf16> to vector<1x16x96xbf16>
    tpu.vector_store %arg4[%c0_7, %c0_8, %c0_9], %15 {strides = array<i32>} : memref<1x16x96xbf16, #tpu.memory_space<vmem>>, vector<1x16x96xbf16>,
    %cst_10 = arith.constant dense<0.000000e+00> : vector<16xf32>
    %16 = vector.multi_reduction <add>, %11, %cst_10 [1] : vector<16x96xf32> to vector<16xf32>
    %17 = vector.shape_cast %16 : vector<16xf32> to vector<16x1xf32>
    %cst_11 = arith.constant 9.600000e+01 : f32
    %18 = vector.broadcast %cst_11 : f32 to vector<16x1xf32>
    %19 = arith.divf %17, %18 : vector<16x1xf32>
    %c0_12 = arith.constant 0 : index
    %c0_13 = arith.constant 0 : index
    %c0_14 = arith.constant 0 : index
    %20 = vector.load %arg5[%c0_12, %c0_13, %c0_14] : memref<1x16x1xf32, #tpu.memory_space<vmem>>, vector<1x16x1xf32>
    %21 = vector.shape_cast %20 : vector<1x16x1xf32> to vector<16x1xf32>
    %22 = vector.shape_cast %19 : vector<16x1xf32> to vector<1x16x1xf32>
    tpu.vector_store %arg5[%c0_12, %c0_13, %c0_14], %22 {strides = array<i32>} : memref<1x16x1xf32, #tpu.memory_space<vmem>>, vector<1x16x1xf32>,
    return
  }
  func.func @transform_0(%arg0: i32) -> (i32, i32, i32) {
    %c0_i32 = arith.constant 0 : i32
    %c0_i32_0 = arith.constant 0 : i32
    %c0_i32_1 = arith.constant 0 : i32
    return %arg0, %c0_i32, %c0_i32_0 : i32, i32, i32
  }
  func.func @transform_1(%arg0: i32) -> (i32, i32) {
    %c0_i32 = arith.constant 0 : i32
    %c0_i32_0 = arith.constant 0 : i32
    %c0_i32_1 = arith.constant 0 : i32
    return %c0_i32, %c0_i32_0 : i32, i32
  }
  func.func @transform_2(%arg0: i32) -> (i32, i32) {
    %c0_i32 = arith.constant 0 : i32
    %c0_i32_0 = arith.constant 0 : i32
    %c0_i32_1 = arith.constant 0 : i32
    return %c0_i32, %c0_i32_0 : i32, i32
  }
  func.func @transform_3(%arg0: i32) -> (i32, i32, i32) {
    %c0_i32 = arith.constant 0 : i32
    %c0_i32_0 = arith.constant 0 : i32
    %c0_i32_1 = arith.constant 0 : i32
    return %arg0, %c0_i32, %c0_i32_0 : i32, i32, i32
  }
  func.func @transform_4(%arg0: i32) -> (i32, i32, i32) {
    %c0_i32 = arith.constant 0 : i32
    %c0_i32_0 = arith.constant 0 : i32
    %c0_i32_1 = arith.constant 0 : i32
    return %arg0, %c0_i32, %c0_i32_0 : i32, i32, i32
  }
}

module attributes {stable_mosaic.version = 11 : i64} {
  func.func @_convv_kernel(%arg0: i32, %arg1: i32, %arg2: memref<1x1x22x38xbf16, #tpu.memory_space<vmem>>, %arg3: memref<7x38x256xbf16, #tpu.memory_space<vmem>>, %arg4: memref<1x256xf32, #tpu.memory_space<vmem>>, %arg5: memref<1x256xf32, #tpu.memory_space<vmem>>, %arg6: memref<1x16x256xbf16, #tpu.memory_space<vmem>>, %arg7: memref<16x256xf32, #tpu.memory_space<vmem>>) attributes {dimension_semantics = [#tpu.dimension_semantics<parallel>, #tpu.dimension_semantics<arbitrary>], iteration_bounds = array<i64: 2, 59>, scalar_prefetch = 0 : i64, scratch_operands = 1 : i64, tpu.core_type = #tpu.core_type<tc>, window_params = [{transform_indices = @transform_0, window_bounds = array<i64: 1, 1, 22, 38>}, {pipeline_mode = #tpu.pipeline_mode<synchronous>, transform_indices = @transform_1, window_bounds = array<i64: 7, 38, 256>}, {pipeline_mode = #tpu.pipeline_mode<synchronous>, transform_indices = @transform_2, window_bounds = array<i64: 1, 256>}, {pipeline_mode = #tpu.pipeline_mode<synchronous>, transform_indices = @transform_3, window_bounds = array<i64: 1, 256>}, {transform_indices = @transform_4, window_bounds = array<i64: 1, 16, 256>}]} {
    %c0 = arith.constant 0 : index
    %c0_0 = arith.constant 0 : index
    %0 = vector.load %arg4[%c0, %c0_0] : memref<1x256xf32, #tpu.memory_space<vmem>>, vector<1x256xf32>
    %c0_1 = arith.constant 0 : index
    %c0_2 = arith.constant 0 : index
    %1 = vector.load %arg5[%c0_1, %c0_2] : memref<1x256xf32, #tpu.memory_space<vmem>>, vector<1x256xf32>
    %c0_3 = arith.constant 0 : index
    %c0_4 = arith.constant 0 : index
    %c0_5 = arith.constant 0 : index
    %c0_6 = arith.constant 0 : index
    %2 = vector.load %arg2[%c0_3, %c0_4, %c0_5, %c0_6] : memref<1x1x22x38xbf16, #tpu.memory_space<vmem>>, vector<1x1x22x38xbf16>
    %3 = vector.shape_cast %2 : vector<1x1x22x38xbf16> to vector<22x38xbf16>
    %4 = arith.extf %3 : vector<22x38xbf16> to vector<22x38xf32>
    %5 = vector.extract_strided_slice %4 {offsets = [0, 0], sizes = [16, 38], strides = [1, 1]} : vector<22x38xf32> to vector<16x38xf32>
    %6 = arith.truncf %5 : vector<16x38xf32> to vector<16x38xbf16>
    %c0_7 = arith.constant 0 : index
    %c0_8 = arith.constant 0 : index
    %c0_9 = arith.constant 0 : index
    %7 = vector.load %arg3[%c0_7, %c0_8, %c0_9] : memref<7x38x256xbf16, #tpu.memory_space<vmem>>, vector<1x38x256xbf16>
    %8 = vector.shape_cast %7 : vector<1x38x256xbf16> to vector<38x256xbf16>
    %cst = arith.constant dense<0.000000e+00> : vector<16x256xf32>
    %9 = tpu.matmul %6, %8, %cst {dimension_numbers = #tpu.dot_dimension_numbers<[1], [0], [0], [1], [0, 0, 1, 1], [], []>} : vector<16x38xbf16>, vector<38x256xbf16>, vector<16x256xf32> -> vector<16x256xf32>
    %10 = vector.extract_strided_slice %4 {offsets = [1, 0], sizes = [16, 38], strides = [1, 1]} : vector<22x38xf32> to vector<16x38xf32>
    %11 = arith.truncf %10 : vector<16x38xf32> to vector<16x38xbf16>
    %c1 = arith.constant 1 : index
    %c0_10 = arith.constant 0 : index
    %c0_11 = arith.constant 0 : index
    %12 = vector.load %arg3[%c1, %c0_10, %c0_11] : memref<7x38x256xbf16, #tpu.memory_space<vmem>>, vector<1x38x256xbf16>
    %13 = vector.shape_cast %12 : vector<1x38x256xbf16> to vector<38x256xbf16>
    %cst_12 = arith.constant dense<0.000000e+00> : vector<16x256xf32>
    %14 = tpu.matmul %11, %13, %cst_12 {dimension_numbers = #tpu.dot_dimension_numbers<[1], [0], [0], [1], [0, 0, 1, 1], [], []>} : vector<16x38xbf16>, vector<38x256xbf16>, vector<16x256xf32> -> vector<16x256xf32>
    %15 = arith.addf %9, %14 : vector<16x256xf32>
    %16 = vector.extract_strided_slice %4 {offsets = [2, 0], sizes = [16, 38], strides = [1, 1]} : vector<22x38xf32> to vector<16x38xf32>
    %17 = arith.truncf %16 : vector<16x38xf32> to vector<16x38xbf16>
    %c2 = arith.constant 2 : index
    %c0_13 = arith.constant 0 : index
    %c0_14 = arith.constant 0 : index
    %18 = vector.load %arg3[%c2, %c0_13, %c0_14] : memref<7x38x256xbf16, #tpu.memory_space<vmem>>, vector<1x38x256xbf16>
    %19 = vector.shape_cast %18 : vector<1x38x256xbf16> to vector<38x256xbf16>
    %cst_15 = arith.constant dense<0.000000e+00> : vector<16x256xf32>
    %20 = tpu.matmul %17, %19, %cst_15 {dimension_numbers = #tpu.dot_dimension_numbers<[1], [0], [0], [1], [0, 0, 1, 1], [], []>} : vector<16x38xbf16>, vector<38x256xbf16>, vector<16x256xf32> -> vector<16x256xf32>
    %21 = arith.addf %15, %20 : vector<16x256xf32>
    %22 = vector.extract_strided_slice %4 {offsets = [3, 0], sizes = [16, 38], strides = [1, 1]} : vector<22x38xf32> to vector<16x38xf32>
    %23 = arith.truncf %22 : vector<16x38xf32> to vector<16x38xbf16>
    %c3 = arith.constant 3 : index
    %c0_16 = arith.constant 0 : index
    %c0_17 = arith.constant 0 : index
    %24 = vector.load %arg3[%c3, %c0_16, %c0_17] : memref<7x38x256xbf16, #tpu.memory_space<vmem>>, vector<1x38x256xbf16>
    %25 = vector.shape_cast %24 : vector<1x38x256xbf16> to vector<38x256xbf16>
    %cst_18 = arith.constant dense<0.000000e+00> : vector<16x256xf32>
    %26 = tpu.matmul %23, %25, %cst_18 {dimension_numbers = #tpu.dot_dimension_numbers<[1], [0], [0], [1], [0, 0, 1, 1], [], []>} : vector<16x38xbf16>, vector<38x256xbf16>, vector<16x256xf32> -> vector<16x256xf32>
    %27 = arith.addf %21, %26 : vector<16x256xf32>
    %28 = vector.extract_strided_slice %4 {offsets = [4, 0], sizes = [16, 38], strides = [1, 1]} : vector<22x38xf32> to vector<16x38xf32>
    %29 = arith.truncf %28 : vector<16x38xf32> to vector<16x38xbf16>
    %c4 = arith.constant 4 : index
    %c0_19 = arith.constant 0 : index
    %c0_20 = arith.constant 0 : index
    %30 = vector.load %arg3[%c4, %c0_19, %c0_20] : memref<7x38x256xbf16, #tpu.memory_space<vmem>>, vector<1x38x256xbf16>
    %31 = vector.shape_cast %30 : vector<1x38x256xbf16> to vector<38x256xbf16>
    %cst_21 = arith.constant dense<0.000000e+00> : vector<16x256xf32>
    %32 = tpu.matmul %29, %31, %cst_21 {dimension_numbers = #tpu.dot_dimension_numbers<[1], [0], [0], [1], [0, 0, 1, 1], [], []>} : vector<16x38xbf16>, vector<38x256xbf16>, vector<16x256xf32> -> vector<16x256xf32>
    %33 = arith.addf %27, %32 : vector<16x256xf32>
    %34 = vector.extract_strided_slice %4 {offsets = [5, 0], sizes = [16, 38], strides = [1, 1]} : vector<22x38xf32> to vector<16x38xf32>
    %35 = arith.truncf %34 : vector<16x38xf32> to vector<16x38xbf16>
    %c5 = arith.constant 5 : index
    %c0_22 = arith.constant 0 : index
    %c0_23 = arith.constant 0 : index
    %36 = vector.load %arg3[%c5, %c0_22, %c0_23] : memref<7x38x256xbf16, #tpu.memory_space<vmem>>, vector<1x38x256xbf16>
    %37 = vector.shape_cast %36 : vector<1x38x256xbf16> to vector<38x256xbf16>
    %cst_24 = arith.constant dense<0.000000e+00> : vector<16x256xf32>
    %38 = tpu.matmul %35, %37, %cst_24 {dimension_numbers = #tpu.dot_dimension_numbers<[1], [0], [0], [1], [0, 0, 1, 1], [], []>} : vector<16x38xbf16>, vector<38x256xbf16>, vector<16x256xf32> -> vector<16x256xf32>
    %39 = arith.addf %33, %38 : vector<16x256xf32>
    %40 = vector.extract_strided_slice %4 {offsets = [6, 0], sizes = [16, 38], strides = [1, 1]} : vector<22x38xf32> to vector<16x38xf32>
    %41 = arith.truncf %40 : vector<16x38xf32> to vector<16x38xbf16>
    %c6 = arith.constant 6 : index
    %c0_25 = arith.constant 0 : index
    %c0_26 = arith.constant 0 : index
    %42 = vector.load %arg3[%c6, %c0_25, %c0_26] : memref<7x38x256xbf16, #tpu.memory_space<vmem>>, vector<1x38x256xbf16>
    %43 = vector.shape_cast %42 : vector<1x38x256xbf16> to vector<38x256xbf16>
    %cst_27 = arith.constant dense<0.000000e+00> : vector<16x256xf32>
    %44 = tpu.matmul %41, %43, %cst_27 {dimension_numbers = #tpu.dot_dimension_numbers<[1], [0], [0], [1], [0, 0, 1, 1], [], []>} : vector<16x38xbf16>, vector<38x256xbf16>, vector<16x256xf32> -> vector<16x256xf32>
    %45 = arith.addf %39, %44 : vector<16x256xf32>
    %46 = vector.broadcast %0 : vector<1x256xf32> to vector<16x256xf32>
    %47 = arith.mulf %45, %46 : vector<16x256xf32>
    %48 = vector.broadcast %1 : vector<1x256xf32> to vector<16x256xf32>
    %49 = arith.addf %47, %48 : vector<16x256xf32>
    %cst_28 = arith.constant 0.000000e+00 : f32
    %50 = vector.broadcast %cst_28 : f32 to vector<16x256xf32>
    %51 = arith.maximumf %49, %50 : vector<16x256xf32>
    %c0_i32 = arith.constant 0 : i32
    %52 = arith.cmpi eq, %arg1, %c0_i32 : i32
    %53 = arith.extui %52 : i1 to i32
    %c0_i32_29 = arith.constant 0 : i32
    %54 = arith.cmpi ne, %53, %c0_i32_29 : i32
    scf.if %54 {
      %c0_33 = arith.constant 0 : index
      %c0_34 = arith.constant 0 : index
      %61 = vector.load %arg7[%c0_33, %c0_34] : memref<16x256xf32, #tpu.memory_space<vmem>>, vector<16x256xf32>
      tpu.vector_store %arg7[%c0_33, %c0_34], %51 {strides = array<i32>} : memref<16x256xf32, #tpu.memory_space<vmem>>, vector<16x256xf32>,
    } else {
    }
    %c0_i32_30 = arith.constant 0 : i32
    %55 = arith.cmpi sgt, %arg1, %c0_i32_30 : i32
    %56 = arith.extui %55 : i1 to i32
    %c0_i32_31 = arith.constant 0 : i32
    %57 = arith.cmpi ne, %56, %c0_i32_31 : i32
    scf.if %57 {
      %c0_33 = arith.constant 0 : index
      %c0_34 = arith.constant 0 : index
      %61 = vector.load %arg7[%c0_33, %c0_34] : memref<16x256xf32, #tpu.memory_space<vmem>>, vector<16x256xf32>
      %62 = arith.maximumf %61, %51 : vector<16x256xf32>
      %c0_35 = arith.constant 0 : index
      %c0_36 = arith.constant 0 : index
      %63 = vector.load %arg7[%c0_35, %c0_36] : memref<16x256xf32, #tpu.memory_space<vmem>>, vector<16x256xf32>
      tpu.vector_store %arg7[%c0_35, %c0_36], %62 {strides = array<i32>} : memref<16x256xf32, #tpu.memory_space<vmem>>, vector<16x256xf32>,
    } else {
    }
    %c58_i32 = arith.constant 58 : i32
    %58 = arith.cmpi eq, %arg1, %c58_i32 : i32
    %59 = arith.extui %58 : i1 to i32
    %c0_i32_32 = arith.constant 0 : i32
    %60 = arith.cmpi ne, %59, %c0_i32_32 : i32
    scf.if %60 {
      %c0_33 = arith.constant 0 : index
      %c0_34 = arith.constant 0 : index
      %61 = vector.load %arg7[%c0_33, %c0_34] : memref<16x256xf32, #tpu.memory_space<vmem>>, vector<16x256xf32>
      %62 = arith.truncf %61 : vector<16x256xf32> to vector<16x256xbf16>
      %c0_35 = arith.constant 0 : index
      %c0_36 = arith.constant 0 : index
      %c0_37 = arith.constant 0 : index
      %63 = vector.load %arg6[%c0_35, %c0_36, %c0_37] : memref<1x16x256xbf16, #tpu.memory_space<vmem>>, vector<1x16x256xbf16>
      %64 = vector.shape_cast %63 : vector<1x16x256xbf16> to vector<16x256xbf16>
      %65 = vector.shape_cast %62 : vector<16x256xbf16> to vector<1x16x256xbf16>
      tpu.vector_store %arg6[%c0_35, %c0_36, %c0_37], %65 {strides = array<i32>} : memref<1x16x256xbf16, #tpu.memory_space<vmem>>, vector<1x16x256xbf16>,
    } else {
    }
    return
  }
  func.func @transform_0(%arg0: i32, %arg1: i32) -> (i32, i32, i32, i32) {
    %c0_i32 = arith.constant 0 : i32
    %c0_i32_0 = arith.constant 0 : i32
    %c0_i32_1 = arith.constant 0 : i32
    return %arg0, %arg1, %c0_i32, %c0_i32_0 : i32, i32, i32, i32
  }
  func.func @transform_1(%arg0: i32, %arg1: i32) -> (i32, i32, i32) {
    %c0_i32 = arith.constant 0 : i32
    %c0_i32_0 = arith.constant 0 : i32
    %c0_i32_1 = arith.constant 0 : i32
    %c0_i32_2 = arith.constant 0 : i32
    return %c0_i32, %c0_i32_0, %c0_i32_1 : i32, i32, i32
  }
  func.func @transform_2(%arg0: i32, %arg1: i32) -> (i32, i32) {
    %c0_i32 = arith.constant 0 : i32
    %c0_i32_0 = arith.constant 0 : i32
    %c0_i32_1 = arith.constant 0 : i32
    return %c0_i32, %c0_i32_0 : i32, i32
  }
  func.func @transform_3(%arg0: i32, %arg1: i32) -> (i32, i32) {
    %c0_i32 = arith.constant 0 : i32
    %c0_i32_0 = arith.constant 0 : i32
    %c0_i32_1 = arith.constant 0 : i32
    return %c0_i32, %c0_i32_0 : i32, i32
  }
  func.func @transform_4(%arg0: i32, %arg1: i32) -> (i32, i32, i32) {
    %c0_i32 = arith.constant 0 : i32
    %c0_i32_0 = arith.constant 0 : i32
    %c0_i32_1 = arith.constant 0 : i32
    return %arg0, %c0_i32, %c0_i32_0 : i32, i32, i32
  }
}

module attributes {stable_mosaic.version = 11 : i64} {
  func.func @_convv_kernel(%arg0: i32, %arg1: i32, %arg2: memref<1x1x22x67xbf16, #tpu.memory_space<vmem>>, %arg3: memref<7x67x256xbf16, #tpu.memory_space<vmem>>, %arg4: memref<1x256xf32, #tpu.memory_space<vmem>>, %arg5: memref<1x256xf32, #tpu.memory_space<vmem>>, %arg6: memref<1x16x256xbf16, #tpu.memory_space<vmem>>, %arg7: memref<16x256xf32, #tpu.memory_space<vmem>>) attributes {dimension_semantics = [#tpu.dimension_semantics<parallel>, #tpu.dimension_semantics<arbitrary>], iteration_bounds = array<i64: 2, 30>, scalar_prefetch = 0 : i64, scratch_operands = 1 : i64, tpu.core_type = #tpu.core_type<tc>, window_params = [{transform_indices = @transform_0, window_bounds = array<i64: 1, 1, 22, 67>}, {pipeline_mode = #tpu.pipeline_mode<synchronous>, transform_indices = @transform_1, window_bounds = array<i64: 7, 67, 256>}, {pipeline_mode = #tpu.pipeline_mode<synchronous>, transform_indices = @transform_2, window_bounds = array<i64: 1, 256>}, {pipeline_mode = #tpu.pipeline_mode<synchronous>, transform_indices = @transform_3, window_bounds = array<i64: 1, 256>}, {transform_indices = @transform_4, window_bounds = array<i64: 1, 16, 256>}]} {
    %c0 = arith.constant 0 : index
    %c0_0 = arith.constant 0 : index
    %0 = vector.load %arg4[%c0, %c0_0] : memref<1x256xf32, #tpu.memory_space<vmem>>, vector<1x256xf32>
    %c0_1 = arith.constant 0 : index
    %c0_2 = arith.constant 0 : index
    %1 = vector.load %arg5[%c0_1, %c0_2] : memref<1x256xf32, #tpu.memory_space<vmem>>, vector<1x256xf32>
    %c0_3 = arith.constant 0 : index
    %c0_4 = arith.constant 0 : index
    %c0_5 = arith.constant 0 : index
    %c0_6 = arith.constant 0 : index
    %2 = vector.load %arg2[%c0_3, %c0_4, %c0_5, %c0_6] : memref<1x1x22x67xbf16, #tpu.memory_space<vmem>>, vector<1x1x22x67xbf16>
    %3 = vector.shape_cast %2 : vector<1x1x22x67xbf16> to vector<22x67xbf16>
    %4 = arith.extf %3 : vector<22x67xbf16> to vector<22x67xf32>
    %5 = vector.extract_strided_slice %4 {offsets = [0, 0], sizes = [16, 67], strides = [1, 1]} : vector<22x67xf32> to vector<16x67xf32>
    %6 = arith.truncf %5 : vector<16x67xf32> to vector<16x67xbf16>
    %c0_7 = arith.constant 0 : index
    %c0_8 = arith.constant 0 : index
    %c0_9 = arith.constant 0 : index
    %7 = vector.load %arg3[%c0_7, %c0_8, %c0_9] : memref<7x67x256xbf16, #tpu.memory_space<vmem>>, vector<1x67x256xbf16>
    %8 = vector.shape_cast %7 : vector<1x67x256xbf16> to vector<67x256xbf16>
    %cst = arith.constant dense<0.000000e+00> : vector<16x256xf32>
    %9 = tpu.matmul %6, %8, %cst {dimension_numbers = #tpu.dot_dimension_numbers<[1], [0], [0], [1], [0, 0, 1, 1], [], []>} : vector<16x67xbf16>, vector<67x256xbf16>, vector<16x256xf32> -> vector<16x256xf32>
    %10 = vector.extract_strided_slice %4 {offsets = [1, 0], sizes = [16, 67], strides = [1, 1]} : vector<22x67xf32> to vector<16x67xf32>
    %11 = arith.truncf %10 : vector<16x67xf32> to vector<16x67xbf16>
    %c1 = arith.constant 1 : index
    %c0_10 = arith.constant 0 : index
    %c0_11 = arith.constant 0 : index
    %12 = vector.load %arg3[%c1, %c0_10, %c0_11] : memref<7x67x256xbf16, #tpu.memory_space<vmem>>, vector<1x67x256xbf16>
    %13 = vector.shape_cast %12 : vector<1x67x256xbf16> to vector<67x256xbf16>
    %cst_12 = arith.constant dense<0.000000e+00> : vector<16x256xf32>
    %14 = tpu.matmul %11, %13, %cst_12 {dimension_numbers = #tpu.dot_dimension_numbers<[1], [0], [0], [1], [0, 0, 1, 1], [], []>} : vector<16x67xbf16>, vector<67x256xbf16>, vector<16x256xf32> -> vector<16x256xf32>
    %15 = arith.addf %9, %14 : vector<16x256xf32>
    %16 = vector.extract_strided_slice %4 {offsets = [2, 0], sizes = [16, 67], strides = [1, 1]} : vector<22x67xf32> to vector<16x67xf32>
    %17 = arith.truncf %16 : vector<16x67xf32> to vector<16x67xbf16>
    %c2 = arith.constant 2 : index
    %c0_13 = arith.constant 0 : index
    %c0_14 = arith.constant 0 : index
    %18 = vector.load %arg3[%c2, %c0_13, %c0_14] : memref<7x67x256xbf16, #tpu.memory_space<vmem>>, vector<1x67x256xbf16>
    %19 = vector.shape_cast %18 : vector<1x67x256xbf16> to vector<67x256xbf16>
    %cst_15 = arith.constant dense<0.000000e+00> : vector<16x256xf32>
    %20 = tpu.matmul %17, %19, %cst_15 {dimension_numbers = #tpu.dot_dimension_numbers<[1], [0], [0], [1], [0, 0, 1, 1], [], []>} : vector<16x67xbf16>, vector<67x256xbf16>, vector<16x256xf32> -> vector<16x256xf32>
    %21 = arith.addf %15, %20 : vector<16x256xf32>
    %22 = vector.extract_strided_slice %4 {offsets = [3, 0], sizes = [16, 67], strides = [1, 1]} : vector<22x67xf32> to vector<16x67xf32>
    %23 = arith.truncf %22 : vector<16x67xf32> to vector<16x67xbf16>
    %c3 = arith.constant 3 : index
    %c0_16 = arith.constant 0 : index
    %c0_17 = arith.constant 0 : index
    %24 = vector.load %arg3[%c3, %c0_16, %c0_17] : memref<7x67x256xbf16, #tpu.memory_space<vmem>>, vector<1x67x256xbf16>
    %25 = vector.shape_cast %24 : vector<1x67x256xbf16> to vector<67x256xbf16>
    %cst_18 = arith.constant dense<0.000000e+00> : vector<16x256xf32>
    %26 = tpu.matmul %23, %25, %cst_18 {dimension_numbers = #tpu.dot_dimension_numbers<[1], [0], [0], [1], [0, 0, 1, 1], [], []>} : vector<16x67xbf16>, vector<67x256xbf16>, vector<16x256xf32> -> vector<16x256xf32>
    %27 = arith.addf %21, %26 : vector<16x256xf32>
    %28 = vector.extract_strided_slice %4 {offsets = [4, 0], sizes = [16, 67], strides = [1, 1]} : vector<22x67xf32> to vector<16x67xf32>
    %29 = arith.truncf %28 : vector<16x67xf32> to vector<16x67xbf16>
    %c4 = arith.constant 4 : index
    %c0_19 = arith.constant 0 : index
    %c0_20 = arith.constant 0 : index
    %30 = vector.load %arg3[%c4, %c0_19, %c0_20] : memref<7x67x256xbf16, #tpu.memory_space<vmem>>, vector<1x67x256xbf16>
    %31 = vector.shape_cast %30 : vector<1x67x256xbf16> to vector<67x256xbf16>
    %cst_21 = arith.constant dense<0.000000e+00> : vector<16x256xf32>
    %32 = tpu.matmul %29, %31, %cst_21 {dimension_numbers = #tpu.dot_dimension_numbers<[1], [0], [0], [1], [0, 0, 1, 1], [], []>} : vector<16x67xbf16>, vector<67x256xbf16>, vector<16x256xf32> -> vector<16x256xf32>
    %33 = arith.addf %27, %32 : vector<16x256xf32>
    %34 = vector.extract_strided_slice %4 {offsets = [5, 0], sizes = [16, 67], strides = [1, 1]} : vector<22x67xf32> to vector<16x67xf32>
    %35 = arith.truncf %34 : vector<16x67xf32> to vector<16x67xbf16>
    %c5 = arith.constant 5 : index
    %c0_22 = arith.constant 0 : index
    %c0_23 = arith.constant 0 : index
    %36 = vector.load %arg3[%c5, %c0_22, %c0_23] : memref<7x67x256xbf16, #tpu.memory_space<vmem>>, vector<1x67x256xbf16>
    %37 = vector.shape_cast %36 : vector<1x67x256xbf16> to vector<67x256xbf16>
    %cst_24 = arith.constant dense<0.000000e+00> : vector<16x256xf32>
    %38 = tpu.matmul %35, %37, %cst_24 {dimension_numbers = #tpu.dot_dimension_numbers<[1], [0], [0], [1], [0, 0, 1, 1], [], []>} : vector<16x67xbf16>, vector<67x256xbf16>, vector<16x256xf32> -> vector<16x256xf32>
    %39 = arith.addf %33, %38 : vector<16x256xf32>
    %40 = vector.extract_strided_slice %4 {offsets = [6, 0], sizes = [16, 67], strides = [1, 1]} : vector<22x67xf32> to vector<16x67xf32>
    %41 = arith.truncf %40 : vector<16x67xf32> to vector<16x67xbf16>
    %c6 = arith.constant 6 : index
    %c0_25 = arith.constant 0 : index
    %c0_26 = arith.constant 0 : index
    %42 = vector.load %arg3[%c6, %c0_25, %c0_26] : memref<7x67x256xbf16, #tpu.memory_space<vmem>>, vector<1x67x256xbf16>
    %43 = vector.shape_cast %42 : vector<1x67x256xbf16> to vector<67x256xbf16>
    %cst_27 = arith.constant dense<0.000000e+00> : vector<16x256xf32>
    %44 = tpu.matmul %41, %43, %cst_27 {dimension_numbers = #tpu.dot_dimension_numbers<[1], [0], [0], [1], [0, 0, 1, 1], [], []>} : vector<16x67xbf16>, vector<67x256xbf16>, vector<16x256xf32> -> vector<16x256xf32>
    %45 = arith.addf %39, %44 : vector<16x256xf32>
    %46 = vector.broadcast %0 : vector<1x256xf32> to vector<16x256xf32>
    %47 = arith.mulf %45, %46 : vector<16x256xf32>
    %48 = vector.broadcast %1 : vector<1x256xf32> to vector<16x256xf32>
    %49 = arith.addf %47, %48 : vector<16x256xf32>
    %cst_28 = arith.constant 0.000000e+00 : f32
    %50 = vector.broadcast %cst_28 : f32 to vector<16x256xf32>
    %51 = arith.maximumf %49, %50 : vector<16x256xf32>
    %c0_i32 = arith.constant 0 : i32
    %52 = arith.cmpi eq, %arg1, %c0_i32 : i32
    %53 = arith.extui %52 : i1 to i32
    %c0_i32_29 = arith.constant 0 : i32
    %54 = arith.cmpi ne, %53, %c0_i32_29 : i32
    scf.if %54 {
      %c0_33 = arith.constant 0 : index
      %c0_34 = arith.constant 0 : index
      %61 = vector.load %arg7[%c0_33, %c0_34] : memref<16x256xf32, #tpu.memory_space<vmem>>, vector<16x256xf32>
      tpu.vector_store %arg7[%c0_33, %c0_34], %51 {strides = array<i32>} : memref<16x256xf32, #tpu.memory_space<vmem>>, vector<16x256xf32>,
    } else {
    }
    %c0_i32_30 = arith.constant 0 : i32
    %55 = arith.cmpi sgt, %arg1, %c0_i32_30 : i32
    %56 = arith.extui %55 : i1 to i32
    %c0_i32_31 = arith.constant 0 : i32
    %57 = arith.cmpi ne, %56, %c0_i32_31 : i32
    scf.if %57 {
      %c0_33 = arith.constant 0 : index
      %c0_34 = arith.constant 0 : index
      %61 = vector.load %arg7[%c0_33, %c0_34] : memref<16x256xf32, #tpu.memory_space<vmem>>, vector<16x256xf32>
      %62 = arith.maximumf %61, %51 : vector<16x256xf32>
      %c0_35 = arith.constant 0 : index
      %c0_36 = arith.constant 0 : index
      %63 = vector.load %arg7[%c0_35, %c0_36] : memref<16x256xf32, #tpu.memory_space<vmem>>, vector<16x256xf32>
      tpu.vector_store %arg7[%c0_35, %c0_36], %62 {strides = array<i32>} : memref<16x256xf32, #tpu.memory_space<vmem>>, vector<16x256xf32>,
    } else {
    }
    %c29_i32 = arith.constant 29 : i32
    %58 = arith.cmpi eq, %arg1, %c29_i32 : i32
    %59 = arith.extui %58 : i1 to i32
    %c0_i32_32 = arith.constant 0 : i32
    %60 = arith.cmpi ne, %59, %c0_i32_32 : i32
    scf.if %60 {
      %c0_33 = arith.constant 0 : index
      %c0_34 = arith.constant 0 : index
      %61 = vector.load %arg7[%c0_33, %c0_34] : memref<16x256xf32, #tpu.memory_space<vmem>>, vector<16x256xf32>
      %62 = arith.truncf %61 : vector<16x256xf32> to vector<16x256xbf16>
      %c0_35 = arith.constant 0 : index
      %c0_36 = arith.constant 0 : index
      %c0_37 = arith.constant 0 : index
      %63 = vector.load %arg6[%c0_35, %c0_36, %c0_37] : memref<1x16x256xbf16, #tpu.memory_space<vmem>>, vector<1x16x256xbf16>
      %64 = vector.shape_cast %63 : vector<1x16x256xbf16> to vector<16x256xbf16>
      %65 = vector.shape_cast %62 : vector<16x256xbf16> to vector<1x16x256xbf16>
      tpu.vector_store %arg6[%c0_35, %c0_36, %c0_37], %65 {strides = array<i32>} : memref<1x16x256xbf16, #tpu.memory_space<vmem>>, vector<1x16x256xbf16>,
    } else {
    }
    return
  }
  func.func @transform_0(%arg0: i32, %arg1: i32) -> (i32, i32, i32, i32) {
    %c0_i32 = arith.constant 0 : i32
    %c0_i32_0 = arith.constant 0 : i32
    %c0_i32_1 = arith.constant 0 : i32
    return %arg0, %arg1, %c0_i32, %c0_i32_0 : i32, i32, i32, i32
  }
  func.func @transform_1(%arg0: i32, %arg1: i32) -> (i32, i32, i32) {
    %c0_i32 = arith.constant 0 : i32
    %c0_i32_0 = arith.constant 0 : i32
    %c0_i32_1 = arith.constant 0 : i32
    %c0_i32_2 = arith.constant 0 : i32
    return %c0_i32, %c0_i32_0, %c0_i32_1 : i32, i32, i32
  }
  func.func @transform_2(%arg0: i32, %arg1: i32) -> (i32, i32) {
    %c0_i32 = arith.constant 0 : i32
    %c0_i32_0 = arith.constant 0 : i32
    %c0_i32_1 = arith.constant 0 : i32
    return %c0_i32, %c0_i32_0 : i32, i32
  }
  func.func @transform_3(%arg0: i32, %arg1: i32) -> (i32, i32) {
    %c0_i32 = arith.constant 0 : i32
    %c0_i32_0 = arith.constant 0 : i32
    %c0_i32_1 = arith.constant 0 : i32
    return %c0_i32, %c0_i32_0 : i32, i32
  }
  func.func @transform_4(%arg0: i32, %arg1: i32) -> (i32, i32, i32) {
    %c0_i32 = arith.constant 0 : i32
    %c0_i32_0 = arith.constant 0 : i32
    %c0_i32_1 = arith.constant 0 : i32
    return %arg0, %c0_i32, %c0_i32_0 : i32, i32, i32
  }
}

module attributes {stable_mosaic.version = 11 : i64} {
  func.func @_convh_kernel(%arg0: i32, %arg1: memref<1x16x129xbf16, #tpu.memory_space<vmem>>, %arg2: memref<129x256xbf16, #tpu.memory_space<vmem>>, %arg3: memref<1x256xf32, #tpu.memory_space<vmem>>, %arg4: memref<1x256xf32, #tpu.memory_space<vmem>>, %arg5: memref<1x16x256xbf16, #tpu.memory_space<vmem>>) attributes {dimension_semantics = [#tpu.dimension_semantics<parallel>], iteration_bounds = array<i64: 2>, scalar_prefetch = 0 : i64, scratch_operands = 0 : i64, tpu.core_type = #tpu.core_type<tc>, window_params = [{transform_indices = @transform_0, window_bounds = array<i64: 1, 16, 129>}, {pipeline_mode = #tpu.pipeline_mode<synchronous>, transform_indices = @transform_1, window_bounds = array<i64: 129, 256>}, {pipeline_mode = #tpu.pipeline_mode<synchronous>, transform_indices = @transform_2, window_bounds = array<i64: 1, 256>}, {pipeline_mode = #tpu.pipeline_mode<synchronous>, transform_indices = @transform_3, window_bounds = array<i64: 1, 256>}, {transform_indices = @transform_4, window_bounds = array<i64: 1, 16, 256>}]} {
    %c0 = arith.constant 0 : index
    %c0_0 = arith.constant 0 : index
    %0 = vector.load %arg3[%c0, %c0_0] : memref<1x256xf32, #tpu.memory_space<vmem>>, vector<1x256xf32>
    %c0_1 = arith.constant 0 : index
    %c0_2 = arith.constant 0 : index
    %1 = vector.load %arg4[%c0_1, %c0_2] : memref<1x256xf32, #tpu.memory_space<vmem>>, vector<1x256xf32>
    %c0_3 = arith.constant 0 : index
    %c0_4 = arith.constant 0 : index
    %c0_5 = arith.constant 0 : index
    %2 = vector.load %arg1[%c0_3, %c0_4, %c0_5] : memref<1x16x129xbf16, #tpu.memory_space<vmem>>, vector<1x16x129xbf16>
    %3 = vector.shape_cast %2 : vector<1x16x129xbf16> to vector<16x129xbf16>
    %c0_6 = arith.constant 0 : index
    %c0_7 = arith.constant 0 : index
    %4 = vector.load %arg2[%c0_6, %c0_7] : memref<129x256xbf16, #tpu.memory_space<vmem>>, vector<129x256xbf16>
    %cst = arith.constant dense<0.000000e+00> : vector<16x256xf32>
    %5 = tpu.matmul %3, %4, %cst {dimension_numbers = #tpu.dot_dimension_numbers<[1], [0], [0], [1], [0, 0, 1, 1], [], []>} : vector<16x129xbf16>, vector<129x256xbf16>, vector<16x256xf32> -> vector<16x256xf32>
    %6 = vector.broadcast %0 : vector<1x256xf32> to vector<16x256xf32>
    %7 = arith.mulf %5, %6 : vector<16x256xf32>
    %8 = vector.broadcast %1 : vector<1x256xf32> to vector<16x256xf32>
    %9 = arith.addf %7, %8 : vector<16x256xf32>
    %cst_8 = arith.constant 0.000000e+00 : f32
    %10 = vector.broadcast %cst_8 : f32 to vector<16x256xf32>
    %11 = arith.maximumf %9, %10 : vector<16x256xf32>
    %12 = arith.truncf %11 : vector<16x256xf32> to vector<16x256xbf16>
    %c0_9 = arith.constant 0 : index
    %c0_10 = arith.constant 0 : index
    %c0_11 = arith.constant 0 : index
    %13 = vector.load %arg5[%c0_9, %c0_10, %c0_11] : memref<1x16x256xbf16, #tpu.memory_space<vmem>>, vector<1x16x256xbf16>
    %14 = vector.shape_cast %13 : vector<1x16x256xbf16> to vector<16x256xbf16>
    %15 = vector.shape_cast %12 : vector<16x256xbf16> to vector<1x16x256xbf16>
    tpu.vector_store %arg5[%c0_9, %c0_10, %c0_11], %15 {strides = array<i32>} : memref<1x16x256xbf16, #tpu.memory_space<vmem>>, vector<1x16x256xbf16>,
    return
  }
  func.func @transform_0(%arg0: i32) -> (i32, i32, i32) {
    %c0_i32 = arith.constant 0 : i32
    %c0_i32_0 = arith.constant 0 : i32
    %c0_i32_1 = arith.constant 0 : i32
    return %arg0, %c0_i32, %c0_i32_0 : i32, i32, i32
  }
  func.func @transform_1(%arg0: i32) -> (i32, i32) {
    %c0_i32 = arith.constant 0 : i32
    %c0_i32_0 = arith.constant 0 : i32
    %c0_i32_1 = arith.constant 0 : i32
    return %c0_i32, %c0_i32_0 : i32, i32
  }
  func.func @transform_2(%arg0: i32) -> (i32, i32) {
    %c0_i32 = arith.constant 0 : i32
    %c0_i32_0 = arith.constant 0 : i32
    %c0_i32_1 = arith.constant 0 : i32
    return %c0_i32, %c0_i32_0 : i32, i32
  }
  func.func @transform_3(%arg0: i32) -> (i32, i32) {
    %c0_i32 = arith.constant 0 : i32
    %c0_i32_0 = arith.constant 0 : i32
    %c0_i32_1 = arith.constant 0 : i32
    return %c0_i32, %c0_i32_0 : i32, i32
  }
  func.func @transform_4(%arg0: i32) -> (i32, i32, i32) {
    %c0_i32 = arith.constant 0 : i32
    %c0_i32_0 = arith.constant 0 : i32
    %c0_i32_1 = arith.constant 0 : i32
    return %arg0, %c0_i32, %c0_i32_0 : i32, i32, i32
  }
}

module attributes {stable_mosaic.version = 11 : i64} {
  func.func @_mid_conv_kernel(%arg0: i32, %arg1: memref<1x22x128xbf16, #tpu.memory_space<vmem>>, %arg2: memref<7x128x128xbf16, #tpu.memory_space<vmem>>, %arg3: memref<1x128xf32, #tpu.memory_space<vmem>>, %arg4: memref<1x128xf32, #tpu.memory_space<vmem>>, %arg5: memref<1x16x128xbf16, #tpu.memory_space<vmem>>, %arg6: memref<1x16x128xbf16, #tpu.memory_space<vmem>>) attributes {dimension_semantics = [#tpu.dimension_semantics<parallel>], iteration_bounds = array<i64: 2>, scalar_prefetch = 0 : i64, scratch_operands = 0 : i64, tpu.core_type = #tpu.core_type<tc>, window_params = [{transform_indices = @transform_0, window_bounds = array<i64: 1, 22, 128>}, {pipeline_mode = #tpu.pipeline_mode<synchronous>, transform_indices = @transform_1, window_bounds = array<i64: 7, 128, 128>}, {pipeline_mode = #tpu.pipeline_mode<synchronous>, transform_indices = @transform_2, window_bounds = array<i64: 1, 128>}, {pipeline_mode = #tpu.pipeline_mode<synchronous>, transform_indices = @transform_3, window_bounds = array<i64: 1, 128>}, {transform_indices = @transform_4, window_bounds = array<i64: 1, 16, 128>}, {transform_indices = @transform_5, window_bounds = array<i64: 1, 16, 128>}]} {
    %c0 = arith.constant 0 : index
    %c0_0 = arith.constant 0 : index
    %0 = vector.load %arg3[%c0, %c0_0] : memref<1x128xf32, #tpu.memory_space<vmem>>, vector<1x128xf32>
    %c0_1 = arith.constant 0 : index
    %c0_2 = arith.constant 0 : index
    %1 = vector.load %arg4[%c0_1, %c0_2] : memref<1x128xf32, #tpu.memory_space<vmem>>, vector<1x128xf32>
    %c0_3 = arith.constant 0 : index
    %c0_4 = arith.constant 0 : index
    %c0_5 = arith.constant 0 : index
    %2 = vector.load %arg1[%c0_3, %c0_4, %c0_5] : memref<1x22x128xbf16, #tpu.memory_space<vmem>>, vector<1x22x128xbf16>
    %3 = vector.shape_cast %2 : vector<1x22x128xbf16> to vector<22x128xbf16>
    %4 = arith.extf %3 : vector<22x128xbf16> to vector<22x128xf32>
    %5 = vector.extract_strided_slice %4 {offsets = [0, 0], sizes = [16, 128], strides = [1, 1]} : vector<22x128xf32> to vector<16x128xf32>
    %6 = arith.truncf %5 : vector<16x128xf32> to vector<16x128xbf16>
    %c0_6 = arith.constant 0 : index
    %c0_7 = arith.constant 0 : index
    %c0_8 = arith.constant 0 : index
    %7 = vector.load %arg2[%c0_6, %c0_7, %c0_8] : memref<7x128x128xbf16, #tpu.memory_space<vmem>>, vector<1x128x128xbf16>
    %8 = vector.shape_cast %7 : vector<1x128x128xbf16> to vector<128x128xbf16>
    %cst = arith.constant dense<0.000000e+00> : vector<16x128xf32>
    %9 = tpu.matmul %6, %8, %cst {dimension_numbers = #tpu.dot_dimension_numbers<[1], [0], [0], [1], [0, 0, 1, 1], [], []>} : vector<16x128xbf16>, vector<128x128xbf16>, vector<16x128xf32> -> vector<16x128xf32>
    %10 = vector.extract_strided_slice %4 {offsets = [1, 0], sizes = [16, 128], strides = [1, 1]} : vector<22x128xf32> to vector<16x128xf32>
    %11 = arith.truncf %10 : vector<16x128xf32> to vector<16x128xbf16>
    %c1 = arith.constant 1 : index
    %c0_9 = arith.constant 0 : index
    %c0_10 = arith.constant 0 : index
    %12 = vector.load %arg2[%c1, %c0_9, %c0_10] : memref<7x128x128xbf16, #tpu.memory_space<vmem>>, vector<1x128x128xbf16>
    %13 = vector.shape_cast %12 : vector<1x128x128xbf16> to vector<128x128xbf16>
    %cst_11 = arith.constant dense<0.000000e+00> : vector<16x128xf32>
    %14 = tpu.matmul %11, %13, %cst_11 {dimension_numbers = #tpu.dot_dimension_numbers<[1], [0], [0], [1], [0, 0, 1, 1], [], []>} : vector<16x128xbf16>, vector<128x128xbf16>, vector<16x128xf32> -> vector<16x128xf32>
    %15 = arith.addf %9, %14 : vector<16x128xf32>
    %16 = vector.extract_strided_slice %4 {offsets = [2, 0], sizes = [16, 128], strides = [1, 1]} : vector<22x128xf32> to vector<16x128xf32>
    %17 = arith.truncf %16 : vector<16x128xf32> to vector<16x128xbf16>
    %c2 = arith.constant 2 : index
    %c0_12 = arith.constant 0 : index
    %c0_13 = arith.constant 0 : index
    %18 = vector.load %arg2[%c2, %c0_12, %c0_13] : memref<7x128x128xbf16, #tpu.memory_space<vmem>>, vector<1x128x128xbf16>
    %19 = vector.shape_cast %18 : vector<1x128x128xbf16> to vector<128x128xbf16>
    %cst_14 = arith.constant dense<0.000000e+00> : vector<16x128xf32>
    %20 = tpu.matmul %17, %19, %cst_14 {dimension_numbers = #tpu.dot_dimension_numbers<[1], [0], [0], [1], [0, 0, 1, 1], [], []>} : vector<16x128xbf16>, vector<128x128xbf16>, vector<16x128xf32> -> vector<16x128xf32>
    %21 = arith.addf %15, %20 : vector<16x128xf32>
    %22 = vector.extract_strided_slice %4 {offsets = [3, 0], sizes = [16, 128], strides = [1, 1]} : vector<22x128xf32> to vector<16x128xf32>
    %23 = arith.truncf %22 : vector<16x128xf32> to vector<16x128xbf16>
    %c3 = arith.constant 3 : index
    %c0_15 = arith.constant 0 : index
    %c0_16 = arith.constant 0 : index
    %24 = vector.load %arg2[%c3, %c0_15, %c0_16] : memref<7x128x128xbf16, #tpu.memory_space<vmem>>, vector<1x128x128xbf16>
    %25 = vector.shape_cast %24 : vector<1x128x128xbf16> to vector<128x128xbf16>
    %cst_17 = arith.constant dense<0.000000e+00> : vector<16x128xf32>
    %26 = tpu.matmul %23, %25, %cst_17 {dimension_numbers = #tpu.dot_dimension_numbers<[1], [0], [0], [1], [0, 0, 1, 1], [], []>} : vector<16x128xbf16>, vector<128x128xbf16>, vector<16x128xf32> -> vector<16x128xf32>
    %27 = arith.addf %21, %26 : vector<16x128xf32>
    %28 = vector.extract_strided_slice %4 {offsets = [4, 0], sizes = [16, 128], strides = [1, 1]} : vector<22x128xf32> to vector<16x128xf32>
    %29 = arith.truncf %28 : vector<16x128xf32> to vector<16x128xbf16>
    %c4 = arith.constant 4 : index
    %c0_18 = arith.constant 0 : index
    %c0_19 = arith.constant 0 : index
    %30 = vector.load %arg2[%c4, %c0_18, %c0_19] : memref<7x128x128xbf16, #tpu.memory_space<vmem>>, vector<1x128x128xbf16>
    %31 = vector.shape_cast %30 : vector<1x128x128xbf16> to vector<128x128xbf16>
    %cst_20 = arith.constant dense<0.000000e+00> : vector<16x128xf32>
    %32 = tpu.matmul %29, %31, %cst_20 {dimension_numbers = #tpu.dot_dimension_numbers<[1], [0], [0], [1], [0, 0, 1, 1], [], []>} : vector<16x128xbf16>, vector<128x128xbf16>, vector<16x128xf32> -> vector<16x128xf32>
    %33 = arith.addf %27, %32 : vector<16x128xf32>
    %34 = vector.extract_strided_slice %4 {offsets = [5, 0], sizes = [16, 128], strides = [1, 1]} : vector<22x128xf32> to vector<16x128xf32>
    %35 = arith.truncf %34 : vector<16x128xf32> to vector<16x128xbf16>
    %c5 = arith.constant 5 : index
    %c0_21 = arith.constant 0 : index
    %c0_22 = arith.constant 0 : index
    %36 = vector.load %arg2[%c5, %c0_21, %c0_22] : memref<7x128x128xbf16, #tpu.memory_space<vmem>>, vector<1x128x128xbf16>
    %37 = vector.shape_cast %36 : vector<1x128x128xbf16> to vector<128x128xbf16>
    %cst_23 = arith.constant dense<0.000000e+00> : vector<16x128xf32>
    %38 = tpu.matmul %35, %37, %cst_23 {dimension_numbers = #tpu.dot_dimension_numbers<[1], [0], [0], [1], [0, 0, 1, 1], [], []>} : vector<16x128xbf16>, vector<128x128xbf16>, vector<16x128xf32> -> vector<16x128xf32>
    %39 = arith.addf %33, %38 : vector<16x128xf32>
    %40 = vector.extract_strided_slice %4 {offsets = [6, 0], sizes = [16, 128], strides = [1, 1]} : vector<22x128xf32> to vector<16x128xf32>
    %41 = arith.truncf %40 : vector<16x128xf32> to vector<16x128xbf16>
    %c6 = arith.constant 6 : index
    %c0_24 = arith.constant 0 : index
    %c0_25 = arith.constant 0 : index
    %42 = vector.load %arg2[%c6, %c0_24, %c0_25] : memref<7x128x128xbf16, #tpu.memory_space<vmem>>, vector<1x128x128xbf16>
    %43 = vector.shape_cast %42 : vector<1x128x128xbf16> to vector<128x128xbf16>
    %cst_26 = arith.constant dense<0.000000e+00> : vector<16x128xf32>
    %44 = tpu.matmul %41, %43, %cst_26 {dimension_numbers = #tpu.dot_dimension_numbers<[1], [0], [0], [1], [0, 0, 1, 1], [], []>} : vector<16x128xbf16>, vector<128x128xbf16>, vector<16x128xf32> -> vector<16x128xf32>
    %45 = arith.addf %39, %44 : vector<16x128xf32>
    %46 = vector.broadcast %0 : vector<1x128xf32> to vector<16x128xf32>
    %47 = arith.mulf %45, %46 : vector<16x128xf32>
    %48 = vector.broadcast %1 : vector<1x128xf32> to vector<16x128xf32>
    %49 = arith.addf %47, %48 : vector<16x128xf32>
    %cst_27 = arith.constant 0.000000e+00 : f32
    %50 = vector.broadcast %cst_27 : f32 to vector<16x128xf32>
    %51 = arith.maximumf %49, %50 : vector<16x128xf32>
    %c0_28 = arith.constant 0 : index
    %c0_29 = arith.constant 0 : index
    %c0_30 = arith.constant 0 : index
    %52 = vector.load %arg5[%c0_28, %c0_29, %c0_30] : memref<1x16x128xbf16, #tpu.memory_space<vmem>>, vector<1x16x128xbf16>
    %53 = vector.shape_cast %52 : vector<1x16x128xbf16> to vector<16x128xbf16>
    %54 = arith.extf %53 : vector<16x128xbf16> to vector<16x128xf32>
    %55 = arith.addf %51, %54 : vector<16x128xf32>
    %56 = arith.truncf %55 : vector<16x128xf32> to vector<16x128xbf16>
    %c0_31 = arith.constant 0 : index
    %c0_32 = arith.constant 0 : index
    %c0_33 = arith.constant 0 : index
    %57 = vector.load %arg6[%c0_31, %c0_32, %c0_33] : memref<1x16x128xbf16, #tpu.memory_space<vmem>>, vector<1x16x128xbf16>
    %58 = vector.shape_cast %57 : vector<1x16x128xbf16> to vector<16x128xbf16>
    %59 = vector.shape_cast %56 : vector<16x128xbf16> to vector<1x16x128xbf16>
    tpu.vector_store %arg6[%c0_31, %c0_32, %c0_33], %59 {strides = array<i32>} : memref<1x16x128xbf16, #tpu.memory_space<vmem>>, vector<1x16x128xbf16>,
    return
  }
  func.func @transform_0(%arg0: i32) -> (i32, i32, i32) {
    %c0_i32 = arith.constant 0 : i32
    %c0_i32_0 = arith.constant 0 : i32
    %c0_i32_1 = arith.constant 0 : i32
    return %arg0, %c0_i32, %c0_i32_0 : i32, i32, i32
  }
  func.func @transform_1(%arg0: i32) -> (i32, i32, i32) {
    %c0_i32 = arith.constant 0 : i32
    %c0_i32_0 = arith.constant 0 : i32
    %c0_i32_1 = arith.constant 0 : i32
    %c0_i32_2 = arith.constant 0 : i32
    return %c0_i32, %c0_i32_0, %c0_i32_1 : i32, i32, i32
  }
  func.func @transform_2(%arg0: i32) -> (i32, i32) {
    %c0_i32 = arith.constant 0 : i32
    %c0_i32_0 = arith.constant 0 : i32
    %c0_i32_1 = arith.constant 0 : i32
    return %c0_i32, %c0_i32_0 : i32, i32
  }
  func.func @transform_3(%arg0: i32) -> (i32, i32) {
    %c0_i32 = arith.constant 0 : i32
    %c0_i32_0 = arith.constant 0 : i32
    %c0_i32_1 = arith.constant 0 : i32
    return %c0_i32, %c0_i32_0 : i32, i32
  }
  func.func @transform_4(%arg0: i32) -> (i32, i32, i32) {
    %c0_i32 = arith.constant 0 : i32
    %c0_i32_0 = arith.constant 0 : i32
    %c0_i32_1 = arith.constant 0 : i32
    return %arg0, %c0_i32, %c0_i32_0 : i32, i32, i32
  }
  func.func @transform_5(%arg0: i32) -> (i32, i32, i32) {
    %c0_i32 = arith.constant 0 : i32
    %c0_i32_0 = arith.constant 0 : i32
    %c0_i32_1 = arith.constant 0 : i32
    return %arg0, %c0_i32, %c0_i32_0 : i32, i32, i32
  }
}

module attributes {stable_mosaic.version = 11 : i64} {
  func.func @_mid_conv_kernel(%arg0: i32, %arg1: memref<1x22x768xbf16, #tpu.memory_space<vmem>>, %arg2: memref<7x768x128xbf16, #tpu.memory_space<vmem>>, %arg3: memref<1x128xf32, #tpu.memory_space<vmem>>, %arg4: memref<1x128xf32, #tpu.memory_space<vmem>>, %arg5: memref<1x16x128xbf16, #tpu.memory_space<vmem>>) attributes {dimension_semantics = [#tpu.dimension_semantics<parallel>], iteration_bounds = array<i64: 2>, scalar_prefetch = 0 : i64, scratch_operands = 0 : i64, tpu.core_type = #tpu.core_type<tc>, window_params = [{transform_indices = @transform_0, window_bounds = array<i64: 1, 22, 768>}, {pipeline_mode = #tpu.pipeline_mode<synchronous>, transform_indices = @transform_1, window_bounds = array<i64: 7, 768, 128>}, {pipeline_mode = #tpu.pipeline_mode<synchronous>, transform_indices = @transform_2, window_bounds = array<i64: 1, 128>}, {pipeline_mode = #tpu.pipeline_mode<synchronous>, transform_indices = @transform_3, window_bounds = array<i64: 1, 128>}, {transform_indices = @transform_4, window_bounds = array<i64: 1, 16, 128>}]} {
    %c0 = arith.constant 0 : index
    %c0_0 = arith.constant 0 : index
    %0 = vector.load %arg3[%c0, %c0_0] : memref<1x128xf32, #tpu.memory_space<vmem>>, vector<1x128xf32>
    %c0_1 = arith.constant 0 : index
    %c0_2 = arith.constant 0 : index
    %1 = vector.load %arg4[%c0_1, %c0_2] : memref<1x128xf32, #tpu.memory_space<vmem>>, vector<1x128xf32>
    %c0_3 = arith.constant 0 : index
    %c0_4 = arith.constant 0 : index
    %c0_5 = arith.constant 0 : index
    %2 = vector.load %arg1[%c0_3, %c0_4, %c0_5] : memref<1x22x768xbf16, #tpu.memory_space<vmem>>, vector<1x22x768xbf16>
    %3 = vector.shape_cast %2 : vector<1x22x768xbf16> to vector<22x768xbf16>
    %4 = arith.extf %3 : vector<22x768xbf16> to vector<22x768xf32>
    %5 = vector.extract_strided_slice %4 {offsets = [0, 0], sizes = [16, 768], strides = [1, 1]} : vector<22x768xf32> to vector<16x768xf32>
    %6 = arith.truncf %5 : vector<16x768xf32> to vector<16x768xbf16>
    %c0_6 = arith.constant 0 : index
    %c0_7 = arith.constant 0 : index
    %c0_8 = arith.constant 0 : index
    %7 = vector.load %arg2[%c0_6, %c0_7, %c0_8] : memref<7x768x128xbf16, #tpu.memory_space<vmem>>, vector<1x768x128xbf16>
    %8 = vector.shape_cast %7 : vector<1x768x128xbf16> to vector<768x128xbf16>
    %cst = arith.constant dense<0.000000e+00> : vector<16x128xf32>
    %9 = tpu.matmul %6, %8, %cst {dimension_numbers = #tpu.dot_dimension_numbers<[1], [0], [0], [1], [0, 0, 1, 1], [], []>} : vector<16x768xbf16>, vector<768x128xbf16>, vector<16x128xf32> -> vector<16x128xf32>
    %10 = vector.extract_strided_slice %4 {offsets = [1, 0], sizes = [16, 768], strides = [1, 1]} : vector<22x768xf32> to vector<16x768xf32>
    %11 = arith.truncf %10 : vector<16x768xf32> to vector<16x768xbf16>
    %c1 = arith.constant 1 : index
    %c0_9 = arith.constant 0 : index
    %c0_10 = arith.constant 0 : index
    %12 = vector.load %arg2[%c1, %c0_9, %c0_10] : memref<7x768x128xbf16, #tpu.memory_space<vmem>>, vector<1x768x128xbf16>
    %13 = vector.shape_cast %12 : vector<1x768x128xbf16> to vector<768x128xbf16>
    %cst_11 = arith.constant dense<0.000000e+00> : vector<16x128xf32>
    %14 = tpu.matmul %11, %13, %cst_11 {dimension_numbers = #tpu.dot_dimension_numbers<[1], [0], [0], [1], [0, 0, 1, 1], [], []>} : vector<16x768xbf16>, vector<768x128xbf16>, vector<16x128xf32> -> vector<16x128xf32>
    %15 = arith.addf %9, %14 : vector<16x128xf32>
    %16 = vector.extract_strided_slice %4 {offsets = [2, 0], sizes = [16, 768], strides = [1, 1]} : vector<22x768xf32> to vector<16x768xf32>
    %17 = arith.truncf %16 : vector<16x768xf32> to vector<16x768xbf16>
    %c2 = arith.constant 2 : index
    %c0_12 = arith.constant 0 : index
    %c0_13 = arith.constant 0 : index
    %18 = vector.load %arg2[%c2, %c0_12, %c0_13] : memref<7x768x128xbf16, #tpu.memory_space<vmem>>, vector<1x768x128xbf16>
    %19 = vector.shape_cast %18 : vector<1x768x128xbf16> to vector<768x128xbf16>
    %cst_14 = arith.constant dense<0.000000e+00> : vector<16x128xf32>
    %20 = tpu.matmul %17, %19, %cst_14 {dimension_numbers = #tpu.dot_dimension_numbers<[1], [0], [0], [1], [0, 0, 1, 1], [], []>} : vector<16x768xbf16>, vector<768x128xbf16>, vector<16x128xf32> -> vector<16x128xf32>
    %21 = arith.addf %15, %20 : vector<16x128xf32>
    %22 = vector.extract_strided_slice %4 {offsets = [3, 0], sizes = [16, 768], strides = [1, 1]} : vector<22x768xf32> to vector<16x768xf32>
    %23 = arith.truncf %22 : vector<16x768xf32> to vector<16x768xbf16>
    %c3 = arith.constant 3 : index
    %c0_15 = arith.constant 0 : index
    %c0_16 = arith.constant 0 : index
    %24 = vector.load %arg2[%c3, %c0_15, %c0_16] : memref<7x768x128xbf16, #tpu.memory_space<vmem>>, vector<1x768x128xbf16>
    %25 = vector.shape_cast %24 : vector<1x768x128xbf16> to vector<768x128xbf16>
    %cst_17 = arith.constant dense<0.000000e+00> : vector<16x128xf32>
    %26 = tpu.matmul %23, %25, %cst_17 {dimension_numbers = #tpu.dot_dimension_numbers<[1], [0], [0], [1], [0, 0, 1, 1], [], []>} : vector<16x768xbf16>, vector<768x128xbf16>, vector<16x128xf32> -> vector<16x128xf32>
    %27 = arith.addf %21, %26 : vector<16x128xf32>
    %28 = vector.extract_strided_slice %4 {offsets = [4, 0], sizes = [16, 768], strides = [1, 1]} : vector<22x768xf32> to vector<16x768xf32>
    %29 = arith.truncf %28 : vector<16x768xf32> to vector<16x768xbf16>
    %c4 = arith.constant 4 : index
    %c0_18 = arith.constant 0 : index
    %c0_19 = arith.constant 0 : index
    %30 = vector.load %arg2[%c4, %c0_18, %c0_19] : memref<7x768x128xbf16, #tpu.memory_space<vmem>>, vector<1x768x128xbf16>
    %31 = vector.shape_cast %30 : vector<1x768x128xbf16> to vector<768x128xbf16>
    %cst_20 = arith.constant dense<0.000000e+00> : vector<16x128xf32>
    %32 = tpu.matmul %29, %31, %cst_20 {dimension_numbers = #tpu.dot_dimension_numbers<[1], [0], [0], [1], [0, 0, 1, 1], [], []>} : vector<16x768xbf16>, vector<768x128xbf16>, vector<16x128xf32> -> vector<16x128xf32>
    %33 = arith.addf %27, %32 : vector<16x128xf32>
    %34 = vector.extract_strided_slice %4 {offsets = [5, 0], sizes = [16, 768], strides = [1, 1]} : vector<22x768xf32> to vector<16x768xf32>
    %35 = arith.truncf %34 : vector<16x768xf32> to vector<16x768xbf16>
    %c5 = arith.constant 5 : index
    %c0_21 = arith.constant 0 : index
    %c0_22 = arith.constant 0 : index
    %36 = vector.load %arg2[%c5, %c0_21, %c0_22] : memref<7x768x128xbf16, #tpu.memory_space<vmem>>, vector<1x768x128xbf16>
    %37 = vector.shape_cast %36 : vector<1x768x128xbf16> to vector<768x128xbf16>
    %cst_23 = arith.constant dense<0.000000e+00> : vector<16x128xf32>
    %38 = tpu.matmul %35, %37, %cst_23 {dimension_numbers = #tpu.dot_dimension_numbers<[1], [0], [0], [1], [0, 0, 1, 1], [], []>} : vector<16x768xbf16>, vector<768x128xbf16>, vector<16x128xf32> -> vector<16x128xf32>
    %39 = arith.addf %33, %38 : vector<16x128xf32>
    %40 = vector.extract_strided_slice %4 {offsets = [6, 0], sizes = [16, 768], strides = [1, 1]} : vector<22x768xf32> to vector<16x768xf32>
    %41 = arith.truncf %40 : vector<16x768xf32> to vector<16x768xbf16>
    %c6 = arith.constant 6 : index
    %c0_24 = arith.constant 0 : index
    %c0_25 = arith.constant 0 : index
    %42 = vector.load %arg2[%c6, %c0_24, %c0_25] : memref<7x768x128xbf16, #tpu.memory_space<vmem>>, vector<1x768x128xbf16>
    %43 = vector.shape_cast %42 : vector<1x768x128xbf16> to vector<768x128xbf16>
    %cst_26 = arith.constant dense<0.000000e+00> : vector<16x128xf32>
    %44 = tpu.matmul %41, %43, %cst_26 {dimension_numbers = #tpu.dot_dimension_numbers<[1], [0], [0], [1], [0, 0, 1, 1], [], []>} : vector<16x768xbf16>, vector<768x128xbf16>, vector<16x128xf32> -> vector<16x128xf32>
    %45 = arith.addf %39, %44 : vector<16x128xf32>
    %46 = vector.broadcast %0 : vector<1x128xf32> to vector<16x128xf32>
    %47 = arith.mulf %45, %46 : vector<16x128xf32>
    %48 = vector.broadcast %1 : vector<1x128xf32> to vector<16x128xf32>
    %49 = arith.addf %47, %48 : vector<16x128xf32>
    %cst_27 = arith.constant 0.000000e+00 : f32
    %50 = vector.broadcast %cst_27 : f32 to vector<16x128xf32>
    %51 = arith.maximumf %49, %50 : vector<16x128xf32>
    %52 = arith.truncf %51 : vector<16x128xf32> to vector<16x128xbf16>
    %c0_28 = arith.constant 0 : index
    %c0_29 = arith.constant 0 : index
    %c0_30 = arith.constant 0 : index
    %53 = vector.load %arg5[%c0_28, %c0_29, %c0_30] : memref<1x16x128xbf16, #tpu.memory_space<vmem>>, vector<1x16x128xbf16>
    %54 = vector.shape_cast %53 : vector<1x16x128xbf16> to vector<16x128xbf16>
    %55 = vector.shape_cast %52 : vector<16x128xbf16> to vector<1x16x128xbf16>
    tpu.vector_store %arg5[%c0_28, %c0_29, %c0_30], %55 {strides = array<i32>} : memref<1x16x128xbf16, #tpu.memory_space<vmem>>, vector<1x16x128xbf16>,
    return
  }
  func.func @transform_0(%arg0: i32) -> (i32, i32, i32) {
    %c0_i32 = arith.constant 0 : i32
    %c0_i32_0 = arith.constant 0 : i32
    %c0_i32_1 = arith.constant 0 : i32
    return %arg0, %c0_i32, %c0_i32_0 : i32, i32, i32
  }
  func.func @transform_1(%arg0: i32) -> (i32, i32, i32) {
    %c0_i32 = arith.constant 0 : i32
    %c0_i32_0 = arith.constant 0 : i32
    %c0_i32_1 = arith.constant 0 : i32
    %c0_i32_2 = arith.constant 0 : i32
    return %c0_i32, %c0_i32_0, %c0_i32_1 : i32, i32, i32
  }
  func.func @transform_2(%arg0: i32) -> (i32, i32) {
    %c0_i32 = arith.constant 0 : i32
    %c0_i32_0 = arith.constant 0 : i32
    %c0_i32_1 = arith.constant 0 : i32
    return %c0_i32, %c0_i32_0 : i32, i32
  }
  func.func @transform_3(%arg0: i32) -> (i32, i32) {
    %c0_i32 = arith.constant 0 : i32
    %c0_i32_0 = arith.constant 0 : i32
    %c0_i32_1 = arith.constant 0 : i32
    return %c0_i32, %c0_i32_0 : i32, i32
  }
  func.func @transform_4(%arg0: i32) -> (i32, i32, i32) {
    %c0_i32 = arith.constant 0 : i32
    %c0_i32_0 = arith.constant 0 : i32
    %c0_i32_1 = arith.constant 0 : i32
    return %arg0, %c0_i32, %c0_i32_0 : i32, i32, i32
  }
}

module attributes {stable_mosaic.version = 11 : i64} {
  func.func @_head_kernel(%arg0: i32, %arg1: memref<2x16x1152xbf16, #tpu.memory_space<vmem>>, %arg2: memref<1152x256xf32, #tpu.memory_space<vmem>>, %arg3: memref<1152x256xf32, #tpu.memory_space<vmem>>, %arg4: memref<1x256xf32, #tpu.memory_space<vmem>>, %arg5: memref<1x256xf32, #tpu.memory_space<vmem>>, %arg6: memref<256x128xf32, #tpu.memory_space<vmem>>, %arg7: memref<1x128xf32, #tpu.memory_space<vmem>>, %arg8: memref<2x128xf32, #tpu.memory_space<vmem>>, %arg9: memref<2x1152xf32, #tpu.memory_space<vmem>>, %arg10: memref<2x1152xf32, #tpu.memory_space<vmem>>) attributes {dimension_semantics = [#tpu.dimension_semantics<arbitrary>], iteration_bounds = array<i64: 1>, scalar_prefetch = 0 : i64, scratch_operands = 2 : i64, tpu.core_type = #tpu.core_type<tc>, window_params = [{transform_indices = @transform_0, window_bounds = array<i64: 2, 16, 1152>}, {pipeline_mode = #tpu.pipeline_mode<synchronous>, transform_indices = @transform_1, window_bounds = array<i64: 1152, 256>}, {pipeline_mode = #tpu.pipeline_mode<synchronous>, transform_indices = @transform_2, window_bounds = array<i64: 1152, 256>}, {pipeline_mode = #tpu.pipeline_mode<synchronous>, transform_indices = @transform_3, window_bounds = array<i64: 1, 256>}, {pipeline_mode = #tpu.pipeline_mode<synchronous>, transform_indices = @transform_4, window_bounds = array<i64: 1, 256>}, {pipeline_mode = #tpu.pipeline_mode<synchronous>, transform_indices = @transform_5, window_bounds = array<i64: 256, 128>}, {pipeline_mode = #tpu.pipeline_mode<synchronous>, transform_indices = @transform_6, window_bounds = array<i64: 1, 128>}, {pipeline_mode = #tpu.pipeline_mode<synchronous>, transform_indices = @transform_7, window_bounds = array<i64: 2, 128>}]} {
    %c0 = arith.constant 0 : index
    %c0_0 = arith.constant 0 : index
    %c0_1 = arith.constant 0 : index
    %0 = vector.load %arg1[%c0, %c0_0, %c0_1] : memref<2x16x1152xbf16, #tpu.memory_space<vmem>>, vector<2x16x1152xbf16>
    %1 = arith.extf %0 : vector<2x16x1152xbf16> to vector<2x16x1152xf32>
    %cst = arith.constant dense<0xFF800000> : vector<2x1152xf32>
    %2 = vector.multi_reduction <maximumf>, %1, %cst [1] : vector<2x16x1152xf32> to vector<2x1152xf32>
    %cst_2 = arith.constant dense<0.000000e+00> : vector<2x1152xf32>
    %3 = vector.multi_reduction <add>, %1, %cst_2 [1] : vector<2x16x1152xf32> to vector<2x1152xf32>
    %c0_i32 = arith.constant 0 : i32
    %4 = arith.cmpi eq, %arg0, %c0_i32 : i32
    %5 = arith.extui %4 : i1 to i32
    %c0_i32_3 = arith.constant 0 : i32
    %6 = arith.cmpi ne, %5, %c0_i32_3 : i32
    scf.if %6 {
      %c0_8 = arith.constant 0 : index
      %c0_9 = arith.constant 0 : index
      %13 = vector.load %arg9[%c0_8, %c0_9] : memref<2x1152xf32, #tpu.memory_space<vmem>>, vector<2x1152xf32>
      tpu.vector_store %arg9[%c0_8, %c0_9], %2 {strides = array<i32>} : memref<2x1152xf32, #tpu.memory_space<vmem>>, vector<2x1152xf32>,
      %c0_10 = arith.constant 0 : index
      %c0_11 = arith.constant 0 : index
      %14 = vector.load %arg10[%c0_10, %c0_11] : memref<2x1152xf32, #tpu.memory_space<vmem>>, vector<2x1152xf32>
      tpu.vector_store %arg10[%c0_10, %c0_11], %3 {strides = array<i32>} : memref<2x1152xf32, #tpu.memory_space<vmem>>, vector<2x1152xf32>,
    } else {
    }
    %c0_i32_4 = arith.constant 0 : i32
    %7 = arith.cmpi sgt, %arg0, %c0_i32_4 : i32
    %8 = arith.extui %7 : i1 to i32
    %c0_i32_5 = arith.constant 0 : i32
    %9 = arith.cmpi ne, %8, %c0_i32_5 : i32
    scf.if %9 {
      %c0_8 = arith.constant 0 : index
      %c0_9 = arith.constant 0 : index
      %13 = vector.load %arg9[%c0_8, %c0_9] : memref<2x1152xf32, #tpu.memory_space<vmem>>, vector<2x1152xf32>
      %14 = arith.maximumf %13, %2 : vector<2x1152xf32>
      %c0_10 = arith.constant 0 : index
      %c0_11 = arith.constant 0 : index
      %15 = vector.load %arg9[%c0_10, %c0_11] : memref<2x1152xf32, #tpu.memory_space<vmem>>, vector<2x1152xf32>
      tpu.vector_store %arg9[%c0_10, %c0_11], %14 {strides = array<i32>} : memref<2x1152xf32, #tpu.memory_space<vmem>>, vector<2x1152xf32>,
      %c0_12 = arith.constant 0 : index
      %c0_13 = arith.constant 0 : index
      %16 = vector.load %arg10[%c0_12, %c0_13] : memref<2x1152xf32, #tpu.memory_space<vmem>>, vector<2x1152xf32>
      %17 = arith.addf %16, %3 : vector<2x1152xf32>
      %c0_14 = arith.constant 0 : index
      %c0_15 = arith.constant 0 : index
      %18 = vector.load %arg10[%c0_14, %c0_15] : memref<2x1152xf32, #tpu.memory_space<vmem>>, vector<2x1152xf32>
      tpu.vector_store %arg10[%c0_14, %c0_15], %17 {strides = array<i32>} : memref<2x1152xf32, #tpu.memory_space<vmem>>, vector<2x1152xf32>,
    } else {
    }
    %c0_i32_6 = arith.constant 0 : i32
    %10 = arith.cmpi eq, %arg0, %c0_i32_6 : i32
    %11 = arith.extui %10 : i1 to i32
    %c0_i32_7 = arith.constant 0 : i32
    %12 = arith.cmpi ne, %11, %c0_i32_7 : i32
    scf.if %12 {
      %c0_8 = arith.constant 0 : index
      %c0_9 = arith.constant 0 : index
      %13 = vector.load %arg9[%c0_8, %c0_9] : memref<2x1152xf32, #tpu.memory_space<vmem>>, vector<2x1152xf32>
      %c0_10 = arith.constant 0 : index
      %c0_11 = arith.constant 0 : index
      %14 = vector.load %arg10[%c0_10, %c0_11] : memref<2x1152xf32, #tpu.memory_space<vmem>>, vector<2x1152xf32>
      %cst_12 = arith.constant 6.250000e-02 : f32
      %15 = vector.broadcast %cst_12 : f32 to vector<2x1152xf32>
      %16 = arith.mulf %14, %15 : vector<2x1152xf32>
      %c0_13 = arith.constant 0 : index
      %c0_14 = arith.constant 0 : index
      %17 = vector.load %arg2[%c0_13, %c0_14] : memref<1152x256xf32, #tpu.memory_space<vmem>>, vector<1152x256xf32>
      %cst_15 = arith.constant dense<0.000000e+00> : vector<2x256xf32>
      %18 = tpu.matmul %13, %17, %cst_15 {dimension_numbers = #tpu.dot_dimension_numbers<[1], [0], [0], [1], [0, 0, 1, 1], [], []>} : vector<2x1152xf32>, vector<1152x256xf32>, vector<2x256xf32> -> vector<2x256xf32>
      %c0_16 = arith.constant 0 : index
      %c0_17 = arith.constant 0 : index
      %19 = vector.load %arg3[%c0_16, %c0_17] : memref<1152x256xf32, #tpu.memory_space<vmem>>, vector<1152x256xf32>
      %cst_18 = arith.constant dense<0.000000e+00> : vector<2x256xf32>
      %20 = tpu.matmul %16, %19, %cst_18 {dimension_numbers = #tpu.dot_dimension_numbers<[1], [0], [0], [1], [0, 0, 1, 1], [], []>} : vector<2x1152xf32>, vector<1152x256xf32>, vector<2x256xf32> -> vector<2x256xf32>
      %21 = arith.addf %18, %20 : vector<2x256xf32>
      %c0_19 = arith.constant 0 : index
      %c0_20 = arith.constant 0 : index
      %22 = vector.load %arg4[%c0_19, %c0_20] : memref<1x256xf32, #tpu.memory_space<vmem>>, vector<1x256xf32>
      %23 = vector.broadcast %22 : vector<1x256xf32> to vector<2x256xf32>
      %24 = arith.mulf %21, %23 : vector<2x256xf32>
      %c0_21 = arith.constant 0 : index
      %c0_22 = arith.constant 0 : index
      %25 = vector.load %arg5[%c0_21, %c0_22] : memref<1x256xf32, #tpu.memory_space<vmem>>, vector<1x256xf32>
      %26 = vector.broadcast %25 : vector<1x256xf32> to vector<2x256xf32>
      %27 = arith.addf %24, %26 : vector<2x256xf32>
      %cst_23 = arith.constant 0.000000e+00 : f32
      %28 = vector.broadcast %cst_23 : f32 to vector<2x256xf32>
      %29 = arith.maximumf %27, %28 : vector<2x256xf32>
      %c0_24 = arith.constant 0 : index
      %c0_25 = arith.constant 0 : index
      %30 = vector.load %arg6[%c0_24, %c0_25] : memref<256x128xf32, #tpu.memory_space<vmem>>, vector<256x128xf32>
      %cst_26 = arith.constant dense<0.000000e+00> : vector<2x128xf32>
      %31 = tpu.matmul %29, %30, %cst_26 {dimension_numbers = #tpu.dot_dimension_numbers<[1], [0], [0], [1], [0, 0, 1, 1], [], []>} : vector<2x256xf32>, vector<256x128xf32>, vector<2x128xf32> -> vector<2x128xf32>
      %c0_27 = arith.constant 0 : index
      %c0_28 = arith.constant 0 : index
      %32 = vector.load %arg7[%c0_27, %c0_28] : memref<1x128xf32, #tpu.memory_space<vmem>>, vector<1x128xf32>
      %33 = vector.broadcast %32 : vector<1x128xf32> to vector<2x128xf32>
      %34 = arith.addf %31, %33 : vector<2x128xf32>
      %c0_29 = arith.constant 0 : index
      %c0_30 = arith.constant 0 : index
      %35 = vector.load %arg8[%c0_29, %c0_30] : memref<2x128xf32, #tpu.memory_space<vmem>>, vector<2x128xf32>
      tpu.vector_store %arg8[%c0_29, %c0_30], %34 {strides = array<i32>} : memref<2x128xf32, #tpu.memory_space<vmem>>, vector<2x128xf32>,
    } else {
    }
    return
  }
  func.func @transform_0(%arg0: i32) -> (i32, i32, i32) {
    %c0_i32 = arith.constant 0 : i32
    %c0_i32_0 = arith.constant 0 : i32
    %c0_i32_1 = arith.constant 0 : i32
    return %c0_i32, %arg0, %c0_i32_0 : i32, i32, i32
  }
  func.func @transform_1(%arg0: i32) -> (i32, i32) {
    %c0_i32 = arith.constant 0 : i32
    %c0_i32_0 = arith.constant 0 : i32
    %c0_i32_1 = arith.constant 0 : i32
    return %c0_i32, %c0_i32_0 : i32, i32
  }
  func.func @transform_2(%arg0: i32) -> (i32, i32) {
    %c0_i32 = arith.constant 0 : i32
    %c0_i32_0 = arith.constant 0 : i32
    %c0_i32_1 = arith.constant 0 : i32
    return %c0_i32, %c0_i32_0 : i32, i32
  }
  func.func @transform_3(%arg0: i32) -> (i32, i32) {
    %c0_i32 = arith.constant 0 : i32
    %c0_i32_0 = arith.constant 0 : i32
    %c0_i32_1 = arith.constant 0 : i32
    return %c0_i32, %c0_i32_0 : i32, i32
  }
  func.func @transform_4(%arg0: i32) -> (i32, i32) {
    %c0_i32 = arith.constant 0 : i32
    %c0_i32_0 = arith.constant 0 : i32
    %c0_i32_1 = arith.constant 0 : i32
    return %c0_i32, %c0_i32_0 : i32, i32
  }
  func.func @transform_5(%arg0: i32) -> (i32, i32) {
    %c0_i32 = arith.constant 0 : i32
    %c0_i32_0 = arith.constant 0 : i32
    %c0_i32_1 = arith.constant 0 : i32
    return %c0_i32, %c0_i32_0 : i32, i32
  }
  func.func @transform_6(%arg0: i32) -> (i32, i32) {
    %c0_i32 = arith.constant 0 : i32
    %c0_i32_0 = arith.constant 0 : i32
    %c0_i32_1 = arith.constant 0 : i32
    return %c0_i32, %c0_i32_0 : i32, i32
  }
  func.func @transform_7(%arg0: i32) -> (i32, i32) {
    %c0_i32 = arith.constant 0 : i32
    %c0_i32_0 = arith.constant 0 : i32
    %c0_i32_1 = arith.constant 0 : i32
    return %c0_i32, %c0_i32_0 : i32, i32
  }
}

</mosaic_0001>

<bundles_post_ra>
// kernel: net_forward.8
= control target key start
LH: loop header
LB: loop body
LE: loop exit
PB: predicated region body
PF: predicated region fallthrough
CT: control target
= control target key end

     0   :  { %s640_s0 = inlined_call_operand.hbm [shape: f32[2,16,96], index: 0, kind: input, shape index: {}]   ;;  %s641_s1 = inlined_call_operand.<no memory space> [shape: f32[1,1], index: 1, kind: input, shape index: {}]   ;;  %s642_s2 = inlined_call_operand.<no memory space> [shape: f32[1,1], index: 2, kind: input, shape index: {}]   ;;  %s643_s3 = inlined_call_operand.vmem [shape: bf16[2,16,96], index: 3, kind: output, shape index: {0}]   ;;  %s644_s4 = inlined_call_operand.vmem [shape: f32[2,16,1], index: 4, kind: output, shape index: {1}]  }
   0x1   :  { %10 = sst [smem:[#allocation2]] %s641_s1 }
   0x2   :  { %11 = sst [smem:[#allocation3]] %s642_s2 }
   0x3   :  { %12 = vsyncpa [#allocation5], 0 }
   0x4   :  { %14 = vsyncpa [#allocation5 + $0x1], 0  ;;  %s541_s19 = smov 0   ;;  %s543_s20 = smov 0  }
   0x5   :  { %s545_s21 = smov 0   ;;  %s547_s22 = smov 0  }
   0x6 LB: > { %s560_s1 = sadd.s32 4294967295, %s505_s22   ;;  %s563_s2 = sadd.s32 1, %s505_s22   ;;  %s505_s22 = sphi %s547_s22, %s651_s22   ;;  %s501_s21 = sphi %s545_s21, %s650_s21   ;;  %s497_s20 = sphi %s543_s20, %s649_s20   ;;  %s493_s19 = sphi %s541_s19, %s648_s19  }
   0x7   : > { %s24_s23 = ssub.s32 %s505_s22, %s563_s2  ;;  %s27_s24 = sadd.s32 1, %s501_s21 }
   0x8   : > { %p25_p0 = scmp.eq.s32.totalorder %s24_s23, 0  ;;  %p34_p1 = scmp.ne.s32.totalorder %s501_s21, %s497_s20 }
   0x9   : > { %p35_p2 = scmp.eq.s32.totalorder %s505_s22, 0  ;;  %p40_p3 = scmp.ne.s32.totalorder %s497_s20, %s493_s19 }
   0xa   : > { %s573_s25 = scalar_select %p25_p0, %s501_s21, %s27_s24  }
   0xb   : > { %p575_p4 = por %p35_p2, %p34_p1  ;;  %p41_p5 = scmp.eq.s32.totalorder %s560_s1, 0 }
   0xc   : > { %p399_p6 = scmp.lt.s32.totalorder %s505_s22, 2  ;;  %s164_s28 = sand.u32 1, %s501_s21  }
   0xd   : > { %p581_p7 = por %p41_p5, %p40_p3  ;;  %s379_s29 = sshll.u32 %s164_s28, 4 }
   0xe   : > { %s390_s30 = sshll.u32 %s505_s22, 4  ;;  %s168_s8 = scalar_lea.vmem [#allocation4], %s379_s29 }
   0xf   : > { %s173_s7 = scalar_lea.hbm %s640_s0, %s390_s30  ;;  %s176_s9 = sshll.u32 %s168_s8, 4  ;;  %s177_s9 = int_to_ptr.vmem [resolvable:$true] %s176_s9 }
  0x10   : > { %s174_s10 = sshll.u32 %s173_s7, 4  ;;  %p592_p8 = pnand %p399_p6, %p575_p4  ;;  %s175_s10 = int_to_ptr.hbm [resolvable:$true] %s174_s10 }
  0x11   : > { %p382_p9 = scmp.ge.s32.totalorder %s505_s22, 1  ;;  %s165_s12 = scalar_lea.sflag [#allocation5], %s164_s28 }
  0x12   : > { %s441_s13 = sshra.s32 %s175_s10, 4  ;;  %p445_p11 = pneg %p592_p8  ;;  %s442_s13 = int_to_ptr.hbm [resolvable:$true] %s441_s13 }
  0x13   : > { %s443_s14 = scalar_lea.hbm %s442_s13, 16  ;;  %s448_s17 = scalar_lea.hbm %s640_s0, 32 }
  0x14   : > { %p444_p10 = scmp.ne.s32.totalorder %s442_s13, %s443_s14  ;;  %p449_p0 = scmp.lt.s32.totalorder %s442_s13, %s640_s0 }
  0x15   : > { %p450_p1 = scmp.lt.s32.totalorder %s448_s17, %s443_s14 }
  0x16   : > { %p446_p12 = pnand %p445_p11, %p444_p10 }
  0x17   : > { %p451_p2 = por %p450_p1, %p449_p0 }
  0x18   : > { %p447_p13 = pneg %p446_p12 }
  0x1a   : > { %p452_p3 = pnand %p451_p2, %p447_p13 }
  0x1c   : > { %455 = shalt.err (!%p452_p3)
}
  0x1d   : > { %s507_s23 = smov 128   ;;  %s508_s24 = smov 8  }
  0x1e   : > { %398 = dma.hbm_to_vmem [thread:$0]  (!%p592_p8), %s175_s10, 256, %s177_s9, %s165_s12, %s507_s23, %s507_s23, %s508_s24  }
  0x1f   : > { %p184_p4 = scmp.lt.s32.totalorder %s505_s22, 3 }
  0x21   : > { %p185_p5 = pnand %p382_p9, %p184_p4 }
  0x22   : > { %s190_s26 = sand.u32 (!%p185_p5), 1, %s497_s20  }
  0x23   : > { %188 = sbr.rel (%p185_p5) target bundleno = 185 (0xb9), region = 32  ;;  %s383_s28 = sshll.u32 (!%p185_p5), %s190_s26, 4 }
  0x24   : > { %s191_s29 = scalar_lea.sflag (!%p185_p5), [#allocation5], %s190_s26  ;;  %s194_s30 = scalar_lea.vmem (!%p185_p5), [#allocation4], %s383_s28 }
  0x28   : > { %488 = dma.done.wait (%p581_p7), %s191_s29, 256  }
  0x29   : > { %490 = vsyncadd (%p581_p7), %s191_s29, 4294967040  ;;  %s235_s5 = sld [smem:[#allocation2]]  ;;  %v237_v0 = vld [vmem:[%s194_s30] sm:$0xff]  ;;  %v238_v1 = vld [vmem:[%s194_s30 + $0x8] sm:$0xff]  ;;  %p225_p6 = scmp.lt.s32.totalorder %s560_s1, 1  ;;  %vm257_vm0 = vcmask 785408  }
  0x2a   : > { %v239_v2 = vmax.f32 %v237_v0, 1e-10  ;;  %v240_v3 = vmax.f32 %v238_v1, 1e-10  ;;  %s236_s22 = sld [smem:[#allocation3]]  ;;  %vm254_vm1 = vcmask 781312  }
  0x2b   : > { %s653_s1 = smov (!%p225_p6, %s560_s1), 1  ;;  %v509_v18 = vmov 96.0   ;;  %vm273_vm3 = vcmask 7168  }
  0x2c   : > { %435 = vlog2.f32 %v239_v2  ;;  %s391_s27 = sshll.u32 %s653_s1, 3  ;;  %s392_s10 = sshll.u32 %s653_s1, 4 }
  0x2d   : > { %437 = vlog2.f32 %v240_v3  ;;  %s229_s9 = scalar_lea.vmem %s643_s3, %s391_s27  ;;  %s234_s13 = scalar_lea.vmem %s644_s4, %s392_s10 }
  0x2e   : > { %439 = vrcp.f32 %v509_v18 }
  0x2f   : > { %s245_s6 = smul.f32 4.3429446, %s235_s5 }
  0x30   : > { %v249_v8 = vstv %s236_s22 }
  0x31   : > { %v246_v5 = vstv %s245_s6 }
  0x32   : > { %v436_v4 = vpop.eup %435 }
  0x33   : > { %v438_v6 = vpop.eup %437  ;;  %v242_v7 = vmul.f32 0.6931472, %v436_v4 }
  0x34   : > { %v244_v9 = vmul.f32 0.6931472, %v438_v6  ;;  %v440_v19 = vpop.eup %439 }
  0x35   : > { %v247_v10 = vmul.f32 %v246_v5, %v242_v7  ;;  %v265_v20 = vmul.f32 96.0, %v440_v19  ;;  %vm269_vm2 = vweird.f32 %v440_v19 }
  0x36   : > { %v248_v11 = vmul.f32 %v246_v5, %v244_v9 }
  0x37   : > { %v250_v12 = vadd.f32 %v249_v8, %v247_v10  ;;  %v266_v21 = vsub.f32 1.0, %v265_v20 }
  0x38   : > { %v251_v13 = vadd.f32 %v249_v8, %v248_v11 }
  0x39   : > { %v258_v14 = vsel %vm257_vm0, %v250_v12, 0.0  ;;  %v252_v15 = vpack.c.bf16 %v250_v12, %v250_v12  ;;  %v267_v22 = vmul.f32 %v440_v19, %v266_v21 }
  0x3a   : > { %259 = vadd.xlane.f32.xlu0 %v258_v14  ;;  %v253_v16 = vpack.c.bf16 %v251_v13, %v251_v13  ;;  %v261_v17 = vsel %vm257_vm0, %v251_v13, 0.0 }
  0x3b   : > { %255 = vst.msk [vmem:[%s229_s9] sm:$0xf] %vm254_vm1, %v252_v15  ;;  %v268_v23 = vadd.f32 %v440_v19, %v267_v22 }
  0x3c   : > { %256 = vst.msk [vmem:[%s229_s9 + $0x4] sm:$0xf] %vm254_vm1, %v253_v16 }
  0x3d   : > { %v270_v24 = vsel %vm269_vm2, %v440_v19, %v268_v23 }
  0x42   : > { %262 = vadd.xlane.f32.xlu0 %v261_v17 }
  0xad   : > { %v260_v25 = vpop.xlane.xlu0 %259 }
  0xae   : > { %v271_v26 = vmul.f32 %v270_v24, %v260_v25 }
  0xb0   : > { %274 = vst.msk [vmem:[%s234_s13] sm:$0xff] %vm273_vm3, %v271_v26 }
  0xb5   : > { %v263_v27 = vpop.xlane.xlu0 %262 }
  0xb6   : > { %v272_v28 = vmul.f32 %v270_v24, %v263_v27 }
  0xb8   : > { %275 = vst.msk [vmem:[%s234_s13 + $0x8] sm:$0xff] %vm273_vm3, %v272_v28 }
  0xb9 PF: > { %p17_p7 = scmp.ge.s32.totalorder %s563_s2, 4   ;;  %s648_s19 = smov %s497_s20 }
  0xba   : > { %s649_s20 = smov %s501_s21  ;;  %s650_s21 = smov %s573_s25 }
  0xbb   : > { %s651_s22 = smov %s563_s2  ;;  %19 = sbr.rel (!%p17_p7) target bundleno = 6 (0x6), region = 84 }
  0xc0   :  { %313 = vsyncpa [#allocation5], 1 }
  0xc1   :  { %315 = vsyncpa [#allocation5 + $0x1], 1 }

// kernel: net_forward.10
= control target key start
LH: loop header
LB: loop body
LE: loop exit
PB: predicated region body
PF: predicated region fallthrough
CT: control target
= control target key end

     0   :  { %s1219_s15 = smov 0   ;;  %s1221_s16 = smov 0   ;;  %s1552_s0 = inlined_call_operand.vmem [shape: bf16[2,59,22,38], index: 0, kind: input, shape index: {}]   ;;  %s1553_s1 = inlined_call_operand.vmem [shape: bf16[7,38,256], index: 1, kind: input, shape index: {}]   ;;  %s1554_s2 = inlined_call_operand.vmem [shape: f32[1,256], index: 2, kind: input, shape index: {}]   ;;  %s1555_s3 = inlined_call_operand.vmem [shape: f32[1,256], index: 3, kind: input, shape index: {}]   ;;  %s1556_s4 = inlined_call_operand.vmem [shape: bf16[2,16,256], index: 4, kind: output, shape index: {}]  }
   0x1   :  { %s1223_s17 = smov 0   ;;  %s1225_s18 = smov 0  }
   0x2   :  { %s1227_s19 = smov 0  }
   0x3 LB: > { %s23_s20 = sadd.s32 1, %s1184_s17  ;;  %s26_s21 = sadd.s32 1, %s1188_s18  ;;  %s1192_s19 = sphi %s1227_s19, %s14_s19   ;;  %s1188_s18 = sphi %s1225_s18, %s1560_s18   ;;  %s1184_s17 = sphi %s1223_s17, %s1559_s17   ;;  %s1180_s16 = sphi %s1221_s16, %s1558_s16   ;;  %s1176_s15 = sphi %s1219_s15, %s1557_s15  }
   0x4   : > { %p24_p0 = scmp.ge.s32.totalorder %s23_s20, 59  ;;  %p913_p1 = scmp.ge.s32.totalorder %s1192_s19, 1 }
   0x5   : > { %p180_p2 = scmp.lt.s32.totalorder %s1192_s19, 119 }
   0x6   : > { %s1562_s20 = smov (%p24_p0, %s23_s20), 0  ;;  %s1564_s21 = smov (!%p24_p0, %s26_s21), %s1188_s18 }
   0x7   : > { %p181_p3 = pnand %p913_p1, %p180_p2  ;;  %p28_p4 = scmp.ge.s32.totalorder %s1564_s21, 2 }
   0x8   : > { %p210_p5 = scmp.lt.s32.totalorder (!%p181_p3), %s1180_s16, 1  ;;  %p212_p6 = scmp.lt.s32.totalorder (!%p181_p3), %s1176_s15, 58 }
   0x9   : > { %s1566_s21 = smov (%p28_p4, %s1564_s21), 0  ;;  %184 = sbr.rel (%p181_p3) target bundleno = 258 (0x102), region = 36 }
   0xa   : > { %p1077_p7 = scmp.ne.s32.totalorder (!%p181_p3), %s1176_s15, 0 }
   0xe   : > { %v238_v0 = vld [vmem:[%s1553_s1 + $0x20] sm:$0x77]  ;;  %vm288_vm0 = vcmask 1042432   ;;  %v925_v1 = vld [vmem:[%s1553_s1 + $0x48] sm:$0x77]  ;;  %s1568_s16 = smov (!%p210_p5, %s1180_s16), 1 }
   0xf   : > { %v336_v2 = vunpack.c.l.b16 %v238_v0  ;;  %v337_v3 = vunpack.c.h.b16 %v238_v0  ;;  %v272_v4 = vunpack.c.l.b16 %v925_v1  ;;  %v273_v5 = vunpack.c.h.b16 %v925_v1  ;;  %v954_v6 = vld [vmem:[%s1553_s1 + $0x10] sm:$0xf]  ;;  %v1087_v7 = vld [vmem:[%s1553_s1 + $0x14] sm:$0xf0]  ;;  %v1086_v8 = vld [vmem:[%s1553_s1 + $0x14] sm:$0xf] }
  0x10   : > { %v956_v9 = vld [vmem:[%s1553_s1 + $0x18] sm:$0xf0]  ;;  %v936_v14 = vld [vmem:[%s1553_s1 + $0x38] sm:$0xf]  ;;  %v1091_v15 = vld [vmem:[%s1553_s1 + $0x3c] sm:$0xf0]  ;;  %v955_v25 = vor.u32 %v1087_v7, %v954_v6 }
  0x11   : > { %v342_v10 = vpack.c.b16 %v336_v2, %v336_v2  ;;  %v343_v11 = vpack.c.b16 %v337_v3, %v337_v3  ;;  %v278_v12 = vpack.c.b16 %v272_v4, %v272_v4  ;;  %v279_v13 = vpack.c.b16 %v273_v5, %v273_v5  ;;  %v1090_v16 = vld [vmem:[%s1553_s1 + $0x3c] sm:$0xf]  ;;  %v938_v17 = vld [vmem:[%s1553_s1 + $0x40] sm:$0xf0]  ;;  %v946_v18 = vld [vmem:[%s1553_s1] sm:$0xf] }
  0x12   : > { %v1085_v19 = vld [vmem:[%s1553_s1 + $0x4] sm:$0xf0]  ;;  %v1084_v24 = vld [vmem:[%s1553_s1 + $0x4] sm:$0xf]  ;;  %v959_v26 = vor.u32 %v1086_v8, %v956_v9  ;;  %v948_v27 = vld [vmem:[%s1553_s1 + $0x8] sm:$0xf0]  ;;  %v937_v30 = vor.u32 %v1091_v15, %v936_v14  ;;  %v941_v31 = vor.u32 %v1090_v16, %v938_v17 }
  0x13   : > { %v351_v20 = vsel %vm288_vm0, %v342_v10, 0  ;;  %v354_v21 = vsel %vm288_vm0, %v343_v11, 0  ;;  %v290_v22 = vsel %vm288_vm0, %v278_v12, 0  ;;  %v293_v23 = vsel %vm288_vm0, %v279_v13, 0  ;;  %v928_v28 = vld [vmem:[%s1553_s1 + $0x28] sm:$0xf] }
  0x14   : > { %361 = vmatpush.bf16.msra.mxu2 %v351_v20  ;;  %375 = vmatpush.bf16.msra.mxu3 %v354_v21  ;;  %v1089_v29 = vld [vmem:[%s1553_s1 + $0x2c] sm:$0xf0]  ;;  %v1088_v32 = vld [vmem:[%s1553_s1 + $0x2c] sm:$0xf]  ;;  %v930_v34 = vld [vmem:[%s1553_s1 + $0x30] sm:$0xf0]  ;;  %v947_v38 = vor.u32 %v1085_v19, %v946_v18  ;;  %v951_v39 = vor.u32 %v1084_v24, %v948_v27 }
  0x15   : > { %300 = vmatpush.bf16.msra.mxu0 %v290_v22  ;;  %314 = vmatpush.bf16.msra.mxu1 %v293_v23  ;;  %v966_v33 = vld [vmem:[%s1553_s1 + $0x70] sm:$0x77]  ;;  %v989_v37 = vld [vmem:[%s1553_s1 + $0x98] sm:$0x77]  ;;  %s1113_s24 = smul.u32 177, %s1568_s16  ;;  %s1082_s25 = sshll.u32 %s1568_s16, 4  ;;  %v929_v42 = vor.u32 %v1089_v29, %v928_v28  ;;  %v933_v45 = vor.u32 %v1088_v32, %v930_v34 }
  0x16   : > { %v409_v35 = vunpack.c.l.b16 %v966_v33  ;;  %v410_v36 = vunpack.c.h.b16 %v966_v33  ;;  %v491_v40 = vunpack.c.l.b16 %v989_v37  ;;  %v492_v41 = vunpack.c.h.b16 %v989_v37  ;;  %s213_s26 = scalar_select %p212_p6, %s1176_s15, 58  ;;  %v977_v48 = vld [vmem:[%s1553_s1 + $0x60] sm:$0xf]  ;;  %v1095_v49 = vld [vmem:[%s1553_s1 + $0x64] sm:$0xf0] }
  0x17   : > { %s1330_s29 = scalar_lea.vmem %s1556_s4, %s1082_s25  ;;  %v1094_v50 = vld [vmem:[%s1553_s1 + $0x64] sm:$0xf]  ;;  %v979_v51 = vld [vmem:[%s1553_s1 + $0x68] sm:$0xf0]  ;;  %v1000_v52 = vld [vmem:[%s1553_s1 + $0x88] sm:$0xf]  ;;  %v978_v0 = vor.u32 %v1095_v49, %v977_v48 }
  0x18   : > { %362 = vmatpush.bf16.msra.mxu2 %v955_v25  ;;  %376 = vmatpush.bf16.msra.mxu3 %v959_v26  ;;  %v415_v43 = vpack.c.b16 %v409_v35, %v409_v35  ;;  %v416_v44 = vpack.c.b16 %v410_v36, %v410_v36  ;;  %v497_v46 = vpack.c.b16 %v491_v40, %v491_v40  ;;  %s1112_s12 = smul.u32 3, %s213_s26  ;;  %v1099_v53 = vld [vmem:[%s1553_s1 + $0x8c] sm:$0xf0]  ;;  %v1098_v56 = vld [vmem:[%s1553_s1 + $0x8c] sm:$0xf]  ;;  %vm284_vm1 = vcmask 310272  }
  0x19   : > { %301 = vmatpush.bf16.msra.mxu0 %v937_v30  ;;  %315 = vmatpush.bf16.msra.mxu1 %v941_v31  ;;  %v498_v47 = vpack.c.b16 %v492_v41, %v492_v41  ;;  %v1002_v57 = vld [vmem:[%s1553_s1 + $0x90] sm:$0xf0]  ;;  %v969_v60 = vld [vmem:[%s1553_s1 + $0x50] sm:$0xf]  ;;  %v1093_v61 = vld [vmem:[%s1553_s1 + $0x54] sm:$0xf0]  ;;  %v982_v1 = vor.u32 %v1094_v50, %v979_v51  ;;  %v1001_v2 = vor.u32 %v1099_v53, %v1000_v52 }
  0x1a   : > { %v425_v54 = vsel %vm288_vm0, %v415_v43, 0  ;;  %v428_v55 = vsel %vm288_vm0, %v416_v44, 0  ;;  %s216_s26 = sadd.s32 %s1113_s24, %s1112_s12  ;;  %v507_v58 = vsel %vm288_vm0, %v497_v46, 0  ;;  %v1092_v62 = vld [vmem:[%s1553_s1 + $0x54] sm:$0xf]  ;;  %v1005_v8 = vor.u32 %v1098_v56, %v1002_v57 }
  0x1b   : > { %v510_v59 = vsel %vm288_vm0, %v498_v47, 0  ;;  %s914_s9 = sshll.u32 %s216_s26, 2  ;;  %v971_v63 = vld [vmem:[%s1553_s1 + $0x58] sm:$0xf0]  ;;  %v992_v3 = vld [vmem:[%s1553_s1 + $0x78] sm:$0xf]  ;;  %v970_v14 = vor.u32 %v1093_v61, %v969_v60 }
  0x1c   : > { %363 = vmatpush.bf16.msra.mxu2 %v947_v38  ;;  %377 = vmatpush.bf16.msra.mxu3 %v951_v39  ;;  %s218_s14 = scalar_lea.vmem %s1552_s0, %s914_s9  ;;  %v1012_v4 = vld [vmem:[%s1553_s1 + $0xc0] sm:$0x77]  ;;  %v1035_v5 = vld [vmem:[%s1553_s1 + $0xe8] sm:$0x77]  ;;  %v1096_v15 = vld [vmem:[%s1553_s1 + $0x7c] sm:$0xf]  ;;  %v974_v19 = vor.u32 %v1092_v62, %v971_v63 }
  0x1d   : > { %302 = vmatpush.bf16.msra.mxu0 %v929_v42  ;;  %316 = vmatpush.bf16.msra.mxu1 %v933_v45  ;;  %v1386_v6 = vld [vmem:[%s218_s14] sm:$0xff]  ;;  %v229_v7 = vld [vmem:[%s218_s14 + $0x8] sm:$0x7]  ;;  %v567_v10 = vunpack.c.l.b16 %v1012_v4  ;;  %v568_v11 = vunpack.c.h.b16 %v1012_v4  ;;  %v647_v12 = vunpack.c.l.b16 %v1035_v5  ;;  %v648_v20 = vunpack.c.h.b16 %v1035_v5  ;;  %v1046_v28 = vld [vmem:[%s1553_s1 + $0xd8] sm:$0xf] }
  0x1e   : > { %v1097_v9 = vld [vmem:[%s1553_s1 + $0x7c] sm:$0xf0]  ;;  %v232_v13 = vunpack.c.l.bf16 %v229_v7  ;;  %v994_v16 = vld [vmem:[%s1553_s1 + $0x80] sm:$0xf0]  ;;  %v1402_v17 = vshrl.u32 %v1386_v6, 16  ;;  %v1405_v18 = vshll.u32 %v1386_v6, 16 }
  0x1f   : > { %960 = vmatmul.msk.bf16.vlgmr.msra.gmra.mxu2 %vm284_vm1, %v1386_v6  ;;  %961 = vmatmul.msk.bf16.vlgmr.msra.gmra.mxu3 %vm284_vm1, %v1386_v6  ;;  %vm246_vm2 = vsmask.f32 7424  ;;  %v993_v22 = vor.u32 %v1097_v9, %v992_v3  ;;  %v653_v23 = vpack.c.b16 %v647_v12, %v647_v12  ;;  %v997_v25 = vor.u32 %v1096_v15, %v994_v16  ;;  %v1107_v32 = vld [vmem:[%s1553_s1 + $0xdc] sm:$0xf0]  ;;  %v1023_v37 = vld [vmem:[%s1553_s1 + $0xb0] sm:$0xf] }
  0x20   : > { %517 = vmatpush.bf16.msrb.mxu2 %v507_v58  ;;  %531 = vmatpush.bf16.msrb.mxu3 %v510_v59  ;;  %v1407_v21 = vpack.c.bf16 %v232_v13, %v232_v13  ;;  %v252_v24 = vrot.slane %v1405_v18, 1  ;;  %v573_v26 = vpack.c.b16 %v567_v10, %v567_v10  ;;  %v574_v27 = vpack.c.b16 %v568_v11, %v568_v11  ;;  %v1103_v38 = vld [vmem:[%s1553_s1 + $0xb4] sm:$0xf0]  ;;  %v1106_v39 = vld [vmem:[%s1553_s1 + $0xdc] sm:$0xf] }
  0x21   : > { %435 = vmatpush.bf16.msrb.mxu0 %v425_v54  ;;  %449 = vmatpush.bf16.msrb.mxu1 %v428_v55  ;;  %v469_v30 = vrot.slane %v1402_v17, 1  ;;  %v470_v34 = vrot.slane %v1405_v18, 2  ;;  %v663_v35 = vsel %vm288_vm0, %v653_v23, 0  ;;  %v654_v36 = vpack.c.b16 %v648_v20, %v648_v20  ;;  %v1048_v40 = vld [vmem:[%s1553_s1 + $0xe0] sm:$0xf0] }
  0x22   : > { %v1414_v29 = vshll.u32 %v1407_v21, 16  ;;  %v472_v31 = vshrl.u32 %v1407_v21, 16  ;;  %v253_v33 = vor.u32 %v252_v24, %v1402_v17  ;;  %v1102_v44 = vld [vmem:[%s1553_s1 + $0xb4] sm:$0xf]  ;;  %v583_v45 = vsel %vm288_vm0, %v573_v26, 0 }
  0x23   : > { %v586_v46 = vsel %vm288_vm0, %v574_v27, 0  ;;  %v666_v47 = vsel %vm288_vm0, %v654_v36, 0  ;;  %v1025_v48 = vld [vmem:[%s1553_s1 + $0xb8] sm:$0xf0]  ;;  %v1047_v50 = vor.u32 %v1107_v32, %v1046_v28  ;;  %v1051_v51 = vor.u32 %v1106_v39, %v1048_v40  ;;  %v1038_v52 = vld [vmem:[%s1553_s1 + $0xc8] sm:$0xf] }
  0x24   : > { %518 = vmatpush.bf16.msrb.mxu2 %v1001_v2  ;;  %532 = vmatpush.bf16.msrb.mxu3 %v1005_v8  ;;  %v257_v41 = vrot.slane %v1414_v29, 1  ;;  %v474_v42 = vrot.slane %v472_v31, 1  ;;  %v475_v43 = vrot.slane %v1414_v29, 2  ;;  %v471_v53 = vor.u32 %v470_v34, %v469_v30  ;;  %v1105_v54 = vld [vmem:[%s1553_s1 + $0xcc] sm:$0xf0] }
  0x25   : > { %436 = vmatpush.bf16.msrb.mxu0 %v978_v0  ;;  %450 = vmatpush.bf16.msrb.mxu1 %v982_v1  ;;  %v1104_v55 = vld [vmem:[%s1553_s1 + $0xcc] sm:$0xf]  ;;  %v1040_v56 = vld [vmem:[%s1553_s1 + $0xd0] sm:$0xf0]  ;;  %vm468_vm3 = vsmask.f32 6400  ;;  %v1024_v58 = vor.u32 %v1103_v38, %v1023_v37  ;;  %v1028_v59 = vor.u32 %v1102_v44, %v1025_v48  ;;  %v1039_v0 = vor.u32 %v1105_v54, %v1038_v52 }
  0x26   : > { %v258_v49 = vsel %vm246_vm2, %v253_v33, %v257_v41  ;;  %v476_v57 = vor.u32 %v475_v43, %v474_v42  ;;  %v1015_v60 = vld [vmem:[%s1553_s1 + $0xa0] sm:$0xf]  ;;  %v1101_v61 = vld [vmem:[%s1553_s1 + $0xa4] sm:$0xf0]  ;;  %v1100_v62 = vld [vmem:[%s1553_s1 + $0xa4] sm:$0xf]  ;;  %v1043_v1 = vor.u32 %v1104_v55, %v1040_v56 }
  0x27   : > { %942 = vmatmul.msk.bf16.vlgmr.msra.gmra.mxu0 %vm284_vm1, %v258_v49  ;;  %943 = vmatmul.msk.bf16.vlgmr.msra.gmra.mxu1 %vm284_vm1, %v258_v49  ;;  %v1017_v63 = vld [vmem:[%s1553_s1 + $0xa8] sm:$0xf0]  ;;  %v1058_v2 = vld [vmem:[%s1553_s1 + $0x110] sm:$0x77]  ;;  %v1016_v4 = vor.u32 %v1101_v61, %v1015_v60  ;;  %v393_v9 = vrot.slane %v1386_v6, 1  ;;  %v394_v10 = vrot.slane %v1407_v21, 1 }
  0x28   : > { %519 = vmatpush.bf16.msrb.mxu2 %v993_v22  ;;  %533 = vmatpush.bf16.msrb.mxu3 %v997_v25  ;;  %v477_v3 = vsel %vm468_vm3, %v471_v53, %v476_v57  ;;  %v1020_v5 = vor.u32 %v1100_v62, %v1017_v63  ;;  %v723_v7 = vunpack.c.l.b16 %v1058_v2  ;;  %v724_v8 = vunpack.c.h.b16 %v1058_v2  ;;  %v1069_v20 = vld [vmem:[%s1553_s1 + $0x100] sm:$0xf]  ;;  %v1111_v22 = vld [vmem:[%s1553_s1 + $0x104] sm:$0xf0]  ;;  %v1071_v24 = vld [vmem:[%s1553_s1 + $0x108] sm:$0xf0] }
  0x29   : > { %437 = vmatpush.bf16.msrb.mxu0 %v970_v14  ;;  %451 = vmatpush.bf16.msrb.mxu1 %v974_v19  ;;  %vm392_vm4 = vcmask 1046528   ;;  %v627_v13 = vrot.slane %v1402_v17, 2  ;;  %v628_v14 = vrot.slane %v1405_v18, 3  ;;  %v630_v16 = vrot.slane %v472_v31, 2  ;;  %v1110_v18 = vld [vmem:[%s1553_s1 + $0x104] sm:$0xf] }
  0x2a   : > { %v729_v11 = vpack.c.b16 %v723_v7, %v723_v7  ;;  %v730_v12 = vpack.c.b16 %v724_v8, %v724_v8  ;;  %v395_v15 = vsel %vm392_vm4, %v393_v9, %v394_v10  ;;  %v631_v19 = vrot.slane %v1414_v29, 3  ;;  %v1061_v29 = vld [vmem:[%s1553_s1 + $0xf0] sm:$0xf]  ;;  %v1109_v30 = vld [vmem:[%s1553_s1 + $0xf4] sm:$0xf0] }
  0x2b   : > { %v629_v25 = vor.u32 %v628_v14, %v627_v13  ;;  %vm626_vm5 = vsmask.f32 5376  ;;  %v1070_v27 = vor.u32 %v1111_v22, %v1069_v20  ;;  %v1074_v28 = vor.u32 %v1110_v18, %v1071_v24  ;;  %v1108_v31 = vld [vmem:[%s1553_s1 + $0xf4] sm:$0xf]  ;;  %v1063_v32 = vld [vmem:[%s1553_s1 + $0xf8] sm:$0xf0] }
  0x2c   : > { %673 = vmatpush.bf16.msra.mxu2 %v663_v35  ;;  %687 = vmatpush.bf16.msra.mxu3 %v666_v47  ;;  %v739_v23 = vsel %vm288_vm0, %v729_v11, 0  ;;  %v742_v17 = vsel %vm288_vm0, %v730_v12, 0  ;;  %v632_v26 = vor.u32 %v631_v19, %v630_v16  ;;  %v1062_v34 = vor.u32 %v1109_v30, %v1061_v29  ;;  %v226_v8 = vld [vmem:[%s1555_s3] sm:$0x3] }
  0x2d   : > { %593 = vmatpush.bf16.msra.mxu0 %v583_v45  ;;  %607 = vmatpush.bf16.msra.mxu1 %v586_v46  ;;  %v1066_v35 = vor.u32 %v1108_v31, %v1063_v32  ;;  %v551_v36 = vrot.slane %v1386_v6, 2  ;;  %v552_v37 = vrot.slane %v1407_v21, 2  ;;  %vm550_vm6 = vcmask 1045504  }
  0x2e   : > { %v633_v33 = vsel %vm626_vm5, %v629_v25, %v632_v26  ;;  %v707_v39 = vrot.slane %v1386_v6, 3  ;;  %v708_v40 = vrot.slane %v1407_v21, 3  ;;  %vm706_vm7 = vcmask 1044480  }
  0x2f   : > { %1006 = vmatmul.msk.bf16.vlgmr.msrb.gmra.mxu2 %vm284_vm1, %v477_v3  ;;  %1007 = vmatmul.msk.bf16.vlgmr.msrb.gmra.mxu3 %vm284_vm1, %v477_v3  ;;  %v553_v38 = vsel %vm550_vm6, %v551_v36, %v552_v37  ;;  %v786_v16 = vperm.slane %v226_v8, 0  ;;  %v787_v20 = vperm.slane %v226_v8, 1 }
  0x30   : > { %674 = vmatpush.bf16.msra.mxu2 %v1047_v50  ;;  %688 = vmatpush.bf16.msra.mxu3 %v1051_v51  ;;  %v709_v41 = vsel %vm706_vm7, %v707_v39, %v708_v40 }
  0x31   : > { %594 = vmatpush.bf16.msra.mxu0 %v1024_v58  ;;  %608 = vmatpush.bf16.msra.mxu1 %v1028_v59 }
  0x34   : > { %675 = vmatpush.bf16.msra.mxu2 %v1039_v0  ;;  %689 = vmatpush.bf16.msra.mxu3 %v1043_v1 }
  0x35   : > { %595 = vmatpush.bf16.msra.mxu0 %v1016_v4  ;;  %609 = vmatpush.bf16.msra.mxu1 %v1020_v5  ;;  %v225_v4 = vld [vmem:[%s1554_s2] sm:$0x3] }
  0x36   : > { %v777_v13 = vperm.slane %v225_v4, 0  ;;  %v778_v14 = vperm.slane %v225_v4, 1 }
  0x37   : > { %983 = vmatmul.msk.bf16.vlgmr.msrb.gmra.mxu0 %vm284_vm1, %v395_v15  ;;  %984 = vmatmul.msk.bf16.vlgmr.msrb.gmra.mxu1 %vm284_vm1, %v395_v15 }
  0x39   : > { %749 = vmatpush.bf16.msrb.mxu0 %v739_v23  ;;  %763 = vmatpush.bf16.msrb.mxu1 %v742_v17 }
  0x3d   : > { %750 = vmatpush.bf16.msrb.mxu0 %v1070_v27  ;;  %764 = vmatpush.bf16.msrb.mxu1 %v1074_v28 }
  0x3f   : > { %1052 = vmatmul.msk.bf16.vlgmr.msra.gmra.mxu2 %vm284_vm1, %v633_v33  ;;  %1053 = vmatmul.msk.bf16.vlgmr.msra.gmra.mxu3 %vm284_vm1, %v633_v33 }
  0x41   : > { %751 = vmatpush.bf16.msrb.mxu0 %v1062_v34  ;;  %765 = vmatpush.bf16.msrb.mxu1 %v1066_v35 }
  0x47   : > { %1029 = vmatmul.msk.bf16.vlgmr.msra.gmra.mxu0 %vm284_vm1, %v553_v38  ;;  %1030 = vmatmul.msk.bf16.vlgmr.msra.gmra.mxu1 %vm284_vm1, %v553_v38 }
  0x57   : > { %1075 = vmatmul.msk.bf16.vlgmr.msrb.gmra.mxu0 %vm284_vm1, %v709_v41  ;;  %1076 = vmatmul.msk.bf16.vlgmr.msrb.gmra.mxu1 %vm284_vm1, %v709_v41 }
  0xa2   : > { %v365_v44 = vpop.f32.mrf.mxu2  ;;  %v379_v45 = vpop.f32.mrf.mxu3 }
  0xa4   : > { %v304_v42 = vpop.f32.mrf.mxu0  ;;  %v318_v43 = vpop.f32.mrf.mxu1 }
  0xa5   : > { %v366_v58 = vadd.f32 %v365_v44, %v304_v42  ;;  %v380_v59 = vadd.f32 %v379_v45, %v318_v43 }
  0xaa   : > { %v367_v48 = vpop.f32.mrf.mxu2  ;;  %v381_v49 = vpop.f32.mrf.mxu3 }
  0xac   : > { %v306_v46 = vpop.f32.mrf.mxu0  ;;  %v320_v47 = vpop.f32.mrf.mxu1 }
  0xad   : > { %v368_v9 = vadd.f32 %v367_v48, %v306_v46  ;;  %v382_v10 = vadd.f32 %v381_v49, %v320_v47 }
  0xb2   : > { %v521_v52 = vpop.f32.mrf.mxu2  ;;  %v535_v6 = vpop.f32.mrf.mxu3 }
  0xb4   : > { %v439_v50 = vpop.f32.mrf.mxu0  ;;  %v453_v51 = vpop.f32.mrf.mxu1 }
  0xb5   : > { %v458_v62 = vadd.f32 %v439_v50, %v366_v58  ;;  %v459_v63 = vadd.f32 %v453_v51, %v380_v59 }
  0xb7   : > { %v540_v2 = vadd.f32 %v521_v52, %v458_v62  ;;  %v541_v3 = vadd.f32 %v535_v6, %v459_v63 }
  0xba   : > { %v523_v54 = vpop.f32.mrf.mxu2  ;;  %v537_v55 = vpop.f32.mrf.mxu3 }
  0xbc   : > { %v441_v53 = vpop.f32.mrf.mxu0  ;;  %v455_v21 = vpop.f32.mrf.mxu1 }
  0xbd   : > { %v460_v22 = vadd.f32 %v441_v53, %v368_v9  ;;  %v461_v23 = vadd.f32 %v455_v21, %v382_v10 }
  0xbf   : > { %v542_v24 = vadd.f32 %v523_v54, %v460_v22  ;;  %v543_v25 = vadd.f32 %v537_v55, %v461_v23 }
  0xc2   : > { %v677_v0 = vpop.f32.mrf.mxu2  ;;  %v691_v1 = vpop.f32.mrf.mxu3 }
  0xc4   : > { %v597_v56 = vpop.f32.mrf.mxu0  ;;  %v611_v57 = vpop.f32.mrf.mxu1 }
  0xc5   : > { %v616_v5 = vadd.f32 %v597_v56, %v540_v2  ;;  %v617_v7 = vadd.f32 %v611_v57, %v541_v3 }
  0xc7   : > { %v696_v11 = vadd.f32 %v677_v0, %v616_v5  ;;  %v697_v12 = vadd.f32 %v691_v1, %v617_v7 }
  0xca   : > { %v679_v28 = vpop.f32.mrf.mxu2  ;;  %v693_v29 = vpop.f32.mrf.mxu3 }
  0xcc   : > { %v599_v60 = vpop.f32.mrf.mxu0  ;;  %v613_v61 = vpop.f32.mrf.mxu1 }
  0xcd   : > { %v618_v30 = vadd.f32 %v599_v60, %v542_v24  ;;  %v619_v31 = vadd.f32 %v613_v61, %v543_v25 }
  0xcf   : > { %v698_v34 = vadd.f32 %v679_v28, %v618_v30  ;;  %v699_v35 = vadd.f32 %v693_v29, %v619_v31 }
  0xd4   : > { %v753_v15 = vpop.f32.mrf.mxu0  ;;  %v767_v19 = vpop.f32.mrf.mxu1 }
  0xd5   : > { %v772_v17 = vadd.f32 %v753_v15, %v696_v11  ;;  %v773_v18 = vadd.f32 %v767_v19, %v697_v12 }
  0xd7   : > { %v781_v26 = vmul.f32 %v777_v13, %v772_v17  ;;  %v782_v27 = vmul.f32 %v778_v14, %v773_v18 }
  0xd9   : > { %v790_v32 = vadd.f32 %v786_v16, %v781_v26  ;;  %v791_v33 = vadd.f32 %v787_v20, %v782_v27 }
  0xdb   : > { %v794_v36 = vmax.f32 %v790_v32, 0.0  ;;  %v795_v37 = vmax.f32 %v791_v33, 0.0 }
  0xdc   : > { %v755_v38 = vpop.f32.mrf.mxu0  ;;  %v769_v39 = vpop.f32.mrf.mxu1 }
  0xdd   : > { %v774_v40 = vadd.f32 %v755_v38, %v698_v34  ;;  %v775_v41 = vadd.f32 %v769_v39, %v699_v35 }
  0xdf   : > { %v783_v42 = vmul.f32 %v777_v13, %v774_v40  ;;  %v784_v43 = vmul.f32 %v778_v14, %v775_v41  ;;  %801 = sbr.rel (%p1077_p7) target bundleno = 232 (0xe8), region = 40 }
  0xe1   : > { %v792_v44 = vadd.f32 %v786_v16, %v783_v42  ;;  %v793_v45 = vadd.f32 %v787_v20, %v784_v43 }
  0xe3   : > { %v796_v46 = vmax.f32 %v792_v44, 0.0  ;;  %v797_v47 = vmax.f32 %v793_v45, 0.0 }
  0xe4   : > { %802 = vst [vmem:[#allocation2 + $0x10] sm:$0xff] %v794_v36 }
  0xe5   : > { %803 = vst [vmem:[#allocation2] sm:$0xff] %v795_v37 }
  0xe6   : > { %804 = vst [vmem:[#allocation2 + $0x18] sm:$0xff] %v796_v46 }
  0xe7   : > { %805 = vst [vmem:[#allocation2 + $0x8] sm:$0xff] %v797_v47 }
  0xe8 PF: > { %p1078_p8 = scmp.le.s32.totalorder %s1176_s15, 0 }
  0xea   : > { %809 = sbr.rel (%p1078_p8) target bundleno = 246 (0xf6), region = 44 }
  0xef   : > { %v810_v48 = vld [vmem:[#allocation2 + $0x10] sm:$0xff]  ;;  %v811_v49 = vld [vmem:[#allocation2] sm:$0xff]  ;;  %v812_v50 = vld [vmem:[#allocation2 + $0x18] sm:$0xff] }
  0xf0   : > { %v814_v51 = vmax.f32 %v810_v48, %v794_v36  ;;  %v815_v52 = vmax.f32 %v811_v49, %v795_v37  ;;  %v816_v6 = vmax.f32 %v812_v50, %v796_v46  ;;  %v813_v53 = vld [vmem:[#allocation2 + $0x8] sm:$0xff] }
  0xf1   : > { %v817_v21 = vmax.f32 %v813_v53, %v797_v47 }
  0xf2   : > { %818 = vst [vmem:[#allocation2 + $0x10] sm:$0xff] %v814_v51 }
  0xf3   : > { %819 = vst [vmem:[#allocation2] sm:$0xff] %v815_v52 }
  0xf4   : > { %820 = vst [vmem:[#allocation2 + $0x18] sm:$0xff] %v816_v6 }
  0xf5   : > { %821 = vst [vmem:[#allocation2 + $0x8] sm:$0xff] %v817_v21 }
  0xf6 PF: > { %p1079_p9 = scmp.ne.s32.totalorder %s1176_s15, 58 }
  0xf8   : > { %825 = sbr.rel (%p1079_p9) target bundleno = 258 (0x102), region = 48 }
  0xfd   : > { %v826_v54 = vld [vmem:[#allocation2 + $0x10] sm:$0xff]  ;;  %v827_v55 = vld [vmem:[#allocation2] sm:$0xff]  ;;  %v828_v56 = vld [vmem:[#allocation2 + $0x18] sm:$0xff] }
  0xfe   : > { %v830_v57 = vpack.c.bf16 %v827_v55, %v826_v54  ;;  %v829_v58 = vld [vmem:[#allocation2 + $0x8] sm:$0xff] }
  0xff   : > { %v831_v59 = vpack.c.bf16 %v829_v58, %v828_v56 }
 0x100   : > { %832 = vst [vmem:[%s1330_s29] sm:$0xff] %v830_v57 }
 0x101   : > { %833 = vst [vmem:[%s1330_s29 + $0x8] sm:$0xff] %v831_v59 }
 0x102 PF: > { %s14_s19 = sadd.s32 1, %s1192_s19   ;;  %s1557_s15 = smov %s1184_s17 }
 0x103   : > { %p11_p10 = scmp.ge.s32.totalorder %s14_s19, 120   ;;  %s1558_s16 = smov %s1188_s18 }
 0x104   : > { %s1559_s17 = smov %s1562_s20  ;;  %s1560_s18 = smov %s1566_s21 }
 0x105   :  { %13 = sbr.rel (!%p11_p10) target bundleno = 3 (0x3), region = 84 }

// kernel: net_forward.11
= control target key start
LH: loop header
LB: loop body
LE: loop exit
PB: predicated region body
PF: predicated region fallthrough
CT: control target
= control target key end

     0   :  { %s612_s15 = smov 0   ;;  %s751_s0 = inlined_call_operand.vmem [shape: bf16[2,16,129], index: 0, kind: input, shape index: {}]   ;;  %s752_s1 = inlined_call_operand.vmem [shape: bf16[129,256], index: 1, kind: input, shape index: {}]   ;;  %s753_s2 = inlined_call_operand.vmem [shape: f32[1,256], index: 2, kind: input, shape index: {}]   ;;  %s754_s3 = inlined_call_operand.vmem [shape: f32[1,256], index: 3, kind: input, shape index: {}]   ;;  %s755_s4 = inlined_call_operand.vmem [shape: bf16[2,16,256], index: 4, kind: output, shape index: {}]  }
   0x1 LB: > { %s464_s16 = sadd.s32 4294967295, %s584_s15   ;;  %p468_p0 = scmp.ge.s32.totalorder %s584_s15, 1  ;;  %s584_s15 = sphi %s612_s15, %s14_s15  }
   0x2   : > { %p162_p1 = scmp.lt.s32.totalorder %s584_s15, 3 }
   0x4   : > { %p163_p2 = pnand %p468_p0, %p162_p1 }
   0x5   : > { %p188_p3 = scmp.lt.s32.totalorder (!%p163_p2), %s464_s16, 1 }
   0x6   : > { %166 = sbr.rel (%p163_p2) target bundleno = 197 (0xc5), region = 36 }
   0xb   : > { %v539_v0 = vld [vmem:[%s752_s1 + $0x70] sm:$0xf]  ;;  %v568_v1 = vld [vmem:[%s752_s1 + $0x74] sm:$0xf0]  ;;  %v567_v2 = vld [vmem:[%s752_s1 + $0x74] sm:$0xf] }
   0xc   : > { %v540_v3 = vor.u32 %v568_v1, %v539_v0  ;;  %v541_v4 = vld [vmem:[%s752_s1 + $0x78] sm:$0xf0]  ;;  %v531_v5 = vld [vmem:[%s752_s1 + $0x60] sm:$0xf]  ;;  %v566_v6 = vld [vmem:[%s752_s1 + $0x64] sm:$0xf0] }
   0xd   : > { %v544_v7 = vor.u32 %v567_v2, %v541_v4  ;;  %v565_v8 = vld [vmem:[%s752_s1 + $0x64] sm:$0xf]  ;;  %v533_v9 = vld [vmem:[%s752_s1 + $0x68] sm:$0xf0]  ;;  %v532_v10 = vor.u32 %v566_v6, %v531_v5  ;;  %v523_v12 = vld [vmem:[%s752_s1 + $0x50] sm:$0xf] }
   0xe   : > { %327 = vmatpush.bf16.msra.mxu0 %v540_v3  ;;  %v536_v11 = vor.u32 %v565_v8, %v533_v9  ;;  %v564_v13 = vld [vmem:[%s752_s1 + $0x54] sm:$0xf0]  ;;  %v563_v14 = vld [vmem:[%s752_s1 + $0x54] sm:$0xf]  ;;  %v525_v15 = vld [vmem:[%s752_s1 + $0x58] sm:$0xf0] }
   0xf   : > { %355 = vmatpush.bf16.msra.mxu2 %v544_v7  ;;  %v524_v16 = vor.u32 %v564_v13, %v523_v12  ;;  %v515_v17 = vld [vmem:[%s752_s1 + $0x40] sm:$0xf]  ;;  %v562_v18 = vld [vmem:[%s752_s1 + $0x44] sm:$0xf0]  ;;  %v528_v19 = vor.u32 %v563_v14, %v525_v15  ;;  %vm318_vm0 = vcmask 1040384   ;;  %v586_v25 = vmov 0  }
  0x10   : > { %v219_v20 = vld [vmem:[%s752_s1 + $0x80] sm:$0x11]  ;;  %v517_v22 = vld [vmem:[%s752_s1 + $0x48] sm:$0xf0]  ;;  %v320_v26 = vsel %vm318_vm0, 65535, %v586_v25  ;;  %s757_s16 = smov (!%p188_p3, %s464_s16), 1  ;;  %v516_v27 = vor.u32 %v562_v18, %v515_v17 }
  0x11   : > { %v561_v21 = vld [vmem:[%s752_s1 + $0x44] sm:$0xf]  ;;  %v279_v23 = vunpack.c.h.b16 %v219_v20  ;;  %v278_v24 = vunpack.c.l.b16 %v219_v20  ;;  %v507_v31 = vld [vmem:[%s752_s1 + $0x30] sm:$0xf]  ;;  %v560_v32 = vld [vmem:[%s752_s1 + $0x34] sm:$0xf0] }
  0x12   : > { %328 = vmatpush.bf16.msra.mxu0 %v532_v10  ;;  %v520_v30 = vor.u32 %v561_v21, %v517_v22  ;;  %s549_s5 = sshll.u32 %s757_s16, 4  ;;  %v559_v33 = vld [vmem:[%s752_s1 + $0x34] sm:$0xf]  ;;  %v509_v34 = vld [vmem:[%s752_s1 + $0x38] sm:$0xf0]  ;;  %v508_v39 = vor.u32 %v560_v32, %v507_v31  ;;  %vm314_vm1 = vcmask 7168  }
  0x13   : > { %356 = vmatpush.bf16.msra.mxu2 %v536_v11  ;;  %v297_v28 = vpack.c.b16 %v279_v23, %v279_v23  ;;  %v296_v29 = vpack.c.b16 %v278_v24, %v278_v24  ;;  %s695_s12 = scalar_lea.vmem %s751_s0, %s549_s5  ;;  %v512_v41 = vor.u32 %v559_v33, %v509_v34  ;;  %v499_v42 = vld [vmem:[%s752_s1 + $0x20] sm:$0xf]  ;;  %v558_v43 = vld [vmem:[%s752_s1 + $0x24] sm:$0xf0]  ;;  %v557_v44 = vld [vmem:[%s752_s1 + $0x24] sm:$0xf]  ;;  %s197_s22 = scalar_lea.vmem %s755_s4, %s549_s5 }
  0x14   : > { %v551_v37 = vld [vmem:[%s695_s12 + $0x4] sm:$0xf]  ;;  %v477_v38 = vld [vmem:[%s695_s12 + $0x8] sm:$0xf0]  ;;  %v500_v46 = vor.u32 %v558_v43, %v499_v42  ;;  %v491_v48 = vld [vmem:[%s752_s1 + $0x10] sm:$0xf] }
  0x15   : > { %v325_v35 = vand.u32 %v320_v26, %v297_v28  ;;  %v322_v36 = vand.u32 %v320_v26, %v296_v29  ;;  %v480_v40 = vor.u32 %v551_v37, %v477_v38  ;;  %v501_v45 = vld [vmem:[%s752_s1 + $0x28] sm:$0xf0]  ;;  %v556_v49 = vld [vmem:[%s752_s1 + $0x14] sm:$0xf0]  ;;  %v555_v50 = vld [vmem:[%s752_s1 + $0x14] sm:$0xf] }
  0x16   : > { %329 = vmatpush.bf16.msra.mxu0 %v524_v16  ;;  %v504_v47 = vor.u32 %v557_v44, %v501_v45  ;;  %v493_v51 = vld [vmem:[%s752_s1 + $0x18] sm:$0xf0]  ;;  %v492_v52 = vor.u32 %v556_v49, %v491_v48  ;;  %v483_v54 = vld [vmem:[%s752_s1] sm:$0xf]  ;;  %v554_v55 = vld [vmem:[%s752_s1 + $0x4] sm:$0xf0] }
  0x17   : > { %357 = vmatpush.bf16.msra.mxu2 %v528_v19  ;;  %376 = vmatpush.bf16.msra.mxu3 %v325_v35  ;;  %v496_v53 = vor.u32 %v555_v50, %v493_v51  ;;  %v553_v56 = vld [vmem:[%s752_s1 + $0x4] sm:$0xf]  ;;  %v485_v57 = vld [vmem:[%s752_s1 + $0x8] sm:$0xf0]  ;;  %v484_v58 = vor.u32 %v554_v55, %v483_v54  ;;  %v475_v59 = vld [vmem:[%s695_s12] sm:$0xf] }
  0x18   : > { %348 = vmatpush.bf16.msra.mxu1 %v322_v36  ;;  %v552_v60 = vld [vmem:[%s695_s12 + $0x4] sm:$0xf0]  ;;  %v488_v61 = vor.u32 %v553_v56, %v485_v57  ;;  %v199_v63 = vld [vmem:[%s753_s2] sm:$0x3] }
  0x19   : > { %v476_v62 = vor.u32 %v552_v60, %v475_v59  ;;  %v384_v2 = vperm.slane %v199_v63, 0  ;;  %v200_v3 = vld [vmem:[%s754_s3] sm:$0x3]  ;;  %v385_v8 = vperm.slane %v199_v63, 1 }
  0x1a   : > { %330 = vmatpush.bf16.msra.mxu0 %v516_v27  ;;  %546 = vmatmul.msk.bf16.vlgmr.msra.gmra.mxu3 %vm314_vm1, %v480_v40  ;;  %v393_v6 = vperm.slane %v200_v3, 0  ;;  %v394_v12 = vperm.slane %v200_v3, 1 }
  0x1b   : > { %358 = vmatpush.bf16.msra.mxu2 %v520_v30  ;;  %545 = vmatmul.msk.bf16.vlgmr.msra.gmra.mxu1 %vm314_vm1, %v480_v40 }
  0x1e   : > { %331 = vmatpush.bf16.msra.mxu0 %v508_v39 }
  0x1f   : > { %359 = vmatpush.bf16.msra.mxu2 %v512_v41 }
  0x22   : > { %332 = vmatpush.bf16.msra.mxu0 %v500_v46 }
  0x23   : > { %360 = vmatpush.bf16.msra.mxu2 %v504_v47 }
  0x26   : > { %333 = vmatpush.bf16.msra.mxu0 %v492_v52 }
  0x27   : > { %361 = vmatpush.bf16.msra.mxu2 %v496_v53 }
  0x2a   : > { %334 = vmatpush.bf16.msra.mxu0 %v484_v58 }
  0x2b   : > { %362 = vmatpush.bf16.msra.mxu2 %v488_v61 }
  0x2d   : > { %335 = vmatmul.bf16.vlgmr.msra.gmra.mxu0 %v476_v62 }
  0x2e   : > { %363 = vmatmul.bf16.vlgmr.msra.gmra.mxu2 %v476_v62 }
  0x98   : > { %v350_v0 = vpop.f32.mrf.mxu1 }
  0x9d   : > { %v378_v7 = vpop.f32.mrf.mxu3 }
  0xa0   : > { %v352_v14 = vpop.f32.mrf.mxu1 }
  0xa5   : > { %v380_v21 = vpop.f32.mrf.mxu3 }
  0xaa   : > { %v336_v1 = vpop.f32.mrf.mxu0 }
  0xab   : > { %v351_v4 = vadd.f32 %v350_v0, %v336_v1 }
  0xad   : > { %v388_v5 = vmul.f32 %v384_v2, %v351_v4 }
  0xaf   : > { %v397_v10 = vadd.f32 %v393_v6, %v388_v5 }
  0xb1   : > { %v364_v9 = vpop.f32.mrf.mxu2  ;;  %v401_v17 = vmax.f32 %v397_v10, 0.0 }
  0xb2   : > { %v379_v11 = vadd.f32 %v378_v7, %v364_v9  ;;  %v338_v13 = vpop.f32.mrf.mxu0 }
  0xb3   : > { %v353_v16 = vadd.f32 %v352_v14, %v338_v13 }
  0xb4   : > { %v389_v15 = vmul.f32 %v385_v8, %v379_v11 }
  0xb5   : > { %v390_v20 = vmul.f32 %v384_v2, %v353_v16 }
  0xb6   : > { %v398_v18 = vadd.f32 %v394_v12, %v389_v15 }
  0xb7   : > { %v399_v25 = vadd.f32 %v393_v6, %v390_v20 }
  0xb8   : > { %v402_v19 = vmax.f32 %v398_v18, 0.0 }
  0xb9   : > { %v366_v22 = vpop.f32.mrf.mxu2  ;;  %v403_v28 = vmax.f32 %v399_v25, 0.0 }
  0xba   : > { %v405_v23 = vpack.c.bf16 %v402_v19, %v401_v17  ;;  %v381_v24 = vadd.f32 %v380_v21, %v366_v22 }
  0xbc   : > { %407 = vst [vmem:[%s197_s22] sm:$0xff] %v405_v23  ;;  %v391_v26 = vmul.f32 %v385_v8, %v381_v24 }
  0xbe   : > { %v400_v27 = vadd.f32 %v394_v12, %v391_v26 }
  0xc0   : > { %v404_v29 = vmax.f32 %v400_v27, 0.0 }
  0xc2   : > { %v406_v30 = vpack.c.bf16 %v404_v29, %v403_v28 }
  0xc4   : > { %408 = vst [vmem:[%s197_s22 + $0x8] sm:$0xff] %v406_v30 }
  0xc5 PF: > { %s14_s15 = sadd.s32 1, %s584_s15  }
  0xc6   : > { %p11_p4 = scmp.ge.s32.totalorder %s14_s15, 4  }
  0xc8   :  { %13 = sbr.rel (!%p11_p4) target bundleno = 1 (0x1), region = 66 }

// kernel: net_forward.9
= control target key start
LH: loop header
LB: loop body
LE: loop exit
PB: predicated region body
PF: predicated region fallthrough
CT: control target
= control target key end

     0   :  { %s1556_s15 = smov 0   ;;  %s1558_s16 = smov 0   ;;  %s2061_s0 = inlined_call_operand.vmem [shape: bf16[2,30,22,67], index: 0, kind: input, shape index: {}]   ;;  %s2062_s1 = inlined_call_operand.vmem [shape: bf16[7,67,256], index: 1, kind: input, shape index: {}]   ;;  %s2063_s2 = inlined_call_operand.vmem [shape: f32[1,256], index: 2, kind: input, shape index: {}]   ;;  %s2064_s3 = inlined_call_operand.vmem [shape: f32[1,256], index: 3, kind: input, shape index: {}]   ;;  %s2065_s4 = inlined_call_operand.vmem [shape: bf16[2,16,256], index: 4, kind: output, shape index: {}]  }
   0x1   :  { %s1560_s17 = smov 0   ;;  %s1562_s18 = smov 0  }
   0x2   :  { %s1564_s19 = smov 0  }
   0x3 LB: > { %s23_s20 = sadd.s32 1, %s1520_s17  ;;  %s26_s21 = sadd.s32 1, %s1524_s18  ;;  %s1528_s19 = sphi %s1564_s19, %s14_s19   ;;  %s1524_s18 = sphi %s1562_s18, %s2069_s18   ;;  %s1520_s17 = sphi %s1560_s17, %s2068_s17   ;;  %s1516_s16 = sphi %s1558_s16, %s2067_s16   ;;  %s1512_s15 = sphi %s1556_s15, %s2066_s15  }
   0x4   : > { %p24_p0 = scmp.ge.s32.totalorder %s23_s20, 30  ;;  %p1084_p1 = scmp.ge.s32.totalorder %s1528_s19, 1 }
   0x5   : > { %p180_p2 = scmp.lt.s32.totalorder %s1528_s19, 61 }
   0x6   : > { %s2071_s20 = smov (%p24_p0, %s23_s20), 0  ;;  %s2073_s21 = smov (!%p24_p0, %s26_s21), %s1524_s18 }
   0x7   : > { %p181_p3 = pnand %p1084_p1, %p180_p2  ;;  %p28_p4 = scmp.ge.s32.totalorder %s2073_s21, 2 }
   0x8   : > { %p210_p5 = scmp.lt.s32.totalorder (!%p181_p3), %s1516_s16, 1  ;;  %p212_p6 = scmp.lt.s32.totalorder (!%p181_p3), %s1512_s15, 29 }
   0x9   : > { %s2075_s21 = smov (%p28_p4, %s2073_s21), 0  ;;  %184 = sbr.rel (%p181_p3) target bundleno = 271 (0x10f), region = 36 }
   0xa   : > { %p1384_p7 = scmp.ne.s32.totalorder (!%p181_p3), %s1512_s15, 0 }
   0xe   : > { %v1100_v0 = vld [vmem:[%s2062_s1 + $0x88] sm:$0x33]  ;;  %vm316_vm0 = vcmask 1040384   ;;  %vm317_vm1 = vcmask 1041408   ;;  %v1530_v2 = vmov 65535   ;;  %s2077_s16 = smov (!%p210_p5, %s1516_s16), 1 }
   0xf   : > { %v292_v1 = vunpack.c.l.b16 %v1100_v0  ;;  %v318_v3 = vsel %vm316_vm0, 4294967295, %v1530_v2  ;;  %v293_v4 = vunpack.c.h.b16 %v1100_v0  ;;  %v242_v5 = vld [vmem:[%s2062_s1 + $0x40] sm:$0x33]  ;;  %v1127_v11 = vld [vmem:[%s2062_s1 + $0x78] sm:$0xf]  ;;  %s213_s14 = scalar_select %p212_p6, %s1512_s15, 29 }
  0x10   : > { %v1596_v6 = vsel %vm317_vm1, %v318_v3, 0  ;;  %v379_v7 = vunpack.c.l.b16 %v242_v5  ;;  %v380_v8 = vunpack.c.h.b16 %v242_v5  ;;  %v1406_v12 = vld [vmem:[%s2062_s1 + $0x7c] sm:$0xf0]  ;;  %v1405_v15 = vld [vmem:[%s2062_s1 + $0x7c] sm:$0xf]  ;;  %s1448_s22 = smul.u32 90, %s2077_s16 }
  0x11   : > { %v302_v9 = vpack.c.b16 %v292_v1, %v292_v1  ;;  %v303_v10 = vpack.c.b16 %v293_v4, %v293_v4  ;;  %v1129_v16 = vld [vmem:[%s2062_s1 + $0x80] sm:$0xf0]  ;;  %v1161_v17 = vld [vmem:[%s2062_s1 + $0x30] sm:$0xf]  ;;  %v1398_v20 = vld [vmem:[%s2062_s1 + $0x34] sm:$0xf0]  ;;  %v1128_v25 = vor.u32 %v1406_v12, %v1127_v11 }
  0x12   : > { %v389_v13 = vpack.c.b16 %v379_v7, %v379_v7  ;;  %v390_v14 = vpack.c.b16 %v380_v8, %v380_v8  ;;  %v1397_v21 = vld [vmem:[%s2062_s1 + $0x34] sm:$0xf]  ;;  %v1163_v22 = vld [vmem:[%s2062_s1 + $0x38] sm:$0xf0]  ;;  %v1132_v26 = vor.u32 %v1405_v15, %v1129_v16  ;;  %v1119_v27 = vld [vmem:[%s2062_s1 + $0x68] sm:$0xf]  ;;  %v1162_v29 = vor.u32 %v1398_v20, %v1161_v17 }
  0x13   : > { %v321_v18 = vand.u32 %v1596_v6, %v302_v9  ;;  %v324_v19 = vand.u32 %v1596_v6, %v303_v10  ;;  %v1404_v28 = vld [vmem:[%s2062_s1 + $0x6c] sm:$0xf0]  ;;  %v1166_v30 = vor.u32 %v1397_v21, %v1163_v22  ;;  %v1403_v31 = vld [vmem:[%s2062_s1 + $0x6c] sm:$0xf]  ;;  %v1121_v32 = vld [vmem:[%s2062_s1 + $0x70] sm:$0xf0] }
  0x14   : > { %v402_v23 = vand.u32 %v389_v13, %v1596_v6  ;;  %v405_v24 = vand.u32 %v390_v14, %v1596_v6  ;;  %v1153_v33 = vld [vmem:[%s2062_s1 + $0x20] sm:$0xf]  ;;  %v1396_v34 = vld [vmem:[%s2062_s1 + $0x24] sm:$0xf0]  ;;  %v1395_v35 = vld [vmem:[%s2062_s1 + $0x24] sm:$0xf]  ;;  %v1120_v39 = vor.u32 %v1404_v28, %v1119_v27  ;;  %v1124_v40 = vor.u32 %v1403_v31, %v1121_v32 }
  0x15   : > { %329 = vmatpush.bf16.msra.mxu0 %v321_v18  ;;  %343 = vmatpush.bf16.msra.mxu1 %v324_v19  ;;  %v1155_v36 = vld [vmem:[%s2062_s1 + $0x28] sm:$0xf0]  ;;  %v1111_v37 = vld [vmem:[%s2062_s1 + $0x58] sm:$0xf]  ;;  %v1402_v38 = vld [vmem:[%s2062_s1 + $0x5c] sm:$0xf0]  ;;  %v1154_v44 = vor.u32 %v1396_v34, %v1153_v33 }
  0x16   : > { %410 = vmatpush.bf16.msra.mxu2 %v402_v23  ;;  %424 = vmatpush.bf16.msra.mxu3 %v405_v24  ;;  %v1401_v41 = vld [vmem:[%s2062_s1 + $0x5c] sm:$0xf]  ;;  %v1113_v42 = vld [vmem:[%s2062_s1 + $0x60] sm:$0xf0]  ;;  %v1145_v43 = vld [vmem:[%s2062_s1 + $0x10] sm:$0xf]  ;;  %v1158_v45 = vor.u32 %v1395_v35, %v1155_v36  ;;  %v1112_v55 = vor.u32 %v1402_v38, %v1111_v37 }
  0x17   : > { %v1394_v46 = vld [vmem:[%s2062_s1 + $0x14] sm:$0xf0]  ;;  %v1393_v47 = vld [vmem:[%s2062_s1 + $0x14] sm:$0xf]  ;;  %v1147_v49 = vld [vmem:[%s2062_s1 + $0x18] sm:$0xf0]  ;;  %v1116_v56 = vor.u32 %v1401_v41, %v1113_v42 }
  0x18   : > { %v1177_v48 = vld [vmem:[%s2062_s1 + $0xd0] sm:$0x33]  ;;  %v1220_v52 = vld [vmem:[%s2062_s1 + $0x118] sm:$0x33]  ;;  %s1389_s23 = sshll.u32 %s2077_s16, 4  ;;  %s1447_s28 = smul.u32 3, %s213_s14  ;;  %v1146_v59 = vor.u32 %v1394_v46, %v1145_v43  ;;  %v1150_v60 = vor.u32 %v1393_v47, %v1147_v49 }
  0x19   : > { %330 = vmatpush.bf16.msra.mxu0 %v1128_v25  ;;  %344 = vmatpush.bf16.msra.mxu1 %v1132_v26  ;;  %v476_v50 = vunpack.c.l.b16 %v1177_v48  ;;  %v477_v51 = vunpack.c.h.b16 %v1177_v48  ;;  %v582_v53 = vunpack.c.l.b16 %v1220_v52  ;;  %v583_v54 = vunpack.c.h.b16 %v1220_v52  ;;  %v1103_v57 = vld [vmem:[%s2062_s1 + $0x48] sm:$0xf]  ;;  %v1400_v58 = vld [vmem:[%s2062_s1 + $0x4c] sm:$0xf0]  ;;  %s1701_s5 = scalar_lea.vmem %s2065_s4, %s1389_s23  ;;  %v1399_v61 = vld [vmem:[%s2062_s1 + $0x4c] sm:$0xf] }
  0x1a   : > { %411 = vmatpush.bf16.msra.mxu2 %v1162_v29  ;;  %425 = vmatpush.bf16.msra.mxu3 %v1166_v30  ;;  %v1105_v62 = vld [vmem:[%s2062_s1 + $0x50] sm:$0xf0]  ;;  %v1137_v63 = vld [vmem:[%s2062_s1] sm:$0xf]  ;;  %v1392_v0 = vld [vmem:[%s2062_s1 + $0x4] sm:$0xf0]  ;;  %s216_s25 = sadd.s32 %s1448_s22, %s1447_s28  ;;  %v1104_v8 = vor.u32 %v1400_v58, %v1103_v57 }
  0x1b   : > { %v1391_v1 = vld [vmem:[%s2062_s1 + $0x4] sm:$0xf]  ;;  %v1139_v2 = vld [vmem:[%s2062_s1 + $0x8] sm:$0xf0]  ;;  %v486_v3 = vpack.c.b16 %v476_v50, %v476_v50  ;;  %v487_v4 = vpack.c.b16 %v477_v51, %v477_v51  ;;  %v592_v5 = vpack.c.b16 %v582_v53, %v582_v53  ;;  %v593_v7 = vpack.c.b16 %v583_v54, %v583_v54  ;;  %s1085_s26 = sshll.u32 %s216_s25, 2 }
  0x1c   : > { %v1108_v9 = vor.u32 %v1399_v61, %v1105_v62  ;;  %s218_s30 = scalar_lea.vmem %s2061_s0, %s1085_s26  ;;  %v1138_v10 = vor.u32 %v1392_v0, %v1137_v63  ;;  %v1142_v11 = vor.u32 %v1391_v1, %v1139_v2  ;;  %v1204_v17 = vld [vmem:[%s2062_s1 + $0xc0] sm:$0xf]  ;;  %v1414_v18 = vld [vmem:[%s2062_s1 + $0xc4] sm:$0xf0]  ;;  %v1413_v23 = vld [vmem:[%s2062_s1 + $0xc4] sm:$0xf] }
  0x1d   : > { %331 = vmatpush.bf16.msra.mxu0 %v1120_v39  ;;  %345 = vmatpush.bf16.msra.mxu1 %v1124_v40  ;;  %v1724_v12 = vld [vmem:[%s218_s30] sm:$0xff]  ;;  %v229_v13 = vld [vmem:[%s218_s30 + $0x8] sm:$0x7]  ;;  %v500_v14 = vand.u32 %v486_v3, %v1596_v6  ;;  %v503_v15 = vand.u32 %v487_v4, %v1596_v6  ;;  %v606_v19 = vand.u32 %v592_v5, %v1596_v6  ;;  %v1206_v24 = vld [vmem:[%s2062_s1 + $0xc8] sm:$0xf0]  ;;  %vm312_vm2 = vcmask 547840  }
  0x1e   : > { %412 = vmatpush.bf16.msra.mxu2 %v1154_v44  ;;  %426 = vmatpush.bf16.msra.mxu3 %v1158_v45  ;;  %v232_v16 = vunpack.c.l.bf16 %v229_v13  ;;  %v609_v20 = vand.u32 %v593_v7, %v1596_v6  ;;  %v1737_v21 = vshrl.u32 %v1724_v12, 16  ;;  %v1740_v22 = vshll.u32 %v1724_v12, 16  ;;  %v1247_v26 = vld [vmem:[%s2062_s1 + $0x108] sm:$0xf]  ;;  %v1422_v27 = vld [vmem:[%s2062_s1 + $0x10c] sm:$0xf0] }
  0x1f   : > { %v1421_v29 = vld [vmem:[%s2062_s1 + $0x10c] sm:$0xf]  ;;  %v1249_v30 = vld [vmem:[%s2062_s1 + $0x110] sm:$0xf0]  ;;  %vm254_vm3 = vsmask.f32 7424  ;;  %v1205_v32 = vor.u32 %v1414_v18, %v1204_v17  ;;  %v1209_v33 = vor.u32 %v1413_v23, %v1206_v24  ;;  %v1248_v40 = vor.u32 %v1422_v27, %v1247_v26 }
  0x20   : > { %v1748_v25 = vpack.c.bf16 %v232_v16, %v232_v16  ;;  %v260_v28 = vrot.slane %v1740_v22, 1  ;;  %v1196_v34 = vld [vmem:[%s2062_s1 + $0xb0] sm:$0xf]  ;;  %v1412_v36 = vld [vmem:[%s2062_s1 + $0xb4] sm:$0xf0]  ;;  %v1252_v41 = vor.u32 %v1421_v29, %v1249_v30  ;;  %v548_v16 = vrot.slane %v1737_v21, 1 }
  0x21   : > { %332 = vmatpush.bf16.msra.mxu0 %v1112_v55  ;;  %346 = vmatpush.bf16.msra.mxu1 %v1116_v56  ;;  %v1411_v37 = vld [vmem:[%s2062_s1 + $0xb4] sm:$0xf]  ;;  %v1198_v38 = vld [vmem:[%s2062_s1 + $0xb8] sm:$0xf0]  ;;  %v1239_v42 = vld [vmem:[%s2062_s1 + $0xf8] sm:$0xf]  ;;  %v1197_v48 = vor.u32 %v1412_v36, %v1196_v34 }
  0x22   : > { %413 = vmatpush.bf16.msra.mxu2 %v1146_v59  ;;  %427 = vmatpush.bf16.msra.mxu3 %v1150_v60  ;;  %v1764_v31 = vshll.u32 %v1748_v25, 16  ;;  %v261_v35 = vor.u32 %v260_v28, %v1737_v21  ;;  %v1420_v43 = vld [vmem:[%s2062_s1 + $0xfc] sm:$0xf0]  ;;  %v1419_v44 = vld [vmem:[%s2062_s1 + $0xfc] sm:$0xf]  ;;  %v1201_v49 = vor.u32 %v1411_v37, %v1198_v38  ;;  %v551_v1 = vshrl.u32 %v1748_v25, 16 }
  0x23   : > { %v1241_v45 = vld [vmem:[%s2062_s1 + $0x100] sm:$0xf0]  ;;  %v1188_v50 = vld [vmem:[%s2062_s1 + $0xa0] sm:$0xf]  ;;  %v1306_v51 = vld [vmem:[%s2062_s1 + $0x1a8] sm:$0x33]  ;;  %v1240_v57 = vor.u32 %v1420_v43, %v1239_v42 }
  0x24   : > { %v265_v39 = vrot.slane %v1764_v31, 1  ;;  %v1263_v46 = vld [vmem:[%s2062_s1 + $0x160] sm:$0x33]  ;;  %v1410_v52 = vld [vmem:[%s2062_s1 + $0xa4] sm:$0xf0]  ;;  %v1244_v58 = vor.u32 %v1419_v44, %v1241_v45  ;;  %v786_v63 = vunpack.c.l.b16 %v1306_v51  ;;  %v787_v0 = vunpack.c.h.b16 %v1306_v51 }
  0x25   : > { %333 = vmatpush.bf16.msra.mxu0 %v1104_v8  ;;  %347 = vmatpush.bf16.msra.mxu1 %v1108_v9  ;;  %v1409_v53 = vld [vmem:[%s2062_s1 + $0xa4] sm:$0xf]  ;;  %v1190_v54 = vld [vmem:[%s2062_s1 + $0xa8] sm:$0xf0]  ;;  %v682_v55 = vunpack.c.l.b16 %v1263_v46  ;;  %v683_v56 = vunpack.c.h.b16 %v1263_v46  ;;  %v1231_v59 = vld [vmem:[%s2062_s1 + $0xe8] sm:$0xf]  ;;  %v1189_v2 = vor.u32 %v1410_v52, %v1188_v50 }
  0x26   : > { %414 = vmatpush.bf16.msra.mxu2 %v1138_v10  ;;  %428 = vmatpush.bf16.msra.mxu3 %v1142_v11  ;;  %v266_v47 = vsel %vm254_vm3, %v261_v35, %v265_v39  ;;  %v1418_v60 = vld [vmem:[%s2062_s1 + $0xec] sm:$0xf0]  ;;  %v1417_v61 = vld [vmem:[%s2062_s1 + $0xec] sm:$0xf]  ;;  %v1233_v62 = vld [vmem:[%s2062_s1 + $0xf0] sm:$0xf0]  ;;  %v1193_v3 = vor.u32 %v1409_v53, %v1190_v54  ;;  %v797_v23 = vpack.c.b16 %v787_v0, %v787_v0 }
  0x27   : > { %v1180_v4 = vld [vmem:[%s2062_s1 + $0x90] sm:$0xf]  ;;  %v1408_v5 = vld [vmem:[%s2062_s1 + $0x94] sm:$0xf0]  ;;  %v1407_v7 = vld [vmem:[%s2062_s1 + $0x94] sm:$0xf]  ;;  %v692_v9 = vpack.c.b16 %v682_v55, %v682_v55  ;;  %v693_v10 = vpack.c.b16 %v683_v56, %v683_v56  ;;  %v1232_v11 = vor.u32 %v1418_v60, %v1231_v59  ;;  %v1236_v13 = vor.u32 %v1417_v61, %v1233_v62 }
  0x28   : > { %1133 = vmatmul.msk.bf16.vlgmr.msra.gmra.mxu0 %vm312_vm2, %v266_v47  ;;  %1134 = vmatmul.msk.bf16.vlgmr.msra.gmra.mxu1 %vm312_vm2, %v266_v47  ;;  %v1182_v8 = vld [vmem:[%s2062_s1 + $0x98] sm:$0xf0]  ;;  %v549_v17 = vrot.slane %v1740_v22, 2  ;;  %v553_v24 = vrot.slane %v551_v1, 1  ;;  %v554_v26 = vrot.slane %v1764_v31, 2  ;;  %v1181_v27 = vor.u32 %v1408_v5, %v1180_v4 }
  0x29   : > { %508 = vmatpush.bf16.msrb.mxu0 %v500_v14  ;;  %522 = vmatpush.bf16.msrb.mxu1 %v503_v15  ;;  %v1223_v14 = vld [vmem:[%s2062_s1 + $0xd8] sm:$0xf]  ;;  %v1416_v15 = vld [vmem:[%s2062_s1 + $0xdc] sm:$0xf0]  ;;  %v1415_v18 = vld [vmem:[%s2062_s1 + $0xdc] sm:$0xf]  ;;  %v1185_v28 = vor.u32 %v1407_v7, %v1182_v8  ;;  %v706_v29 = vand.u32 %v692_v9, %v1596_v6  ;;  %v709_v30 = vand.u32 %v693_v10, %v1596_v6 }
  0x2a   : > { %614 = vmatpush.bf16.msrb.mxu2 %v606_v19  ;;  %628 = vmatpush.bf16.msrb.mxu3 %v609_v20  ;;  %v1225_v19 = vld [vmem:[%s2062_s1 + $0xe0] sm:$0xf0]  ;;  %v796_v20 = vpack.c.b16 %v786_v63, %v786_v63  ;;  %vm447_vm4 = vcmask 1046528   ;;  %v449_v35 = vrot.slane %v1748_v25, 1  ;;  %vm547_vm5 = vsmask.f32 6400 }
  0x2b   : > { %1167 = vmatmul.msk.bf16.vlgmr.msra.gmra.mxu2 %vm312_vm2, %v1724_v12  ;;  %1168 = vmatmul.msk.bf16.vlgmr.msra.gmra.mxu3 %vm312_vm2, %v1724_v12  ;;  %v1228_v34 = vor.u32 %v1415_v18, %v1225_v19  ;;  %v813_v37 = vand.u32 %v797_v23, %v1596_v6  ;;  %v550_v38 = vor.u32 %v549_v17, %v548_v16  ;;  %v1429_v42 = vld [vmem:[%s2062_s1 + $0x154] sm:$0xf]  ;;  %v1292_v43 = vld [vmem:[%s2062_s1 + $0x158] sm:$0xf0]  ;;  %v1333_v44 = vld [vmem:[%s2062_s1 + $0x198] sm:$0xf] }
  0x2c   : > { %v810_v36 = vand.u32 %v796_v20, %v1596_v6  ;;  %v555_v39 = vor.u32 %v554_v26, %v553_v24  ;;  %v1438_v45 = vld [vmem:[%s2062_s1 + $0x19c] sm:$0xf0]  ;;  %v1437_v46 = vld [vmem:[%s2062_s1 + $0x19c] sm:$0xf]  ;;  %v1335_v47 = vld [vmem:[%s2062_s1 + $0x1a0] sm:$0xf0]  ;;  %v1295_v51 = vor.u32 %v1429_v42, %v1292_v43 }
  0x2d   : > { %509 = vmatpush.bf16.msrb.mxu0 %v1205_v32  ;;  %523 = vmatpush.bf16.msrb.mxu1 %v1209_v33  ;;  %v448_v32 = vrot.slane %v1724_v12, 1  ;;  %v1224_v33 = vor.u32 %v1416_v15, %v1223_v14  ;;  %v1282_v52 = vld [vmem:[%s2062_s1 + $0x140] sm:$0xf]  ;;  %v1428_v53 = vld [vmem:[%s2062_s1 + $0x144] sm:$0xf0]  ;;  %v1334_v54 = vor.u32 %v1438_v45, %v1333_v44  ;;  %v1338_v55 = vor.u32 %v1437_v46, %v1335_v47 }
  0x2e   : > { %615 = vmatpush.bf16.msrb.mxu2 %v1248_v40  ;;  %629 = vmatpush.bf16.msrb.mxu3 %v1252_v41  ;;  %v1290_v40 = vld [vmem:[%s2062_s1 + $0x150] sm:$0xf]  ;;  %v1430_v41 = vld [vmem:[%s2062_s1 + $0x154] sm:$0xf0]  ;;  %v1427_v56 = vld [vmem:[%s2062_s1 + $0x144] sm:$0xf] }
  0x2f   : > { %v1291_v50 = vor.u32 %v1430_v41, %v1290_v40  ;;  %v1436_v59 = vld [vmem:[%s2062_s1 + $0x18c] sm:$0xf0]  ;;  %v1435_v60 = vld [vmem:[%s2062_s1 + $0x18c] sm:$0xf]  ;;  %v1327_v61 = vld [vmem:[%s2062_s1 + $0x190] sm:$0xf0] }
  0x30   : > { %v1274_v62 = vld [vmem:[%s2062_s1 + $0x130] sm:$0xf]  ;;  %v1426_v63 = vld [vmem:[%s2062_s1 + $0x134] sm:$0xf0]  ;;  %v1425_v4 = vld [vmem:[%s2062_s1 + $0x134] sm:$0xf]  ;;  %v1330_v9 = vor.u32 %v1435_v60, %v1327_v61 }
  0x31   : > { %510 = vmatpush.bf16.msrb.mxu0 %v1197_v48  ;;  %524 = vmatpush.bf16.msrb.mxu1 %v1201_v49  ;;  %v450_v48 = vsel %vm447_vm4, %v448_v32, %v449_v35  ;;  %v556_v49 = vsel %vm547_vm5, %v550_v38, %v555_v39  ;;  %v1349_v0 = vld [vmem:[%s2062_s1 + $0x1f0] sm:$0x33]  ;;  %v1276_v5 = vld [vmem:[%s2062_s1 + $0x138] sm:$0xf0]  ;;  %v1317_v7 = vld [vmem:[%s2062_s1 + $0x178] sm:$0xf]  ;;  %v1275_v16 = vor.u32 %v1426_v63, %v1274_v62 }
  0x32   : > { %616 = vmatpush.bf16.msrb.mxu2 %v1240_v57  ;;  %630 = vmatpush.bf16.msrb.mxu3 %v1244_v58  ;;  %v1284_v57 = vld [vmem:[%s2062_s1 + $0x148] sm:$0xf0]  ;;  %v1325_v58 = vld [vmem:[%s2062_s1 + $0x188] sm:$0xf]  ;;  %v1434_v10 = vld [vmem:[%s2062_s1 + $0x17c] sm:$0xf0]  ;;  %v886_v14 = vunpack.c.l.b16 %v1349_v0  ;;  %v887_v15 = vunpack.c.h.b16 %v1349_v0  ;;  %v1279_v19 = vor.u32 %v1425_v4, %v1276_v5 }
  0x33   : > { %v1326_v8 = vor.u32 %v1436_v59, %v1325_v58  ;;  %v1266_v17 = vld [vmem:[%s2062_s1 + $0x120] sm:$0xf]  ;;  %v1424_v18 = vld [vmem:[%s2062_s1 + $0x124] sm:$0xf0]  ;;  %v1318_v20 = vor.u32 %v1434_v10, %v1317_v7  ;;  %v1423_v24 = vld [vmem:[%s2062_s1 + $0x124] sm:$0xf] }
  0x34   : > { %v1268_v26 = vld [vmem:[%s2062_s1 + $0x128] sm:$0xf0]  ;;  %v757_v32 = vrot.slane %v551_v1, 2  ;;  %v1311_v35 = vld [vmem:[%s2062_s1 + $0x170] sm:$0xf0]  ;;  %v1267_v38 = vor.u32 %v1424_v18, %v1266_v17  ;;  %v654_v39 = vrot.slane %v1724_v12, 2 }
  0x35   : > { %511 = vmatpush.bf16.msrb.mxu0 %v1189_v2  ;;  %525 = vmatpush.bf16.msrb.mxu1 %v1193_v3  ;;  %v1283_v2 = vor.u32 %v1428_v53, %v1282_v52  ;;  %v1287_v3 = vor.u32 %v1427_v56, %v1284_v57  ;;  %v655_v1 = vrot.slane %v1748_v25, 2  ;;  %vm653_vm6 = vcmask 1045504   ;;  %v1376_v44 = vld [vmem:[%s2062_s1 + $0x1e0] sm:$0xf]  ;;  %v1446_v45 = vld [vmem:[%s2062_s1 + $0x1e4] sm:$0xf0] }
  0x36   : > { %617 = vmatpush.bf16.msrb.mxu2 %v1232_v11  ;;  %631 = vmatpush.bf16.msrb.mxu3 %v1236_v13  ;;  %v1433_v11 = vld [vmem:[%s2062_s1 + $0x17c] sm:$0xf]  ;;  %v1319_v13 = vld [vmem:[%s2062_s1 + $0x180] sm:$0xf0]  ;;  %vm753_vm7 = vsmask.f32 5376 }
  0x37   : > { %v1322_v23 = vor.u32 %v1433_v11, %v1319_v13  ;;  %v1445_v46 = vld [vmem:[%s2062_s1 + $0x1e4] sm:$0xf]  ;;  %v1378_v47 = vld [vmem:[%s2062_s1 + $0x1e8] sm:$0xf0]  ;;  %v1444_v52 = vld [vmem:[%s2062_s1 + $0x1d4] sm:$0xf0] }
  0x38   : > { %v1443_v53 = vld [vmem:[%s2062_s1 + $0x1d4] sm:$0xf]  ;;  %v1360_v57 = vld [vmem:[%s2062_s1 + $0x1c0] sm:$0xf]  ;;  %v1442_v58 = vld [vmem:[%s2062_s1 + $0x1c4] sm:$0xf0] }
  0x39   : > { %512 = vmatpush.bf16.msrb.mxu0 %v1181_v27  ;;  %526 = vmatpush.bf16.msrb.mxu1 %v1185_v28  ;;  %v1309_v27 = vld [vmem:[%s2062_s1 + $0x168] sm:$0xf]  ;;  %v1432_v28 = vld [vmem:[%s2062_s1 + $0x16c] sm:$0xf0]  ;;  %v1441_v59 = vld [vmem:[%s2062_s1 + $0x1c4] sm:$0xf]  ;;  %v1361_v61 = vor.u32 %v1442_v58, %v1360_v57 }
  0x3a   : > { %618 = vmatpush.bf16.msrb.mxu2 %v1224_v33  ;;  %632 = vmatpush.bf16.msrb.mxu3 %v1228_v34  ;;  %v758_v33 = vrot.slane %v1764_v31, 3  ;;  %v1431_v34 = vld [vmem:[%s2062_s1 + $0x16c] sm:$0xf]  ;;  %v1352_v63 = vld [vmem:[%s2062_s1 + $0x1b0] sm:$0xf]  ;;  %v858_v7 = vrot.slane %v1724_v12, 3 }
  0x3b   : > { %v1314_v31 = vor.u32 %v1431_v34, %v1311_v35  ;;  %v1362_v60 = vld [vmem:[%s2062_s1 + $0x1c8] sm:$0xf0]  ;;  %v1440_v0 = vld [vmem:[%s2062_s1 + $0x1b4] sm:$0xf0]  ;;  %vm857_vm8 = vcmask 1044480  }
  0x3c   : > { %1210 = vmatmul.msk.bf16.vlgmr.msrb.gmra.mxu0 %vm312_vm2, %v450_v48  ;;  %1211 = vmatmul.msk.bf16.vlgmr.msrb.gmra.mxu1 %vm312_vm2, %v450_v48  ;;  %v759_v41 = vor.u32 %v758_v33, %v757_v32  ;;  %v1365_v62 = vor.u32 %v1441_v59, %v1362_v60  ;;  %v1353_v4 = vor.u32 %v1440_v0, %v1352_v63 }
  0x3d   : > { %714 = vmatpush.bf16.msra.mxu0 %v706_v29  ;;  %728 = vmatpush.bf16.msra.mxu1 %v709_v30  ;;  %v754_v29 = vrot.slane %v1737_v21, 2  ;;  %v755_v30 = vrot.slane %v1740_v22, 3  ;;  %v1271_v21 = vor.u32 %v1423_v24, %v1268_v26  ;;  %v1310_v22 = vor.u32 %v1432_v28, %v1309_v27 }
  0x3e   : > { %818 = vmatpush.bf16.msra.mxu2 %v810_v36  ;;  %832 = vmatpush.bf16.msra.mxu3 %v813_v37  ;;  %v896_v36 = vpack.c.b16 %v886_v14, %v886_v14  ;;  %v897_v37 = vpack.c.b16 %v887_v15, %v887_v15 }
  0x3f   : > { %1253 = vmatmul.msk.bf16.vlgmr.msrb.gmra.mxu2 %vm312_vm2, %v556_v49  ;;  %1254 = vmatmul.msk.bf16.vlgmr.msrb.gmra.mxu3 %vm312_vm2, %v556_v49  ;;  %v756_v40 = vor.u32 %v755_v30, %v754_v29  ;;  %v1377_v49 = vor.u32 %v1446_v45, %v1376_v44 }
  0x40   : > { %v910_v42 = vand.u32 %v896_v36, %v1596_v6  ;;  %v913_v43 = vand.u32 %v897_v37, %v1596_v6  ;;  %v656_v6 = vsel %vm653_vm6, %v654_v39, %v655_v1  ;;  %v225_v39 = vld [vmem:[%s2063_s2] sm:$0x3] }
  0x41   : > { %715 = vmatpush.bf16.msra.mxu0 %v1291_v50  ;;  %729 = vmatpush.bf16.msra.mxu1 %v1295_v51  ;;  %v760_v48 = vsel %vm753_vm7, %v756_v40, %v759_v41  ;;  %v1381_v50 = vor.u32 %v1445_v46, %v1378_v47  ;;  %v1368_v51 = vld [vmem:[%s2062_s1 + $0x1d0] sm:$0xf]  ;;  %v226_v40 = vld [vmem:[%s2064_s3] sm:$0x3]  ;;  %v948_v45 = vperm.slane %v225_v39, 0  ;;  %v949_v46 = vperm.slane %v225_v39, 1 }
  0x42   : > { %819 = vmatpush.bf16.msra.mxu2 %v1334_v54  ;;  %833 = vmatpush.bf16.msra.mxu3 %v1338_v55  ;;  %v1370_v54 = vld [vmem:[%s2062_s1 + $0x1d8] sm:$0xf0]  ;;  %v1369_v55 = vor.u32 %v1444_v52, %v1368_v51 }
  0x43   : > { %v1373_v56 = vor.u32 %v1443_v53, %v1370_v54 }
  0x45   : > { %716 = vmatpush.bf16.msra.mxu0 %v1283_v2  ;;  %730 = vmatpush.bf16.msra.mxu1 %v1287_v3  ;;  %v1439_v2 = vld [vmem:[%s2062_s1 + $0x1b4] sm:$0xf]  ;;  %v1354_v3 = vld [vmem:[%s2062_s1 + $0x1b8] sm:$0xf0] }
  0x46   : > { %820 = vmatpush.bf16.msra.mxu2 %v1326_v8  ;;  %834 = vmatpush.bf16.msra.mxu3 %v1330_v9  ;;  %v1357_v5 = vor.u32 %v1439_v2, %v1354_v3  ;;  %v859_v8 = vrot.slane %v1748_v25, 3 }
  0x48   : > { %v860_v9 = vsel %vm857_vm8, %v858_v7, %v859_v8 }
  0x49   : > { %717 = vmatpush.bf16.msra.mxu0 %v1275_v16  ;;  %731 = vmatpush.bf16.msra.mxu1 %v1279_v19 }
  0x4a   : > { %821 = vmatpush.bf16.msra.mxu2 %v1318_v20  ;;  %835 = vmatpush.bf16.msra.mxu3 %v1322_v23 }
  0x4d   : > { %718 = vmatpush.bf16.msra.mxu0 %v1267_v38  ;;  %732 = vmatpush.bf16.msra.mxu1 %v1271_v21 }
  0x4e   : > { %822 = vmatpush.bf16.msra.mxu2 %v1310_v22  ;;  %836 = vmatpush.bf16.msra.mxu3 %v1314_v31 }
  0x50   : > { %1296 = vmatmul.msk.bf16.vlgmr.msra.gmra.mxu0 %vm312_vm2, %v656_v6  ;;  %1297 = vmatmul.msk.bf16.vlgmr.msra.gmra.mxu1 %vm312_vm2, %v656_v6  ;;  %v957_v6 = vperm.slane %v226_v40, 0 }
  0x51   : > { %918 = vmatpush.bf16.msrb.mxu0 %v910_v42  ;;  %932 = vmatpush.bf16.msrb.mxu1 %v913_v43 }
  0x52   : > { %1339 = vmatmul.msk.bf16.vlgmr.msra.gmra.mxu2 %vm312_vm2, %v760_v48  ;;  %1340 = vmatmul.msk.bf16.vlgmr.msra.gmra.mxu3 %vm312_vm2, %v760_v48 }
  0x55   : > { %919 = vmatpush.bf16.msrb.mxu0 %v1377_v49  ;;  %933 = vmatpush.bf16.msrb.mxu1 %v1381_v50  ;;  %v958_v49 = vperm.slane %v226_v40, 1 }
  0x59   : > { %920 = vmatpush.bf16.msrb.mxu0 %v1369_v55  ;;  %934 = vmatpush.bf16.msrb.mxu1 %v1373_v56 }
  0x5d   : > { %921 = vmatpush.bf16.msrb.mxu0 %v1361_v61  ;;  %935 = vmatpush.bf16.msrb.mxu1 %v1365_v62 }
  0x61   : > { %922 = vmatpush.bf16.msrb.mxu0 %v1353_v4  ;;  %936 = vmatpush.bf16.msrb.mxu1 %v1357_v5 }
  0x64   : > { %1382 = vmatmul.msk.bf16.vlgmr.msrb.gmra.mxu0 %vm312_vm2, %v860_v9  ;;  %1383 = vmatmul.msk.bf16.vlgmr.msrb.gmra.mxu1 %vm312_vm2, %v860_v9 }
  0xa5   : > { %v335_v10 = vpop.f32.mrf.mxu0  ;;  %v349_v11 = vpop.f32.mrf.mxu1 }
  0xad   : > { %v337_v15 = vpop.f32.mrf.mxu0  ;;  %v351_v16 = vpop.f32.mrf.mxu1 }
  0xae   : > { %v416_v13 = vpop.f32.mrf.mxu2  ;;  %v430_v14 = vpop.f32.mrf.mxu3 }
  0xaf   : > { %v417_v33 = vadd.f32 %v416_v13, %v335_v10  ;;  %v431_v34 = vadd.f32 %v430_v14, %v349_v11 }
  0xb6   : > { %v418_v17 = vpop.f32.mrf.mxu2  ;;  %v432_v18 = vpop.f32.mrf.mxu3 }
  0xb7   : > { %v419_v41 = vadd.f32 %v418_v17, %v337_v15  ;;  %v433_v42 = vadd.f32 %v432_v18, %v351_v16 }
  0xb9   : > { %v514_v19 = vpop.f32.mrf.mxu0  ;;  %v528_v12 = vpop.f32.mrf.mxu1 }
  0xba   : > { %v533_v35 = vadd.f32 %v514_v19, %v417_v33  ;;  %v534_v36 = vadd.f32 %v528_v12, %v431_v34 }
  0xc1   : > { %v516_v20 = vpop.f32.mrf.mxu0  ;;  %v530_v25 = vpop.f32.mrf.mxu1 }
  0xc2   : > { %v620_v23 = vpop.f32.mrf.mxu2  ;;  %v634_v24 = vpop.f32.mrf.mxu3  ;;  %v535_v50 = vadd.f32 %v516_v20, %v419_v41  ;;  %v536_v51 = vadd.f32 %v530_v25, %v433_v42 }
  0xc3   : > { %v639_v21 = vadd.f32 %v620_v23, %v533_v35  ;;  %v640_v22 = vadd.f32 %v634_v24, %v534_v36 }
  0xca   : > { %v622_v28 = vpop.f32.mrf.mxu2  ;;  %v636_v29 = vpop.f32.mrf.mxu3 }
  0xcb   : > { %v641_v54 = vadd.f32 %v622_v28, %v535_v50  ;;  %v642_v55 = vadd.f32 %v636_v29, %v536_v51 }
  0xcd   : > { %v720_v26 = vpop.f32.mrf.mxu0  ;;  %v734_v27 = vpop.f32.mrf.mxu1 }
  0xce   : > { %v739_v1 = vadd.f32 %v720_v26, %v639_v21  ;;  %v740_v31 = vadd.f32 %v734_v27, %v640_v22 }
  0xd5   : > { %v722_v30 = vpop.f32.mrf.mxu0  ;;  %v736_v32 = vpop.f32.mrf.mxu1 }
  0xd6   : > { %v824_v37 = vpop.f32.mrf.mxu2  ;;  %v838_v38 = vpop.f32.mrf.mxu3  ;;  %v741_v60 = vadd.f32 %v722_v30, %v641_v54  ;;  %v742_v61 = vadd.f32 %v736_v32, %v642_v55 }
  0xd7   : > { %v843_v43 = vadd.f32 %v824_v37, %v739_v1  ;;  %v844_v44 = vadd.f32 %v838_v38, %v740_v31 }
  0xde   : > { %v826_v58 = vpop.f32.mrf.mxu2  ;;  %v840_v59 = vpop.f32.mrf.mxu3 }
  0xdf   : > { %v845_v0 = vadd.f32 %v826_v58, %v741_v60  ;;  %v846_v2 = vadd.f32 %v840_v59, %v742_v61 }
  0xe1   : > { %v924_v47 = vpop.f32.mrf.mxu0  ;;  %v938_v48 = vpop.f32.mrf.mxu1 }
  0xe2   : > { %v943_v52 = vadd.f32 %v924_v47, %v843_v43  ;;  %v944_v53 = vadd.f32 %v938_v48, %v844_v44 }
  0xe4   : > { %v952_v56 = vmul.f32 %v948_v45, %v943_v52  ;;  %v953_v57 = vmul.f32 %v949_v46, %v944_v53 }
  0xe6   : > { %v961_v62 = vadd.f32 %v957_v6, %v952_v56  ;;  %v962_v63 = vadd.f32 %v958_v49, %v953_v57 }
  0xe8   : > { %v965_v3 = vmax.f32 %v961_v62, 0.0  ;;  %v966_v4 = vmax.f32 %v962_v63, 0.0 }
  0xe9   : > { %v926_v5 = vpop.f32.mrf.mxu0  ;;  %v940_v7 = vpop.f32.mrf.mxu1 }
  0xea   : > { %v945_v8 = vadd.f32 %v926_v5, %v845_v0  ;;  %v946_v9 = vadd.f32 %v940_v7, %v846_v2 }
  0xec   : > { %v954_v10 = vmul.f32 %v948_v45, %v945_v8  ;;  %v955_v11 = vmul.f32 %v949_v46, %v946_v9  ;;  %972 = sbr.rel (%p1384_p7) target bundleno = 245 (0xf5), region = 40 }
  0xee   : > { %v963_v13 = vadd.f32 %v957_v6, %v954_v10  ;;  %v964_v14 = vadd.f32 %v958_v49, %v955_v11 }
  0xf0   : > { %v967_v15 = vmax.f32 %v963_v13, 0.0  ;;  %v968_v16 = vmax.f32 %v964_v14, 0.0 }
  0xf1   : > { %973 = vst [vmem:[#allocation2 + $0x10] sm:$0xff] %v965_v3 }
  0xf2   : > { %974 = vst [vmem:[#allocation2] sm:$0xff] %v966_v4 }
  0xf3   : > { %975 = vst [vmem:[#allocation2 + $0x18] sm:$0xff] %v967_v15 }
  0xf4   : > { %976 = vst [vmem:[#allocation2 + $0x8] sm:$0xff] %v968_v16 }
  0xf5 PF: > { %p1385_p8 = scmp.le.s32.totalorder %s1512_s15, 0 }
  0xf7   : > { %980 = sbr.rel (%p1385_p8) target bundleno = 259 (0x103), region = 44 }
  0xfc   : > { %v981_v17 = vld [vmem:[#allocation2 + $0x10] sm:$0xff]  ;;  %v982_v18 = vld [vmem:[#allocation2] sm:$0xff]  ;;  %v983_v19 = vld [vmem:[#allocation2 + $0x18] sm:$0xff] }
  0xfd   : > { %v985_v12 = vmax.f32 %v981_v17, %v965_v3  ;;  %v986_v20 = vmax.f32 %v982_v18, %v966_v4  ;;  %v987_v25 = vmax.f32 %v983_v19, %v967_v15  ;;  %v984_v23 = vld [vmem:[#allocation2 + $0x8] sm:$0xff] }
  0xfe   : > { %v988_v24 = vmax.f32 %v984_v23, %v968_v16 }
  0xff   : > { %989 = vst [vmem:[#allocation2 + $0x10] sm:$0xff] %v985_v12 }
 0x100   : > { %990 = vst [vmem:[#allocation2] sm:$0xff] %v986_v20 }
 0x101   : > { %991 = vst [vmem:[#allocation2 + $0x18] sm:$0xff] %v987_v25 }
 0x102   : > { %992 = vst [vmem:[#allocation2 + $0x8] sm:$0xff] %v988_v24 }
 0x103 PF: > { %p1386_p9 = scmp.ne.s32.totalorder %s1512_s15, 29 }
 0x105   : > { %996 = sbr.rel (%p1386_p9) target bundleno = 271 (0x10f), region = 48 }
 0x10a   : > { %v997_v26 = vld [vmem:[#allocation2 + $0x10] sm:$0xff]  ;;  %v998_v27 = vld [vmem:[#allocation2] sm:$0xff]  ;;  %v999_v28 = vld [vmem:[#allocation2 + $0x18] sm:$0xff] }
 0x10b   : > { %v1001_v29 = vpack.c.bf16 %v998_v27, %v997_v26  ;;  %v1000_v30 = vld [vmem:[#allocation2 + $0x8] sm:$0xff] }
 0x10c   : > { %v1002_v32 = vpack.c.bf16 %v1000_v30, %v999_v28 }
 0x10d   : > { %1003 = vst [vmem:[%s1701_s5] sm:$0xff] %v1001_v29 }
 0x10e   : > { %1004 = vst [vmem:[%s1701_s5 + $0x8] sm:$0xff] %v1002_v32 }
 0x10f PF: > { %s14_s19 = sadd.s32 1, %s1528_s19   ;;  %s2066_s15 = smov %s1520_s17 }
 0x110   : > { %p11_p10 = scmp.ge.s32.totalorder %s14_s19, 62   ;;  %s2067_s16 = smov %s1524_s18 }
 0x111   : > { %s2068_s17 = smov %s2071_s20  ;;  %s2069_s18 = smov %s2075_s21 }
 0x112   :  { %13 = sbr.rel (!%p11_p10) target bundleno = 3 (0x3), region = 84 }

// kernel: net_forward.13
= control target key start
LH: loop header
LB: loop body
LE: loop exit
PB: predicated region body
PF: predicated region fallthrough
CT: control target
= control target key end

     0   :  { %s1410_s18 = smov 0   ;;  %s1642_s0 = inlined_call_operand.vmem [shape: bf16[2,22,128], index: 0, kind: input, shape index: {}]   ;;  %s1643_s1 = inlined_call_operand.vmem [shape: bf16[7,128,128], index: 1, kind: input, shape index: {}]   ;;  %s1644_s2 = inlined_call_operand.vmem [shape: f32[1,128], index: 2, kind: input, shape index: {}]   ;;  %s1645_s3 = inlined_call_operand.vmem [shape: f32[1,128], index: 3, kind: input, shape index: {}]   ;;  %s1646_s4 = inlined_call_operand.vmem [shape: bf16[2,16,128], index: 4, kind: input, shape index: {}]   ;;  %s1647_s5 = inlined_call_operand.vmem [shape: bf16[2,16,128], index: 5, kind: output, shape index: {}]  }
   0x1 LB: > { %s957_s19 = sadd.s32 4294967295, %s1378_s18   ;;  %p961_p0 = scmp.ge.s32.totalorder %s1378_s18, 1  ;;  %s1378_s18 = sphi %s1410_s18, %s15_s18  }
   0x2   : > { %p197_p1 = scmp.lt.s32.totalorder %s1378_s18, 3 }
   0x4   : > { %p198_p2 = pnand %p961_p0, %p197_p1 }
   0x5   : > { %p230_p3 = scmp.lt.s32.totalorder (!%p198_p2), %s957_s19, 1 }
   0x6   : > { %201 = sbr.rel (%p198_p2) target bundleno = 230 (0xe6), region = 40 }
   0xb   : > { %v1311_v0 = vld [vmem:[%s1643_s1 + $0x78] sm:$0xff]  ;;  %v1310_v3 = vld [vmem:[%s1643_s1 + $0x70] sm:$0xff]  ;;  %s1649_s19 = smov (!%p230_p3, %s957_s19), 1  ;;  %v1309_v8 = vld [vmem:[%s1643_s1 + $0x68] sm:$0xff]  ;;  %vm288_vm0 = vsmask.f32 7424 }
   0xc   : > { %v1303_v1 = vld [vmem:[%s1643_s1 + $0x38] sm:$0xff]  ;;  %350 = vmatpush.bf16.msra.mxu0 %v1311_v0  ;;  %v1302_v4 = vld [vmem:[%s1643_s1 + $0x30] sm:$0xff]  ;;  %v1301_v9 = vld [vmem:[%s1643_s1 + $0x28] sm:$0xff]  ;;  %s1361_s15 = smul.u32 12, %s1649_s19  ;;  %vm445_vm1 = vcmask 1046528   ;;  %vm623_vm3 = vcmask 1045504  }
   0xd   : > { %v1319_v2 = vld [vmem:[%s1643_s1 + $0xb8] sm:$0xff]  ;;  %412 = vmatpush.bf16.msra.mxu1 %v1303_v1  ;;  %v1318_v6 = vld [vmem:[%s1643_s1 + $0xb0] sm:$0xff]  ;;  %v1317_v10 = vld [vmem:[%s1643_s1 + $0xa8] sm:$0xff]  ;;  %vm531_vm2 = vsmask.f32 6400  ;;  %vm799_vm5 = vcmask 1044480  }
   0xe   : > { %v1327_v5 = vld [vmem:[%s1643_s1 + $0xf8] sm:$0xff]  ;;  %498 = vmatpush.bf16.msra.mxu2 %v1319_v2  ;;  %v1326_v7 = vld [vmem:[%s1643_s1 + $0xf0] sm:$0xff]  ;;  %v1325_v11 = vld [vmem:[%s1643_s1 + $0xe8] sm:$0xff]  ;;  %s234_s28 = scalar_lea.vmem %s1642_s0, %s1361_s15  ;;  %vm709_vm4 = vsmask.f32 5376  ;;  %s1293_s23 = sshll.u32 %s1649_s19, 3 }
   0xf   : > { %590 = vmatpush.bf16.msra.mxu3 %v1327_v5  ;;  %v1308_v12 = vld [vmem:[%s1643_s1 + $0x60] sm:$0xff]  ;;  %v249_v16 = vld [vmem:[%s234_s28 + $0x8] sm:$0x7]  ;;  %v1307_v17 = vld [vmem:[%s1643_s1 + $0x58] sm:$0xff]  ;;  %s244_s30 = scalar_lea.vmem %s1647_s5, %s1293_s23 }
  0x10   : > { %351 = vmatpush.bf16.msra.mxu0 %v1310_v3  ;;  %v1300_v13 = vld [vmem:[%s1643_s1 + $0x20] sm:$0xff]  ;;  %v1299_v18 = vld [vmem:[%s1643_s1 + $0x18] sm:$0xff]  ;;  %v252_v19 = vunpack.c.l.bf16 %v249_v16  ;;  %v1306_v23 = vld [vmem:[%s1643_s1 + $0x50] sm:$0xff] }
  0x11   : > { %413 = vmatpush.bf16.msra.mxu1 %v1302_v4  ;;  %v1316_v14 = vld [vmem:[%s1643_s1 + $0xa0] sm:$0xff]  ;;  %v1315_v20 = vld [vmem:[%s1643_s1 + $0x98] sm:$0xff]  ;;  %v1298_v24 = vld [vmem:[%s1643_s1 + $0x10] sm:$0xff] }
  0x12   : > { %499 = vmatpush.bf16.msra.mxu2 %v1318_v6  ;;  %v1324_v15 = vld [vmem:[%s1643_s1 + $0xe0] sm:$0xff]  ;;  %v1323_v21 = vld [vmem:[%s1643_s1 + $0xd8] sm:$0xff]  ;;  %v1492_v25 = vpack.c.bf16 %v252_v19, %v252_v19  ;;  %v1314_v26 = vld [vmem:[%s1643_s1 + $0x90] sm:$0xff] }
  0x13   : > { %591 = vmatpush.bf16.msra.mxu3 %v1326_v7  ;;  %v1484_v22 = vld [vmem:[%s234_s28] sm:$0xff]  ;;  %v1322_v27 = vld [vmem:[%s1643_s1 + $0xd0] sm:$0xff]  ;;  %v1305_v30 = vld [vmem:[%s1643_s1 + $0x48] sm:$0xff]  ;;  %s239_s28 = scalar_lea.vmem %s1646_s4, %s1293_s23 }
  0x14   : > { %352 = vmatpush.bf16.msra.mxu0 %v1309_v8  ;;  %v1501_v28 = vshll.u32 %v1484_v22, 16  ;;  %v1504_v29 = vshrl.u32 %v1484_v22, 16  ;;  %v1297_v31 = vld [vmem:[%s1643_s1 + $0x8] sm:$0xff]  ;;  %v1513_v32 = vshll.u32 %v1492_v25, 16  ;;  %v535_v33 = vshrl.u32 %v1492_v25, 16  ;;  %v1304_v39 = vld [vmem:[%s1643_s1 + $0x40] sm:$0xff] }
  0x15   : > { %414 = vmatpush.bf16.msra.mxu1 %v1301_v9  ;;  %v1313_v35 = vld [vmem:[%s1643_s1 + $0x88] sm:$0xff]  ;;  %v1296_v40 = vld [vmem:[%s1643_s1] sm:$0xff]  ;;  %v1335_v46 = vld [vmem:[%s1643_s1 + $0x138] sm:$0xff]  ;;  %v446_v47 = vrot.slane %v1484_v22, 1  ;;  %v447_v48 = vrot.slane %v1492_v25, 1  ;;  %v624_v16 = vrot.slane %v1484_v22, 2 }
  0x16   : > { %500 = vmatpush.bf16.msra.mxu2 %v1317_v10  ;;  %v294_v34 = vrot.slane %v1501_v28, 1  ;;  %v1321_v36 = vld [vmem:[%s1643_s1 + $0xc8] sm:$0xff]  ;;  %v532_v37 = vrot.slane %v1504_v29, 1  ;;  %v533_v38 = vrot.slane %v1501_v28, 2  ;;  %v537_v41 = vrot.slane %v535_v33, 1  ;;  %v1312_v45 = vld [vmem:[%s1643_s1 + $0x80] sm:$0xff] }
  0x17   : > { %592 = vmatpush.bf16.msra.mxu3 %v1325_v11  ;;  %v538_v42 = vrot.slane %v1513_v32, 2  ;;  %v299_v44 = vrot.slane %v1513_v32, 1  ;;  %v1343_v49 = vld [vmem:[%s1643_s1 + $0x178] sm:$0xff]  ;;  %v1320_v51 = vld [vmem:[%s1643_s1 + $0xc0] sm:$0xff]  ;;  %v1334_v55 = vld [vmem:[%s1643_s1 + $0x130] sm:$0xff]  ;;  %v448_v56 = vsel %vm445_vm1, %v446_v47, %v447_v48  ;;  %v710_v11 = vrot.slane %v1504_v29, 2 }
  0x18   : > { %353 = vmatpush.bf16.msra.mxu0 %v1308_v12  ;;  %v295_v43 = vor.u32 %v294_v34, %v1504_v29  ;;  %v1351_v50 = vld [vmem:[%s1643_s1 + $0x1b8] sm:$0xff]  ;;  %v534_v52 = vor.u32 %v533_v38, %v532_v37  ;;  %v1342_v57 = vld [vmem:[%s1643_s1 + $0x170] sm:$0xff]  ;;  %v1333_v60 = vld [vmem:[%s1643_s1 + $0x128] sm:$0xff]  ;;  %v711_v12 = vrot.slane %v1501_v28, 3 }
  0x19   : > { %415 = vmatpush.bf16.msra.mxu1 %v1300_v13  ;;  %v539_v53 = vor.u32 %v538_v42, %v537_v41  ;;  %v1350_v58 = vld [vmem:[%s1643_s1 + $0x1b0] sm:$0xff]  ;;  %v1341_v61 = vld [vmem:[%s1643_s1 + $0x168] sm:$0xff]  ;;  %v1332_v63 = vld [vmem:[%s1643_s1 + $0x120] sm:$0xff]  ;;  %v713_v13 = vrot.slane %v535_v33, 2 }
  0x1a   : > { %501 = vmatpush.bf16.msra.mxu2 %v1316_v14  ;;  %v300_v54 = vsel %vm288_vm0, %v295_v43, %v299_v44  ;;  %v1349_v62 = vld [vmem:[%s1643_s1 + $0x1a8] sm:$0xff]  ;;  %v1340_v0 = vld [vmem:[%s1643_s1 + $0x160] sm:$0xff]  ;;  %v1331_v2 = vld [vmem:[%s1643_s1 + $0x118] sm:$0xff]  ;;  %v714_v14 = vrot.slane %v1513_v32, 3 }
  0x1b   : > { %593 = vmatpush.bf16.msra.mxu3 %v1324_v15  ;;  %v540_v59 = vsel %vm531_vm2, %v534_v52, %v539_v53  ;;  %v1348_v1 = vld [vmem:[%s1643_s1 + $0x1a0] sm:$0xff]  ;;  %v1339_v3 = vld [vmem:[%s1643_s1 + $0x158] sm:$0xff]  ;;  %v1330_v5 = vld [vmem:[%s1643_s1 + $0x110] sm:$0xff] }
  0x1c   : > { %354 = vmatpush.bf16.msra.mxu0 %v1307_v17  ;;  %v1347_v4 = vld [vmem:[%s1643_s1 + $0x198] sm:$0xff]  ;;  %v1338_v6 = vld [vmem:[%s1643_s1 + $0x150] sm:$0xff]  ;;  %v1329_v8 = vld [vmem:[%s1643_s1 + $0x108] sm:$0xff]  ;;  %v625_v17 = vrot.slane %v1492_v25, 2 }
  0x1d   : > { %416 = vmatpush.bf16.msra.mxu1 %v1299_v18  ;;  %v1346_v7 = vld [vmem:[%s1643_s1 + $0x190] sm:$0xff]  ;;  %v1337_v9 = vld [vmem:[%s1643_s1 + $0x148] sm:$0xff]  ;;  %v1328_v15 = vld [vmem:[%s1643_s1 + $0x100] sm:$0xff] }
  0x1e   : > { %502 = vmatpush.bf16.msra.mxu2 %v1315_v20  ;;  %v1345_v10 = vld [vmem:[%s1643_s1 + $0x188] sm:$0xff]  ;;  %v1336_v18 = vld [vmem:[%s1643_s1 + $0x140] sm:$0xff]  ;;  %v712_v20 = vor.u32 %v711_v12, %v710_v11 }
  0x1f   : > { %594 = vmatpush.bf16.msra.mxu3 %v1323_v21  ;;  %v1344_v19 = vld [vmem:[%s1643_s1 + $0x180] sm:$0xff]  ;;  %v715_v21 = vor.u32 %v714_v14, %v713_v13 }
  0x20   : > { %355 = vmatpush.bf16.msra.mxu0 %v1306_v23  ;;  %v800_v23 = vrot.slane %v1484_v22, 3  ;;  %v1370_v47 = vld [vmem:[%s1644_s2] ss:$0 sm:$0xff] }
  0x21   : > { %417 = vmatpush.bf16.msra.mxu1 %v1298_v24  ;;  %v801_v24 = vrot.slane %v1492_v25, 3 }
  0x22   : > { %503 = vmatpush.bf16.msra.mxu2 %v1314_v26  ;;  %v626_v26 = vsel %vm623_vm3, %v624_v16, %v625_v17 }
  0x23   : > { %595 = vmatpush.bf16.msra.mxu3 %v1322_v27  ;;  %v716_v27 = vsel %vm709_vm4, %v712_v20, %v715_v21  ;;  %v802_v28 = vsel %vm799_vm5, %v800_v23, %v801_v24 }
  0x24   : > { %356 = vmatpush.bf16.msra.mxu0 %v1305_v30 }
  0x25   : > { %418 = vmatpush.bf16.msra.mxu1 %v1297_v31 }
  0x26   : > { %504 = vmatpush.bf16.msra.mxu2 %v1313_v35 }
  0x27   : > { %596 = vmatpush.bf16.msra.mxu3 %v1321_v36 }
  0x28   : > { %357 = vmatpush.bf16.msra.mxu0 %v1304_v39 }
  0x29   : > { %419 = vmatpush.bf16.msra.mxu1 %v1296_v40 }
  0x2a   : > { %505 = vmatpush.bf16.msra.mxu2 %v1312_v45 }
  0x2b   : > { %597 = vmatpush.bf16.msra.mxu3 %v1320_v51  ;;  %358 = vmatmul.bf16.vlgmr.msra.gmra.mxu0 %v300_v54  ;;  %v1371_v51 = vld [vmem:[%s1645_s3] ss:$0 sm:$0xff] }
  0x2c   : > { %676 = vmatpush.bf16.msrb.mxu0 %v1335_v46  ;;  %420 = vmatmul.bf16.vlgmr.msra.gmra.mxu1 %v1484_v22 }
  0x2d   : > { %766 = vmatpush.bf16.msrb.mxu1 %v1343_v49  ;;  %506 = vmatmul.bf16.vlgmr.msra.gmra.mxu2 %v448_v56 }
  0x2e   : > { %852 = vmatpush.bf16.msrb.mxu2 %v1351_v50  ;;  %598 = vmatmul.bf16.vlgmr.msra.gmra.mxu3 %v540_v59 }
  0x30   : > { %677 = vmatpush.bf16.msrb.mxu0 %v1334_v55 }
  0x31   : > { %767 = vmatpush.bf16.msrb.mxu1 %v1342_v57  ;;  %v1353_v57 = vld [vmem:[%s239_s28] sm:$0xff]  }
  0x32   : > { %853 = vmatpush.bf16.msrb.mxu2 %v1350_v58 }
  0x34   : > { %678 = vmatpush.bf16.msrb.mxu0 %v1333_v60  ;;  %v1354_v60 = vunpack.c.l.bf16 %v1353_v57 }
  0x35   : > { %768 = vmatpush.bf16.msrb.mxu1 %v1341_v61 }
  0x36   : > { %854 = vmatpush.bf16.msrb.mxu2 %v1349_v62  ;;  %v1355_v62 = vunpack.c.h.bf16 %v1353_v57 }
  0x38   : > { %679 = vmatpush.bf16.msrb.mxu0 %v1332_v63 }
  0x39   : > { %769 = vmatpush.bf16.msrb.mxu1 %v1340_v0 }
  0x3a   : > { %855 = vmatpush.bf16.msrb.mxu2 %v1348_v1 }
  0x3c   : > { %680 = vmatpush.bf16.msrb.mxu0 %v1331_v2 }
  0x3d   : > { %770 = vmatpush.bf16.msrb.mxu1 %v1339_v3 }
  0x3e   : > { %856 = vmatpush.bf16.msrb.mxu2 %v1347_v4 }
  0x40   : > { %681 = vmatpush.bf16.msrb.mxu0 %v1330_v5 }
  0x41   : > { %771 = vmatpush.bf16.msrb.mxu1 %v1338_v6 }
  0x42   : > { %857 = vmatpush.bf16.msrb.mxu2 %v1346_v7 }
  0x44   : > { %682 = vmatpush.bf16.msrb.mxu0 %v1329_v8 }
  0x45   : > { %772 = vmatpush.bf16.msrb.mxu1 %v1337_v9 }
  0x46   : > { %858 = vmatpush.bf16.msrb.mxu2 %v1345_v10 }
  0x48   : > { %683 = vmatpush.bf16.msrb.mxu0 %v1328_v15 }
  0x49   : > { %773 = vmatpush.bf16.msrb.mxu1 %v1336_v18 }
  0x4a   : > { %859 = vmatpush.bf16.msrb.mxu2 %v1344_v19 }
  0x4b   : > { %684 = vmatmul.bf16.vlgmr.msrb.gmra.mxu0 %v626_v26 }
  0x4c   : > { %774 = vmatmul.bf16.vlgmr.msrb.gmra.mxu1 %v716_v27 }
  0x4d   : > { %860 = vmatmul.bf16.vlgmr.msrb.gmra.mxu2 %v802_v28 }
  0xa8   : > { %v359_v29 = vpop.f32.mrf.mxu0 }
  0xa9   : > { %v421_v30 = vpop.f32.mrf.mxu1 }
  0xaa   : > { %v422_v32 = vadd.f32 %v421_v30, %v359_v29 }
  0xb0   : > { %v507_v31 = vpop.f32.mrf.mxu2  ;;  %v361_v33 = vpop.f32.mrf.mxu0 }
  0xb1   : > { %v599_v34 = vpop.f32.mrf.mxu3  ;;  %v423_v22 = vpop.f32.mrf.mxu1  ;;  %v512_v35 = vadd.f32 %v507_v31, %v422_v32 }
  0xb2   : > { %v424_v37 = vadd.f32 %v423_v22, %v361_v33 }
  0xb3   : > { %v604_v36 = vadd.f32 %v599_v34, %v512_v35 }
  0xb8   : > { %v509_v25 = vpop.f32.mrf.mxu2 }
  0xb9   : > { %v513_v41 = vadd.f32 %v509_v25, %v424_v37  ;;  %v601_v42 = vpop.f32.mrf.mxu3 }
  0xbb   : > { %v605_v45 = vadd.f32 %v601_v42, %v513_v41 }
  0xc8   : > { %v685_v38 = vpop.f32.mrf.mxu0 }
  0xc9   : > { %v690_v39 = vadd.f32 %v685_v38, %v604_v36  ;;  %v775_v40 = vpop.f32.mrf.mxu1 }
  0xcb   : > { %v780_v43 = vadd.f32 %v775_v40, %v690_v39 }
  0xd0   : > { %v861_v44 = vpop.f32.mrf.mxu2  ;;  %v687_v48 = vpop.f32.mrf.mxu0 }
  0xd1   : > { %v866_v46 = vadd.f32 %v861_v44, %v780_v43  ;;  %v691_v49 = vadd.f32 %v687_v48, %v605_v45  ;;  %v777_v52 = vpop.f32.mrf.mxu1 }
  0xd3   : > { %v871_v50 = vmul.f32 %v1370_v47, %v866_v46  ;;  %v781_v53 = vadd.f32 %v777_v52, %v691_v49 }
  0xd5   : > { %v876_v55 = vadd.f32 %v1371_v51, %v871_v50 }
  0xd7   : > { %v878_v59 = vmax.f32 %v876_v55, 0.0 }
  0xd8   : > { %v863_v54 = vpop.f32.mrf.mxu2 }
  0xd9   : > { %v867_v56 = vadd.f32 %v863_v54, %v781_v53  ;;  %v884_v0 = vadd.f32 %v1354_v60, %v878_v59 }
  0xdb   : > { %v872_v58 = vmul.f32 %v1370_v47, %v867_v56 }
  0xdd   : > { %v877_v61 = vadd.f32 %v1371_v51, %v872_v58 }
  0xdf   : > { %v879_v63 = vmax.f32 %v877_v61, 0.0 }
  0xe1   : > { %v885_v1 = vadd.f32 %v1355_v62, %v879_v63 }
  0xe3   : > { %v1359_v2 = vpack.c.bf16 %v885_v1, %v884_v0 }
  0xe5   : > { %1360 = vst [vmem:[%s244_s30] sm:$0xff] %v1359_v2  }
  0xe6 PF: > { %s15_s18 = sadd.s32 1, %s1378_s18  }
  0xe7   : > { %p12_p4 = scmp.ge.s32.totalorder %s15_s18, 4  }
  0xe9   :  { %14 = sbr.rel (!%p12_p4) target bundleno = 1 (0x1), region = 79 }

// kernel: net_forward.15
= control target key start
LH: loop header
LB: loop body
LE: loop exit
PB: predicated region body
PF: predicated region fallthrough
CT: control target
= control target key end

     0   :  { %s4494_s0 = inlined_call_operand.vmem [shape: bf16[2,16,1152], index: 0, kind: input, shape index: {}]   ;;  %s4495_s1 = inlined_call_operand.vmem [shape: f32[1152,256], index: 1, kind: input, shape index: {}]   ;;  %s4496_s2 = inlined_call_operand.vmem [shape: f32[1152,256], index: 2, kind: input, shape index: {}]   ;;  %s4497_s3 = inlined_call_operand.vmem [shape: f32[1,256], index: 3, kind: input, shape index: {}]   ;;  %s4498_s4 = inlined_call_operand.vmem [shape: f32[1,256], index: 4, kind: input, shape index: {}]   ;;  %s4499_s5 = inlined_call_operand.vmem [shape: f32[256,128], index: 5, kind: input, shape index: {}]   ;;  %s4500_s6 = inlined_call_operand.vmem [shape: f32[1,128], index: 6, kind: input, shape index: {}]   ;;  %s4501_s7 = inlined_call_operand.hbm [shape: f32[2,128], index: 7, kind: output, shape index: {}]  }
   0x1   :  { %v979_v0 = vld [vmem:[%s4496_s2 + $0xf0] sm:$0xff]  ;;  %v977_v3 = vld [vmem:[%s4496_s2 + $0xe0] sm:$0xff] }
   0x2   :  { %v1043_v1 = vld [vmem:[%s4496_s2 + $0x2f0] sm:$0xff]  ;;  %1262 = vmatpush.msra.mxu0 %v979_v0  ;;  %v1041_v5 = vld [vmem:[%s4496_s2 + $0x2e0] sm:$0xff] }
   0x3   :  { %v1075_v2 = vld [vmem:[%s4496_s2 + $0x3f0] sm:$0xff]  ;;  %1302 = vmatpush.msra.mxu2 %v1043_v1  ;;  %v1073_v6 = vld [vmem:[%s4496_s2 + $0x3e0] sm:$0xff] }
   0x4   :  { %v1011_v4 = vld [vmem:[%s4496_s2 + $0x1f0] sm:$0xff]  ;;  %1322 = vmatpush.msra.mxu3 %v1075_v2  ;;  %v1009_v8 = vld [vmem:[%s4496_s2 + $0x1e0] sm:$0xff]  ;;  %1263 = vmatpush.msra.mxu0 %v977_v3 }
   0x5   :  { %1282 = vmatpush.msra.mxu1 %v1011_v4  ;;  %v975_v7 = vld [vmem:[%s4496_s2 + $0xd0] sm:$0xff]  ;;  %1303 = vmatpush.msra.mxu2 %v1041_v5  ;;  %v973_v11 = vld [vmem:[%s4496_s2 + $0xc0] sm:$0xff] }
   0x6   :  { %v1039_v9 = vld [vmem:[%s4496_s2 + $0x2d0] sm:$0xff]  ;;  %1323 = vmatpush.msra.mxu3 %v1073_v6  ;;  %v1037_v13 = vld [vmem:[%s4496_s2 + $0x2c0] sm:$0xff]  ;;  %1264 = vmatpush.msra.mxu0 %v975_v7 }
   0x7   :  { %v1071_v10 = vld [vmem:[%s4496_s2 + $0x3d0] sm:$0xff]  ;;  %1283 = vmatpush.msra.mxu1 %v1009_v8  ;;  %1304 = vmatpush.msra.mxu2 %v1039_v9  ;;  %v1069_v14 = vld [vmem:[%s4496_s2 + $0x3c0] sm:$0xff] }
   0x8   :  { %v1007_v12 = vld [vmem:[%s4496_s2 + $0x1d0] sm:$0xff]  ;;  %v1005_v15 = vld [vmem:[%s4496_s2 + $0x1c0] sm:$0xff]  ;;  %1324 = vmatpush.msra.mxu3 %v1071_v10  ;;  %1265 = vmatpush.msra.mxu0 %v973_v11 }
   0x9   :  { %1284 = vmatpush.msra.mxu1 %v1007_v12  ;;  %v971_v16 = vld [vmem:[%s4496_s2 + $0xb0] sm:$0xff]  ;;  %1305 = vmatpush.msra.mxu2 %v1037_v13  ;;  %v969_v20 = vld [vmem:[%s4496_s2 + $0xa0] sm:$0xff] }
   0xa   :  { %v1035_v17 = vld [vmem:[%s4496_s2 + $0x2b0] sm:$0xff]  ;;  %1325 = vmatpush.msra.mxu3 %v1069_v14  ;;  %v1033_v21 = vld [vmem:[%s4496_s2 + $0x2a0] sm:$0xff]  ;;  %1266 = vmatpush.msra.mxu0 %v971_v16 }
   0xb   :  { %v1067_v18 = vld [vmem:[%s4496_s2 + $0x3b0] sm:$0xff]  ;;  %1285 = vmatpush.msra.mxu1 %v1005_v15  ;;  %1306 = vmatpush.msra.mxu2 %v1035_v17  ;;  %v1065_v22 = vld [vmem:[%s4496_s2 + $0x3a0] sm:$0xff] }
   0xc   :  { %v1003_v19 = vld [vmem:[%s4496_s2 + $0x1b0] sm:$0xff]  ;;  %v1001_v23 = vld [vmem:[%s4496_s2 + $0x1a0] sm:$0xff]  ;;  %1326 = vmatpush.msra.mxu3 %v1067_v18  ;;  %1267 = vmatpush.msra.mxu0 %v969_v20 }
   0xd   :  { %1286 = vmatpush.msra.mxu1 %v1003_v19  ;;  %v967_v24 = vld [vmem:[%s4496_s2 + $0x90] sm:$0xff]  ;;  %1307 = vmatpush.msra.mxu2 %v1033_v21  ;;  %v965_v28 = vld [vmem:[%s4496_s2 + $0x80] sm:$0xff] }
   0xe   :  { %v1031_v25 = vld [vmem:[%s4496_s2 + $0x290] sm:$0xff]  ;;  %1327 = vmatpush.msra.mxu3 %v1065_v22  ;;  %v1029_v29 = vld [vmem:[%s4496_s2 + $0x280] sm:$0xff]  ;;  %1268 = vmatpush.msra.mxu0 %v967_v24 }
   0xf   :  { %v1063_v26 = vld [vmem:[%s4496_s2 + $0x390] sm:$0xff]  ;;  %1287 = vmatpush.msra.mxu1 %v1001_v23  ;;  %1308 = vmatpush.msra.mxu2 %v1031_v25  ;;  %v1061_v30 = vld [vmem:[%s4496_s2 + $0x380] sm:$0xff] }
  0x10   :  { %v999_v27 = vld [vmem:[%s4496_s2 + $0x190] sm:$0xff]  ;;  %v997_v31 = vld [vmem:[%s4496_s2 + $0x180] sm:$0xff]  ;;  %1328 = vmatpush.msra.mxu3 %v1063_v26  ;;  %1269 = vmatpush.msra.mxu0 %v965_v28  ;;  %v2468_v28 = vld [vmem:[%s4494_s0 + $0x8] sm:$0xff] }
  0x11   :  { %1288 = vmatpush.msra.mxu1 %v999_v27  ;;  %v963_v32 = vld [vmem:[%s4496_s2 + $0x70] sm:$0xff]  ;;  %1309 = vmatpush.msra.mxu2 %v1029_v29  ;;  %v961_v36 = vld [vmem:[%s4496_s2 + $0x60] sm:$0xff] }
  0x12   :  { %v1027_v33 = vld [vmem:[%s4496_s2 + $0x270] sm:$0xff]  ;;  %1329 = vmatpush.msra.mxu3 %v1061_v30  ;;  %v1025_v37 = vld [vmem:[%s4496_s2 + $0x260] sm:$0xff]  ;;  %1270 = vmatpush.msra.mxu0 %v963_v32 }
  0x13   :  { %v1059_v34 = vld [vmem:[%s4496_s2 + $0x370] sm:$0xff]  ;;  %1289 = vmatpush.msra.mxu1 %v997_v31  ;;  %1310 = vmatpush.msra.mxu2 %v1027_v33  ;;  %v1057_v38 = vld [vmem:[%s4496_s2 + $0x360] sm:$0xff]  ;;  %v2483_v31 = vld [vmem:[%s4494_s0 + $0x48] sm:$0xff] }
  0x14   :  { %v995_v35 = vld [vmem:[%s4496_s2 + $0x170] sm:$0xff]  ;;  %v993_v39 = vld [vmem:[%s4496_s2 + $0x160] sm:$0xff]  ;;  %1330 = vmatpush.msra.mxu3 %v1059_v34  ;;  %1271 = vmatpush.msra.mxu0 %v961_v36  ;;  %v4510_v36 = vunpack.c.h.bf16 %v2468_v28 }
  0x15   :  { %1290 = vmatpush.msra.mxu1 %v995_v35  ;;  %v959_v40 = vld [vmem:[%s4496_s2 + $0x50] sm:$0xff]  ;;  %1311 = vmatpush.msra.mxu2 %v1025_v37  ;;  %v957_v44 = vld [vmem:[%s4496_s2 + $0x40] sm:$0xff]  ;;  %v4512_v35 = vunpack.c.l.bf16 %v2468_v28 }
  0x16   :  { %v1023_v41 = vld [vmem:[%s4496_s2 + $0x250] sm:$0xff]  ;;  %1331 = vmatpush.msra.mxu3 %v1057_v38  ;;  %v1021_v45 = vld [vmem:[%s4496_s2 + $0x240] sm:$0xff]  ;;  %1272 = vmatpush.msra.mxu0 %v959_v40 }
  0x17   :  { %v1055_v42 = vld [vmem:[%s4496_s2 + $0x350] sm:$0xff]  ;;  %1291 = vmatpush.msra.mxu1 %v993_v39  ;;  %1312 = vmatpush.msra.mxu2 %v1023_v41  ;;  %v1053_v46 = vld [vmem:[%s4496_s2 + $0x340] sm:$0xff] }
  0x18   :  { %v991_v43 = vld [vmem:[%s4496_s2 + $0x150] sm:$0xff]  ;;  %v989_v47 = vld [vmem:[%s4496_s2 + $0x140] sm:$0xff]  ;;  %1332 = vmatpush.msra.mxu3 %v1055_v42  ;;  %1273 = vmatpush.msra.mxu0 %v957_v44 }
  0x19   :  { %1292 = vmatpush.msra.mxu1 %v991_v43  ;;  %v955_v48 = vld [vmem:[%s4496_s2 + $0x30] sm:$0xff]  ;;  %1313 = vmatpush.msra.mxu2 %v1021_v45  ;;  %v953_v52 = vld [vmem:[%s4496_s2 + $0x20] sm:$0xff] }
  0x1a   :  { %v1019_v49 = vld [vmem:[%s4496_s2 + $0x230] sm:$0xff]  ;;  %1333 = vmatpush.msra.mxu3 %v1053_v46  ;;  %v1017_v53 = vld [vmem:[%s4496_s2 + $0x220] sm:$0xff]  ;;  %1274 = vmatpush.msra.mxu0 %v955_v48  ;;  %v4506_v48 = vunpack.c.h.bf16 %v2483_v31 }
  0x1b   :  { %v1051_v50 = vld [vmem:[%s4496_s2 + $0x330] sm:$0xff]  ;;  %1293 = vmatpush.msra.mxu1 %v989_v47  ;;  %1314 = vmatpush.msra.mxu2 %v1019_v49  ;;  %v1049_v54 = vld [vmem:[%s4496_s2 + $0x320] sm:$0xff]  ;;  %v4508_v47 = vunpack.c.l.bf16 %v2483_v31 }
  0x1c   :  { %v987_v51 = vld [vmem:[%s4496_s2 + $0x130] sm:$0xff]  ;;  %v985_v55 = vld [vmem:[%s4496_s2 + $0x120] sm:$0xff]  ;;  %1334 = vmatpush.msra.mxu3 %v1051_v50  ;;  %1275 = vmatpush.msra.mxu0 %v953_v52 }
  0x1d   :  { %1294 = vmatpush.msra.mxu1 %v987_v51  ;;  %v951_v56 = vld [vmem:[%s4496_s2 + $0x10] sm:$0xff]  ;;  %1315 = vmatpush.msra.mxu2 %v1017_v53  ;;  %v949_v60 = vld [vmem:[%s4496_s2] sm:$0xff] }
  0x1e   :  { %v1015_v57 = vld [vmem:[%s4496_s2 + $0x210] sm:$0xff]  ;;  %1335 = vmatpush.msra.mxu3 %v1049_v54  ;;  %v1013_v61 = vld [vmem:[%s4496_s2 + $0x200] sm:$0xff]  ;;  %1276 = vmatpush.msra.mxu0 %v951_v56 }
  0x1f   :  { %v1047_v58 = vld [vmem:[%s4496_s2 + $0x310] sm:$0xff]  ;;  %1295 = vmatpush.msra.mxu1 %v985_v55  ;;  %1316 = vmatpush.msra.mxu2 %v1015_v57  ;;  %v1045_v62 = vld [vmem:[%s4496_s2 + $0x300] sm:$0xff] }
  0x20   :  { %v983_v59 = vld [vmem:[%s4496_s2 + $0x110] sm:$0xff]  ;;  %1336 = vmatpush.msra.mxu3 %v1047_v58  ;;  %1277 = vmatpush.msra.mxu0 %v949_v60  ;;  %v981_v2 = vld [vmem:[%s4496_s2 + $0x100] sm:$0xff] }
  0x21   :  { %v1107_v63 = vld [vmem:[%s4496_s2 + $0x4f0] sm:$0xff]  ;;  %1296 = vmatpush.msra.mxu1 %v983_v59  ;;  %1317 = vmatpush.msra.mxu2 %v1013_v61  ;;  %v1105_v3 = vld [vmem:[%s4496_s2 + $0x4e0] sm:$0xff] }
  0x22   :  { %v1171_v0 = vld [vmem:[%s4496_s2 + $0x6f0] sm:$0xff]  ;;  %1337 = vmatpush.msra.mxu3 %v1045_v62  ;;  %1342 = vmatpush.msrb.mxu0 %v1107_v63  ;;  %v1169_v5 = vld [vmem:[%s4496_s2 + $0x6e0] sm:$0xff] }
  0x23   :  { %v1203_v1 = vld [vmem:[%s4496_s2 + $0x7f0] sm:$0xff]  ;;  %1382 = vmatpush.msrb.mxu2 %v1171_v0  ;;  %v1201_v6 = vld [vmem:[%s4496_s2 + $0x7e0] sm:$0xff]  ;;  %1297 = vmatpush.msra.mxu1 %v981_v2 }
  0x24   :  { %v1139_v4 = vld [vmem:[%s4496_s2 + $0x5f0] sm:$0xff]  ;;  %1402 = vmatpush.msrb.mxu3 %v1203_v1  ;;  %1343 = vmatpush.msrb.mxu0 %v1105_v3  ;;  %v1137_v8 = vld [vmem:[%s4496_s2 + $0x5e0] sm:$0xff] }
  0x25   :  { %v1103_v7 = vld [vmem:[%s4496_s2 + $0x4d0] sm:$0xff]  ;;  %1362 = vmatpush.msrb.mxu1 %v1139_v4  ;;  %1383 = vmatpush.msrb.mxu2 %v1169_v5  ;;  %v1101_v11 = vld [vmem:[%s4496_s2 + $0x4c0] sm:$0xff] }
  0x26   :  { %v1167_v9 = vld [vmem:[%s4496_s2 + $0x6d0] sm:$0xff]  ;;  %1403 = vmatpush.msrb.mxu3 %v1201_v6  ;;  %1344 = vmatpush.msrb.mxu0 %v1103_v7  ;;  %v1165_v13 = vld [vmem:[%s4496_s2 + $0x6c0] sm:$0xff] }
  0x27   :  { %v1199_v10 = vld [vmem:[%s4496_s2 + $0x7d0] sm:$0xff]  ;;  %1363 = vmatpush.msrb.mxu1 %v1137_v8  ;;  %1384 = vmatpush.msrb.mxu2 %v1167_v9  ;;  %v1197_v14 = vld [vmem:[%s4496_s2 + $0x7c0] sm:$0xff] }
  0x28   :  { %v1135_v12 = vld [vmem:[%s4496_s2 + $0x5d0] sm:$0xff]  ;;  %v1133_v16 = vld [vmem:[%s4496_s2 + $0x5c0] sm:$0xff]  ;;  %1404 = vmatpush.msrb.mxu3 %v1199_v10  ;;  %1345 = vmatpush.msrb.mxu0 %v1101_v11 }
  0x29   :  { %v1099_v15 = vld [vmem:[%s4496_s2 + $0x4b0] sm:$0xff]  ;;  %v1097_v19 = vld [vmem:[%s4496_s2 + $0x4a0] sm:$0xff]  ;;  %1364 = vmatpush.msrb.mxu1 %v1135_v12  ;;  %1385 = vmatpush.msrb.mxu2 %v1165_v13 }
  0x2a   :  { %v1163_v17 = vld [vmem:[%s4496_s2 + $0x6b0] sm:$0xff]  ;;  %v1161_v21 = vld [vmem:[%s4496_s2 + $0x6a0] sm:$0xff]  ;;  %1405 = vmatpush.msrb.mxu3 %v1197_v14  ;;  %1346 = vmatpush.msrb.mxu0 %v1099_v15 }
  0x2b   :  { %v1195_v18 = vld [vmem:[%s4496_s2 + $0x7b0] sm:$0xff]  ;;  %v1193_v22 = vld [vmem:[%s4496_s2 + $0x7a0] sm:$0xff]  ;;  %1365 = vmatpush.msrb.mxu1 %v1133_v16  ;;  %1386 = vmatpush.msrb.mxu2 %v1163_v17 }
  0x2c   :  { %v1131_v20 = vld [vmem:[%s4496_s2 + $0x5b0] sm:$0xff]  ;;  %v1129_v24 = vld [vmem:[%s4496_s2 + $0x5a0] sm:$0xff]  ;;  %1406 = vmatpush.msrb.mxu3 %v1195_v18  ;;  %1347 = vmatpush.msrb.mxu0 %v1097_v19 }
  0x2d   :  { %v1095_v23 = vld [vmem:[%s4496_s2 + $0x490] sm:$0xff]  ;;  %v2463_v27 = vld [vmem:[%s4494_s0] sm:$0xff]  ;;  %1366 = vmatpush.msrb.mxu1 %v1131_v20  ;;  %1387 = vmatpush.msrb.mxu2 %v1161_v21 }
  0x2e   :  { %v1159_v25 = vld [vmem:[%s4496_s2 + $0x690] sm:$0xff]  ;;  %v2473_v29 = vld [vmem:[%s4494_s0 + $0x24] sm:$0xff]  ;;  %v4516_v33 = vunpack.c.l.bf16 %v2463_v27  ;;  %v4514_v34 = vunpack.c.h.bf16 %v2463_v27  ;;  %1407 = vmatpush.msrb.mxu3 %v1193_v22  ;;  %1348 = vmatpush.msrb.mxu0 %v1095_v23  ;;  %v2534_v56 = vld [vmem:[%s4494_s0 + $0x20] sm:$0xf] }
  0x2f   :  { %v1191_v26 = vld [vmem:[%s4496_s2 + $0x790] sm:$0xff]  ;;  %v1093_v37 = vld [vmem:[%s4496_s2 + $0x480] sm:$0xff]  ;;  %v4517_v40 = vunpack.c.l.bf16 %v2473_v29  ;;  %v4515_v41 = vunpack.c.h.bf16 %v2473_v29  ;;  %1367 = vmatpush.msrb.mxu1 %v1129_v24  ;;  %1388 = vmatpush.msrb.mxu2 %v1159_v25  ;;  %v55_v0 = vunpack.c.l.bf16 %v2534_v56 }
  0x30   :  { %v2478_v30 = vld [vmem:[%s4494_s0 + $0x2c] sm:$0xff]  ;;  %v2505_v39 = vld [vmem:[%s4494_s0 + $0x74] sm:$0xff]  ;;  %v1157_v45 = vld [vmem:[%s4496_s2 + $0x680] sm:$0xff]  ;;  %1408 = vmatpush.msrb.mxu3 %v1191_v26  ;;  %1349 = vmatpush.msrb.mxu0 %v1093_v37 }
  0x31   :  { %v2488_v32 = vld [vmem:[%s4494_s0 + $0x50] sm:$0xff]  ;;  %v4513_v42 = vunpack.c.l.bf16 %v2478_v30  ;;  %v4511_v43 = vunpack.c.h.bf16 %v2478_v30  ;;  %v1189_v46 = vld [vmem:[%s4496_s2 + $0x780] sm:$0xff]  ;;  %v4505_v54 = vunpack.c.l.bf16 %v2505_v39  ;;  %v4503_v55 = vunpack.c.h.bf16 %v2505_v39  ;;  %1389 = vmatpush.msrb.mxu2 %v1157_v45 }
  0x32   :  { %v2500_v38 = vld [vmem:[%s4494_s0 + $0x6c] sm:$0xff]  ;;  %v4504_v49 = vunpack.c.l.bf16 %v2488_v32  ;;  %v4502_v50 = vunpack.c.h.bf16 %v2488_v32  ;;  %v2539_v57 = vld [vmem:[%s4494_s0 + $0x44] sm:$0xf]  ;;  %v209_v61 = vadd.f32 %v4517_v40, %v4516_v33  ;;  %v216_v62 = vadd.f32 %v4515_v41, %v4514_v34  ;;  %1409 = vmatpush.msrb.mxu3 %v1189_v46 }
  0x33   :  { %v1127_v44 = vld [vmem:[%s4496_s2 + $0x590] sm:$0xff]  ;;  %v4509_v52 = vunpack.c.l.bf16 %v2500_v38  ;;  %v4507_v53 = vunpack.c.h.bf16 %v2500_v38  ;;  %v1125_v58 = vld [vmem:[%s4496_s2 + $0x580] sm:$0xff]  ;;  %v223_v63 = vadd.f32 %v4513_v42, %v4512_v35  ;;  %v230_v3 = vadd.f32 %v4511_v43, %v4510_v36 }
  0x34   :  { %v1091_v51 = vld [vmem:[%s4496_s2 + $0x470] sm:$0xff]  ;;  %1368 = vmatpush.msrb.mxu1 %v1127_v44  ;;  %v1089_v1 = vld [vmem:[%s4496_s2 + $0x460] sm:$0xff]  ;;  %v64_v6 = vunpack.c.l.bf16 %v2539_v57  ;;  %v210_v8 = vrot.slane %v209_v61, 4  ;;  %v217_v9 = vrot.slane %v216_v62, 4  ;;  %v286_v11 = vadd.f32 %v4505_v54, %v4504_v49 }
  0x35   :  { %v1155_v59 = vld [vmem:[%s4496_s2 + $0x670] sm:$0xff]  ;;  %v272_v4 = vadd.f32 %v4509_v52, %v4508_v47  ;;  %v279_v5 = vadd.f32 %v4507_v53, %v4506_v48  ;;  %1350 = vmatpush.msrb.mxu0 %v1091_v51  ;;  %v1153_v7 = vld [vmem:[%s4496_s2 + $0x660] sm:$0xff]  ;;  %v224_v10 = vrot.slane %v223_v63, 4 }
  0x36   :  { %v1187_v60 = vld [vmem:[%s4496_s2 + $0x770] sm:$0xff] }
  0x37   :  { %v1123_v2 = vld [vmem:[%s4496_s2 + $0x570] sm:$0xff] }
  0x38   :  { %12 = vsyncpa [#allocation5], 0  ;;  %1369 = vmatpush.msrb.mxu1 %v1125_v58  ;;  %1390 = vmatpush.msrb.mxu2 %v1155_v59  ;;  %v1185_v12 = vld [vmem:[%s4496_s2 + $0x760] sm:$0xff]  ;;  %v1087_v13 = vld [vmem:[%s4496_s2 + $0x450] sm:$0xff]  ;;  %v231_v14 = vrot.slane %v230_v3, 4  ;;  %v273_v15 = vrot.slane %v272_v4, 4  ;;  %v293_v17 = vadd.f32 %v4503_v55, %v4502_v50  ;;  %v211_v20 = vadd.f32 %v210_v8, %v209_v61 }
  0x39   :  { %v280_v16 = vrot.slane %v279_v5, 4  ;;  %1410 = vmatpush.msrb.mxu3 %v1187_v60  ;;  %1351 = vmatpush.msrb.mxu0 %v1089_v1  ;;  %v1121_v18 = vld [vmem:[%s4496_s2 + $0x560] sm:$0xff]  ;;  %v1151_v19 = vld [vmem:[%s4496_s2 + $0x650] sm:$0xff]  ;;  %v218_v21 = vadd.f32 %v217_v9, %v216_v62  ;;  %v225_v22 = vadd.f32 %v224_v10, %v223_v63  ;;  %v287_v23 = vrot.slane %v286_v11, 4  ;;  %v1012_v53 = vld [vmem:[%s4496_s2 + $0x1f8] sm:$0xff]  ;;  %s2146_s20 = smov [#allocation4]  }
  0x3a   :  { %1370 = vmatpush.msrb.mxu1 %v1123_v2  ;;  %1391 = vmatpush.msrb.mxu2 %v1153_v7  ;;  %v1183_v24 = vld [vmem:[%s4496_s2 + $0x750] sm:$0xff]  ;;  %v1085_v25 = vld [vmem:[%s4496_s2 + $0x440] sm:$0xff]  ;;  %v232_v26 = vadd.f32 %v231_v14, %v230_v3  ;;  %v274_v37 = vadd.f32 %v273_v15, %v272_v4  ;;  %v294_v45 = vrot.slane %v293_v17, 4  ;;  %v212_v58 = vrot.slane %v211_v20, 2  ;;  %v980_v36 = vld [vmem:[%s4496_s2 + $0xf8] sm:$0xff]  ;;  %s2109_s23 = sshll.u32 %s4501_s7, 4  ;;  %s2110_s23 = int_to_ptr.hbm [resolvable:$true] %s2109_s23 }
  0x3b   :  { %v281_v44 = vadd.f32 %v280_v16, %v279_v5  ;;  %1411 = vmatpush.msrb.mxu3 %v1185_v12  ;;  %1352 = vmatpush.msrb.mxu0 %v1087_v13  ;;  %v1119_v46 = vld [vmem:[%s4496_s2 + $0x550] sm:$0xff]  ;;  %v1149_v51 = vld [vmem:[%s4496_s2 + $0x640] sm:$0xff]  ;;  %v219_v59 = vrot.slane %v218_v21, 2  ;;  %v226_v60 = vrot.slane %v225_v22, 2  ;;  %v288_v61 = vadd.f32 %v287_v23, %v286_v11  ;;  %v1042_v42 = vld [vmem:[%s4496_s2 + $0x2e8] sm:$0xff] }
  0x3c   :  { %vm369_vm0 = vcmask 1041408   ;;  %1371 = vmatpush.msrb.mxu1 %v1121_v18  ;;  %1392 = vmatpush.msrb.mxu2 %v1151_v19  ;;  %v1181_v62 = vld [vmem:[%s4496_s2 + $0x740] sm:$0xff]  ;;  %v1083_v63 = vld [vmem:[%s4496_s2 + $0x430] sm:$0xff]  ;;  %v233_v1 = vrot.slane %v232_v26, 2  ;;  %v275_v2 = vrot.slane %v274_v37, 2  ;;  %v295_v4 = vadd.f32 %v294_v45, %v293_v17 }
  0x3d   :  { %v282_v3 = vrot.slane %v281_v44, 2  ;;  %1412 = vmatpush.msrb.mxu3 %v1183_v24  ;;  %1353 = vmatpush.msrb.mxu0 %v1085_v25  ;;  %v1117_v5 = vld [vmem:[%s4496_s2 + $0x540] sm:$0xff]  ;;  %v1147_v7 = vld [vmem:[%s4496_s2 + $0x630] sm:$0xff]  ;;  %v213_v8 = vadd.f32 %v212_v58, %v211_v20  ;;  %v220_v9 = vadd.f32 %v219_v59, %v218_v21  ;;  %v227_v10 = vadd.f32 %v226_v60, %v225_v22 }
  0x3e   :  { %v289_v11 = vrot.slane %v288_v61, 2  ;;  %vm371_vm1 = vcmask 1045508   ;;  %1372 = vmatpush.msrb.mxu1 %v1119_v46  ;;  %1393 = vmatpush.msrb.mxu2 %v1149_v51  ;;  %v1179_v12 = vld [vmem:[%s4496_s2 + $0x730] sm:$0xff]  ;;  %v1081_v13 = vld [vmem:[%s4496_s2 + $0x420] sm:$0xff]  ;;  %v234_v14 = vadd.f32 %v233_v1, %v232_v26  ;;  %v276_v15 = vadd.f32 %v275_v2, %v274_v37  ;;  %v41_v46 = vld [vmem:[%s4494_s0 + $0x68] sm:$0xf] }
  0x3f   :  { %v283_v16 = vadd.f32 %v282_v3, %v281_v44  ;;  %v296_v17 = vrot.slane %v295_v4, 2  ;;  %vm373_vm2 = vcmask 1043456   ;;  %1413 = vmatpush.msrb.mxu3 %v1181_v62  ;;  %1354 = vmatpush.msrb.mxu0 %v1083_v63  ;;  %v1115_v18 = vld [vmem:[%s4496_s2 + $0x530] sm:$0xff]  ;;  %v1145_v19 = vld [vmem:[%s4496_s2 + $0x620] sm:$0xff]  ;;  %v214_v21 = vrot.slane %v213_v8, 1 }
  0x40   :  { %v1177_v20 = vld [vmem:[%s4496_s2 + $0x720] sm:$0xff]  ;;  %v221_v22 = vrot.slane %v220_v9, 1  ;;  %v228_v23 = vrot.slane %v227_v10, 1  ;;  %v290_v24 = vadd.f32 %v289_v11, %v288_v61  ;;  %1373 = vmatpush.msrb.mxu1 %v1117_v5  ;;  %1394 = vmatpush.msrb.mxu2 %v1147_v7  ;;  %v1079_v25 = vld [vmem:[%s4496_s2 + $0x410] sm:$0xff]  ;;  %v235_v26 = vrot.slane %v234_v14, 1 }
  0x41   :  { %v277_v37 = vrot.slane %v276_v15, 1  ;;  %v284_v44 = vrot.slane %v283_v16, 1  ;;  %v297_v45 = vadd.f32 %v296_v17, %v295_v4  ;;  %1414 = vmatpush.msrb.mxu3 %v1179_v12  ;;  %1355 = vmatpush.msrb.mxu0 %v1081_v13  ;;  %v1113_v51 = vld [vmem:[%s4496_s2 + $0x520] sm:$0xff]  ;;  %v1143_v58 = vld [vmem:[%s4496_s2 + $0x610] sm:$0xff]  ;;  %v215_v59 = vadd.f32 %v214_v21, %v213_v8  ;;  %v46_v63 = vld [vmem:[%s4494_s0 + $0x8c] sm:$0xf] }
  0x42   :  { %v222_v60 = vadd.f32 %v221_v22, %v220_v9  ;;  %v229_v61 = vadd.f32 %v228_v23, %v227_v10  ;;  %v291_v62 = vrot.slane %v290_v24, 1  ;;  %vm389_vm3 = vcmask 1041409   ;;  %1374 = vmatpush.msrb.mxu1 %v1115_v18  ;;  %1395 = vmatpush.msrb.mxu2 %v1145_v19  ;;  %v1175_v1 = vld [vmem:[%s4496_s2 + $0x710] sm:$0xff]  ;;  %v1077_v7 = vld [vmem:[%s4496_s2 + $0x400] sm:$0xff] }
  0x43   :  { %v236_v2 = vadd.f32 %v235_v26, %v234_v14  ;;  %v278_v3 = vadd.f32 %v277_v37, %v276_v15  ;;  %v285_v4 = vadd.f32 %v284_v44, %v283_v16  ;;  %v298_v5 = vrot.slane %v297_v45, 1  ;;  %1415 = vmatpush.msrb.mxu3 %v1177_v20  ;;  %1356 = vmatpush.msrb.mxu0 %v1079_v25  ;;  %v1111_v11 = vld [vmem:[%s4496_s2 + $0x510] sm:$0xff]  ;;  %v1141_v12 = vld [vmem:[%s4496_s2 + $0x600] sm:$0xff] }
  0x44   :  { %vm391_vm4 = vcmask 1043459   ;;  %v292_v8 = vadd.f32 %v291_v62, %v290_v24  ;;  %vm393_vm5 = vcmask 1045509   ;;  %v435_v9 = vrot.slane %v222_v60, 6  ;;  %1375 = vmatpush.msrb.mxu1 %v1113_v51  ;;  %1396 = vmatpush.msrb.mxu2 %v1143_v58  ;;  %v1173_v17 = vld [vmem:[%s4496_s2 + $0x700] sm:$0xff]  ;;  %v2689_v24 = vld [vmem:[%s4494_s0 + $0x10] sm:$0xff] }
  0x45   :  { %v436_v10 = vrot.slane %v229_v61, 4  ;;  %v73_v13 = vunpack.c.l.bf16 %v41_v46  ;;  %v299_v14 = vadd.f32 %v298_v5, %v297_v45  ;;  %vm395_vm6 = vcmask 1047559   ;;  %1416 = vmatpush.msrb.mxu3 %v1175_v1  ;;  %1357 = vmatpush.msrb.mxu0 %v1077_v7  ;;  %v1109_v21 = vld [vmem:[%s4496_s2 + $0x500] sm:$0xff]  ;;  %v2706_v1 = vld [vmem:[%s4494_s0 + $0x34] sm:$0xff] }
  0x46   :  { %v437_v15 = vrot.slane %v236_v2, 2  ;;  %v441_v16 = vrot.slane %v285_v4, 6  ;;  %v82_v18 = vunpack.c.l.bf16 %v46_v63  ;;  %v442_v19 = vrot.slane %v292_v8, 4  ;;  %1376 = vmatpush.msrb.mxu1 %v1111_v11  ;;  %1397 = vmatpush.msrb.mxu2 %v1141_v12  ;;  %v2711_v2 = vld [vmem:[%s4494_s0 + $0x3c] sm:$0xff]  ;;  %v1235_v55 = vld [vmem:[%s4496_s2 + $0x8f0] sm:$0xff] }
  0x47   :  { %v447_v20 = vsel %vm369_vm0, %v215_v59, %v435_v9  ;;  %v139_v22 = vmax.f32 %v55_v0, %v64_v6  ;;  %v265_v23 = vadd.f32 %v64_v6, %v55_v0  ;;  %v443_v25 = vrot.slane %v299_v14, 2  ;;  %1417 = vmatpush.msrb.mxu3 %v1173_v17  ;;  %v2697_v0 = vld [vmem:[%s4494_s0 + $0x18] sm:$0xff] }
  0x48   :  { %v448_v26 = vsel %vm371_vm1, %v436_v10, %v437_v15  ;;  %v453_v37 = vsel %vm369_vm0, %v278_v3, %v441_v16  ;;  %v202_v44 = vmax.f32 %v73_v13, %v82_v18  ;;  %v328_v57 = vadd.f32 %v82_v18, %v73_v13  ;;  %1377 = vmatpush.msrb.mxu1 %v1109_v21  ;;  %v2728_v21 = vld [vmem:[%s4494_s0 + $0x60] sm:$0xff] }
  0x49   :  { %v449_v45 = vsel %vm373_vm2, %v447_v20, %v448_v26  ;;  %v140_v56 = vrot.slane %v139_v22, 4  ;;  %v266_v46 = vrot.slane %v265_v23, 4  ;;  %v454_v6 = vsel %vm371_vm1, %v442_v19, %v443_v25  ;;  %v2723_v20 = vld [vmem:[%s4494_s0 + $0x58] sm:$0xff] }
  0x4a   :  { %v203_v51 = vrot.slane %v202_v44, 4  ;;  %v51_v58 = vunpack.c.l.bf16 %v2689_v24  ;;  %v52_v59 = vunpack.c.h.bf16 %v2689_v24  ;;  %v455_v60 = vsel %vm373_vm2, %v453_v37, %v454_v6  ;;  %v1000_v24 = vld [vmem:[%s4496_s2 + $0x198] sm:$0xff] }
  0x4b   :  { %v141_v61 = vmax.f32 %v139_v22, %v140_v56  ;;  %v267_v62 = vadd.f32 %v266_v46, %v265_v23  ;;  %v329_v63 = vrot.slane %v328_v57, 4  ;;  %v461_v3 = vrot.slane %v455_v60, 7  ;;  %v2737_v46 = vld [vmem:[%s4494_s0 + $0x7c] sm:$0xff] }
  0x4c   :  { %v204_v4 = vmax.f32 %v202_v44, %v203_v51  ;;  %v53_v5 = vunpack.c.l.bf16 %v2697_v0  ;;  %v54_v7 = vunpack.c.h.bf16 %v2697_v0  ;;  %v60_v11 = vunpack.c.l.bf16 %v2706_v1  ;;  %v1219_v0 = vld [vmem:[%s4496_s2 + $0x870] sm:$0xff] }
  0x4d   :  { %v142_v8 = vrot.slane %v141_v61, 2  ;;  %v268_v9 = vrot.slane %v267_v62, 2  ;;  %v330_v10 = vadd.f32 %v329_v63, %v328_v57  ;;  %v462_v12 = vsel %vm389_vm3, %v461_v3, %v449_v45  ;;  %v2742_v57 = vld [vmem:[%s4494_s0 + $0x84] sm:$0xff]  ;;  %s2107_s0 = sshll.u32 %s2146_s20, 4  ;;  %s2108_s0 = int_to_ptr.vmem [resolvable:$true] %s2107_s0 }
  0x4e   :  { %v205_v13 = vrot.slane %v204_v4, 2  ;;  %v61_v14 = vunpack.c.h.bf16 %v2706_v1  ;;  %v62_v15 = vunpack.c.l.bf16 %v2711_v2  ;;  %v463_v16 = vsel %vm391_vm4, %v461_v3, %v462_v12 }
  0x4f   :  { %v143_v17 = vmax.f32 %v141_v61, %v142_v8  ;;  %v269_v18 = vadd.f32 %v268_v9, %v267_v62  ;;  %v331_v19 = vrot.slane %v330_v10, 2  ;;  %v464_v22 = vsel %vm393_vm5, %v461_v3, %v463_v16 }
  0x50   :  { %v206_v23 = vmax.f32 %v204_v4, %v205_v13  ;;  %v63_v25 = vunpack.c.h.bf16 %v2711_v2  ;;  %v69_v26 = vunpack.c.l.bf16 %v2723_v20  ;;  %v465_v37 = vsel %vm395_vm6, %v461_v3, %v464_v22 }
  0x51   :  { %v144_v44 = vrot.slane %v143_v17, 1  ;;  %v270_v45 = vrot.slane %v269_v18, 1  ;;  %v332_v56 = vadd.f32 %v331_v19, %v330_v10  ;;  %v658_v6 = vmul.f32 0.0625, %v465_v37 }
  0x52   :  { %v207_v51 = vrot.slane %v206_v23, 1  ;;  %v4522_v60 = vunpack.c.h.bf16 %v2723_v20  ;;  %v4520_v61 = vunpack.c.l.bf16 %v2728_v21  ;;  %v4518_v4 = vunpack.c.h.bf16 %v2728_v21 }
  0x53   :  { %v145_v62 = vmax.f32 %v143_v17, %v144_v44  ;;  %v271_v63 = vadd.f32 %v270_v45, %v269_v18  ;;  %v333_v3 = vrot.slane %v332_v56, 1  ;;  %1240 = vst [vmem:[#allocation1] ss:$4 sm:$0xff] %v658_v6  ;;  %v78_v9 = vunpack.c.l.bf16 %v2737_v46 }
  0x54   :  { %v208_v8 = vmax.f32 %v206_v23, %v207_v51  ;;  %v4523_v10 = vunpack.c.h.bf16 %v2737_v46  ;;  %v4521_v12 = vunpack.c.l.bf16 %v2742_v57  ;;  %v4519_v16 = vunpack.c.h.bf16 %v2742_v57 }
  0x55   :  { %v334_v13 = vadd.f32 %v333_v3, %v332_v56  ;;  %v237_v17 = vadd.f32 %v60_v11, %v51_v58  ;;  %v244_v18 = vadd.f32 %v61_v14, %v52_v59  ;;  %v251_v22 = vadd.f32 %v62_v15, %v53_v5 }
  0x56   :  { %v2759_v19 = vrot.slane %v208_v8, 7  ;;  %v258_v23 = vadd.f32 %v63_v25, %v54_v7  ;;  %v300_v37 = vadd.f32 %v78_v9, %v69_v26  ;;  %v307_v6 = vadd.f32 %v4523_v10, %v4522_v60 }
  0x57   :  { %v475_v44 = vrot.slane %v334_v13, 7  ;;  %v238_v45 = vrot.slane %v237_v17, 4  ;;  %v245_v56 = vrot.slane %v244_v18, 4  ;;  %v252_v3 = vrot.slane %v251_v22, 4 }
  0x58   :  { %v407_v51 = vsel %vm389_vm3, %v2759_v19, %v145_v62  ;;  %v259_v8 = vrot.slane %v258_v23, 4  ;;  %v301_v50 = vrot.slane %v300_v37, 4  ;;  %v1044_v62 = vld [vmem:[%s4496_s2 + $0x2f8] sm:$0xff]  ;;  %v308_v34 = vrot.slane %v307_v6, 4 }
  0x59   :  { %v408_v13 = vsel %vm391_vm4, %v2759_v19, %v407_v51  ;;  %v476_v49 = vsel %vm389_vm3, %v475_v44, %v271_v63  ;;  %v239_v54 = vadd.f32 %v238_v45, %v237_v17  ;;  %v246_v48 = vadd.f32 %v245_v56, %v244_v18  ;;  %v1233_v63 = vld [vmem:[%s4496_s2 + $0x8e0] sm:$0xff] }
  0x5a   :  { %v2793_v47 = vsel %vm393_vm5, %v2759_v19, %v408_v13  ;;  %v477_v52 = vsel %vm391_vm4, %v475_v44, %v476_v49  ;;  %v253_v17 = vadd.f32 %v252_v3, %v251_v22  ;;  %v260_v18 = vadd.f32 %v259_v8, %v258_v23  ;;  %v2799_v45 = vld.sshfl [vmem:[#allocation1 + $0x10] sm:$0xff pattern:$0x73625140]  ;;  %v2801_v56 = vld.sshfl [vmem:[#allocation1] sm:$0xff pattern:$0x73625140] }
  0x5b   :  { %v478_v51 = vsel %vm393_vm5, %v475_v44, %v477_v52  ;;  %v1010_v49 = vld [vmem:[%s4496_s2 + $0x1e8] sm:$0xff]  ;;  %v302_v13 = vadd.f32 %v301_v50, %v300_v37  ;;  %v314_v22 = vadd.f32 %v4521_v12, %v4520_v61  ;;  %v321_v23 = vadd.f32 %v4519_v16, %v4518_v4  ;;  %1318 = vmatmul.f32.vlgmr.msra.gmra.mxu2 %v2799_v45  ;;  %v2820_v52 = vld.sshfl [vmem:[#allocation1 + $0x18] sm:$0xff pattern:$0x73625140]  ;;  %v1229_v12 = vld [vmem:[%s4496_s2 + $0x8c0] sm:$0xff] }
  0x5c   :  { %1278 = vmatmul.f32.vlgmr.msra.gmra.mxu0 %v2801_v56  ;;  %v479_v3 = vsel %vm395_vm6, %v475_v44, %v478_v51  ;;  %v2823_v8 = vld.sshfl [vmem:[#allocation1 + $0x8] sm:$0xff pattern:$0x73625140]  ;;  %1338 = vmatmul.f32.vlgmr.msra.gmra.mxu3 %v2820_v52  ;;  %v240_v50 = vrot.slane %v239_v54, 2  ;;  %v247_v37 = vrot.slane %v246_v48, 2  ;;  %v254_v43 = vrot.slane %v253_v17, 2 }
  0x5d   :  { %1422 = vmatpush.msra.mxu0 %v1235_v55  ;;  %485 = vst [vmem:[#allocation3 + $0x10] sm:$0x3] %v479_v3  ;;  %v261_v35 = vrot.slane %v260_v18, 2  ;;  %1462 = vmatpush.msra.mxu2 %v1012_v53  ;;  %v1231_v44 = vld [vmem:[%s4496_s2 + $0x8d0] sm:$0xff]  ;;  %v303_v51 = vrot.slane %v302_v13, 2  ;;  %v315_v41 = vrot.slane %v314_v22, 4  ;;  %v174_v2 = vmax.f32 %v69_v26, %v78_v9 }
  0x5e   :  { %1482 = vmatpush.msra.mxu3 %v1044_v62  ;;  %v322_v33 = vrot.slane %v321_v23, 4  ;;  %1298 = vmatmul.f32.vlgmr.msra.gmra.mxu1 %v2823_v8  ;;  %v978_v53 = vld [vmem:[%s4496_s2 + $0xe8] sm:$0xff]  ;;  %v1008_v55 = vld [vmem:[%s4496_s2 + $0x1d8] sm:$0xff]  ;;  %v241_v62 = vadd.f32 %v240_v50, %v239_v54  ;;  %v248_v3 = vadd.f32 %v247_v37, %v246_v48  ;;  %v255_v40 = vadd.f32 %v254_v43, %v253_v17 }
  0x5f   :  { %1423 = vmatpush.msra.mxu0 %v1233_v63  ;;  %1442 = vmatpush.msra.mxu1 %v980_v36  ;;  %v1040_v4 = vld [vmem:[%s4496_s2 + $0x2d8] sm:$0xff]  ;;  %v262_v16 = vadd.f32 %v261_v35, %v260_v18  ;;  %v304_v61 = vadd.f32 %v303_v51, %v302_v13  ;;  %v309_v63 = vadd.f32 %v308_v34, %v307_v6  ;;  %v1006_v35 = vld [vmem:[%s4496_s2 + $0x1c8] sm:$0xff]  ;;  %v175_v9 = vrot.slane %v174_v2, 4 }
  0x60   :  { %1463 = vmatpush.msra.mxu2 %v1010_v49  ;;  %1483 = vmatpush.msra.mxu3 %v1042_v42  ;;  %v242_v60 = vrot.slane %v241_v62, 1  ;;  %v249_v10 = vrot.slane %v248_v3, 1  ;;  %v256_v54 = vrot.slane %v255_v40, 1  ;;  %v316_v48 = vadd.f32 %v315_v41, %v314_v22  ;;  %v976_v36 = vld [vmem:[%s4496_s2 + $0xd8] sm:$0xff]  ;;  %v1038_v42 = vld [vmem:[%s4496_s2 + $0x2c8] sm:$0xff]  ;;  %v1227_v41 = vld [vmem:[%s4496_s2 + $0x8b0] sm:$0xff] }
  0x61   :  { %1424 = vmatpush.msra.mxu0 %v1231_v44  ;;  %1443 = vmatpush.msra.mxu1 %v978_v53  ;;  %v263_v34 = vrot.slane %v262_v16, 1  ;;  %v305_v43 = vrot.slane %v304_v61, 1  ;;  %v310_v6 = vrot.slane %v309_v63, 2  ;;  %v323_v17 = vadd.f32 %v322_v33, %v321_v23  ;;  %v974_v50 = vld [vmem:[%s4496_s2 + $0xc8] sm:$0xff]  ;;  %v1004_v33 = vld [vmem:[%s4496_s2 + $0x1b8] sm:$0xff] }
  0x62   :  { %1464 = vmatpush.msra.mxu2 %v1008_v55  ;;  %1484 = vmatpush.msra.mxu3 %v1040_v4  ;;  %v243_v18 = vadd.f32 %v242_v60, %v241_v62  ;;  %v250_v49 = vadd.f32 %v249_v10, %v248_v3  ;;  %v257_v13 = vadd.f32 %v256_v54, %v255_v40  ;;  %v317_v22 = vrot.slane %v316_v48, 2  ;;  %v1036_v40 = vld [vmem:[%s4496_s2 + $0x2b8] sm:$0xff]  ;;  %v1002_v54 = vld [vmem:[%s4496_s2 + $0x1a8] sm:$0xff] }
  0x63   :  { %1425 = vmatpush.msra.mxu0 %v1229_v12  ;;  %v264_v37 = vadd.f32 %v263_v34, %v262_v16  ;;  %v2863_v44 = vadd.f32 %v305_v43, %v304_v61  ;;  %v311_v51 = vadd.f32 %v310_v6, %v309_v63  ;;  %v324_v53 = vrot.slane %v323_v17, 2  ;;  %1444 = vmatpush.msra.mxu1 %v976_v36  ;;  %v1225_v16 = vld [vmem:[%s4496_s2 + $0x8a0] sm:$0xff]  ;;  %v972_v61 = vld [vmem:[%s4496_s2 + $0xb8] sm:$0xff]  ;;  %v970_v43 = vld [vmem:[%s4496_s2 + $0xa8] sm:$0xff] }
  0x64   :  { %v657_v23 = vld [vmem:[#allocation3 + $0x10] sm:$0x3]  ;;  %1465 = vmatpush.msra.mxu2 %v1006_v35  ;;  %v318_v4 = vadd.f32 %v317_v22, %v316_v48  ;;  %v438_v10 = vrot.slane %v250_v49, 6  ;;  %v439_v12 = vrot.slane %v257_v13, 4  ;;  %1485 = vmatpush.msra.mxu3 %v1038_v42  ;;  %v111_v63 = vmax.f32 %v51_v58, %v60_v11  ;;  %v1223_v11 = vld [vmem:[%s4496_s2 + $0x890] sm:$0xff]  ;;  %v968_v49 = vld [vmem:[%s4496_s2 + $0x98] sm:$0xff] }
  0x65   :  { %v660_v60 = vmul.f32 0.0625, %v657_v23  ;;  %1426 = vmatpush.msra.mxu0 %v1227_v41  ;;  %v312_v55 = vrot.slane %v311_v51, 1  ;;  %v325_v62 = vadd.f32 %v324_v53, %v323_v17  ;;  %v440_v3 = vrot.slane %v264_v37, 2  ;;  %1445 = vmatpush.msra.mxu1 %v974_v50  ;;  %v1034_v48 = vld [vmem:[%s4496_s2 + $0x2a8] sm:$0xff] }
  0x66   :  { %1466 = vmatpush.msra.mxu2 %v1004_v33  ;;  %v319_v36 = vrot.slane %v318_v4, 1  ;;  %v450_v35 = vsel %vm369_vm0, %v243_v18, %v438_v10  ;;  %1486 = vmatpush.msra.mxu3 %v1036_v40  ;;  %v118_v34 = vmax.f32 %v52_v59, %v61_v14  ;;  %v125_v58 = vmax.f32 %v53_v5, %v62_v15  ;;  %v1032_v59 = vld [vmem:[%s4496_s2 + $0x298] sm:$0xff]  ;;  %v1221_v18 = vld [vmem:[%s4496_s2 + $0x880] sm:$0xff]  ;;  %v998_v23 = vld [vmem:[%s4496_s2 + $0x188] sm:$0xff] }
  0x67   :  { %1251 = vst [vmem:[#allocation1] ss:$4 sm:$0xff] %v660_v60  ;;  %v313_v6 = vadd.f32 %v312_v55, %v311_v51  ;;  %v326_v17 = vrot.slane %v325_v62, 1  ;;  %v451_v1 = vsel %vm371_vm1, %v439_v12, %v440_v3  ;;  %v112_v42 = vrot.slane %v111_v63, 4  ;;  %1427 = vmatpush.msra.mxu0 %v1225_v16  ;;  %1446 = vmatpush.msra.mxu1 %v972_v61  ;;  %v1030_v37 = vld [vmem:[%s4496_s2 + $0x288] sm:$0xff] }
  0x68   :  { %v320_v5 = vadd.f32 %v319_v36, %v318_v4  ;;  %v2907_v14 = vsel %vm373_vm2, %v450_v35, %v451_v1  ;;  %v119_v15 = vrot.slane %v118_v34, 4  ;;  %v126_v41 = vrot.slane %v125_v58, 4  ;;  %1467 = vmatpush.msra.mxu2 %v1002_v54  ;;  %1487 = vmatpush.msra.mxu3 %v1034_v48  ;;  %v966_v10 = vld [vmem:[%s4496_s2 + $0x88] sm:$0xff]  ;;  %v1217_v36 = vld [vmem:[%s4496_s2 + $0x860] sm:$0xff]  ;;  %v964_v35 = vld [vmem:[%s4496_s2 + $0x78] sm:$0xff] }
  0x69   :  { %v327_v13 = vadd.f32 %v326_v17, %v325_v62  ;;  %v444_v22 = vrot.slane %v313_v6, 6  ;;  %v113_v50 = vmax.f32 %v111_v63, %v112_v42  ;;  %v132_v33 = vmax.f32 %v54_v7, %v63_v25  ;;  %1428 = vmatpush.msra.mxu0 %v1223_v11  ;;  %1447 = vmatpush.msra.mxu1 %v970_v43  ;;  %v1028_v62 = vld [vmem:[%s4496_s2 + $0x278] sm:$0xff]  ;;  %v994_v6 = vld [vmem:[%s4496_s2 + $0x168] sm:$0xff] }
  0x6a   :  { %v445_v51 = vrot.slane %v320_v5, 4  ;;  %v120_v53 = vmax.f32 %v118_v34, %v119_v15  ;;  %v127_v40 = vmax.f32 %v125_v58, %v126_v41  ;;  %1468 = vmatpush.msra.mxu2 %v1000_v24  ;;  %1488 = vmatpush.msra.mxu3 %v1032_v59  ;;  %v4524_v16 = vunpack.c.h.bf16 %v2737_v46  ;;  %v1026_v24 = vld [vmem:[%s4496_s2 + $0x268] sm:$0xff]  ;;  %v1215_v41 = vld [vmem:[%s4496_s2 + $0x850] sm:$0xff] }
  0x6b   :  { %v446_v7 = vrot.slane %v327_v13, 2  ;;  %v456_v25 = vsel %vm369_vm0, %v2863_v44, %v444_v22  ;;  %v114_v60 = vrot.slane %v113_v50, 2  ;;  %v133_v4 = vrot.slane %v132_v33, 4  ;;  %1429 = vmatpush.msra.mxu0 %v1221_v18  ;;  %1448 = vmatpush.msra.mxu1 %v968_v49  ;;  %v996_v44 = vld [vmem:[%s4496_s2 + $0x178] sm:$0xff]  ;;  %v962_v18 = vld [vmem:[%s4496_s2 + $0x68] sm:$0xff] }
  0x6c   :  { %v121_v12 = vrot.slane %v120_v53, 2  ;;  %v128_v26 = vrot.slane %v127_v40, 2  ;;  %v4525_v61 = vunpack.c.h.bf16 %v2723_v20  ;;  %1469 = vmatpush.msra.mxu2 %v998_v23  ;;  %1489 = vmatpush.msra.mxu3 %v1030_v37  ;;  %v4526_v48 = vunpack.c.l.bf16 %v2742_v57  ;;  %v1024_v23 = vld [vmem:[%s4496_s2 + $0x258] sm:$0xff] }
  0x6d   :  { %v457_v3 = vsel %vm371_vm1, %v445_v51, %v446_v7  ;;  %v115_v63 = vmax.f32 %v113_v50, %v114_v60  ;;  %v134_v54 = vmax.f32 %v132_v33, %v133_v4  ;;  %v4527_v46 = vunpack.c.l.bf16 %v2728_v21  ;;  %1430 = vmatpush.msra.mxu0 %v1219_v0  ;;  %1449 = vmatpush.msra.mxu1 %v966_v10  ;;  %v992_v33 = vld [vmem:[%s4496_s2 + $0x158] sm:$0xff]  ;;  %v990_v4 = vld [vmem:[%s4496_s2 + $0x148] sm:$0xff] }
  0x6e   :  { %v181_v55 = vmax.f32 %v4525_v61, %v4524_v16  ;;  %v458_v34 = vsel %vm373_vm2, %v456_v25, %v457_v3  ;;  %v122_v58 = vmax.f32 %v120_v53, %v121_v12  ;;  %v129_v11 = vmax.f32 %v127_v40, %v128_v26  ;;  %1470 = vmatpush.msra.mxu2 %v996_v44  ;;  %v1022_v10 = vld [vmem:[%s4496_s2 + $0x248] sm:$0xff]  ;;  %v1211_v61 = vld [vmem:[%s4496_s2 + $0x830] sm:$0xff] }
  0x6f   :  { %v188_v20 = vmax.f32 %v4527_v46, %v4526_v48  ;;  %v176_v43 = vmax.f32 %v174_v2, %v175_v9  ;;  %v468_v17 = vrot.slane %v458_v34, 7  ;;  %v135_v1 = vrot.slane %v134_v54, 2  ;;  %1490 = vmatpush.msra.mxu3 %v1028_v62  ;;  %1431 = vmatpush.msra.mxu0 %v1217_v36  ;;  %v960_v2 = vld [vmem:[%s4496_s2 + $0x58] sm:$0xff] }
  0x70   :  { %v182_v42 = vrot.slane %v181_v55, 4  ;;  %v123_v59 = vrot.slane %v122_v58, 1  ;;  %1450 = vmatpush.msra.mxu1 %v964_v35  ;;  %v116_v13 = vrot.slane %v115_v63, 1  ;;  %1471 = vmatpush.msra.mxu2 %v994_v6  ;;  %v130_v53 = vrot.slane %v129_v11, 1  ;;  %v1209_v35 = vld [vmem:[%s4496_s2 + $0x820] sm:$0xff]  ;;  %v956_v34 = vld [vmem:[%s4496_s2 + $0x38] sm:$0xff] }
  0x71   :  { %v177_v5 = vrot.slane %v176_v43, 2  ;;  %v189_v15 = vrot.slane %v188_v20, 4  ;;  %v469_v49 = vsel %vm389_vm3, %v468_v17, %v2907_v14  ;;  %v136_v22 = vmax.f32 %v134_v54, %v135_v1  ;;  %1491 = vmatpush.msra.mxu3 %v1026_v24  ;;  %v1213_v14 = vld [vmem:[%s4496_s2 + $0x840] sm:$0xff]  ;;  %1432 = vmatpush.msra.mxu0 %v1215_v41  ;;  %v1018_v6 = vld [vmem:[%s4496_s2 + $0x228] sm:$0xff] }
  0x72   :  { %v183_v50 = vmax.f32 %v181_v55, %v182_v42  ;;  %v470_v37 = vsel %vm391_vm4, %v468_v17, %v469_v49  ;;  %v2980_v51 = vmax.f32 %v122_v58, %v123_v59  ;;  %1451 = vmatpush.msra.mxu1 %v962_v18  ;;  %v4528_v26 = vunpack.c.h.bf16 %v2742_v57  ;;  %1472 = vmatpush.msra.mxu2 %v992_v33  ;;  %v958_v55 = vld [vmem:[%s4496_s2 + $0x48] sm:$0xff]  ;;  %v1020_v57 = vld [vmem:[%s4496_s2 + $0x238] sm:$0xff]  ;;  %v1207_v59 = vld [vmem:[%s4496_s2 + $0x810] sm:$0xff] }
  0x73   :  { %v178_v40 = vmax.f32 %v176_v43, %v177_v5  ;;  %v471_v0 = vsel %vm393_vm5, %v468_v17, %v470_v37  ;;  %v137_v7 = vrot.slane %v136_v22, 1  ;;  %v190_v60 = vmax.f32 %v188_v20, %v189_v15  ;;  %1492 = vmatpush.msra.mxu3 %v1024_v23  ;;  %1433 = vmatpush.msra.mxu0 %v1213_v14  ;;  %v954_v5 = vld [vmem:[%s4496_s2 + $0x28] sm:$0xff]  ;;  %v984_v37 = vld [vmem:[%s4496_s2 + $0x118] sm:$0xff] }
  0x74   :  { %v184_v25 = vrot.slane %v183_v50, 2  ;;  %v472_v12 = vsel %vm395_vm6, %v468_v17, %v471_v0  ;;  %v4529_v9 = vunpack.c.h.bf16 %v2728_v21  ;;  %1452 = vmatpush.msra.mxu1 %v960_v2  ;;  %v988_v21 = vld [vmem:[%s4496_s2 + $0x138] sm:$0xff]  ;;  %v117_v48 = vmax.f32 %v115_v63, %v116_v13  ;;  %1473 = vmatpush.msra.mxu2 %v990_v4  ;;  %v982_v4 = vld [vmem:[%s4496_s2 + $0x108] sm:$0xff] }
  0x75   :  { %v659_v44 = vmul.f32 0.0625, %v472_v12  ;;  %v179_v62 = vrot.slane %v178_v40, 1  ;;  %v191_v54 = vrot.slane %v190_v60, 2  ;;  %v3012_v46 = vmax.f32 %v129_v11, %v130_v53  ;;  %1493 = vmatpush.msra.mxu3 %v1022_v10  ;;  %1434 = vmatpush.msra.mxu0 %v1211_v61  ;;  %v986_v11 = vld [vmem:[%s4496_s2 + $0x128] sm:$0xff]  ;;  %v952_v14 = vld [vmem:[%s4496_s2 + $0x18] sm:$0xff] }
  0x76   :  { %v195_v16 = vmax.f32 %v4529_v9, %v4528_v26  ;;  %v185_v3 = vmax.f32 %v183_v50, %v184_v25  ;;  %v3014_v20 = vmax.f32 %v136_v22, %v137_v7  ;;  %v360_v63 = vrot.slane %v2980_v51, 6  ;;  %1453 = vmatpush.msra.mxu1 %v958_v55  ;;  %1474 = vmatpush.msra.mxu2 %v988_v21  ;;  %v1014_v10 = vld [vmem:[%s4496_s2 + $0x208] sm:$0xff]  ;;  %v1172_v21 = vld [vmem:[%s4496_s2 + $0x6f8] sm:$0xff] }
  0x77   :  { %1242 = vst [vmem:[#allocation1 + $0x20] ss:$4 sm:$0xff] %v659_v44  ;;  %v192_v43 = vmax.f32 %v190_v60, %v191_v54  ;;  %v4530_v17 = vunpack.c.l.bf16 %v2473_v29  ;;  %v4531_v1 = vunpack.c.l.bf16 %v2463_v27  ;;  %1494 = vmatpush.msra.mxu3 %v1020_v57  ;;  %v4532_v15 = vunpack.c.h.bf16 %v2473_v29  ;;  %1435 = vmatpush.msra.mxu0 %v1209_v35  ;;  %v1076_v44 = vld [vmem:[%s4496_s2 + $0x3f8] sm:$0xff]  ;;  %v950_v57 = vld [vmem:[%s4496_s2 + $0x8] sm:$0xff] }
  0x78   :  { %v196_v36 = vrot.slane %v195_v16, 4  ;;  %v186_v58 = vrot.slane %v185_v3, 1  ;;  %v4533_v41 = vunpack.c.h.bf16 %v2463_v27  ;;  %v4534_v49 = vunpack.c.l.bf16 %v2478_v30  ;;  %1454 = vmatpush.msra.mxu1 %v956_v34  ;;  %v1016_v27 = vld [vmem:[%s4496_s2 + $0x218] sm:$0xff]  ;;  %1475 = vmatpush.msra.mxu2 %v986_v11 }
  0x79   :  { %v83_v42 = vmax.f32 %v4531_v1, %v4530_v17  ;;  %v4535_v13 = vunpack.c.l.bf16 %v2468_v28  ;;  %v3047_v50 = vmax.f32 %v178_v40, %v179_v62  ;;  %v193_v23 = vrot.slane %v192_v43, 1  ;;  %1495 = vmatpush.msra.mxu3 %v1018_v6  ;;  %v1205_v40 = vld [vmem:[%s4496_s2 + $0x800] sm:$0xff]  ;;  %1436 = vmatpush.msra.mxu0 %v1207_v59  ;;  %v1074_v17 = vld [vmem:[%s4496_s2 + $0x3e8] sm:$0xff]  ;;  %v1108_v1 = vld [vmem:[%s4496_s2 + $0x4f8] sm:$0xff] }
  0x7a   :  { %v197_v24 = vmax.f32 %v195_v16, %v196_v36  ;;  %v90_v18 = vmax.f32 %v4533_v41, %v4532_v15  ;;  %v3049_v33 = vmax.f32 %v185_v3, %v186_v58  ;;  %v361_v53 = vrot.slane %v3012_v46, 4  ;;  %1455 = vmatpush.msra.mxu1 %v954_v5  ;;  %1476 = vmatpush.msra.mxu2 %v984_v37  ;;  %v1138_v37 = vld [vmem:[%s4496_s2 + $0x5e8] sm:$0xff] }
  0x7b   :  { %v97_v22 = vmax.f32 %v4535_v13, %v4534_v49  ;;  %v84_v29 = vrot.slane %v83_v42, 4  ;;  %v3064_v7 = vmax.f32 %v192_v43, %v193_v23  ;;  %v362_v25 = vrot.slane %v3014_v20, 2  ;;  %1496 = vmatpush.msra.mxu3 %v1016_v27  ;;  %1437 = vmatpush.msra.mxu0 %v1205_v40  ;;  %v1170_v27 = vld [vmem:[%s4496_s2 + $0x6e8] sm:$0xff] }
  0x7c   :  { %v198_v51 = vrot.slane %v197_v24, 2  ;;  %v91_v2 = vrot.slane %v90_v18, 4  ;;  %v375_v60 = vsel %vm369_vm0, %v117_v48, %v360_v63  ;;  %v4536_v12 = vunpack.c.h.bf16 %v2478_v30  ;;  %1456 = vmatpush.msra.mxu1 %v952_v14  ;;  %1477 = vmatpush.msra.mxu2 %v982_v4  ;;  %v1072_v14 = vld [vmem:[%s4496_s2 + $0x3d8] sm:$0xff]  ;;  %v1106_v4 = vld [vmem:[%s4496_s2 + $0x4e8] sm:$0xff] }
  0x7d   :  { %v98_v0 = vrot.slane %v97_v22, 4  ;;  %v4537_v26 = vunpack.c.h.bf16 %v2468_v28  ;;  %v366_v62 = vrot.slane %v3049_v33, 6  ;;  %v367_v3 = vrot.slane %v3064_v7, 4  ;;  %v1140_v28 = vld [vmem:[%s4496_s2 + $0x5f8] sm:$0xff]  ;;  %1497 = vmatpush.msra.mxu3 %v1014_v10 }
  0x7e   :  { %v199_v16 = vmax.f32 %v197_v24, %v198_v51  ;;  %v92_v61 = vmax.f32 %v90_v18, %v91_v2  ;;  %v85_v54 = vmax.f32 %v83_v42, %v84_v29  ;;  %v3092_v48 = vld.sshfl [vmem:[#allocation1 + $0x30] sm:$0xff pattern:$0x73625140]  ;;  %v3094_v46 = vld.sshfl [vmem:[#allocation1 + $0x20] sm:$0xff pattern:$0x73625140]  ;;  %v4538_v20 = vunpack.c.l.bf16 %v2500_v38  ;;  %1457 = vmatpush.msra.mxu1 %v950_v57 }
  0x7f   :  { %v104_v9 = vmax.f32 %v4537_v26, %v4536_v12  ;;  %v99_v55 = vmax.f32 %v97_v22, %v98_v0  ;;  %v4539_v36 = vunpack.c.l.bf16 %v2483_v31  ;;  %v4540_v34 = vunpack.c.h.bf16 %v2500_v38  ;;  %1398 = vmatmul.f32.vlgmr.msrb.gmra.mxu2 %v3092_v48  ;;  %1358 = vmatmul.f32.vlgmr.msrb.gmra.mxu0 %v3094_v46  ;;  %v3116_v38 = vld.sshfl [vmem:[#allocation1 + $0x38] sm:$0xff pattern:$0x73625140]  ;;  %v3120_v5 = vld.sshfl [vmem:[#allocation1 + $0x28] sm:$0xff pattern:$0x73625140] }
  0x80   :  { %v4541_v58 = vunpack.c.h.bf16 %v2483_v31  ;;  %v4542_v63 = vunpack.c.l.bf16 %v2505_v39  ;;  %v4543_v11 = vunpack.c.l.bf16 %v2488_v32  ;;  %v200_v31 = vrot.slane %v199_v16, 1  ;;  %1418 = vmatmul.f32.vlgmr.msrb.gmra.mxu3 %v3116_v38  ;;  %1502 = vmatpush.msrb.mxu0 %v1076_v44  ;;  %v1136_v10 = vld [vmem:[%s4496_s2 + $0x5d8] sm:$0xff] }
  0x81   :  { %v105_v30 = vrot.slane %v104_v9, 4  ;;  %v146_v35 = vmax.f32 %v4539_v36, %v4538_v20  ;;  %v376_v42 = vsel %vm371_vm1, %v361_v53, %v362_v25  ;;  %v93_v24 = vrot.slane %v92_v61, 2  ;;  %1378 = vmatmul.f32.vlgmr.msrb.gmra.mxu1 %v3120_v5  ;;  %1542 = vmatpush.msrb.mxu2 %v1140_v28  ;;  %v3137_v25 = vld.sshfl [vmem:[#allocation1] sm:$0xff pattern:$0x73625140]  ;;  %v1070_v28 = vld [vmem:[%s4496_s2 + $0x3c8] sm:$0xff] }
  0x82   :  { %v153_v43 = vmax.f32 %v4541_v58, %v4540_v34  ;;  %v160_v6 = vmax.f32 %v4543_v11, %v4542_v63  ;;  %v100_v59 = vrot.slane %v99_v55, 2  ;;  %v201_v13 = vmax.f32 %v199_v16, %v200_v31  ;;  %1562 = vmatpush.msrb.mxu3 %v1172_v21  ;;  %1503 = vmatpush.msrb.mxu0 %v1074_v17  ;;  %v1104_v21 = vld [vmem:[%s4496_s2 + $0x4d8] sm:$0xff]  ;;  %v1102_v63 = vld [vmem:[%s4496_s2 + $0x4c8] sm:$0xff] }
  0x83   :  { %v106_v15 = vmax.f32 %v104_v9, %v105_v30  ;;  %v147_v41 = vrot.slane %v146_v35, 4  ;;  %v86_v22 = vrot.slane %v85_v54, 2  ;;  %v94_v33 = vmax.f32 %v92_v61, %v93_v24  ;;  %1522 = vmatpush.msrb.mxu1 %v1108_v1  ;;  %1543 = vmatpush.msrb.mxu2 %v1138_v37  ;;  %v1164_v17 = vld [vmem:[%s4496_s2 + $0x6b8] sm:$0xff] }
  0x84   :  { %v154_v18 = vrot.slane %v153_v43, 4  ;;  %v161_v49 = vrot.slane %v160_v6, 4  ;;  %v3123_v23 = vmax.f32 %v99_v55, %v100_v59  ;;  %v368_v2 = vrot.slane %v201_v13, 2  ;;  %1563 = vmatpush.msrb.mxu3 %v1170_v27  ;;  %1504 = vmatpush.msrb.mxu0 %v1072_v14  ;;  %v1066_v59 = vld [vmem:[%s4496_s2 + $0x3a8] sm:$0xff]  ;;  %v1128_v14 = vld [vmem:[%s4496_s2 + $0x598] sm:$0xff] }
  0x85   :  { %v107_v29 = vrot.slane %v106_v15, 2  ;;  %v148_v51 = vmax.f32 %v146_v35, %v147_v41  ;;  %v377_v0 = vsel %vm373_vm2, %v375_v60, %v376_v42  ;;  %v381_v7 = vsel %vm369_vm0, %v3047_v50, %v366_v62  ;;  %v1168_v50 = vld [vmem:[%s4496_s2 + $0x6d8] sm:$0xff]  ;;  %1523 = vmatpush.msrb.mxu1 %v1106_v4  ;;  %1544 = vmatpush.msrb.mxu2 %v1136_v10  ;;  %v1062_v4 = vld [vmem:[%s4496_s2 + $0x388] sm:$0xff] }
  0x86   :  { %v155_v53 = vmax.f32 %v153_v43, %v154_v18  ;;  %v162_v40 = vmax.f32 %v160_v6, %v161_v49  ;;  %v382_v60 = vsel %vm371_vm1, %v367_v3, %v368_v2  ;;  %v3149_v61 = vmax.f32 %v85_v54, %v86_v22  ;;  %1564 = vmatpush.msrb.mxu3 %v1168_v50  ;;  %v1068_v43 = vld [vmem:[%s4496_s2 + $0x3b8] sm:$0xff]  ;;  %v1130_v22 = vld [vmem:[%s4496_s2 + $0x5a8] sm:$0xff] }
  0x87   :  { %v108_v12 = vmax.f32 %v106_v15, %v107_v29  ;;  %v149_v26 = vrot.slane %v148_v51, 2  ;;  %v95_v55 = vrot.slane %v94_v33, 1  ;;  %v4544_v44 = vunpack.c.h.bf16 %v2505_v39  ;;  %v1166_v39 = vld [vmem:[%s4496_s2 + $0x6c8] sm:$0xff]  ;;  %1438 = vmatmul.f32.vlgmr.msra.gmra.mxu0 %v3137_v25  ;;  %1524 = vmatpush.msrb.mxu1 %v1104_v21  ;;  %v1132_v6 = vld [vmem:[%s4496_s2 + $0x5b8] sm:$0xff] }
  0x88   :  { %v156_v9 = vrot.slane %v155_v53, 2  ;;  %v163_v16 = vrot.slane %v162_v40, 2  ;;  %v4545_v62 = vunpack.c.h.bf16 %v2488_v32  ;;  %v383_v57 = vsel %vm373_vm2, %v381_v7, %v382_v60  ;;  %v1134_v32 = vld [vmem:[%s4496_s2 + $0x5c8] sm:$0xff]  ;;  %1505 = vmatpush.msrb.mxu0 %v1070_v28  ;;  %1565 = vmatpush.msrb.mxu3 %v1166_v39  ;;  %v1100_v15 = vld [vmem:[%s4496_s2 + $0x4b8] sm:$0xff] }
  0x89   :  { %v102_v3 = vrot.slane %v3123_v23, 1  ;;  %v109_v54 = vrot.slane %v108_v12, 1  ;;  %v399_v36 = vrot.slane %v383_v57, 7  ;;  %v150_v35 = vmax.f32 %v148_v51, %v149_v26  ;;  %1545 = vmatpush.msrb.mxu2 %v1134_v32  ;;  %1525 = vmatpush.msrb.mxu1 %v1102_v63  ;;  %v1160_v2 = vld [vmem:[%s4496_s2 + $0x698] sm:$0xff]  ;;  %v1158_v50 = vld [vmem:[%s4496_s2 + $0x688] sm:$0xff] }
  0x8a   :  { %v167_v30 = vmax.f32 %v4545_v62, %v4544_v44  ;;  %v157_v20 = vmax.f32 %v155_v53, %v156_v9  ;;  %v164_v34 = vmax.f32 %v162_v40, %v163_v16  ;;  %v3183_v31 = vmax.f32 %v94_v33, %v95_v55  ;;  %1506 = vmatpush.msrb.mxu0 %v1068_v43  ;;  %v1162_v33 = vld [vmem:[%s4496_s2 + $0x6a8] sm:$0xff]  ;;  %v1096_v10 = vld [vmem:[%s4496_s2 + $0x498] sm:$0xff] }
  0x8b   :  { %v400_v1 = vsel %vm389_vm3, %v399_v36, %v377_v0  ;;  %v88_v18 = vrot.slane %v3149_v61, 1  ;;  %v103_v49 = vmax.f32 %v3123_v23, %v102_v3  ;;  %v110_v13 = vmax.f32 %v108_v12, %v109_v54  ;;  %1546 = vmatpush.msrb.mxu2 %v1132_v6  ;;  %1566 = vmatpush.msrb.mxu3 %v1164_v17  ;;  %v1064_v23 = vld [vmem:[%s4496_s2 + $0x398] sm:$0xff]  ;;  %v1098_v53 = vld [vmem:[%s4496_s2 + $0x4a8] sm:$0xff] }
  0x8c   :  { %v168_v58 = vrot.slane %v167_v30, 4  ;;  %v158_v11 = vrot.slane %v157_v20, 1  ;;  %v165_v42 = vrot.slane %v164_v34, 1  ;;  %v401_v41 = vsel %vm391_vm4, %v399_v36, %v400_v1  ;;  %1507 = vmatpush.msrb.mxu0 %v1066_v59  ;;  %1526 = vmatpush.msrb.mxu1 %v1100_v15  ;;  %v1126_v16 = vld [vmem:[%s4496_s2 + $0x588] sm:$0xff]  ;;  %v1124_v28 = vld [vmem:[%s4496_s2 + $0x578] sm:$0xff] }
  0x8d   :  { %v402_v37 = vsel %vm393_vm5, %v399_v36, %v401_v41  ;;  %v151_v27 = vrot.slane %v150_v35, 1  ;;  %1547 = vmatpush.msrb.mxu2 %v1130_v22  ;;  %1567 = vmatpush.msrb.mxu3 %v1162_v33  ;;  %v89_v12 = vmax.f32 %v3149_v61, %v88_v18  ;;  %v357_v26 = vrot.slane %v3183_v31, 6  ;;  %v1060_v61 = vld [vmem:[%s4496_s2 + $0x378] sm:$0xff]  ;;  %v1058_v54 = vld [vmem:[%s4496_s2 + $0x368] sm:$0xff] }
  0x8e   :  { %v169_v24 = vmax.f32 %v167_v30, %v168_v58  ;;  %v159_v29 = vmax.f32 %v157_v20, %v158_v11  ;;  %v403_v40 = vsel %vm395_vm6, %v399_v36, %v402_v37  ;;  %v166_v0 = vmax.f32 %v164_v34, %v165_v42  ;;  %1508 = vmatpush.msrb.mxu0 %v1064_v23  ;;  %v1094_v30 = vld [vmem:[%s4496_s2 + $0x488] sm:$0xff]  ;;  %v1156_v21 = vld [vmem:[%s4496_s2 + $0x678] sm:$0xff] }
  0x8f   :  { %1627 = vst [vmem:[#allocation1 + $0x20] ss:$4 sm:$0xff] %v403_v40  ;;  %v358_v9 = vrot.slane %v103_v49, 4  ;;  %1527 = vmatpush.msrb.mxu1 %v1098_v53  ;;  %v152_v60 = vmax.f32 %v150_v35, %v151_v27  ;;  %v359_v44 = vrot.slane %v110_v13, 2  ;;  %1548 = vmatpush.msrb.mxu2 %v1128_v14  ;;  %v1092_v20 = vld [vmem:[%s4496_s2 + $0x478] sm:$0xff]  ;;  %v1122_v32 = vld [vmem:[%s4496_s2 + $0x568] sm:$0xff]  ;;  %v370_v35 = vsel %vm369_vm0, %v89_v12, %v357_v26 }
  0x90   :  { %v170_v51 = vrot.slane %v169_v24, 2  ;;  %v363_v62 = vrot.slane %v159_v29, 6  ;;  %1568 = vmatpush.msrb.mxu3 %v1160_v2  ;;  %1509 = vmatpush.msrb.mxu0 %v1062_v4  ;;  %v364_v3 = vrot.slane %v166_v0, 4  ;;  %v1154_v39 = vld [vmem:[%s4496_s2 + $0x668] sm:$0xff]  ;;  %v1056_v43 = vld [vmem:[%s4496_s2 + $0x358] sm:$0xff] }
  0x91   :  { %1528 = vmatpush.msrb.mxu1 %v1096_v10  ;;  %1549 = vmatpush.msrb.mxu2 %v1126_v16  ;;  %v372_v34 = vsel %vm371_vm1, %v358_v9, %v359_v44  ;;  %v1090_v63 = vld [vmem:[%s4496_s2 + $0x468] sm:$0xff]  ;;  %v1120_v11 = vld [vmem:[%s4496_s2 + $0x558] sm:$0xff]  ;;  %v691_v16 = vld [vmem:[%s4495_s1 + $0xf0] sm:$0xff] }
  0x92   :  { %v171_v7 = vmax.f32 %v169_v24, %v170_v51  ;;  %1569 = vmatpush.msrb.mxu3 %v1158_v50  ;;  %1510 = vmatpush.msrb.mxu0 %v1060_v61  ;;  %v378_v58 = vsel %vm369_vm0, %v152_v60, %v363_v62  ;;  %v1152_v6 = vld [vmem:[%s4496_s2 + $0x658] sm:$0xff]  ;;  %v1054_v1 = vld [vmem:[%s4496_s2 + $0x348] sm:$0xff]  ;;  %v374_v42 = vsel %vm373_vm2, %v370_v35, %v372_v34  ;;  %v723_v50 = vld [vmem:[%s4495_s1 + $0x1f0] sm:$0xff] }
  0x93   :  { %1529 = vmatpush.msrb.mxu1 %v1094_v30  ;;  %1550 = vmatpush.msrb.mxu2 %v1124_v28  ;;  %v1088_v31 = vld [vmem:[%s4496_s2 + $0x458] sm:$0xff]  ;;  %v1118_v59 = vld [vmem:[%s4496_s2 + $0x548] sm:$0xff]  ;;  %v689_v44 = vld [vmem:[%s4495_s1 + $0xe0] sm:$0xff] }
  0x94   :  { %v172_v55 = vrot.slane %v171_v7, 1  ;;  %1570 = vmatpush.msrb.mxu3 %v1156_v21  ;;  %1511 = vmatpush.msrb.mxu0 %v1058_v54  ;;  %v1150_v15 = vld [vmem:[%s4496_s2 + $0x648] sm:$0xff]  ;;  %v1052_v18 = vld [vmem:[%s4496_s2 + $0x338] sm:$0xff]  ;;  %v721_v62 = vld [vmem:[%s4495_s1 + $0x1e0] sm:$0xff] }
  0x95   :  { %1530 = vmatpush.msrb.mxu1 %v1092_v20  ;;  %1551 = vmatpush.msrb.mxu2 %v1122_v32  ;;  %v1086_v49 = vld [vmem:[%s4496_s2 + $0x448] sm:$0xff]  ;;  %v1116_v13 = vld [vmem:[%s4496_s2 + $0x538] sm:$0xff]  ;;  %v687_v30 = vld [vmem:[%s4495_s1 + $0xd0] sm:$0xff] }
  0x96   :  { %v173_v57 = vmax.f32 %v171_v7, %v172_v55  ;;  %1571 = vmatpush.msrb.mxu3 %v1154_v39  ;;  %1512 = vmatpush.msrb.mxu0 %v1056_v43  ;;  %v1148_v22 = vld [vmem:[%s4496_s2 + $0x638] sm:$0xff]  ;;  %v1050_v37 = vld [vmem:[%s4496_s2 + $0x328] sm:$0xff]  ;;  %v719_v28 = vld [vmem:[%s4495_s1 + $0x1d0] sm:$0xff] }
  0x97   :  { %1531 = vmatpush.msrb.mxu1 %v1090_v63  ;;  %1552 = vmatpush.msrb.mxu2 %v1120_v11  ;;  %v1084_v27 = vld [vmem:[%s4496_s2 + $0x438] sm:$0xff]  ;;  %v1114_v51 = vld [vmem:[%s4496_s2 + $0x528] sm:$0xff]  ;;  %v683_v32 = vld [vmem:[%s4495_s1 + $0xb0] sm:$0xff] }
  0x98   :  { %v365_v36 = vrot.slane %v173_v57, 2  ;;  %1572 = vmatpush.msrb.mxu3 %v1152_v6  ;;  %1513 = vmatpush.msrb.mxu0 %v1054_v1  ;;  %v1146_v23 = vld [vmem:[%s4496_s2 + $0x628] sm:$0xff]  ;;  %v1048_v40 = vld [vmem:[%s4496_s2 + $0x318] sm:$0xff]  ;;  %v685_v57 = vld [vmem:[%s4495_s1 + $0xc0] sm:$0xff] }
  0x99   :  { %1532 = vmatpush.msrb.mxu1 %v1088_v31  ;;  %1553 = vmatpush.msrb.mxu2 %v1118_v59  ;;  %v1082_v14 = vld [vmem:[%s4496_s2 + $0x428] sm:$0xff]  ;;  %v1112_v0 = vld [vmem:[%s4496_s2 + $0x518] sm:$0xff]  ;;  %v681_v35 = vld [vmem:[%s4495_s1 + $0xa0] sm:$0xff] }
  0x9a   :  { %v379_v17 = vsel %vm371_vm1, %v364_v3, %v365_v36  ;;  %1573 = vmatpush.msrb.mxu3 %v1150_v15  ;;  %1514 = vmatpush.msrb.mxu0 %v1052_v18  ;;  %v1144_v7 = vld [vmem:[%s4496_s2 + $0x618] sm:$0xff]  ;;  %v1046_v4 = vld [vmem:[%s4496_s2 + $0x308] sm:$0xff]  ;;  %v717_v3 = vld [vmem:[%s4495_s1 + $0x1c0] sm:$0xff] }
  0x9b   :  { %v380_v24 = vsel %vm373_vm2, %v378_v58, %v379_v17  ;;  %1533 = vmatpush.msrb.mxu1 %v1086_v49  ;;  %1554 = vmatpush.msrb.mxu2 %v1116_v13  ;;  %v1080_v10 = vld [vmem:[%s4496_s2 + $0x418] sm:$0xff]  ;;  %v1110_v12 = vld [vmem:[%s4496_s2 + $0x508] sm:$0xff]  ;;  %v679_v58 = vld [vmem:[%s4495_s1 + $0x90] sm:$0xff] }
  0x9c   :  { %v388_v41 = vrot.slane %v380_v24, 7  ;;  %1574 = vmatpush.msrb.mxu3 %v1148_v22  ;;  %1515 = vmatpush.msrb.mxu0 %v1050_v37  ;;  %v1142_v26 = vld [vmem:[%s4496_s2 + $0x608] sm:$0xff]  ;;  %v1204_v9 = vld [vmem:[%s4496_s2 + $0x7f8] sm:$0xff]  ;;  %v711_v43 = vld [vmem:[%s4495_s1 + $0x190] sm:$0xff] }
  0x9d   :  { %1534 = vmatpush.msrb.mxu1 %v1084_v27  ;;  %1555 = vmatpush.msrb.mxu2 %v1114_v51  ;;  %v1078_v60 = vld [vmem:[%s4496_s2 + $0x408] sm:$0xff]  ;;  %v1236_v55 = vld [vmem:[%s4496_s2 + $0x8f8] sm:$0xff]  ;;  %v677_v11 = vld [vmem:[%s4495_s1 + $0x80] sm:$0xff] }
  0x9e   :  { %v390_v33 = vsel %vm389_vm3, %v388_v41, %v374_v42  ;;  %1575 = vmatpush.msrb.mxu3 %v1146_v23  ;;  %1516 = vmatpush.msrb.mxu0 %v1048_v40  ;;  %v1200_v61 = vld [vmem:[%s4496_s2 + $0x7d8] sm:$0xff]  ;;  %v1230_v20 = vld [vmem:[%s4496_s2 + $0x8c8] sm:$0xff]  ;;  %v709_v6 = vld [vmem:[%s4495_s1 + $0x180] sm:$0xff] }
  0x9f   :  { %v392_v29 = vsel %vm391_vm4, %v388_v41, %v390_v33  ;;  %1535 = vmatpush.msrb.mxu1 %v1082_v14  ;;  %1556 = vmatpush.msrb.mxu2 %v1112_v0  ;;  %v1232_v21 = vld [vmem:[%s4496_s2 + $0x8d8] sm:$0xff]  ;;  %v1194_v39 = vld [vmem:[%s4496_s2 + $0x7a8] sm:$0xff]  ;;  %v675_v31 = vld [vmem:[%s4495_s1 + $0x70] sm:$0xff] }
  0xa0   :  { %v394_v53 = vsel %vm393_vm5, %v388_v41, %v392_v29  ;;  %1576 = vmatpush.msrb.mxu3 %v1144_v7  ;;  %1478 = vmatmul.f32.vlgmr.msra.gmra.mxu2 %v2823_v8  ;;  %v1202_v8 = vld [vmem:[%s4496_s2 + $0x7e8] sm:$0xff]  ;;  %v1196_v54 = vld [vmem:[%s4496_s2 + $0x7b8] sm:$0xff]  ;;  %v707_v42 = vld [vmem:[%s4495_s1 + $0x170] sm:$0xff] }
  0xa1   :  { %v396_v2 = vsel %vm395_vm6, %v388_v41, %v394_v53  ;;  %1517 = vmatpush.msrb.mxu0 %v1046_v4  ;;  %1536 = vmatpush.msrb.mxu1 %v1080_v10  ;;  %v1228_v36 = vld [vmem:[%s4496_s2 + $0x8b8] sm:$0xff]  ;;  %v1226_v34 = vld [vmem:[%s4496_s2 + $0x8a8] sm:$0xff]  ;;  %v673_v15 = vld [vmem:[%s4495_s1 + $0x60] sm:$0xff] }
  0xa2   :  { %1625 = vst [vmem:[#allocation1] ss:$4 sm:$0xff] %v396_v2  ;;  %1557 = vmatpush.msrb.mxu2 %v1110_v12  ;;  %1577 = vmatpush.msrb.mxu3 %v1142_v26  ;;  %v1190_v63 = vld [vmem:[%s4496_s2 + $0x788] sm:$0xff]  ;;  %v1188_v17 = vld [vmem:[%s4496_s2 + $0x778] sm:$0xff]  ;;  %v705_v41 = vld [vmem:[%s4495_s1 + $0x160] sm:$0xff] }
  0xa3   :  { %1582 = vmatpush.msra.mxu0 %v1204_v9  ;;  %1498 = vmatmul.f32.vlgmr.msra.gmra.mxu3 %v2799_v45  ;;  %v1234_v45 = vld [vmem:[%s4496_s2 + $0x8e8] sm:$0xff]  ;;  %v1220_v59 = vld [vmem:[%s4496_s2 + $0x878] sm:$0xff]  ;;  %v671_v13 = vld [vmem:[%s4495_s1 + $0x50] sm:$0xff] }
  0xa4   :  { %1647 = vmatpush.msra.mxu2 %v691_v16  ;;  %1667 = vmatpush.msra.mxu3 %v723_v50  ;;  %v1222_v1 = vld [vmem:[%s4496_s2 + $0x888] sm:$0xff]  ;;  %v1184_v18 = vld [vmem:[%s4496_s2 + $0x758] sm:$0xff]  ;;  %v703_v22 = vld [vmem:[%s4495_s1 + $0x150] sm:$0xff] }
  0xa5   :  { %1537 = vmatpush.msrb.mxu1 %v1078_v60  ;;  %1583 = vmatpush.msra.mxu0 %v1202_v8  ;;  %v1186_v24 = vld [vmem:[%s4496_s2 + $0x768] sm:$0xff]  ;;  %v1216_v37 = vld [vmem:[%s4496_s2 + $0x858] sm:$0xff]  ;;  %v669_v27 = vld [vmem:[%s4495_s1 + $0x40] sm:$0xff] }
  0xa6   :  { %1458 = vmatmul.f32.vlgmr.msra.gmra.mxu1 %v2801_v56  ;;  %1648 = vmatpush.msra.mxu2 %v689_v44  ;;  %v1198_v56 = vld [vmem:[%s4496_s2 + $0x7c8] sm:$0xff]  ;;  %v701_v29 = vld [vmem:[%s4495_s1 + $0x140] sm:$0xff]  ;;  %v1180_v51 = vld [vmem:[%s4496_s2 + $0x738] sm:$0xff] }
  0xa7   :  { %1602 = vmatpush.msra.mxu1 %v1236_v55  ;;  %1668 = vmatpush.msra.mxu3 %v721_v62  ;;  %v1218_v49 = vld [vmem:[%s4496_s2 + $0x868] sm:$0xff]  ;;  %v667_v53 = vld [vmem:[%s4495_s1 + $0x30] sm:$0xff]  ;;  %v1212_v2 = vld [vmem:[%s4496_s2 + $0x838] sm:$0xff] }
  0xa8   :  { %1584 = vmatpush.msra.mxu0 %v1200_v61  ;;  %1649 = vmatpush.msra.mxu2 %v687_v30  ;;  %v1182_v33 = vld [vmem:[%s4496_s2 + $0x748] sm:$0xff]  ;;  %v699_v40 = vld [vmem:[%s4495_s1 + $0x130] sm:$0xff]  ;;  %v665_v0 = vld [vmem:[%s4495_s1 + $0x20] sm:$0xff] }
  0xa9   :  { %1603 = vmatpush.msra.mxu1 %v1234_v45  ;;  %1669 = vmatpush.msra.mxu3 %v719_v28  ;;  %v1214_v23 = vld [vmem:[%s4496_s2 + $0x848] sm:$0xff]  ;;  %v697_v7 = vld [vmem:[%s4495_s1 + $0x120] sm:$0xff]  ;;  %v1176_v4 = vld [vmem:[%s4496_s2 + $0x718] sm:$0xff] }
  0xaa   :  { %1558 = vmatmul.f32.vlgmr.msrb.gmra.mxu2 %v3120_v5  ;;  %1585 = vmatpush.msra.mxu0 %v1198_v56  ;;  %v715_v5 = vld [vmem:[%s4495_s1 + $0x1b0] sm:$0xff]  ;;  %v1178_v14 = vld [vmem:[%s4496_s2 + $0x728] sm:$0xff]  ;;  %v1208_v16 = vld [vmem:[%s4496_s2 + $0x818] sm:$0xff] }
  0xab   :  { %1604 = vmatpush.msra.mxu1 %v1232_v21  ;;  %1650 = vmatpush.msra.mxu2 %v685_v57  ;;  %v1210_v10 = vld [vmem:[%s4496_s2 + $0x828] sm:$0xff]  ;;  %v663_v12 = vld [vmem:[%s4495_s1 + $0x10] sm:$0xff]  ;;  %v661_v50 = vld [vmem:[%s4495_s1] sm:$0xff] }
  0xac   :  { %1670 = vmatpush.msra.mxu3 %v717_v3  ;;  %1518 = vmatmul.f32.vlgmr.msrb.gmra.mxu0 %v2820_v52  ;;  %v713_v52 = vld [vmem:[%s4495_s1 + $0x1a0] sm:$0xff]  ;;  %v695_v26 = vld [vmem:[%s4495_s1 + $0x110] sm:$0xff]  ;;  %v1174_v9 = vld [vmem:[%s4496_s2 + $0x708] sm:$0xff] }
  0xad   :  { %1578 = vmatmul.f32.vlgmr.msrb.gmra.mxu3 %v3092_v48  ;;  %1586 = vmatpush.msra.mxu0 %v1196_v54  ;;  %v1192_v48 = vld [vmem:[%s4496_s2 + $0x798] sm:$0xff]  ;;  %v693_v60 = vld [vmem:[%s4495_s1 + $0x100] sm:$0xff]  ;;  %v755_v55 = vld [vmem:[%s4495_s1 + $0x2f0] sm:$0xff] }
  0xae   :  { %1605 = vmatpush.msra.mxu1 %v1230_v20  ;;  %1651 = vmatpush.msra.mxu2 %v683_v32  ;;  %v3533_v8 = vld.sshfl [vmem:[#allocation1] sm:$0xff pattern:$0x73625140]  ;;  %v819_v44 = vld [vmem:[%s4495_s1 + $0x4f0] sm:$0xff]  ;;  %v1206_v61 = vld [vmem:[%s4496_s2 + $0x808] sm:$0xff] }
  0xaf   :  { %1671 = vmatpush.msra.mxu3 %v715_v5  ;;  %1538 = vmatmul.f32.vlgmr.msrb.gmra.mxu1 %v3094_v46  ;;  %v1224_v46 = vld [vmem:[%s4496_s2 + $0x898] sm:$0xff]  ;;  %v851_v62 = vld [vmem:[%s4495_s1 + $0x5f0] sm:$0xff]  ;;  %v3548_v45 = vld.sshfl [vmem:[#allocation1 + $0x8] sm:$0xff pattern:$0x73625140] }
  0xb0   :  { %1587 = vmatpush.msra.mxu0 %v1194_v39  ;;  %1606 = vmatpush.msra.mxu1 %v1228_v36  ;;  %v753_v30 = vld [vmem:[%s4495_s1 + $0x2e0] sm:$0xff]  ;;  %v787_v28 = vld [vmem:[%s4495_s1 + $0x3f0] sm:$0xff] }
  0xb1   :  { %1652 = vmatpush.msra.mxu2 %v681_v35  ;;  %1672 = vmatpush.msra.mxu3 %v713_v52  ;;  %v849_v56 = vld [vmem:[%s4495_s1 + $0x5e0] sm:$0xff]  ;;  %v751_v21 = vld [vmem:[%s4495_s1 + $0x2d0] sm:$0xff] }
  0xb2   :  { %1588 = vmatpush.msra.mxu0 %v1192_v48  ;;  %1607 = vmatpush.msra.mxu1 %v1226_v34  ;;  %v785_v57 = vld [vmem:[%s4495_s1 + $0x3e0] sm:$0xff]  ;;  %v815_v3 = vld [vmem:[%s4495_s1 + $0x4d0] sm:$0xff] }
  0xb3   :  { %1653 = vmatpush.msra.mxu2 %v679_v58  ;;  %1673 = vmatpush.msra.mxu3 %v711_v43  ;;  %v847_v54 = vld [vmem:[%s4495_s1 + $0x5d0] sm:$0xff]  ;;  %v749_v20 = vld [vmem:[%s4495_s1 + $0x2c0] sm:$0xff] }
  0xb4   :  { %1589 = vmatpush.msra.mxu0 %v1190_v63  ;;  %1608 = vmatpush.msra.mxu1 %v1224_v46  ;;  %v783_v32 = vld [vmem:[%s4495_s1 + $0x3d0] sm:$0xff]  ;;  %v813_v5 = vld [vmem:[%s4495_s1 + $0x4c0] sm:$0xff] }
  0xb5   :  { %1654 = vmatpush.msra.mxu2 %v677_v11  ;;  %1674 = vmatpush.msra.mxu3 %v709_v6  ;;  %v845_v39 = vld [vmem:[%s4495_s1 + $0x5c0] sm:$0xff]  ;;  %v811_v36 = vld [vmem:[%s4495_s1 + $0x4b0] sm:$0xff] }
  0xb6   :  { %1590 = vmatpush.msra.mxu0 %v1188_v17  ;;  %1609 = vmatpush.msra.mxu1 %v1222_v1  ;;  %v843_v35 = vld [vmem:[%s4495_s1 + $0x5b0] sm:$0xff]  ;;  %v745_v52 = vld [vmem:[%s4495_s1 + $0x2a0] sm:$0xff] }
  0xb7   :  { %1655 = vmatpush.msra.mxu2 %v675_v31  ;;  %1675 = vmatpush.msra.mxu3 %v707_v42  ;;  %v779_v48 = vld [vmem:[%s4495_s1 + $0x3b0] sm:$0xff]  ;;  %v809_v34 = vld [vmem:[%s4495_s1 + $0x4a0] sm:$0xff]  ;;  %v3633_v31 = vld.sshfl [vmem:[#allocation1 + $0x18] sm:$0xff pattern:$0x73625140] }
  0xb8   :  { %1591 = vmatpush.msra.mxu0 %v1186_v24  ;;  %1610 = vmatpush.msra.mxu1 %v1220_v59  ;;  %v841_v58 = vld [vmem:[%s4495_s1 + $0x5a0] sm:$0xff]  ;;  %v743_v43 = vld [vmem:[%s4495_s1 + $0x290] sm:$0xff] }
  0xb9   :  { %1656 = vmatpush.msra.mxu2 %v673_v15  ;;  %1676 = vmatpush.msra.mxu3 %v705_v41  ;;  %v777_v63 = vld [vmem:[%s4495_s1 + $0x3a0] sm:$0xff]  ;;  %v807_v46 = vld [vmem:[%s4495_s1 + $0x490] sm:$0xff] }
  0xba   :  { %1592 = vmatpush.msra.mxu0 %v1184_v18  ;;  %1611 = vmatpush.msra.mxu1 %v1218_v49  ;;  %v839_v11 = vld [vmem:[%s4495_s1 + $0x590] sm:$0xff]  ;;  %v741_v17 = vld [vmem:[%s4495_s1 + $0x280] sm:$0xff] }
  0xbb   :  { %1657 = vmatpush.msra.mxu2 %v671_v13  ;;  %1677 = vmatpush.msra.mxu3 %v703_v22  ;;  %v3628_v6 = vld.sshfl [vmem:[#allocation1 + $0x10] sm:$0xff pattern:$0x73625140]  ;;  %v805_v24 = vld [vmem:[%s4495_s1 + $0x480] sm:$0xff] }
  0xbc   :  { %1593 = vmatpush.msra.mxu0 %v1182_v33  ;;  %1612 = vmatpush.msra.mxu1 %v1216_v37  ;;  %v775_v42 = vld [vmem:[%s4495_s1 + $0x390] sm:$0xff]  ;;  %v837_v59 = vld [vmem:[%s4495_s1 + $0x580] sm:$0xff] }
  0xbd   :  { %1658 = vmatpush.msra.mxu2 %v669_v27  ;;  %1678 = vmatpush.msra.mxu3 %v701_v29  ;;  %v739_v15 = vld [vmem:[%s4495_s1 + $0x270] sm:$0xff]  ;;  %v773_v41 = vld [vmem:[%s4495_s1 + $0x380] sm:$0xff] }
  0xbe   :  { %1594 = vmatpush.msra.mxu0 %v1180_v51  ;;  %1613 = vmatpush.msra.mxu1 %v1214_v23  ;;  %v803_v18 = vld [vmem:[%s4495_s1 + $0x470] sm:$0xff]  ;;  %v737_v13 = vld [vmem:[%s4495_s1 + $0x260] sm:$0xff] }
  0xbf   :  { %1659 = vmatpush.msra.mxu2 %v667_v53  ;;  %1679 = vmatpush.msra.mxu3 %v699_v40  ;;  %v835_v49 = vld [vmem:[%s4495_s1 + $0x570] sm:$0xff]  ;;  %v801_v33 = vld [vmem:[%s4495_s1 + $0x460] sm:$0xff] }
  0xc0   :  { %1595 = vmatpush.msra.mxu0 %v1178_v14  ;;  %1614 = vmatpush.msra.mxu1 %v1212_v2  ;;  %v771_v22 = vld [vmem:[%s4495_s1 + $0x370] sm:$0xff]  ;;  %v833_v37 = vld [vmem:[%s4495_s1 + $0x560] sm:$0xff] }
  0xc1   :  { %1660 = vmatpush.msra.mxu2 %v665_v0  ;;  %1680 = vmatpush.msra.mxu3 %v697_v7  ;;  %v735_v27 = vld [vmem:[%s4495_s1 + $0x250] sm:$0xff]  ;;  %v769_v29 = vld [vmem:[%s4495_s1 + $0x360] sm:$0xff] }
  0xc2   :  { %1596 = vmatpush.msra.mxu0 %v1176_v4  ;;  %1615 = vmatpush.msra.mxu1 %v1210_v10  ;;  %v799_v51 = vld [vmem:[%s4495_s1 + $0x450] sm:$0xff]  ;;  %v733_v53 = vld [vmem:[%s4495_s1 + $0x240] sm:$0xff] }
  0xc3   :  { %1661 = vmatpush.msra.mxu2 %v663_v12  ;;  %1681 = vmatpush.msra.mxu3 %v695_v26  ;;  %v831_v23 = vld [vmem:[%s4495_s1 + $0x550] sm:$0xff]  ;;  %v797_v14 = vld [vmem:[%s4495_s1 + $0x440] sm:$0xff] }
  0xc4   :  { %1597 = vmatpush.msra.mxu0 %v1174_v9  ;;  %1616 = vmatpush.msra.mxu1 %v1208_v16  ;;  %v767_v40 = vld [vmem:[%s4495_s1 + $0x350] sm:$0xff]  ;;  %v829_v2 = vld [vmem:[%s4495_s1 + $0x540] sm:$0xff] }
  0xc5   :  { %1662 = vmatpush.msra.mxu2 %v661_v50  ;;  %1682 = vmatpush.msra.mxu3 %v693_v60  ;;  %v731_v0 = vld [vmem:[%s4495_s1 + $0x230] sm:$0xff]  ;;  %v765_v7 = vld [vmem:[%s4495_s1 + $0x340] sm:$0xff] }
  0xc6   :  { %1598 = vmatmul.f32.vlgmr.msra.gmra.mxu0 %v3116_v38  ;;  %1663 = vmatmul.f32.vlgmr.msra.gmra.mxu2 %v3533_v8  ;;  %v817_v38 = vld [vmem:[%s4495_s1 + $0x4e0] sm:$0xff]  ;;  %v795_v4 = vld [vmem:[%s4495_s1 + $0x430] sm:$0xff] }
  0xc7   :  { %1687 = vmatpush.msrb.mxu0 %v755_v55  ;;  %1727 = vmatpush.msrb.mxu2 %v819_v44  ;;  %v827_v10 = vld [vmem:[%s4495_s1 + $0x530] sm:$0xff]  ;;  %v729_v12 = vld [vmem:[%s4495_s1 + $0x220] sm:$0xff] }
  0xc8   :  { %1747 = vmatpush.msrb.mxu3 %v851_v62  ;;  %1617 = vmatpush.msra.mxu1 %v1206_v61  ;;  %v763_v26 = vld [vmem:[%s4495_s1 + $0x330] sm:$0xff]  ;;  %v793_v9 = vld [vmem:[%s4495_s1 + $0x420] sm:$0xff] }
  0xc9   :  { %1683 = vmatmul.f32.vlgmr.msra.gmra.mxu3 %v3548_v45  ;;  %1618 = vmatmul.f32.vlgmr.msra.gmra.mxu1 %v3137_v25  ;;  %v410_v25 = vsel %vm395_vm6, %v2759_v19, %v2793_v47  ;;  %v747_v47 = vld [vmem:[%s4495_s1 + $0x2b0] sm:$0xff]  ;;  %v781_v19 = vld [vmem:[%s4495_s1 + $0x3c0] sm:$0xff] }
  0xca   :  { %1688 = vmatpush.msrb.mxu0 %v753_v30  ;;  %1707 = vmatpush.msrb.mxu1 %v787_v28  ;;  %416 = vst [vmem:[#allocation2 + $0x10] sm:$0x3] %v410_v25  ;;  %v825_v16 = vld [vmem:[%s4495_s1 + $0x520] sm:$0xff]  ;;  %v727_v50 = vld [vmem:[%s4495_s1 + $0x210] sm:$0xff] }
  0xcb   :  { %1728 = vmatpush.msrb.mxu2 %v817_v38  ;;  %1748 = vmatpush.msrb.mxu3 %v849_v56  ;;  %v761_v60 = vld [vmem:[%s4495_s1 + $0x320] sm:$0xff]  ;;  %v791_v55 = vld [vmem:[%s4495_s1 + $0x410] sm:$0xff] }
  0xcc   :  { %1689 = vmatpush.msrb.mxu0 %v751_v21  ;;  %1708 = vmatpush.msrb.mxu1 %v785_v57  ;;  %v823_v44 = vld [vmem:[%s4495_s1 + $0x510] sm:$0xff]  ;;  %v725_v62 = vld [vmem:[%s4495_s1 + $0x200] sm:$0xff]  ;;  %v692_v57 = vld [vmem:[%s4495_s1 + $0xf8] sm:$0xff] }
  0xcd   :  { %1729 = vmatpush.msrb.mxu2 %v815_v3  ;;  %1749 = vmatpush.msrb.mxu3 %v847_v54  ;;  %v759_v61 = vld [vmem:[%s4495_s1 + $0x310] sm:$0xff]  ;;  %v789_v30 = vld [vmem:[%s4495_s1 + $0x400] sm:$0xff]  ;;  %v3755_v54 = vld.sshfl [vmem:[#allocation1 + $0x28] sm:$0xff pattern:$0x73625140] }
  0xce   :  { %1690 = vmatpush.msrb.mxu0 %v749_v20  ;;  %1709 = vmatpush.msrb.mxu1 %v783_v32  ;;  %v821_v28 = vld [vmem:[%s4495_s1 + $0x500] sm:$0xff]  ;;  %v883_v56 = vld [vmem:[%s4495_s1 + $0x6f0] sm:$0xff] }
  0xcf   :  { %1730 = vmatpush.msrb.mxu2 %v813_v5  ;;  %1750 = vmatpush.msrb.mxu3 %v845_v39  ;;  %v3740_v38 = vld.sshfl [vmem:[#allocation1 + $0x20] sm:$0xff pattern:$0x73625140]  ;;  %v947_v21 = vld [vmem:[%s4495_s1 + $0x8f0] sm:$0xff]  ;;  %v690_v5 = vld [vmem:[%s4495_s1 + $0xe8] sm:$0xff] }
  0xd0   :  { %1691 = vmatpush.msrb.mxu0 %v747_v47  ;;  %1710 = vmatpush.msrb.mxu1 %v781_v19  ;;  %v757_v3 = vld [vmem:[%s4495_s1 + $0x300] sm:$0xff]  ;;  %v915_v25 = vld [vmem:[%s4495_s1 + $0x7f0] sm:$0xff] }
  0xd1   :  { %1731 = vmatpush.msrb.mxu2 %v811_v36  ;;  %1751 = vmatpush.msrb.mxu3 %v843_v35  ;;  %v654_v1 = vld [vmem:[#allocation2 + $0x10] sm:$0x3]  ;;  %v881_v20 = vld [vmem:[%s4495_s1 + $0x6e0] sm:$0xff]  ;;  %v879_v39 = vld [vmem:[%s4495_s1 + $0x6d0] sm:$0xff] }
  0xd2   :  { %1692 = vmatpush.msrb.mxu0 %v745_v52  ;;  %1711 = vmatpush.msrb.mxu1 %v779_v48  ;;  %1636 = vst [vmem:[#allocation1] ss:$4 sm:$0xff] %v654_v1  ;;  %v945_v32 = vld [vmem:[%s4495_s1 + $0x8e0] sm:$0xff]  ;;  %v943_v19 = vld [vmem:[%s4495_s1 + $0x8d0] sm:$0xff]  ;;  %v688_v36 = vld [vmem:[%s4495_s1 + $0xd8] sm:$0xff] }
  0xd3   :  { %1732 = vmatpush.msrb.mxu2 %v809_v34  ;;  %1752 = vmatpush.msrb.mxu3 %v841_v58  ;;  %v913_v47 = vld [vmem:[%s4495_s1 + $0x7e0] sm:$0xff]  ;;  %v911_v52 = vld [vmem:[%s4495_s1 + $0x7d0] sm:$0xff]  ;;  %v686_v34 = vld [vmem:[%s4495_s1 + $0xc8] sm:$0xff] }
  0xd4   :  { %1693 = vmatpush.msrb.mxu0 %v743_v43  ;;  %1712 = vmatpush.msrb.mxu1 %v777_v63  ;;  %v877_v35 = vld [vmem:[%s4495_s1 + $0x6c0] sm:$0xff]  ;;  %v875_v58 = vld [vmem:[%s4495_s1 + $0x6b0] sm:$0xff] }
  0xd5   :  { %1733 = vmatpush.msrb.mxu2 %v807_v46  ;;  %1753 = vmatpush.msrb.mxu3 %v839_v11  ;;  %v941_v48 = vld [vmem:[%s4495_s1 + $0x8c0] sm:$0xff]  ;;  %v939_v63 = vld [vmem:[%s4495_s1 + $0x8b0] sm:$0xff]  ;;  %v684_v46 = vld [vmem:[%s4495_s1 + $0xb8] sm:$0xff] }
  0xd6   :  { %1694 = vmatpush.msrb.mxu0 %v741_v17  ;;  %1713 = vmatpush.msrb.mxu1 %v775_v42  ;;  %v909_v43 = vld [vmem:[%s4495_s1 + $0x7c0] sm:$0xff]  ;;  %v907_v17 = vld [vmem:[%s4495_s1 + $0x7b0] sm:$0xff]  ;;  %v682_v42 = vld [vmem:[%s4495_s1 + $0xa8] sm:$0xff] }
  0xd7   :  { %1734 = vmatpush.msrb.mxu2 %v805_v24  ;;  %1754 = vmatpush.msrb.mxu3 %v837_v59  ;;  %v873_v11 = vld [vmem:[%s4495_s1 + $0x6a0] sm:$0xff]  ;;  %v871_v24 = vld [vmem:[%s4495_s1 + $0x690] sm:$0xff] }
  0xd8   :  { %1695 = vmatpush.msrb.mxu0 %v739_v15  ;;  %1714 = vmatpush.msrb.mxu1 %v773_v41  ;;  %v937_v1 = vld [vmem:[%s4495_s1 + $0x8a0] sm:$0xff]  ;;  %v935_v15 = vld [vmem:[%s4495_s1 + $0x890] sm:$0xff]  ;;  %v680_v41 = vld [vmem:[%s4495_s1 + $0x98] sm:$0xff] }
  0xd9   :  { %1735 = vmatpush.msrb.mxu2 %v803_v18  ;;  %1755 = vmatpush.msrb.mxu3 %v835_v49  ;;  %v905_v59 = vld [vmem:[%s4495_s1 + $0x7a0] sm:$0xff]  ;;  %v903_v49 = vld [vmem:[%s4495_s1 + $0x790] sm:$0xff] }
  0xda   :  { %1696 = vmatpush.msrb.mxu0 %v737_v13  ;;  %1715 = vmatpush.msrb.mxu1 %v771_v22  ;;  %v869_v18 = vld [vmem:[%s4495_s1 + $0x680] sm:$0xff]  ;;  %v678_v22 = vld [vmem:[%s4495_s1 + $0x88] sm:$0xff] }
  0xdb   :  { %1736 = vmatpush.msrb.mxu2 %v801_v33  ;;  %1756 = vmatpush.msrb.mxu3 %v833_v37  ;;  %v933_v13 = vld [vmem:[%s4495_s1 + $0x880] sm:$0xff]  ;;  %v867_v33 = vld [vmem:[%s4495_s1 + $0x670] sm:$0xff] }
  0xdc   :  { %1697 = vmatpush.msrb.mxu0 %v735_v27  ;;  %1716 = vmatpush.msrb.mxu1 %v769_v29  ;;  %v901_v37 = vld [vmem:[%s4495_s1 + $0x780] sm:$0xff]  ;;  %v931_v27 = vld [vmem:[%s4495_s1 + $0x870] sm:$0xff]  ;;  %v676_v29 = vld [vmem:[%s4495_s1 + $0x78] sm:$0xff] }
  0xdd   :  { %1737 = vmatpush.msrb.mxu2 %v799_v51  ;;  %1757 = vmatpush.msrb.mxu3 %v831_v23  ;;  %v865_v51 = vld [vmem:[%s4495_s1 + $0x660] sm:$0xff]  ;;  %v899_v23 = vld [vmem:[%s4495_s1 + $0x770] sm:$0xff] }
  0xde   :  { %1698 = vmatpush.msrb.mxu0 %v733_v53  ;;  %1717 = vmatpush.msrb.mxu1 %v767_v40  ;;  %v929_v53 = vld [vmem:[%s4495_s1 + $0x860] sm:$0xff]  ;;  %v674_v40 = vld [vmem:[%s4495_s1 + $0x68] sm:$0xff] }
  0xdf   :  { %1738 = vmatpush.msrb.mxu2 %v797_v14  ;;  %1758 = vmatpush.msrb.mxu3 %v829_v2  ;;  %v863_v14 = vld [vmem:[%s4495_s1 + $0x650] sm:$0xff]  ;;  %v897_v2 = vld [vmem:[%s4495_s1 + $0x760] sm:$0xff] }
  0xe0   :  { %1699 = vmatpush.msrb.mxu0 %v731_v0  ;;  %1718 = vmatpush.msrb.mxu1 %v765_v7  ;;  %v927_v0 = vld [vmem:[%s4495_s1 + $0x850] sm:$0xff]  ;;  %v672_v7 = vld [vmem:[%s4495_s1 + $0x58] sm:$0xff] }
  0xe1   :  { %1739 = vmatpush.msrb.mxu2 %v795_v4  ;;  %1759 = vmatpush.msrb.mxu3 %v827_v10  ;;  %v861_v4 = vld [vmem:[%s4495_s1 + $0x640] sm:$0xff]  ;;  %v895_v10 = vld [vmem:[%s4495_s1 + $0x750] sm:$0xff] }
  0xe2   :  { %1700 = vmatpush.msrb.mxu0 %v729_v12  ;;  %1719 = vmatpush.msrb.mxu1 %v763_v26  ;;  %v925_v12 = vld [vmem:[%s4495_s1 + $0x840] sm:$0xff]  ;;  %v670_v26 = vld [vmem:[%s4495_s1 + $0x48] sm:$0xff] }
  0xe3   :  { %1740 = vmatpush.msrb.mxu2 %v793_v9  ;;  %1760 = vmatpush.msrb.mxu3 %v825_v16  ;;  %v859_v9 = vld [vmem:[%s4495_s1 + $0x630] sm:$0xff]  ;;  %v893_v16 = vld [vmem:[%s4495_s1 + $0x740] sm:$0xff] }
  0xe4   :  { %1701 = vmatpush.msrb.mxu0 %v727_v50  ;;  %1720 = vmatpush.msrb.mxu1 %v761_v60  ;;  %v923_v50 = vld [vmem:[%s4495_s1 + $0x830] sm:$0xff]  ;;  %v668_v60 = vld [vmem:[%s4495_s1 + $0x38] sm:$0xff] }
  0xe5   :  { %1741 = vmatpush.msrb.mxu2 %v791_v55  ;;  %1761 = vmatpush.msrb.mxu3 %v823_v44  ;;  %v857_v55 = vld [vmem:[%s4495_s1 + $0x620] sm:$0xff]  ;;  %v891_v44 = vld [vmem:[%s4495_s1 + $0x730] sm:$0xff] }
  0xe6   :  { %1702 = vmatpush.msrb.mxu0 %v725_v62  ;;  %1721 = vmatpush.msrb.mxu1 %v759_v61  ;;  %v921_v62 = vld [vmem:[%s4495_s1 + $0x820] sm:$0xff]  ;;  %v666_v61 = vld [vmem:[%s4495_s1 + $0x28] sm:$0xff] }
  0xe7   :  { %1742 = vmatpush.msrb.mxu2 %v789_v30  ;;  %1762 = vmatpush.msrb.mxu3 %v821_v28  ;;  %v855_v30 = vld [vmem:[%s4495_s1 + $0x610] sm:$0xff]  ;;  %v889_v28 = vld [vmem:[%s4495_s1 + $0x720] sm:$0xff] }
  0xe8   :  { %1703 = vmatmul.f32.vlgmr.msrb.gmra.mxu0 %v3628_v6  ;;  %1743 = vmatmul.f32.vlgmr.msrb.gmra.mxu2 %v3740_v38 }
  0xe9   :  { %1767 = vmatpush.msra.mxu0 %v883_v56  ;;  %1807 = vmatpush.msra.mxu2 %v947_v21  ;;  %v919_v56 = vld [vmem:[%s4495_s1 + $0x810] sm:$0xff]  ;;  %v664_v21 = vld [vmem:[%s4495_s1 + $0x18] sm:$0xff] }
  0xea   :  { %1827 = vmatpush.msra.mxu3 %v692_v57  ;;  %1722 = vmatpush.msrb.mxu1 %v757_v3  ;;  %v853_v57 = vld [vmem:[%s4495_s1 + $0x600] sm:$0xff]  ;;  %v887_v3 = vld [vmem:[%s4495_s1 + $0x710] sm:$0xff] }
  0xeb   :  { %1763 = vmatmul.f32.vlgmr.msrb.gmra.mxu3 %v3755_v54  ;;  %1723 = vmatmul.f32.vlgmr.msrb.gmra.mxu1 %v3633_v31 }
  0xec   :  { %1768 = vmatpush.msra.mxu0 %v881_v20  ;;  %1787 = vmatpush.msra.mxu1 %v915_v25  ;;  %v917_v20 = vld [vmem:[%s4495_s1 + $0x800] sm:$0xff]  ;;  %v662_v25 = vld [vmem:[%s4495_s1 + $0x8] sm:$0xff] }
  0xed   :  { %1808 = vmatpush.msra.mxu2 %v945_v32  ;;  %1828 = vmatpush.msra.mxu3 %v690_v5  ;;  %v3940_v32 = vld.sshfl [vmem:[#allocation1 + $0x30] sm:$0xff pattern:$0x73625140]  ;;  %v3942_v5 = vld.sshfl [vmem:[#allocation1] sm:$0xff pattern:$0x73625140] }
  0xee   :  { %1769 = vmatpush.msra.mxu0 %v879_v39  ;;  %1788 = vmatpush.msra.mxu1 %v913_v47  ;;  %v724_v39 = vld [vmem:[%s4495_s1 + $0x1f8] sm:$0xff] }
  0xef   :  { %1809 = vmatpush.msra.mxu2 %v943_v19  ;;  %1829 = vmatpush.msra.mxu3 %v688_v36  ;;  %v788_v47 = vld [vmem:[%s4495_s1 + $0x3f8] sm:$0xff]  ;;  %v885_v19 = vld [vmem:[%s4495_s1 + $0x700] sm:$0xff] }
  0xf0   :  { %1770 = vmatpush.msra.mxu0 %v877_v35  ;;  %1789 = vmatpush.msra.mxu1 %v911_v52  ;;  %v820_v36 = vld [vmem:[%s4495_s1 + $0x4f8] sm:$0xff]  ;;  %v722_v52 = vld [vmem:[%s4495_s1 + $0x1e8] sm:$0xff] }
  0xf1   :  { %1810 = vmatpush.msra.mxu2 %v941_v48  ;;  %1830 = vmatpush.msra.mxu3 %v686_v34  ;;  %v3959_v35 = vld.sshfl [vmem:[#allocation1 + $0x38] sm:$0xff pattern:$0x73625140]  ;;  %v786_v34 = vld [vmem:[%s4495_s1 + $0x3e8] sm:$0xff] }
  0xf2   :  { %1771 = vmatpush.msra.mxu0 %v875_v58  ;;  %1790 = vmatpush.msra.mxu1 %v909_v43  ;;  %v756_v48 = vld [vmem:[%s4495_s1 + $0x2f8] sm:$0xff]  ;;  %v818_v58 = vld [vmem:[%s4495_s1 + $0x4e8] sm:$0xff] }
  0xf3   :  { %1811 = vmatpush.msra.mxu2 %v939_v63  ;;  %1831 = vmatpush.msra.mxu3 %v684_v46  ;;  %v754_v43 = vld [vmem:[%s4495_s1 + $0x2e8] sm:$0xff]  ;;  %v784_v63 = vld [vmem:[%s4495_s1 + $0x3d8] sm:$0xff] }
  0xf4   :  { %1772 = vmatpush.msra.mxu0 %v873_v11  ;;  %1791 = vmatpush.msra.mxu1 %v907_v17  ;;  %v718_v46 = vld [vmem:[%s4495_s1 + $0x1c8] sm:$0xff]  ;;  %v816_v11 = vld [vmem:[%s4495_s1 + $0x4d8] sm:$0xff]  ;;  %v3989_v17 = vpop.f32.mrf.mxu0 }
  0xf5   :  { %1812 = vmatpush.msra.mxu2 %v937_v1  ;;  %1832 = vmatpush.msra.mxu3 %v682_v42  ;;  %v752_v1 = vld [vmem:[%s4495_s1 + $0x2d8] sm:$0xff]  ;;  %v782_v42 = vld [vmem:[%s4495_s1 + $0x3c8] sm:$0xff] }
  0xf6   :  { %1773 = vmatpush.msra.mxu0 %v871_v24  ;;  %1792 = vmatpush.msra.mxu1 %v905_v59  ;;  %v3997_v24 = vpop.f32.mrf.mxu1  ;;  %v716_v59 = vld [vmem:[%s4495_s1 + $0x1b8] sm:$0xff] }
  0xf7   :  { %1813 = vmatpush.msra.mxu2 %v935_v15  ;;  %1833 = vmatpush.msra.mxu3 %v680_v41  ;;  %v814_v15 = vld [vmem:[%s4495_s1 + $0x4c8] sm:$0xff]  ;;  %v4005_v41 = vpop.f32.mrf.mxu2 }
  0xf8   :  { %1774 = vmatpush.msra.mxu0 %v869_v18  ;;  %1793 = vmatpush.msra.mxu1 %v903_v49  ;;  %v750_v18 = vld [vmem:[%s4495_s1 + $0x2c8] sm:$0xff]  ;;  %v780_v49 = vld [vmem:[%s4495_s1 + $0x3b8] sm:$0xff] }
  0xf9   :  { %1814 = vmatpush.msra.mxu2 %v933_v13  ;;  %1834 = vmatpush.msra.mxu3 %v678_v22  ;;  %v714_v13 = vld [vmem:[%s4495_s1 + $0x1a8] sm:$0xff]  ;;  %v812_v22 = vld [vmem:[%s4495_s1 + $0x4b8] sm:$0xff] }
  0xfa   :  { %1775 = vmatpush.msra.mxu0 %v867_v33  ;;  %1794 = vmatpush.msra.mxu1 %v901_v37  ;;  %v748_v33 = vld [vmem:[%s4495_s1 + $0x2b8] sm:$0xff]  ;;  %v778_v37 = vld [vmem:[%s4495_s1 + $0x3a8] sm:$0xff] }
  0xfb   :  { %1815 = vmatpush.msra.mxu2 %v931_v27  ;;  %1835 = vmatpush.msra.mxu3 %v676_v29  ;;  %v4025_v27 = vpop.f32.mrf.mxu3  ;;  %v712_v29 = vld [vmem:[%s4495_s1 + $0x198] sm:$0xff] }
  0xfc   :  { %1776 = vmatpush.msra.mxu0 %v865_v51  ;;  %1795 = vmatpush.msra.mxu1 %v899_v23  ;;  %v810_v51 = vld [vmem:[%s4495_s1 + $0x4a8] sm:$0xff] }
  0xfd   :  { %1816 = vmatpush.msra.mxu2 %v929_v53  ;;  %1836 = vmatpush.msra.mxu3 %v674_v40  ;;  %v746_v23 = vld [vmem:[%s4495_s1 + $0x2a8] sm:$0xff]  ;;  %v776_v53 = vld [vmem:[%s4495_s1 + $0x398] sm:$0xff] }
  0xfe   :  { %1777 = vmatpush.msra.mxu0 %v863_v14  ;;  %1796 = vmatpush.msra.mxu1 %v897_v2  ;;  %v710_v40 = vld [vmem:[%s4495_s1 + $0x188] sm:$0xff]  ;;  %v808_v14 = vld [vmem:[%s4495_s1 + $0x498] sm:$0xff] }
  0xff   :  { %1817 = vmatpush.msra.mxu2 %v927_v0  ;;  %1837 = vmatpush.msra.mxu3 %v672_v7  ;;  %v744_v2 = vld [vmem:[%s4495_s1 + $0x298] sm:$0xff]  ;;  %v774_v0 = vld [vmem:[%s4495_s1 + $0x388] sm:$0xff] }
 0x100   :  { %1778 = vmatpush.msra.mxu0 %v861_v4  ;;  %1797 = vmatpush.msra.mxu1 %v895_v10  ;;  %v708_v7 = vld [vmem:[%s4495_s1 + $0x178] sm:$0xff]  ;;  %v806_v4 = vld [vmem:[%s4495_s1 + $0x488] sm:$0xff]  ;;  %v4057_v10 = vpop.f32.mrf.mxu0 }
 0x101   :  { %1818 = vmatpush.msra.mxu2 %v925_v12  ;;  %1838 = vmatpush.msra.mxu3 %v670_v26  ;;  %v742_v12 = vld [vmem:[%s4495_s1 + $0x288] sm:$0xff]  ;;  %v772_v26 = vld [vmem:[%s4495_s1 + $0x378] sm:$0xff] }
 0x102   :  { %1779 = vmatpush.msra.mxu0 %v859_v9  ;;  %1798 = vmatpush.msra.mxu1 %v893_v16  ;;  %v4065_v9 = vpop.f32.mrf.mxu1  ;;  %v706_v16 = vld [vmem:[%s4495_s1 + $0x168] sm:$0xff] }
 0x103   :  { %1819 = vmatpush.msra.mxu2 %v923_v50  ;;  %1839 = vmatpush.msra.mxu3 %v668_v60  ;;  %v804_v50 = vld [vmem:[%s4495_s1 + $0x478] sm:$0xff]  ;;  %v4073_v60 = vpop.f32.mrf.mxu2 }
 0x104   :  { %1780 = vmatpush.msra.mxu0 %v857_v55  ;;  %1799 = vmatpush.msra.mxu1 %v891_v44  ;;  %v740_v55 = vld [vmem:[%s4495_s1 + $0x278] sm:$0xff]  ;;  %v770_v44 = vld [vmem:[%s4495_s1 + $0x368] sm:$0xff] }
 0x105   :  { %1820 = vmatpush.msra.mxu2 %v921_v62  ;;  %1840 = vmatpush.msra.mxu3 %v666_v61  ;;  %v704_v62 = vld [vmem:[%s4495_s1 + $0x158] sm:$0xff]  ;;  %v802_v61 = vld [vmem:[%s4495_s1 + $0x468] sm:$0xff] }
 0x106   :  { %1781 = vmatpush.msra.mxu0 %v855_v30  ;;  %1800 = vmatpush.msra.mxu1 %v889_v28  ;;  %v738_v30 = vld [vmem:[%s4495_s1 + $0x268] sm:$0xff]  ;;  %v768_v28 = vld [vmem:[%s4495_s1 + $0x358] sm:$0xff] }
 0x107   :  { %1821 = vmatpush.msra.mxu2 %v919_v56  ;;  %1841 = vmatpush.msra.mxu3 %v664_v21  ;;  %v4093_v56 = vpop.f32.mrf.mxu3  ;;  %v702_v21 = vld [vmem:[%s4495_s1 + $0x148] sm:$0xff] }
 0x108   :  { %1782 = vmatpush.msra.mxu0 %v853_v57  ;;  %1801 = vmatpush.msra.mxu1 %v887_v3  ;;  %v800_v57 = vld [vmem:[%s4495_s1 + $0x458] sm:$0xff] }
 0x109   :  { %1822 = vmatpush.msra.mxu2 %v917_v20  ;;  %1842 = vmatpush.msra.mxu3 %v662_v25  ;;  %v736_v3 = vld [vmem:[%s4495_s1 + $0x258] sm:$0xff]  ;;  %v766_v20 = vld [vmem:[%s4495_s1 + $0x348] sm:$0xff] }
 0x10a   :  { %1783 = vmatmul.f32.vlgmr.msra.gmra.mxu0 %v3940_v32  ;;  %1823 = vmatmul.f32.vlgmr.msra.gmra.mxu2 %v3942_v5  ;;  %v700_v25 = vld [vmem:[%s4495_s1 + $0x138] sm:$0xff] }
 0x10b   :  { %1843 = vmatmul.f32.vlgmr.msra.gmra.mxu3 %v3533_v8  ;;  %1847 = vmatpush.msrb.mxu0 %v724_v39  ;;  %v720_v8 = vld [vmem:[%s4495_s1 + $0x1d8] sm:$0xff]  ;;  %v798_v39 = vld [vmem:[%s4495_s1 + $0x448] sm:$0xff] }
 0x10c   :  { %1887 = vmatpush.msrb.mxu2 %v788_v47  ;;  %1802 = vmatpush.msra.mxu1 %v885_v19  ;;  %v4113_v47 = vpop.f32.mrf.mxu0  ;;  %v734_v19 = vld [vmem:[%s4495_s1 + $0x248] sm:$0xff] }
 0x10d   :  { %1907 = vmatpush.msrb.mxu3 %v820_v36  ;;  %1803 = vmatmul.f32.vlgmr.msra.gmra.mxu1 %v3959_v35  ;;  %v764_v36 = vld [vmem:[%s4495_s1 + $0x338] sm:$0xff] }
 0x10e   :  { %1848 = vmatpush.msrb.mxu0 %v722_v52  ;;  %1867 = vmatpush.msrb.mxu1 %v756_v48  ;;  %v698_v52 = vld [vmem:[%s4495_s1 + $0x128] sm:$0xff]  ;;  %v796_v48 = vld [vmem:[%s4495_s1 + $0x438] sm:$0xff] }
 0x10f   :  { %1888 = vmatpush.msrb.mxu2 %v786_v34  ;;  %1908 = vmatpush.msrb.mxu3 %v818_v58  ;;  %v762_v58 = vld [vmem:[%s4495_s1 + $0x328] sm:$0xff] }
 0x110   :  { %1849 = vmatpush.msrb.mxu0 %v720_v8  ;;  %1868 = vmatpush.msrb.mxu1 %v754_v43  ;;  %v732_v8 = vld [vmem:[%s4495_s1 + $0x238] sm:$0xff] }
 0x111   :  { %1889 = vmatpush.msrb.mxu2 %v784_v63  ;;  %1909 = vmatpush.msrb.mxu3 %v816_v11  ;;  %v696_v63 = vld [vmem:[%s4495_s1 + $0x118] sm:$0xff] }
 0x112   :  { %1850 = vmatpush.msrb.mxu0 %v718_v46  ;;  %1869 = vmatpush.msrb.mxu1 %v752_v1  ;;  %v794_v46 = vld [vmem:[%s4495_s1 + $0x428] sm:$0xff] }
 0x113   :  { %1890 = vmatpush.msrb.mxu2 %v782_v42  ;;  %1910 = vmatpush.msrb.mxu3 %v814_v15  ;;  %v730_v1 = vld [vmem:[%s4495_s1 + $0x228] sm:$0xff]  ;;  %v760_v42 = vld [vmem:[%s4495_s1 + $0x318] sm:$0xff] }
 0x114   :  { %1851 = vmatpush.msrb.mxu0 %v716_v59  ;;  %1870 = vmatpush.msrb.mxu1 %v750_v18  ;;  %v694_v59 = vld [vmem:[%s4495_s1 + $0x108] sm:$0xff]  ;;  %v792_v15 = vld [vmem:[%s4495_s1 + $0x418] sm:$0xff] }
 0x115   :  { %1891 = vmatpush.msrb.mxu2 %v780_v49  ;;  %1911 = vmatpush.msrb.mxu3 %v812_v22  ;;  %v728_v49 = vld [vmem:[%s4495_s1 + $0x218] sm:$0xff] }
 0x116   :  { %1852 = vmatpush.msrb.mxu0 %v714_v13  ;;  %1871 = vmatpush.msrb.mxu1 %v748_v33  ;;  %v758_v13 = vld [vmem:[%s4495_s1 + $0x308] sm:$0xff]  ;;  %v852_v33 = vld [vmem:[%s4495_s1 + $0x5f8] sm:$0xff] }
 0x117   :  { %1892 = vmatpush.msrb.mxu2 %v778_v37  ;;  %1912 = vmatpush.msrb.mxu3 %v810_v51  ;;  %v916_v37 = vld [vmem:[%s4495_s1 + $0x7f8] sm:$0xff]  ;;  %v726_v51 = vld [vmem:[%s4495_s1 + $0x208] sm:$0xff] }
 0x118   :  { %1853 = vmatpush.msrb.mxu0 %v712_v29  ;;  %1872 = vmatpush.msrb.mxu1 %v746_v23  ;;  %v790_v23 = vld [vmem:[%s4495_s1 + $0x408] sm:$0xff] }
 0x119   :  { %1893 = vmatpush.msrb.mxu2 %v776_v53  ;;  %1913 = vmatpush.msrb.mxu3 %v808_v14  ;;  %v884_v14 = vld [vmem:[%s4495_s1 + $0x6f8] sm:$0xff] }
 0x11a   :  { %1854 = vmatpush.msrb.mxu0 %v710_v40  ;;  %1873 = vmatpush.msrb.mxu1 %v744_v2  ;;  %v850_v40 = vld [vmem:[%s4495_s1 + $0x5e8] sm:$0xff] }
 0x11b   :  { %1894 = vmatpush.msrb.mxu2 %v774_v0  ;;  %1914 = vmatpush.msrb.mxu3 %v806_v4  ;;  %v848_v4 = vld [vmem:[%s4495_s1 + $0x5d8] sm:$0xff] }
 0x11c   :  { %1855 = vmatpush.msrb.mxu0 %v708_v7  ;;  %1874 = vmatpush.msrb.mxu1 %v742_v12  ;;  %v882_v12 = vld [vmem:[%s4495_s1 + $0x6e8] sm:$0xff] }
 0x11d   :  { %1895 = vmatpush.msrb.mxu2 %v772_v26  ;;  %1915 = vmatpush.msrb.mxu3 %v804_v50  ;;  %v912_v26 = vld [vmem:[%s4495_s1 + $0x7d8] sm:$0xff]  ;;  %v846_v50 = vld [vmem:[%s4495_s1 + $0x5c8] sm:$0xff] }
 0x11e   :  { %1856 = vmatpush.msrb.mxu0 %v706_v16  ;;  %1875 = vmatpush.msrb.mxu1 %v740_v55  ;;  %v880_v55 = vld [vmem:[%s4495_s1 + $0x6d8] sm:$0xff] }
 0x11f   :  { %1896 = vmatpush.msrb.mxu2 %v770_v44  ;;  %1916 = vmatpush.msrb.mxu3 %v802_v61  ;;  %v910_v44 = vld [vmem:[%s4495_s1 + $0x7c8] sm:$0xff] }
 0x120   :  { %1857 = vmatpush.msrb.mxu0 %v704_v62  ;;  %1876 = vmatpush.msrb.mxu1 %v738_v30  ;;  %v944_v62 = vld [vmem:[%s4495_s1 + $0x8d8] sm:$0xff] }
 0x121   :  { %1897 = vmatpush.msrb.mxu2 %v768_v28  ;;  %1917 = vmatpush.msrb.mxu3 %v800_v57  ;;  %v844_v30 = vld [vmem:[%s4495_s1 + $0x5b8] sm:$0xff]  ;;  %v878_v28 = vld [vmem:[%s4495_s1 + $0x6c8] sm:$0xff] }
 0x122   :  { %1858 = vmatpush.msrb.mxu0 %v702_v21  ;;  %1877 = vmatpush.msrb.mxu1 %v736_v3  ;;  %v908_v21 = vld [vmem:[%s4495_s1 + $0x7b8] sm:$0xff]  ;;  %v942_v57 = vld [vmem:[%s4495_s1 + $0x8c8] sm:$0xff] }
 0x123   :  { %1898 = vmatpush.msrb.mxu2 %v766_v20  ;;  %v1459_v34 = vpop.f32.mrf.mxu1  ;;  %1918 = vmatpush.msrb.mxu3 %v798_v39  ;;  %v1479_v43 = vpop.f32.mrf.mxu2  ;;  %v842_v3 = vld [vmem:[%s4495_s1 + $0x5a8] sm:$0xff]  ;;  %v876_v20 = vld [vmem:[%s4495_s1 + $0x6b8] sm:$0xff] }
 0x124   :  { %1859 = vmatpush.msrb.mxu0 %v700_v25  ;;  %1878 = vmatpush.msrb.mxu1 %v734_v19  ;;  %v1480_v11 = vadd.f32 %v1479_v43, %v1459_v34  ;;  %v906_v25 = vld [vmem:[%s4495_s1 + $0x7a8] sm:$0xff]  ;;  %v940_v39 = vld [vmem:[%s4495_s1 + $0x8b8] sm:$0xff] }
 0x125   :  { %1899 = vmatpush.msrb.mxu2 %v764_v36  ;;  %1919 = vmatpush.msrb.mxu3 %v796_v48  ;;  %v840_v19 = vld [vmem:[%s4495_s1 + $0x598] sm:$0xff]  ;;  %v874_v36 = vld [vmem:[%s4495_s1 + $0x6a8] sm:$0xff] }
 0x126   :  { %1860 = vmatpush.msrb.mxu0 %v698_v52  ;;  %1879 = vmatpush.msrb.mxu1 %v732_v8  ;;  %v1499_v18 = vpop.f32.mrf.mxu3  ;;  %v904_v52 = vld [vmem:[%s4495_s1 + $0x798] sm:$0xff]  ;;  %v938_v48 = vld [vmem:[%s4495_s1 + $0x8a8] sm:$0xff] }
 0x127   :  { %1900 = vmatpush.msrb.mxu2 %v762_v58  ;;  %1920 = vmatpush.msrb.mxu3 %v794_v46  ;;  %v1500_v22 = vadd.f32 %v1499_v18, %v1480_v11  ;;  %v838_v34 = vld [vmem:[%s4495_s1 + $0x588] sm:$0xff]  ;;  %v872_v8 = vld [vmem:[%s4495_s1 + $0x698] sm:$0xff] }
 0x128   :  { %1861 = vmatpush.msrb.mxu0 %v696_v63  ;;  %1880 = vmatpush.msrb.mxu1 %v730_v1  ;;  %v902_v58 = vld [vmem:[%s4495_s1 + $0x788] sm:$0xff]  ;;  %v936_v43 = vld [vmem:[%s4495_s1 + $0x898] sm:$0xff] }
 0x129   :  { %1901 = vmatpush.msrb.mxu2 %v760_v42  ;;  %1921 = vmatpush.msrb.mxu3 %v792_v15  ;;  %v1519_v29 = vpop.f32.mrf.mxu0  ;;  %v836_v63 = vld [vmem:[%s4495_s1 + $0x578] sm:$0xff]  ;;  %v870_v46 = vld [vmem:[%s4495_s1 + $0x688] sm:$0xff] }
 0x12a   :  { %1862 = vmatpush.msrb.mxu0 %v694_v59  ;;  %1881 = vmatpush.msrb.mxu1 %v728_v49  ;;  %v1520_v53 = vadd.f32 %v1519_v29, %v1500_v22  ;;  %v900_v11 = vld [vmem:[%s4495_s1 + $0x778] sm:$0xff]  ;;  %v934_v1 = vld [vmem:[%s4495_s1 + $0x888] sm:$0xff] }
 0x12b   :  { %1902 = vmatpush.msrb.mxu2 %v758_v13  ;;  %1863 = vmatmul.f32.vlgmr.msrb.gmra.mxu0 %v3548_v45  ;;  %v914_v45 = vld [vmem:[%s4495_s1 + $0x7e8] sm:$0xff]  ;;  %v868_v59 = vld [vmem:[%s4495_s1 + $0x678] sm:$0xff] }
 0x12c   :  { %1903 = vmatmul.f32.vlgmr.msrb.gmra.mxu2 %v3633_v31  ;;  %1927 = vmatpush.msra.mxu0 %v852_v33  ;;  %v1539_v2 = vpop.f32.mrf.mxu1  ;;  %v948_v31 = vld [vmem:[%s4495_s1 + $0x8f8] sm:$0xff]  ;;  %v834_v42 = vld [vmem:[%s4495_s1 + $0x568] sm:$0xff] }
 0x12d   :  { %1967 = vmatpush.msra.mxu2 %v916_v37  ;;  %v1559_v0 = vpop.f32.mrf.mxu2  ;;  %1882 = vmatpush.msrb.mxu1 %v726_v51  ;;  %v1540_v7 = vadd.f32 %v1539_v2, %v1520_v53  ;;  %v898_v15 = vld [vmem:[%s4495_s1 + $0x768] sm:$0xff]  ;;  %v932_v18 = vld [vmem:[%s4495_s1 + $0x878] sm:$0xff] }
 0x12e   :  { %1922 = vmatpush.msrb.mxu3 %v790_v23  ;;  %1883 = vmatmul.f32.vlgmr.msrb.gmra.mxu1 %v3628_v6  ;;  %v946_v6 = vld [vmem:[%s4495_s1 + $0x8e8] sm:$0xff]  ;;  %v832_v49 = vld [vmem:[%s4495_s1 + $0x558] sm:$0xff] }
 0x12f   :  { %1923 = vmatmul.f32.vlgmr.msrb.gmra.mxu3 %v3740_v38  ;;  %1928 = vmatpush.msra.mxu0 %v850_v40  ;;  %v1560_v16 = vadd.f32 %v1559_v0, %v1540_v7  ;;  %v866_v13 = vld [vmem:[%s4495_s1 + $0x668] sm:$0xff]  ;;  %v896_v22 = vld [vmem:[%s4495_s1 + $0x758] sm:$0xff] }
 0x130   :  { %1947 = vmatpush.msra.mxu1 %v884_v14  ;;  %v1579_v38 = vpop.f32.mrf.mxu3  ;;  %1968 = vmatpush.msra.mxu2 %v914_v45  ;;  %v930_v33 = vld [vmem:[%s4495_s1 + $0x868] sm:$0xff]  ;;  %v864_v29 = vld [vmem:[%s4495_s1 + $0x658] sm:$0xff] }
 0x131   :  { %1987 = vmatpush.msra.mxu3 %v948_v31  ;;  %1929 = vmatpush.msra.mxu0 %v848_v4  ;;  %v4209_v61 = vadd.f32 %v1579_v38, %v1560_v16  ;;  %v830_v37 = vld [vmem:[%s4495_s1 + $0x548] sm:$0xff]  ;;  %v928_v23 = vld [vmem:[%s4495_s1 + $0x858] sm:$0xff] }
 0x132   :  { %1948 = vmatpush.msra.mxu1 %v882_v12  ;;  %1969 = vmatpush.msra.mxu2 %v912_v26  ;;  %v894_v51 = vld [vmem:[%s4495_s1 + $0x748] sm:$0xff]  ;;  %v828_v53 = vld [vmem:[%s4495_s1 + $0x538] sm:$0xff] }
 0x133   :  { %1988 = vmatpush.msra.mxu3 %v946_v6  ;;  %1930 = vmatpush.msra.mxu0 %v846_v50  ;;  %v862_v40 = vld [vmem:[%s4495_s1 + $0x648] sm:$0xff]  ;;  %v892_v2 = vld [vmem:[%s4495_s1 + $0x738] sm:$0xff] }
 0x134   :  { %1949 = vmatpush.msra.mxu1 %v880_v55  ;;  %1970 = vmatpush.msra.mxu2 %v910_v44  ;;  %v926_v0 = vld [vmem:[%s4495_s1 + $0x848] sm:$0xff]  ;;  %v860_v7 = vld [vmem:[%s4495_s1 + $0x638] sm:$0xff] }
 0x135   :  { %1989 = vmatpush.msra.mxu3 %v944_v62  ;;  %1931 = vmatpush.msra.mxu0 %v844_v30  ;;  %v826_v31 = vld [vmem:[%s4495_s1 + $0x528] sm:$0xff]  ;;  %v924_v12 = vld [vmem:[%s4495_s1 + $0x838] sm:$0xff] }
 0x136   :  { %1950 = vmatpush.msra.mxu1 %v878_v28  ;;  %1971 = vmatpush.msra.mxu2 %v908_v21  ;;  %v890_v4 = vld [vmem:[%s4495_s1 + $0x728] sm:$0xff]  ;;  %v824_v26 = vld [vmem:[%s4495_s1 + $0x518] sm:$0xff] }
 0x137   :  { %1990 = vmatpush.msra.mxu3 %v942_v57  ;;  %1932 = vmatpush.msra.mxu0 %v842_v3  ;;  %v858_v6 = vld [vmem:[%s4495_s1 + $0x628] sm:$0xff]  ;;  %v888_v38 = vld [vmem:[%s4495_s1 + $0x718] sm:$0xff]  ;;  %v2039_v3 = vld [vmem:[%s4499_s5 + $0x70] sm:$0xff] }
 0x138   :  { %1951 = vmatpush.msra.mxu1 %v876_v20  ;;  %1972 = vmatpush.msra.mxu2 %v906_v25  ;;  %v922_v50 = vld [vmem:[%s4495_s1 + $0x828] sm:$0xff]  ;;  %v856_v62 = vld [vmem:[%s4495_s1 + $0x618] sm:$0xff]  ;;  %v1300_v25 = vadd.f32 %v3997_v24, %v3989_v17  ;;  %v2031_v24 = vld [vmem:[%s4499_s5 + $0x30] sm:$0xff] }
 0x139   :  { %1991 = vmatpush.msra.mxu3 %v940_v39  ;;  %1933 = vmatpush.msra.mxu0 %v840_v19  ;;  %v822_v44 = vld [vmem:[%s4495_s1 + $0x508] sm:$0xff]  ;;  %v920_v30 = vld [vmem:[%s4495_s1 + $0x818] sm:$0xff]  ;;  %v2033_v39 = vld [vmem:[%s4499_s5 + $0x40] sm:$0xff] }
 0x13a   :  { %1952 = vmatpush.msra.mxu1 %v874_v36  ;;  %1973 = vmatpush.msra.mxu2 %v904_v52  ;;  %v854_v28 = vld [vmem:[%s4495_s1 + $0x608] sm:$0xff]  ;;  %v2040_v57 = vld [vmem:[%s4499_s5 + $0x78] sm:$0xff]  ;;  %v1320_v19 = vadd.f32 %v4005_v41, %v1300_v25 }
 0x13b   :  { %1992 = vmatpush.msra.mxu3 %v938_v48  ;;  %1934 = vmatpush.msra.mxu0 %v838_v34  ;;  %v918_v21 = vld [vmem:[%s4495_s1 + $0x808] sm:$0xff]  ;;  %v2032_v48 = vld [vmem:[%s4499_s5 + $0x38] sm:$0xff] }
 0x13c   :  { %1953 = vmatpush.msra.mxu1 %v872_v8  ;;  %1974 = vmatpush.msra.mxu2 %v902_v58  ;;  %v2034_v20 = vld [vmem:[%s4499_s5 + $0x48] sm:$0xff]  ;;  %v1340_v36 = vadd.f32 %v4025_v27, %v1320_v19  ;;  %v2028_v58 = vld [vmem:[%s4499_s5 + $0x18] sm:$0xff] }
 0x13d   :  { %1993 = vmatpush.msra.mxu3 %v936_v43  ;;  %1935 = vmatpush.msra.mxu0 %v836_v63  ;;  %v2030_v41 = vld [vmem:[%s4499_s5 + $0x28] sm:$0xff] }
 0x13e   :  { %1954 = vmatpush.msra.mxu1 %v870_v46  ;;  %1975 = vmatpush.msra.mxu2 %v900_v11  ;;  %v1360_v52 = vadd.f32 %v4057_v10, %v1340_v36  ;;  %v2025_v11 = vld [vmem:[%s4499_s5] sm:$0xff] }
 0x13f   :  { %1994 = vmatpush.msra.mxu3 %v934_v1  ;;  %1936 = vmatpush.msra.mxu0 %v834_v42 }
 0x140   :  { %1955 = vmatpush.msra.mxu1 %v868_v59  ;;  %1976 = vmatpush.msra.mxu2 %v898_v15  ;;  %v1380_v17 = vadd.f32 %v4065_v9, %v1360_v52  ;;  %v2029_v9 = vld [vmem:[%s4499_s5 + $0x20] sm:$0xff] }
 0x141   :  { %1995 = vmatpush.msra.mxu3 %v932_v18  ;;  %1937 = vmatpush.msra.mxu0 %v832_v49 }
 0x142   :  { %1956 = vmatpush.msra.mxu1 %v866_v13  ;;  %1977 = vmatpush.msra.mxu2 %v896_v22  ;;  %v1400_v27 = vadd.f32 %v4073_v60, %v1380_v17  ;;  %v2027_v60 = vld [vmem:[%s4499_s5 + $0x10] sm:$0xff] }
 0x143   :  { %1996 = vmatpush.msra.mxu3 %v930_v33  ;;  %v1599_v14 = vpop.f32.mrf.mxu0  ;;  %1938 = vmatpush.msra.mxu0 %v830_v37  ;;  %v4428_v37 = vld [vmem:[%s4497_s3] sm:$0x3] }
 0x144   :  { %1957 = vmatpush.msra.mxu1 %v864_v29  ;;  %v1600_v45 = vadd.f32 %v1599_v14, %v4209_v61  ;;  %1978 = vmatpush.msra.mxu2 %v894_v51  ;;  %v886_v61 = vld [vmem:[%s4495_s1 + $0x708] sm:$0xff]  ;;  %v1420_v10 = vadd.f32 %v4093_v56, %v1400_v27  ;;  %v4433_v51 = vld [vmem:[%s4498_s4] sm:$0x3] }
 0x145   :  { %1997 = vmatpush.msra.mxu3 %v928_v23  ;;  %1939 = vmatpush.msra.mxu0 %v828_v53  ;;  %v2026_v56 = vld [vmem:[%s4499_s5 + $0x8] sm:$0xff]  ;;  %v2009_v53 = vperm.slane %v4428_v37, 0 }
 0x146   :  { %1958 = vmatpush.msra.mxu1 %v862_v40  ;;  %1979 = vmatpush.msra.mxu2 %v892_v2  ;;  %v1619_v16 = vpop.f32.mrf.mxu1  ;;  %v1440_v8 = vadd.f32 %v4113_v47, %v1420_v10  ;;  %v2017_v2 = vperm.slane %v4433_v51, 0 }
 0x147   :  { %1998 = vmatpush.msra.mxu3 %v926_v0  ;;  %1940 = vmatpush.msra.mxu0 %v826_v31  ;;  %v4344_v55 = vadd.f32 %v1619_v16, %v1600_v45  ;;  %v2056_v31 = vld [vmem:[%s4499_s5 + $0xf8] sm:$0xff]  ;;  %v2051_v16 = vld [vmem:[%s4499_s5 + $0xd0] sm:$0xff] }
 0x148   :  { %1959 = vmatpush.msra.mxu1 %v860_v7  ;;  %1980 = vmatpush.msra.mxu2 %v890_v4  ;;  %v2055_v7 = vld [vmem:[%s4499_s5 + $0xf0] sm:$0xff] }
 0x149   :  { %1999 = vmatpush.msra.mxu3 %v924_v12  ;;  %1941 = vmatpush.msra.mxu0 %v824_v26  ;;  %v1664_v34 = vpop.f32.mrf.mxu2  ;;  %v2054_v12 = vld [vmem:[%s4499_s5 + $0xe8] sm:$0xff]  ;;  %v2053_v26 = vld [vmem:[%s4499_s5 + $0xe0] sm:$0xff] }
 0x14a   :  { %1960 = vmatpush.msra.mxu1 %v858_v6  ;;  %1981 = vmatpush.msra.mxu2 %v888_v38  ;;  %v1665_v43 = vadd.f32 %v1664_v34, %v1440_v8  ;;  %v2052_v6 = vld [vmem:[%s4499_s5 + $0xd8] sm:$0xff]  ;;  %v2050_v38 = vld [vmem:[%s4499_s5 + $0xc8] sm:$0xff]  ;;  %v2010_v34 = vperm.slane %v4428_v37, 1 }
 0x14b   :  { %2000 = vmatpush.msra.mxu3 %v922_v50  ;;  %1942 = vmatpush.msra.mxu0 %v822_v44  ;;  %v2049_v50 = vld [vmem:[%s4499_s5 + $0xc0] sm:$0xff]  ;;  %v2048_v44 = vld [vmem:[%s4499_s5 + $0xb8] sm:$0xff] }
 0x14c   :  { %1961 = vmatpush.msra.mxu1 %v856_v62  ;;  %1982 = vmatpush.msra.mxu2 %v886_v61  ;;  %v1684_v63 = vpop.f32.mrf.mxu3  ;;  %v2047_v62 = vld [vmem:[%s4499_s5 + $0xb0] sm:$0xff]  ;;  %v2046_v61 = vld [vmem:[%s4499_s5 + $0xa8] sm:$0xff] }
 0x14d   :  { %2001 = vmatpush.msra.mxu3 %v920_v30  ;;  %1943 = vmatmul.f32.vlgmr.msra.gmra.mxu0 %v3755_v54  ;;  %v2038_v54 = vld [vmem:[%s4499_s5 + $0x68] sm:$0xff]  ;;  %v1685_v46 = vadd.f32 %v1684_v63, %v1665_v43  ;;  %v2045_v30 = vld [vmem:[%s4499_s5 + $0xa0] sm:$0xff] }
 0x14e   :  { %1983 = vmatmul.f32.vlgmr.msra.gmra.mxu2 %v3959_v35  ;;  %1962 = vmatpush.msra.mxu1 %v854_v28  ;;  %v2037_v35 = vld [vmem:[%s4499_s5 + $0x60] sm:$0xff]  ;;  %v2044_v28 = vld [vmem:[%s4499_s5 + $0x98] sm:$0xff] }
 0x14f   :  { %2002 = vmatpush.msra.mxu3 %v918_v21  ;;  %1963 = vmatmul.f32.vlgmr.msra.gmra.mxu1 %v3940_v32  ;;  %v2036_v32 = vld [vmem:[%s4499_s5 + $0x58] sm:$0xff]  ;;  %v2043_v21 = vld [vmem:[%s4499_s5 + $0x90] sm:$0xff]  ;;  %v2119_v63 = vld [vmem:[%s4500_s6] ss:$0 sm:$0xff] }
 0x150   :  { %2003 = vmatmul.f32.vlgmr.msra.gmra.mxu3 %v3942_v5  ;;  %2061 = vmatpush.msrb.mxu0 %v2040_v57  ;;  %v2035_v5 = vld [vmem:[%s4499_s5 + $0x50] sm:$0xff] }
 0x151   :  { %2081 = vmatpush.msrb.mxu1 %v2056_v31 }
 0x152   :  { %2062 = vmatpush.msrb.mxu0 %v2039_v3  ;;  %v2042_v3 = vld [vmem:[%s4499_s5 + $0x88] sm:$0xff] }
 0x153   :  { %2082 = vmatpush.msrb.mxu1 %v2055_v7 }
 0x154   :  { %2063 = vmatpush.msrb.mxu0 %v2038_v54 }
 0x155   :  { %2083 = vmatpush.msrb.mxu1 %v2054_v12 }
 0x156   :  { %2064 = vmatpush.msrb.mxu0 %v2037_v35  ;;  %v2041_v35 = vld [vmem:[%s4499_s5 + $0x80] sm:$0xff] }
 0x157   :  { %2084 = vmatpush.msrb.mxu1 %v2053_v26 }
 0x158   :  { %2065 = vmatpush.msrb.mxu0 %v2036_v32 }
 0x159   :  { %2085 = vmatpush.msrb.mxu1 %v2052_v6 }
 0x15a   :  { %2066 = vmatpush.msrb.mxu0 %v2035_v5 }
 0x15b   :  { %2086 = vmatpush.msrb.mxu1 %v2051_v16 }
 0x15c   :  { %2067 = vmatpush.msrb.mxu0 %v2034_v20 }
 0x15d   :  { %2087 = vmatpush.msrb.mxu1 %v2050_v38 }
 0x15e   :  { %2068 = vmatpush.msrb.mxu0 %v2033_v39 }
 0x15f   :  { %2088 = vmatpush.msrb.mxu1 %v2049_v50 }
 0x160   :  { %2069 = vmatpush.msrb.mxu0 %v2032_v48 }
 0x161   :  { %2089 = vmatpush.msrb.mxu1 %v2048_v44 }
 0x162   :  { %2070 = vmatpush.msrb.mxu0 %v2031_v24 }
 0x163   :  { %2090 = vmatpush.msrb.mxu1 %v2047_v62 }
 0x164   :  { %2071 = vmatpush.msrb.mxu0 %v2030_v41 }
 0x165   :  { %v1704_v47 = vpop.f32.mrf.mxu0  ;;  %2091 = vmatpush.msrb.mxu1 %v2046_v61 }
 0x166   :  { %2072 = vmatpush.msrb.mxu0 %v2029_v9  ;;  %v1705_v1 = vadd.f32 %v1704_v47, %v1685_v46 }
 0x167   :  { %2092 = vmatpush.msrb.mxu1 %v2045_v30 }
 0x168   :  { %2073 = vmatpush.msrb.mxu0 %v2028_v58  ;;  %v1724_v42 = vpop.f32.mrf.mxu1 }
 0x169   :  { %v1725_v15 = vadd.f32 %v1724_v42, %v1705_v1  ;;  %2093 = vmatpush.msrb.mxu1 %v2044_v28 }
 0x16a   :  { %2074 = vmatpush.msrb.mxu0 %v2027_v60 }
 0x16b   :  { %v1744_v59 = vpop.f32.mrf.mxu2  ;;  %2094 = vmatpush.msrb.mxu1 %v2043_v21 }
 0x16c   :  { %2075 = vmatpush.msrb.mxu0 %v2026_v56  ;;  %v1745_v18 = vadd.f32 %v1744_v59, %v1725_v15 }
 0x16d   :  { %2095 = vmatpush.msrb.mxu1 %v2042_v3 }
 0x16e   :  { %2076 = vmatpush.msrb.mxu0 %v2025_v11  ;;  %v1764_v49 = vpop.f32.mrf.mxu3 }
 0x16f   :  { %v1765_v13 = vadd.f32 %v1764_v49, %v1745_v18  ;;  %2096 = vmatpush.msrb.mxu1 %v2041_v35 }
 0x187   :  { %v1784_v22 = vpop.f32.mrf.mxu0 }
 0x188   :  { %v1785_v33 = vadd.f32 %v1784_v22, %v1765_v13 }
 0x18a   :  { %v1804_v29 = vpop.f32.mrf.mxu1 }
 0x18b   :  { %v1805_v23 = vadd.f32 %v1804_v29, %v1785_v33 }
 0x18d   :  { %v1824_v40 = vpop.f32.mrf.mxu2 }
 0x18e   :  { %v1825_v14 = vadd.f32 %v1824_v40, %v1805_v23  ;;  %v1844_v57 = vpop.f32.mrf.mxu3 }
 0x18f   :  { %v1845_v32 = vadd.f32 %v1844_v57, %v4344_v55  ;;  %v2018_v55 = vperm.slane %v4433_v51, 1 }
 0x190   :  { %v2013_v0 = vmul.f32 %v2009_v53, %v1825_v14 }
 0x192   :  { %v2021_v45 = vadd.f32 %v2017_v2, %v2013_v0 }
 0x194   :  { %v2023_v4 = vmax.f32 %v2021_v45, 0.0 }
 0x196   :  { %2077 = vmatmul.f32.vlgmr.msrb.gmra.mxu0 %v2023_v4 }
 0x1a8   :  { %v1864_v54 = vpop.f32.mrf.mxu0 }
 0x1a9   :  { %v1865_v5 = vadd.f32 %v1864_v54, %v1845_v32 }
 0x1ab   :  { %v1884_v20 = vpop.f32.mrf.mxu1 }
 0x1ac   :  { %v1885_v39 = vadd.f32 %v1884_v20, %v1865_v5 }
 0x1af   :  { %v1904_v25 = vpop.f32.mrf.mxu2 }
 0x1b0   :  { %v1905_v19 = vadd.f32 %v1904_v25, %v1885_v39 }
 0x1b2   :  { %v1924_v36 = vpop.f32.mrf.mxu3 }
 0x1b3   :  { %v1925_v52 = vadd.f32 %v1924_v36, %v1905_v19 }
 0x1ca   :  { %v1944_v48 = vpop.f32.mrf.mxu0 }
 0x1cb   :  { %v1945_v17 = vadd.f32 %v1944_v48, %v1925_v52 }
 0x1cc   :  { %v1964_v24 = vpop.f32.mrf.mxu1 }
 0x1cd   :  { %v1965_v41 = vadd.f32 %v1964_v24, %v1945_v17 }
 0x1d1   :  { %v1984_v27 = vpop.f32.mrf.mxu2 }
 0x1d2   :  { %v1985_v10 = vadd.f32 %v1984_v27, %v1965_v41 }
 0x1d3   :  { %v2004_v8 = vpop.f32.mrf.mxu3 }
 0x1d4   :  { %v2005_v9 = vadd.f32 %v2004_v8, %v1985_v10 }
 0x1d6   :  { %v2014_v58 = vmul.f32 %v2010_v34, %v2005_v9 }
 0x1d8   :  { %v2022_v43 = vadd.f32 %v2018_v55, %v2014_v58 }
 0x1da   :  { %v2024_v60 = vmax.f32 %v2022_v43, 0.0 }
 0x1dc   :  { %2097 = vmatmul.f32.vlgmr.msrb.gmra.mxu1 %v2024_v60 }
 0x213   :  { %v2078_v56 = vpop.f32.mrf.mxu0 }
 0x214   :  { %v2079_v47 = vadd.f32 %v2119_v63, %v2078_v56 }
 0x259   :  { %v2098_v46 = vpop.f32.mrf.mxu1 }
 0x25a   :  { %v2099_v11 = vadd.f32 %v2098_v46, %v2079_v47 }
 0x25c   :  { %2101 = vst [vmem:[#allocation4] sm:$0x3] %v2099_v11 }
 0x25d   :  { %2112 = dma.vmem_to_hbm [thread:$0]  %s2108_s0, 32, %s2110_s23, [#allocation5]  }
 0x25e   :  { %2144 = dma.done.wait [#allocation5], 32  }
 0x25f   :  { %2145 = vsyncadd [#allocation5], 4294967264 }
 0x260   :  { %2117 = vsyncpa [#allocation5], 1 }

// kernel: net_forward.12
= control target key start
LH: loop header
LB: loop body
LE: loop exit
PB: predicated region body
PF: predicated region fallthrough
CT: control target
= control target key end

     0   :  { %s6224_s15 = smov 0   ;;  %s7546_s0 = inlined_call_operand.vmem [shape: bf16[2,22,768], index: 0, kind: input, shape index: {}]   ;;  %s7547_s1 = inlined_call_operand.vmem [shape: bf16[7,768,128], index: 1, kind: input, shape index: {}]   ;;  %s7548_s2 = inlined_call_operand.vmem [shape: f32[1,128], index: 2, kind: input, shape index: {}]   ;;  %s7549_s3 = inlined_call_operand.vmem [shape: f32[1,128], index: 3, kind: input, shape index: {}]   ;;  %s7550_s4 = inlined_call_operand.vmem [shape: bf16[2,16,128], index: 4, kind: output, shape index: {}]  }
   0x1 LB: > { %s3878_s16 = sadd.s32 4294967295, %s6197_s15   ;;  %p3882_p0 = scmp.ge.s32.totalorder %s6197_s15, 1  ;;  %s6197_s15 = sphi %s6224_s15, %s14_s15  }
   0x2   : > { %p162_p1 = scmp.lt.s32.totalorder %s6197_s15, 3 }
   0x4   : > { %p163_p2 = pnand %p3882_p0, %p162_p1 }
   0x5   : > { %p188_p3 = scmp.lt.s32.totalorder (!%p163_p2), %s3878_s16, 1 }
   0x6   : > { %166 = sbr.rel (%p163_p2) target bundleno = 512 (0x200), region = 36 }
   0xb   : > { %v5894_v0 = vld [vmem:[%s7547_s1 + $0x1b8] sm:$0xff]  ;;  %v5893_v4 = vld [vmem:[%s7547_s1 + $0x1b0] sm:$0xff]  ;;  %s7560_s16 = smov (!%p188_p3, %s3878_s16), 1  ;;  %v5892_v8 = vld [vmem:[%s7547_s1 + $0x1a8] sm:$0xff]  ;;  %vm432_vm0 = vsmask.f32 7424 }
   0xc   : > { %v5902_v1 = vld [vmem:[%s7547_s1 + $0x1f8] sm:$0xff]  ;;  %799 = vmatpush.bf16.msra.mxu0 %v5894_v0  ;;  %v5901_v5 = vld [vmem:[%s7547_s1 + $0x1f0] sm:$0xff]  ;;  %v5900_v9 = vld [vmem:[%s7547_s1 + $0x1e8] sm:$0xff]  ;;  %s6180_s17 = smul.u32 72, %s7560_s16  ;;  %vm1364_vm1 = vcmask 1046528   ;;  %vm2392_vm3 = vcmask 1045504  }
   0xd   : > { %v5910_v2 = vld [vmem:[%s7547_s1 + $0x238] sm:$0xff]  ;;  %813 = vmatpush.bf16.msra.mxu1 %v5902_v1  ;;  %v5909_v6 = vld [vmem:[%s7547_s1 + $0x230] sm:$0xff]  ;;  %v5908_v10 = vld [vmem:[%s7547_s1 + $0x228] sm:$0xff]  ;;  %vm1860_vm2 = vsmask.f32 6400  ;;  %vm3408_vm5 = vcmask 1044480  }
   0xe   : > { %v5918_v3 = vld [vmem:[%s7547_s1 + $0x278] sm:$0xff]  ;;  %827 = vmatpush.bf16.msra.mxu2 %v5910_v2  ;;  %v5917_v7 = vld [vmem:[%s7547_s1 + $0x270] sm:$0xff]  ;;  %v5916_v11 = vld [vmem:[%s7547_s1 + $0x268] sm:$0xff]  ;;  %s6286_s28 = scalar_lea.vmem %s7546_s0, %s6180_s17  ;;  %vm2888_vm4 = vsmask.f32 5376  ;;  %s5832_s27 = sshll.u32 %s7560_s16, 3 }
   0xf   : > { %841 = vmatpush.bf16.msra.mxu3 %v5918_v3  ;;  %v5891_v12 = vld [vmem:[%s7547_s1 + $0x1a0] sm:$0xff]  ;;  %v5890_v16 = vld [vmem:[%s7547_s1 + $0x198] sm:$0xff]  ;;  %v206_v22 = vld [vmem:[%s6286_s28 + $0x30] sm:$0x77]  ;;  %s197_s30 = scalar_lea.vmem %s7550_s4, %s5832_s27 }
  0x10   : > { %800 = vmatpush.bf16.msra.mxu0 %v5893_v4  ;;  %v5899_v13 = vld [vmem:[%s7547_s1 + $0x1e0] sm:$0xff]  ;;  %v5898_v17 = vld [vmem:[%s7547_s1 + $0x1d8] sm:$0xff]  ;;  %v221_v23 = vunpack.c.l.bf16 %v206_v22  ;;  %v3896_v25 = vld [vmem:[%s6286_s28 + $0x8] sm:$0xf]  ;;  %v222_v28 = vunpack.c.h.bf16 %v206_v22 }
  0x11   : > { %814 = vmatpush.bf16.msra.mxu1 %v5901_v5  ;;  %v5907_v14 = vld [vmem:[%s7547_s1 + $0x220] sm:$0xff]  ;;  %v5906_v18 = vld [vmem:[%s7547_s1 + $0x218] sm:$0xff]  ;;  %v5889_v29 = vld [vmem:[%s7547_s1 + $0x190] sm:$0xff] }
  0x12   : > { %828 = vmatpush.bf16.msra.mxu2 %v5909_v6  ;;  %v5915_v15 = vld [vmem:[%s7547_s1 + $0x260] sm:$0xff]  ;;  %v5914_v19 = vld [vmem:[%s7547_s1 + $0x258] sm:$0xff]  ;;  %v5897_v30 = vld [vmem:[%s7547_s1 + $0x1d0] sm:$0xff]  ;;  %v6322_v35 = vpack.c.bf16 %v221_v23, %v221_v23  ;;  %v6336_v43 = vpack.c.bf16 %v222_v28, %v222_v28 }
  0x13   : > { %842 = vmatpush.bf16.msra.mxu3 %v5917_v7  ;;  %v3888_v20 = vld [vmem:[%s6286_s28] sm:$0xf]  ;;  %v5836_v21 = vld [vmem:[%s6286_s28 + $0x14] sm:$0xf0]  ;;  %v5905_v31 = vld [vmem:[%s7547_s1 + $0x210] sm:$0xff] }
  0x14   : > { %801 = vmatpush.bf16.msra.mxu0 %v5892_v8  ;;  %v6303_v24 = vor.u32 %v5836_v21, %v3888_v20  ;;  %v5837_v26 = vld [vmem:[%s6286_s28 + $0x1c] sm:$0xf0]  ;;  %v207_v27 = vld [vmem:[%s6286_s28 + $0x38] sm:$0x77]  ;;  %v5913_v34 = vld [vmem:[%s7547_s1 + $0x250] sm:$0xff]  ;;  %v6353_v51 = vshll.u32 %v6322_v35, 16 }
  0x15   : > { %815 = vmatpush.bf16.msra.mxu1 %v5900_v9  ;;  %v223_v32 = vunpack.c.l.bf16 %v207_v27  ;;  %v6317_v33 = vor.u32 %v5837_v26, %v3896_v25  ;;  %v5833_v37 = vld [vmem:[%s6286_s28 + $0x4] sm:$0xf]  ;;  %v3890_v38 = vld [vmem:[%s6286_s28 + $0x18] sm:$0xf0]  ;;  %v224_v39 = vunpack.c.h.bf16 %v207_v27  ;;  %v5834_v44 = vld [vmem:[%s6286_s28 + $0xc] sm:$0xf] }
  0x16   : > { %829 = vmatpush.bf16.msra.mxu2 %v5908_v10  ;;  %v6325_v36 = vshll.u32 %v6303_v24, 16  ;;  %v6334_v42 = vor.u32 %v5833_v37, %v3890_v38  ;;  %v3898_v45 = vld [vmem:[%s6286_s28 + $0x20] sm:$0xf0]  ;;  %v5888_v47 = vld [vmem:[%s7547_s1 + $0x188] sm:$0xff]  ;;  %v6349_v49 = vshrl.u32 %v6303_v24, 16  ;;  %v6378_v61 = vshll.u32 %v6336_v43, 16 }
  0x17   : > { %843 = vmatpush.bf16.msra.mxu3 %v5916_v11  ;;  %v6329_v40 = vpack.c.bf16 %v223_v32, %v223_v32  ;;  %v6332_v41 = vshll.u32 %v6317_v33, 16  ;;  %v6340_v46 = vor.u32 %v5834_v44, %v3898_v45  ;;  %v5896_v48 = vld [vmem:[%s7547_s1 + $0x1c8] sm:$0xff]  ;;  %v6365_v55 = vshrl.u32 %v6317_v33, 16  ;;  %v5887_v63 = vld [vmem:[%s7547_s1 + $0x180] sm:$0xff]  ;;  %v5926_v6 = vld [vmem:[%s7547_s1 + $0x2b8] sm:$0xff] }
  0x18   : > { %802 = vmatpush.bf16.msra.mxu0 %v5891_v12  ;;  %v438_v50 = vrot.slane %v6325_v36, 1  ;;  %v6356_v52 = vshll.u32 %v6334_v42, 16  ;;  %v5904_v53 = vld [vmem:[%s7547_s1 + $0x208] sm:$0xff]  ;;  %v6371_v58 = vpack.c.bf16 %v224_v39, %v224_v39  ;;  %v6374_v59 = vshrl.u32 %v6334_v42, 16  ;;  %v5895_v0 = vld [vmem:[%s7547_s1 + $0x1c0] sm:$0xff]  ;;  %v5934_v10 = vld [vmem:[%s7547_s1 + $0x2f8] sm:$0xff] }
  0x19   : > { %816 = vmatpush.bf16.msra.mxu1 %v5899_v13  ;;  %v5912_v54 = vld [vmem:[%s7547_s1 + $0x248] sm:$0xff]  ;;  %v462_v56 = vrot.slane %v6332_v41, 1  ;;  %v6369_v57 = vshll.u32 %v6329_v40, 16  ;;  %v6381_v62 = vshll.u32 %v6340_v46, 16  ;;  %v443_v2 = vrot.slane %v6353_v51, 1  ;;  %v5903_v5 = vld [vmem:[%s7547_s1 + $0x200] sm:$0xff] }
  0x1a   : > { %830 = vmatpush.bf16.msra.mxu2 %v5907_v14  ;;  %v450_v60 = vrot.slane %v6356_v52, 1  ;;  %v439_v1 = vor.u32 %v438_v50, %v6349_v49  ;;  %v6392_v3 = vshrl.u32 %v6340_v46, 16  ;;  %v6395_v4 = vshll.u32 %v6371_v58, 16  ;;  %v5846_v11 = vld [vmem:[%s7547_s1 + $0x38] sm:$0xff]  ;;  %v5911_v14 = vld [vmem:[%s7547_s1 + $0x240] sm:$0xff]  ;;  %v5933_v21 = vld [vmem:[%s7547_s1 + $0x2f0] sm:$0xff] }
  0x1b   : > { %844 = vmatpush.bf16.msra.mxu3 %v5915_v15  ;;  %v463_v7 = vor.u32 %v462_v56, %v6365_v55  ;;  %v467_v8 = vrot.slane %v6369_v57, 1  ;;  %v474_v9 = vrot.slane %v6381_v62, 1  ;;  %v455_v13 = vrot.slane %v6378_v61, 1  ;;  %v5854_v15 = vld [vmem:[%s7547_s1 + $0x78] sm:$0xff]  ;;  %v5845_v22 = vld [vmem:[%s7547_s1 + $0x30] sm:$0xff]  ;;  %v5924_v27 = vld [vmem:[%s7547_s1 + $0x2a8] sm:$0xff] }
  0x1c   : > { %803 = vmatpush.bf16.msra.mxu0 %v5890_v16  ;;  %v451_v12 = vor.u32 %v450_v60, %v6374_v59  ;;  %v444_v16 = vsel %vm432_vm0, %v439_v1, %v443_v2  ;;  %v5853_v25 = vld [vmem:[%s7547_s1 + $0x70] sm:$0xff]  ;;  %v5932_v28 = vld [vmem:[%s7547_s1 + $0x2e8] sm:$0xff]  ;;  %v5931_v32 = vld [vmem:[%s7547_s1 + $0x2e0] sm:$0xff] }
  0x1d   : > { %817 = vmatpush.bf16.msra.mxu1 %v5898_v17  ;;  %v475_v17 = vor.u32 %v474_v9, %v6392_v3  ;;  %v468_v20 = vsel %vm432_vm0, %v463_v7, %v467_v8  ;;  %v3904_v37 = vld [vmem:[%s6286_s28 + $0x10] sm:$0xf]  ;;  %v5838_v38 = vld [vmem:[%s6286_s28 + $0x24] sm:$0xf0]  ;;  %v208_v39 = vld [vmem:[%s6286_s28 + $0x40] sm:$0x77] }
  0x1e   : > { %831 = vmatpush.bf16.msra.mxu2 %v5906_v18  ;;  %v479_v18 = vrot.slane %v6395_v4, 1  ;;  %v456_v23 = vsel %vm432_vm0, %v451_v12, %v455_v13  ;;  %v5851_v44 = vld [vmem:[%s7547_s1 + $0x60] sm:$0xff]  ;;  %v5835_v45 = vld [vmem:[%s6286_s28 + $0x14] sm:$0xf]  ;;  %v5930_v50 = vld [vmem:[%s7547_s1 + $0x2d8] sm:$0xff]  ;;  %v6476_v56 = vor.u32 %v5838_v38, %v3904_v37  ;;  %v226_v60 = vunpack.c.h.bf16 %v208_v39 }
  0x1f   : > { %845 = vmatpush.bf16.msra.mxu3 %v5914_v19  ;;  %v5925_v19 = vld [vmem:[%s7547_s1 + $0x2b0] sm:$0xff]  ;;  %v5928_v12 = vld [vmem:[%s7547_s1 + $0x2c8] sm:$0xff]  ;;  %v5886_v37 = vld [vmem:[%s7547_s1 + $0x178] sm:$0xff] }
  0x20   : > { %804 = vmatpush.bf16.msra.mxu0 %v5889_v29  ;;  %v480_v26 = vsel %vm432_vm0, %v475_v17, %v479_v18  ;;  %v5844_v29 = vld [vmem:[%s7547_s1 + $0x28] sm:$0xff]  ;;  %v5921_v1 = vld [vmem:[%s7547_s1 + $0x290] sm:$0xff]  ;;  %v6495_v7 = vshll.u32 %v6476_v56, 16  ;;  %v6497_v8 = vpack.c.bf16 %v226_v60, %v226_v60  ;;  %v5859_v60 = vld [vmem:[%s7547_s1 + $0xa0] sm:$0xff] }
  0x21   : > { %818 = vmatpush.bf16.msra.mxu1 %v5897_v30  ;;  %v5852_v30 = vld [vmem:[%s7547_s1 + $0x68] sm:$0xff]  ;;  %v5929_v2 = vld [vmem:[%s7547_s1 + $0x2d0] sm:$0xff] }
  0x22   : > { %832 = vmatpush.bf16.msra.mxu2 %v5905_v31  ;;  %v5923_v31 = vld [vmem:[%s7547_s1 + $0x2a0] sm:$0xff]  ;;  %v5840_v13 = vld [vmem:[%s7547_s1 + $0x8] sm:$0xff] }
  0x23   : > { %846 = vmatpush.bf16.msra.mxu3 %v5913_v34  ;;  %v5843_v34 = vld [vmem:[%s7547_s1 + $0x20] sm:$0xff] }
  0x24   : > { %805 = vmatpush.bf16.msra.mxu0 %v5888_v47  ;;  %v3906_v47 = vld [vmem:[%s6286_s28 + $0x28] sm:$0xf0] }
  0x25   : > { %819 = vmatpush.bf16.msra.mxu1 %v5896_v48  ;;  %v5922_v48 = vld [vmem:[%s7547_s1 + $0x298] sm:$0xff] }
  0x26   : > { %833 = vmatpush.bf16.msra.mxu2 %v5904_v53  ;;  %v5842_v53 = vld [vmem:[%s7547_s1 + $0x18] sm:$0xff] }
  0x27   : > { %847 = vmatpush.bf16.msra.mxu3 %v5912_v54  ;;  %v225_v54 = vunpack.c.l.bf16 %v208_v39  ;;  %v5861_v39 = vld [vmem:[%s7547_s1 + $0xb0] sm:$0xff] }
  0x28   : > { %806 = vmatpush.bf16.msra.mxu0 %v5887_v63  ;;  %v6478_v63 = vor.u32 %v5835_v45, %v3906_v47  ;;  %v5877_v45 = vld [vmem:[%s7547_s1 + $0x130] sm:$0xff] }
  0x29   : > { %820 = vmatpush.bf16.msra.mxu1 %v5895_v0  ;;  %v5850_v0 = vld [vmem:[%s7547_s1 + $0x58] sm:$0xff]  ;;  %v5885_v47 = vld [vmem:[%s7547_s1 + $0x170] sm:$0xff] }
  0x2a   : > { %834 = vmatpush.bf16.msra.mxu2 %v5903_v5  ;;  %v5841_v5 = vld [vmem:[%s7547_s1 + $0x10] sm:$0xff]  ;;  %v6500_v9 = vshll.u32 %v6478_v63, 16  ;;  %v6522_v17 = vshrl.u32 %v6478_v63, 16 }
  0x2b   : > { %848 = vmatpush.bf16.msra.mxu3 %v5911_v14  ;;  %807 = vmatmul.bf16.vlgmr.msra.gmra.mxu0 %v444_v16  ;;  %v6515_v14 = vshrl.u32 %v6476_v56, 16 }
  0x2c   : > { %855 = vmatpush.bf16.msrb.mxu0 %v5926_v6  ;;  %821 = vmatmul.bf16.vlgmr.msra.gmra.mxu1 %v456_v23  ;;  %v6492_v6 = vpack.c.bf16 %v225_v54, %v225_v54  ;;  %v498_v18 = vrot.slane %v6500_v9, 1  ;;  %v5839_v23 = vld [vmem:[%s7547_s1] sm:$0xff]  ;;  %v5884_v54 = vld [vmem:[%s7547_s1 + $0x168] sm:$0xff] }
  0x2d   : > { %869 = vmatpush.bf16.msrb.mxu1 %v5934_v10  ;;  %835 = vmatmul.bf16.vlgmr.msra.gmra.mxu2 %v468_v20  ;;  %v5849_v10 = vld [vmem:[%s7547_s1 + $0x50] sm:$0xff]  ;;  %v5848_v20 = vld [vmem:[%s7547_s1 + $0x48] sm:$0xff] }
  0x2e   : > { %1171 = vmatpush.bf16.msrb.mxu2 %v5846_v11  ;;  %849 = vmatmul.bf16.vlgmr.msra.gmra.mxu3 %v480_v26  ;;  %v5920_v11 = vld [vmem:[%s7547_s1 + $0x288] sm:$0xff]  ;;  %v6519_v16 = vshll.u32 %v6492_v6, 16 }
  0x2f   : > { %1185 = vmatpush.bf16.msrb.mxu3 %v5854_v15  ;;  %v486_v15 = vrot.slane %v6495_v7, 1 }
  0x30   : > { %856 = vmatpush.bf16.msrb.mxu0 %v5925_v19  ;;  %v6526_v19 = vshll.u32 %v6497_v8, 16  ;;  %v491_v26 = vrot.slane %v6519_v16, 1 }
  0x31   : > { %870 = vmatpush.bf16.msrb.mxu1 %v5933_v21  ;;  %v5919_v21 = vld [vmem:[%s7547_s1 + $0x280] sm:$0xff] }
  0x32   : > { %1172 = vmatpush.bf16.msrb.mxu2 %v5845_v22  ;;  %v5927_v22 = vld [vmem:[%s7547_s1 + $0x2c0] sm:$0xff] }
  0x33   : > { %1186 = vmatpush.bf16.msrb.mxu3 %v5853_v25  ;;  %v487_v25 = vor.u32 %v486_v15, %v6515_v14  ;;  %v5865_v15 = vld [vmem:[%s7547_s1 + $0xd0] sm:$0xff] }
  0x34   : > { %857 = vmatpush.bf16.msrb.mxu0 %v5924_v27  ;;  %v5862_v27 = vld [vmem:[%s7547_s1 + $0xb8] sm:$0xff] }
  0x35   : > { %871 = vmatpush.bf16.msrb.mxu1 %v5932_v28  ;;  %v5870_v28 = vld [vmem:[%s7547_s1 + $0xf8] sm:$0xff] }
  0x36   : > { %1173 = vmatpush.bf16.msrb.mxu2 %v5844_v29  ;;  %v499_v29 = vor.u32 %v498_v18, %v6522_v17  ;;  %v5873_v18 = vld [vmem:[%s7547_s1 + $0x110] sm:$0xff] }
  0x37   : > { %1187 = vmatpush.bf16.msrb.mxu3 %v5852_v30  ;;  %v503_v30 = vrot.slane %v6526_v19, 1 }
  0x38   : > { %858 = vmatpush.bf16.msrb.mxu0 %v5923_v31  ;;  %v5878_v31 = vld [vmem:[%s7547_s1 + $0x138] sm:$0xff] }
  0x39   : > { %872 = vmatpush.bf16.msrb.mxu1 %v5931_v32  ;;  %v5847_v32 = vld [vmem:[%s7547_s1 + $0x40] sm:$0xff]  ;;  %v504_v38 = vsel %vm432_vm0, %v499_v29, %v503_v30  ;;  %v5942_v29 = vld [vmem:[%s7547_s1 + $0x338] sm:$0xff] }
  0x3a   : > { %1174 = vmatpush.bf16.msrb.mxu2 %v5843_v34  ;;  %v492_v34 = vsel %vm432_vm0, %v487_v25, %v491_v26  ;;  %v5880_v25 = vld [vmem:[%s7547_s1 + $0x148] sm:$0xff]  ;;  %v5855_v26 = vld [vmem:[%s7547_s1 + $0x80] sm:$0xff]  ;;  %v5950_v30 = vld [vmem:[%s7547_s1 + $0x378] sm:$0xff] }
  0x3b   : > { %1188 = vmatpush.bf16.msrb.mxu3 %v5851_v44  ;;  %v5869_v44 = vld [vmem:[%s7547_s1 + $0xf0] sm:$0xff] }
  0x3c   : > { %859 = vmatpush.bf16.msrb.mxu0 %v5922_v48  ;;  %v5860_v48 = vld [vmem:[%s7547_s1 + $0xa8] sm:$0xff] }
  0x3d   : > { %873 = vmatpush.bf16.msrb.mxu1 %v5930_v50  ;;  %v5868_v50 = vld [vmem:[%s7547_s1 + $0xe8] sm:$0xff] }
  0x3e   : > { %1175 = vmatpush.bf16.msrb.mxu2 %v5842_v53  ;;  %v5876_v53 = vld [vmem:[%s7547_s1 + $0x128] sm:$0xff] }
  0x3f   : > { %1189 = vmatpush.bf16.msrb.mxu3 %v5850_v0  ;;  %v5867_v0 = vld [vmem:[%s7547_s1 + $0xe0] sm:$0xff] }
  0x40   : > { %860 = vmatpush.bf16.msrb.mxu0 %v5921_v1  ;;  %v5875_v1 = vld [vmem:[%s7547_s1 + $0x120] sm:$0xff] }
  0x41   : > { %874 = vmatpush.bf16.msrb.mxu1 %v5929_v2  ;;  %v5883_v2 = vld [vmem:[%s7547_s1 + $0x160] sm:$0xff] }
  0x42   : > { %1176 = vmatpush.bf16.msrb.mxu2 %v5841_v5  ;;  %v5858_v5 = vld [vmem:[%s7547_s1 + $0x98] sm:$0xff] }
  0x43   : > { %1190 = vmatpush.bf16.msrb.mxu3 %v5849_v10  ;;  %v5866_v10 = vld [vmem:[%s7547_s1 + $0xd8] sm:$0xff] }
  0x44   : > { %861 = vmatpush.bf16.msrb.mxu0 %v5920_v11  ;;  %v5874_v11 = vld [vmem:[%s7547_s1 + $0x118] sm:$0xff] }
  0x45   : > { %875 = vmatpush.bf16.msrb.mxu1 %v5928_v12  ;;  %v5882_v12 = vld [vmem:[%s7547_s1 + $0x158] sm:$0xff] }
  0x46   : > { %1177 = vmatpush.bf16.msrb.mxu2 %v5840_v13  ;;  %v5857_v13 = vld [vmem:[%s7547_s1 + $0x90] sm:$0xff] }
  0x47   : > { %1191 = vmatpush.bf16.msrb.mxu3 %v5848_v20  ;;  %v5881_v20 = vld [vmem:[%s7547_s1 + $0x150] sm:$0xff] }
  0x48   : > { %862 = vmatpush.bf16.msrb.mxu0 %v5919_v21  ;;  %v5856_v21 = vld [vmem:[%s7547_s1 + $0x88] sm:$0xff] }
  0x49   : > { %876 = vmatpush.bf16.msrb.mxu1 %v5927_v22  ;;  %v5864_v22 = vld [vmem:[%s7547_s1 + $0xc8] sm:$0xff] }
  0x4a   : > { %1178 = vmatpush.bf16.msrb.mxu2 %v5839_v23  ;;  %v5872_v23 = vld [vmem:[%s7547_s1 + $0x108] sm:$0xff] }
  0x4b   : > { %1192 = vmatpush.bf16.msrb.mxu3 %v5847_v32  ;;  %863 = vmatmul.bf16.vlgmr.msrb.gmra.mxu0 %v492_v34  ;;  %v5879_v32 = vld [vmem:[%s7547_s1 + $0x140] sm:$0xff]  ;;  %v5966_v34 = vld [vmem:[%s7547_s1 + $0x3f8] sm:$0xff] }
  0x4c   : > { %1199 = vmatpush.bf16.msra.mxu0 %v5862_v27  ;;  %877 = vmatmul.bf16.vlgmr.msrb.gmra.mxu1 %v504_v38  ;;  %v5863_v27 = vld [vmem:[%s7547_s1 + $0xc0] sm:$0xff]  ;;  %v5949_v38 = vld [vmem:[%s7547_s1 + $0x370] sm:$0xff] }
  0x4d   : > { %1213 = vmatpush.bf16.msra.mxu1 %v5870_v28  ;;  %1179 = vmatmul.bf16.vlgmr.msrb.gmra.mxu2 %v6303_v24  ;;  %v5871_v28 = vld [vmem:[%s7547_s1 + $0x100] sm:$0xff] }
  0x4e   : > { %1227 = vmatpush.bf16.msra.mxu2 %v5878_v31  ;;  %1193 = vmatmul.bf16.vlgmr.msrb.gmra.mxu3 %v6334_v42  ;;  %v5958_v31 = vld [vmem:[%s7547_s1 + $0x3b8] sm:$0xff] }
  0x4f   : > { %1241 = vmatpush.bf16.msra.mxu3 %v5886_v37  ;;  %v5941_v37 = vld [vmem:[%s7547_s1 + $0x330] sm:$0xff] }
  0x50   : > { %1200 = vmatpush.bf16.msra.mxu0 %v5861_v39  ;;  %v5957_v39 = vld [vmem:[%s7547_s1 + $0x3b0] sm:$0xff] }
  0x51   : > { %1214 = vmatpush.bf16.msra.mxu1 %v5869_v44  ;;  %v5965_v44 = vld [vmem:[%s7547_s1 + $0x3f0] sm:$0xff] }
  0x52   : > { %1228 = vmatpush.bf16.msra.mxu2 %v5877_v45  ;;  %v5940_v45 = vld [vmem:[%s7547_s1 + $0x328] sm:$0xff] }
  0x53   : > { %1242 = vmatpush.bf16.msra.mxu3 %v5885_v47  ;;  %v5948_v47 = vld [vmem:[%s7547_s1 + $0x368] sm:$0xff] }
  0x54   : > { %1201 = vmatpush.bf16.msra.mxu0 %v5860_v48  ;;  %v5956_v48 = vld [vmem:[%s7547_s1 + $0x3a8] sm:$0xff] }
  0x55   : > { %1215 = vmatpush.bf16.msra.mxu1 %v5868_v50  ;;  %v5964_v50 = vld [vmem:[%s7547_s1 + $0x3e8] sm:$0xff] }
  0x56   : > { %1229 = vmatpush.bf16.msra.mxu2 %v5876_v53  ;;  %v5939_v53 = vld [vmem:[%s7547_s1 + $0x320] sm:$0xff] }
  0x57   : > { %1243 = vmatpush.bf16.msra.mxu3 %v5884_v54  ;;  %v5947_v54 = vld [vmem:[%s7547_s1 + $0x360] sm:$0xff] }
  0x58   : > { %1202 = vmatpush.bf16.msra.mxu0 %v5859_v60  ;;  %v5955_v60 = vld [vmem:[%s7547_s1 + $0x3a0] sm:$0xff] }
  0x59   : > { %1216 = vmatpush.bf16.msra.mxu1 %v5867_v0  ;;  %v5963_v0 = vld [vmem:[%s7547_s1 + $0x3e0] sm:$0xff] }
  0x5a   : > { %1230 = vmatpush.bf16.msra.mxu2 %v5875_v1  ;;  %v5938_v1 = vld [vmem:[%s7547_s1 + $0x318] sm:$0xff] }
  0x5b   : > { %1244 = vmatpush.bf16.msra.mxu3 %v5883_v2  ;;  %v5946_v2 = vld [vmem:[%s7547_s1 + $0x358] sm:$0xff] }
  0x5c   : > { %1203 = vmatpush.bf16.msra.mxu0 %v5858_v5  ;;  %v5954_v5 = vld [vmem:[%s7547_s1 + $0x398] sm:$0xff] }
  0x5d   : > { %1217 = vmatpush.bf16.msra.mxu1 %v5866_v10  ;;  %v5962_v10 = vld [vmem:[%s7547_s1 + $0x3d8] sm:$0xff] }
  0x5e   : > { %1231 = vmatpush.bf16.msra.mxu2 %v5874_v11  ;;  %v5937_v11 = vld [vmem:[%s7547_s1 + $0x310] sm:$0xff] }
  0x5f   : > { %1245 = vmatpush.bf16.msra.mxu3 %v5882_v12  ;;  %v5945_v12 = vld [vmem:[%s7547_s1 + $0x350] sm:$0xff] }
  0x60   : > { %1204 = vmatpush.bf16.msra.mxu0 %v5857_v13  ;;  %v5953_v13 = vld [vmem:[%s7547_s1 + $0x390] sm:$0xff] }
  0x61   : > { %1218 = vmatpush.bf16.msra.mxu1 %v5865_v15  ;;  %v5961_v15 = vld [vmem:[%s7547_s1 + $0x3d0] sm:$0xff] }
  0x62   : > { %1232 = vmatpush.bf16.msra.mxu2 %v5873_v18  ;;  %v5936_v18 = vld [vmem:[%s7547_s1 + $0x308] sm:$0xff] }
  0x63   : > { %1246 = vmatpush.bf16.msra.mxu3 %v5881_v20  ;;  %v5944_v20 = vld [vmem:[%s7547_s1 + $0x348] sm:$0xff] }
  0x64   : > { %1205 = vmatpush.bf16.msra.mxu0 %v5856_v21  ;;  %v5952_v21 = vld [vmem:[%s7547_s1 + $0x388] sm:$0xff] }
  0x65   : > { %1219 = vmatpush.bf16.msra.mxu1 %v5864_v22  ;;  %v5960_v22 = vld [vmem:[%s7547_s1 + $0x3c8] sm:$0xff] }
  0x66   : > { %1233 = vmatpush.bf16.msra.mxu2 %v5872_v23  ;;  %v5935_v23 = vld [vmem:[%s7547_s1 + $0x300] sm:$0xff] }
  0x67   : > { %1247 = vmatpush.bf16.msra.mxu3 %v5880_v25  ;;  %v5943_v25 = vld [vmem:[%s7547_s1 + $0x340] sm:$0xff] }
  0x68   : > { %1206 = vmatpush.bf16.msra.mxu0 %v5855_v26  ;;  %v5951_v26 = vld [vmem:[%s7547_s1 + $0x380] sm:$0xff] }
  0x69   : > { %1220 = vmatpush.bf16.msra.mxu1 %v5863_v27  ;;  %v1365_v27 = vrot.slane %v6303_v24, 1 }
  0x6a   : > { %1234 = vmatpush.bf16.msra.mxu2 %v5871_v28  ;;  %v1366_v28 = vrot.slane %v6322_v35, 1 }
  0x6b   : > { %1248 = vmatpush.bf16.msra.mxu3 %v5879_v32  ;;  %1207 = vmatmul.bf16.vlgmr.msra.gmra.mxu0 %v6317_v33  ;;  %v1369_v32 = vrot.slane %v6336_v43, 1 }
  0x6c   : > { %1677 = vmatpush.bf16.msrb.mxu0 %v5942_v29  ;;  %1221 = vmatmul.bf16.vlgmr.msra.gmra.mxu1 %v6340_v46  ;;  %v5974_v29 = vld [vmem:[%s7547_s1 + $0x438] sm:$0xff] }
  0x6d   : > { %1691 = vmatpush.bf16.msrb.mxu1 %v5950_v30  ;;  %1235 = vmatmul.bf16.vlgmr.msra.gmra.mxu2 %v6476_v56  ;;  %v5982_v30 = vld [vmem:[%s7547_s1 + $0x478] sm:$0xff] }
  0x6e   : > { %1705 = vmatpush.bf16.msrb.mxu2 %v5958_v31  ;;  %1249 = vmatmul.bf16.vlgmr.msra.gmra.mxu3 %v6478_v63  ;;  %v1368_v31 = vrot.slane %v6334_v42, 1 }
  0x6f   : > { %1719 = vmatpush.bf16.msrb.mxu3 %v5966_v34  ;;  %v1371_v34 = vrot.slane %v6317_v33, 1 }
  0x70   : > { %1678 = vmatpush.bf16.msrb.mxu0 %v5941_v37  ;;  %v1372_v37 = vrot.slane %v6329_v40, 1 }
  0x71   : > { %1692 = vmatpush.bf16.msrb.mxu1 %v5949_v38  ;;  %v5990_v38 = vld [vmem:[%s7547_s1 + $0x4b8] sm:$0xff] }
  0x72   : > { %1706 = vmatpush.bf16.msrb.mxu2 %v5957_v39  ;;  %v5959_v39 = vld [vmem:[%s7547_s1 + $0x3c0] sm:$0xff] }
  0x73   : > { %1720 = vmatpush.bf16.msrb.mxu3 %v5965_v44  ;;  %v5998_v44 = vld [vmem:[%s7547_s1 + $0x4f8] sm:$0xff] }
  0x74   : > { %1679 = vmatpush.bf16.msrb.mxu0 %v5940_v45  ;;  %v1374_v45 = vrot.slane %v6340_v46, 1 }
  0x75   : > { %1693 = vmatpush.bf16.msrb.mxu1 %v5948_v47  ;;  %v1375_v47 = vrot.slane %v6371_v58, 1 }
  0x76   : > { %1707 = vmatpush.bf16.msrb.mxu2 %v5956_v48  ;;  %v1367_v48 = vsel %vm1364_vm1, %v1365_v27, %v1366_v28  ;;  %v5977_v27 = vld [vmem:[%s7547_s1 + $0x450] sm:$0xff] }
  0x77   : > { %1721 = vmatpush.bf16.msrb.mxu3 %v5964_v50  ;;  %v5973_v50 = vld [vmem:[%s7547_s1 + $0x430] sm:$0xff] }
  0x78   : > { %1680 = vmatpush.bf16.msrb.mxu0 %v5939_v53  ;;  %v5981_v53 = vld [vmem:[%s7547_s1 + $0x470] sm:$0xff] }
  0x79   : > { %1694 = vmatpush.bf16.msrb.mxu1 %v5947_v54  ;;  %v1370_v54 = vsel %vm1364_vm1, %v1368_v31, %v1369_v32  ;;  %v5985_v28 = vld [vmem:[%s7547_s1 + $0x490] sm:$0xff]  ;;  %v5968_v31 = vld [vmem:[%s7547_s1 + $0x408] sm:$0xff] }
  0x7a   : > { %1708 = vmatpush.bf16.msrb.mxu2 %v5955_v60  ;;  %v1373_v60 = vsel %vm1364_vm1, %v1371_v34, %v1372_v37  ;;  %v5976_v32 = vld [vmem:[%s7547_s1 + $0x448] sm:$0xff]  ;;  %v1873_v34 = vshrl.u32 %v6336_v43, 16 }
  0x7b   : > { %1722 = vmatpush.bf16.msrb.mxu3 %v5963_v0  ;;  %v5989_v0 = vld [vmem:[%s7547_s1 + $0x4b0] sm:$0xff]  ;;  %v5984_v37 = vld [vmem:[%s7547_s1 + $0x488] sm:$0xff] }
  0x7c   : > { %1681 = vmatpush.bf16.msrb.mxu0 %v5938_v1  ;;  %v5997_v1 = vld [vmem:[%s7547_s1 + $0x4f0] sm:$0xff] }
  0x7d   : > { %1695 = vmatpush.bf16.msrb.mxu1 %v5946_v2  ;;  %v1376_v2 = vsel %vm1364_vm1, %v1374_v45, %v1375_v47  ;;  %v1867_v47 = vrot.slane %v6353_v51, 2 }
  0x7e   : > { %1709 = vmatpush.bf16.msrb.mxu2 %v5954_v5  ;;  %v5972_v5 = vld [vmem:[%s7547_s1 + $0x428] sm:$0xff] }
  0x7f   : > { %1723 = vmatpush.bf16.msrb.mxu3 %v5962_v10  ;;  %v5980_v10 = vld [vmem:[%s7547_s1 + $0x468] sm:$0xff] }
  0x80   : > { %1682 = vmatpush.bf16.msrb.mxu0 %v5937_v11  ;;  %v5988_v11 = vld [vmem:[%s7547_s1 + $0x4a8] sm:$0xff] }
  0x81   : > { %1696 = vmatpush.bf16.msrb.mxu1 %v5945_v12  ;;  %v5996_v12 = vld [vmem:[%s7547_s1 + $0x4e8] sm:$0xff] }
  0x82   : > { %1710 = vmatpush.bf16.msrb.mxu2 %v5953_v13  ;;  %v5971_v13 = vld [vmem:[%s7547_s1 + $0x420] sm:$0xff] }
  0x83   : > { %1724 = vmatpush.bf16.msrb.mxu3 %v5961_v15  ;;  %v5979_v15 = vld [vmem:[%s7547_s1 + $0x460] sm:$0xff] }
  0x84   : > { %1683 = vmatpush.bf16.msrb.mxu0 %v5936_v18  ;;  %v5987_v18 = vld [vmem:[%s7547_s1 + $0x4a0] sm:$0xff] }
  0x85   : > { %1697 = vmatpush.bf16.msrb.mxu1 %v5944_v20  ;;  %v5995_v20 = vld [vmem:[%s7547_s1 + $0x4e0] sm:$0xff] }
  0x86   : > { %1711 = vmatpush.bf16.msrb.mxu2 %v5952_v21  ;;  %v5970_v21 = vld [vmem:[%s7547_s1 + $0x418] sm:$0xff] }
  0x87   : > { %1725 = vmatpush.bf16.msrb.mxu3 %v5960_v22  ;;  %v5978_v22 = vld [vmem:[%s7547_s1 + $0x458] sm:$0xff] }
  0x88   : > { %1684 = vmatpush.bf16.msrb.mxu0 %v5935_v23  ;;  %v5986_v23 = vld [vmem:[%s7547_s1 + $0x498] sm:$0xff] }
  0x89   : > { %1698 = vmatpush.bf16.msrb.mxu1 %v5943_v25  ;;  %v5994_v25 = vld [vmem:[%s7547_s1 + $0x4d8] sm:$0xff] }
  0x8a   : > { %1712 = vmatpush.bf16.msrb.mxu2 %v5951_v26  ;;  %v5969_v26 = vld [vmem:[%s7547_s1 + $0x410] sm:$0xff] }
  0x8b   : > { %1726 = vmatpush.bf16.msrb.mxu3 %v5959_v39  ;;  %1685 = vmatmul.bf16.vlgmr.msrb.gmra.mxu0 %v1367_v48  ;;  %v1861_v39 = vrot.slane %v6349_v49, 1  ;;  %v1377_v48 = vrot.slane %v6476_v56, 1 }
  0x8c   : > { %1733 = vmatpush.bf16.msra.mxu0 %v5974_v29  ;;  %1699 = vmatmul.bf16.vlgmr.msrb.gmra.mxu1 %v1370_v54  ;;  %v5993_v29 = vld [vmem:[%s7547_s1 + $0x4d0] sm:$0xff]  ;;  %v5975_v54 = vld [vmem:[%s7547_s1 + $0x440] sm:$0xff] }
  0x8d   : > { %1747 = vmatpush.bf16.msra.mxu1 %v5982_v30  ;;  %1713 = vmatmul.bf16.vlgmr.msrb.gmra.mxu2 %v1373_v60  ;;  %v1864_v30 = vshrl.u32 %v6322_v35, 16  ;;  %v1870_v60 = vrot.slane %v6374_v59, 1 }
  0x8e   : > { %2209 = vmatpush.bf16.msra.mxu2 %v5990_v38  ;;  %1727 = vmatmul.bf16.vlgmr.msrb.gmra.mxu3 %v1376_v2  ;;  %v5992_v38 = vld [vmem:[%s7547_s1 + $0x4c8] sm:$0xff]  ;;  %v1876_v2 = vrot.slane %v6378_v61, 2 }
  0x8f   : > { %2223 = vmatpush.bf16.msra.mxu3 %v5998_v44  ;;  %v1862_v44 = vrot.slane %v6325_v36, 2  ;;  %v1866_v45 = vrot.slane %v1864_v30, 1 }
  0x90   : > { %1734 = vmatpush.bf16.msra.mxu0 %v5973_v50  ;;  %v1378_v50 = vrot.slane %v6492_v6, 1 }
  0x91   : > { %1748 = vmatpush.bf16.msra.mxu1 %v5981_v53  ;;  %v5967_v53 = vld [vmem:[%s7547_s1 + $0x400] sm:$0xff] }
  0x92   : > { %2210 = vmatpush.bf16.msra.mxu2 %v5989_v0  ;;  %v1871_v0 = vrot.slane %v6356_v52, 2 }
  0x93   : > { %2224 = vmatpush.bf16.msra.mxu3 %v5997_v1  ;;  %v1875_v1 = vrot.slane %v1873_v34, 1 }
  0x94   : > { %1735 = vmatpush.bf16.msra.mxu0 %v5972_v5  ;;  %v5983_v5 = vld [vmem:[%s7547_s1 + $0x480] sm:$0xff] }
  0x95   : > { %1749 = vmatpush.bf16.msra.mxu1 %v5980_v10  ;;  %v6006_v10 = vld [vmem:[%s7547_s1 + $0x538] sm:$0xff] }
  0x96   : > { %2211 = vmatpush.bf16.msra.mxu2 %v5988_v11  ;;  %v1380_v11 = vrot.slane %v6478_v63, 1 }
  0x97   : > { %2225 = vmatpush.bf16.msra.mxu3 %v5996_v12  ;;  %v1381_v12 = vrot.slane %v6497_v8, 1 }
  0x98   : > { %1736 = vmatpush.bf16.msra.mxu0 %v5971_v13  ;;  %v6014_v13 = vld [vmem:[%s7547_s1 + $0x578] sm:$0xff] }
  0x99   : > { %1750 = vmatpush.bf16.msra.mxu1 %v5979_v15  ;;  %v6022_v15 = vld [vmem:[%s7547_s1 + $0x5b8] sm:$0xff] }
  0x9a   : > { %2212 = vmatpush.bf16.msra.mxu2 %v5987_v18  ;;  %v1863_v18 = vor.u32 %v1862_v44, %v1861_v39  ;;  %v6004_v39 = vld [vmem:[%s7547_s1 + $0x528] sm:$0xff] }
  0x9b   : > { %2226 = vmatpush.bf16.msra.mxu3 %v5995_v20  ;;  %v1868_v20 = vor.u32 %v1867_v47, %v1866_v45  ;;  %v6012_v44 = vld [vmem:[%s7547_s1 + $0x568] sm:$0xff] }
  0x9c   : > { %1737 = vmatpush.bf16.msra.mxu0 %v5970_v21  ;;  %v5991_v21 = vld [vmem:[%s7547_s1 + $0x4c0] sm:$0xff]  ;;  %v6020_v45 = vld [vmem:[%s7547_s1 + $0x5a8] sm:$0xff] }
  0x9d   : > { %1751 = vmatpush.bf16.msra.mxu1 %v5978_v22  ;;  %v1379_v22 = vsel %vm1364_vm1, %v1377_v48, %v1378_v50  ;;  %v6028_v47 = vld [vmem:[%s7547_s1 + $0x5e8] sm:$0xff]  ;;  %v6003_v48 = vld [vmem:[%s7547_s1 + $0x520] sm:$0xff] }
  0x9e   : > { %2213 = vmatpush.bf16.msra.mxu2 %v5986_v23  ;;  %v6030_v23 = vld [vmem:[%s7547_s1 + $0x5f8] sm:$0xff] }
  0x9f   : > { %2227 = vmatpush.bf16.msra.mxu3 %v5994_v25  ;;  %v1872_v25 = vor.u32 %v1871_v0, %v1870_v60  ;;  %v6027_v0 = vld [vmem:[%s7547_s1 + $0x5e0] sm:$0xff] }
  0xa0   : > { %1738 = vmatpush.bf16.msra.mxu0 %v5969_v26  ;;  %v1877_v26 = vor.u32 %v1876_v2, %v1875_v1  ;;  %v6002_v2 = vld [vmem:[%s7547_s1 + $0x518] sm:$0xff] }
  0xa1   : > { %1752 = vmatpush.bf16.msra.mxu1 %v5977_v27  ;;  %v1382_v27 = vsel %vm1364_vm1, %v1380_v11, %v1381_v12  ;;  %v6026_v11 = vld [vmem:[%s7547_s1 + $0x5d8] sm:$0xff] }
  0xa2   : > { %2214 = vmatpush.bf16.msra.mxu2 %v5985_v28  ;;  %v6005_v28 = vld [vmem:[%s7547_s1 + $0x530] sm:$0xff] }
  0xa3   : > { %2228 = vmatpush.bf16.msra.mxu3 %v5993_v29  ;;  %v6013_v29 = vld [vmem:[%s7547_s1 + $0x570] sm:$0xff] }
  0xa4   : > { %1739 = vmatpush.bf16.msra.mxu0 %v5968_v31  ;;  %v6021_v31 = vld [vmem:[%s7547_s1 + $0x5b0] sm:$0xff] }
  0xa5   : > { %1753 = vmatpush.bf16.msra.mxu1 %v5976_v32  ;;  %v1869_v32 = vsel %vm1860_vm2, %v1863_v18, %v1868_v20  ;;  %v7554_v18 = vshrl.u32 %v6492_v6, 16  ;;  %v6009_v20 = vld [vmem:[%s7547_s1 + $0x550] sm:$0xff] }
  0xa6   : > { %2215 = vmatpush.bf16.msra.mxu2 %v5984_v37  ;;  %v6029_v37 = vld [vmem:[%s7547_s1 + $0x5f0] sm:$0xff] }
  0xa7   : > { %2229 = vmatpush.bf16.msra.mxu3 %v5992_v38  ;;  %v1878_v38 = vsel %vm1860_vm2, %v1872_v25, %v1877_v26 }
  0xa8   : > { %1740 = vmatpush.bf16.msra.mxu0 %v5967_v53  ;;  %v808_v50 = vpop.f32.mrf.mxu0  ;;  %v6011_v53 = vld [vmem:[%s7547_s1 + $0x560] sm:$0xff] }
  0xa9   : > { %1754 = vmatpush.bf16.msra.mxu1 %v5975_v54  ;;  %v6019_v54 = vld [vmem:[%s7547_s1 + $0x5a0] sm:$0xff]  ;;  %v822_v60 = vpop.f32.mrf.mxu1 }
  0xaa   : > { %2216 = vmatpush.bf16.msra.mxu2 %v5983_v5  ;;  %v823_v1 = vadd.f32 %v822_v60, %v808_v50  ;;  %v6010_v5 = vld [vmem:[%s7547_s1 + $0x558] sm:$0xff]  ;;  %v1879_v50 = vrot.slane %v6365_v55, 1  ;;  %v1885_v60 = vrot.slane %v6369_v57, 2 }
  0xab   : > { %2230 = vmatpush.bf16.msra.mxu3 %v5991_v21  ;;  %1741 = vmatmul.bf16.vlgmr.msra.gmra.mxu0 %v1379_v22  ;;  %v6017_v21 = vld [vmem:[%s7547_s1 + $0x590] sm:$0xff] }
  0xac   : > { %2237 = vmatpush.bf16.msrb.mxu0 %v6006_v10  ;;  %1755 = vmatmul.bf16.vlgmr.msra.gmra.mxu1 %v1382_v27  ;;  %v6018_v10 = vld [vmem:[%s7547_s1 + $0x598] sm:$0xff]  ;;  %v7552_v27 = vshrl.u32 %v6371_v58, 16 }
  0xad   : > { %2251 = vmatpush.bf16.msrb.mxu1 %v6014_v13  ;;  %2217 = vmatmul.bf16.vlgmr.msra.gmra.mxu2 %v1869_v32  ;;  %v6001_v13 = vld [vmem:[%s7547_s1 + $0x510] sm:$0xff] }
  0xae   : > { %2265 = vmatpush.bf16.msrb.mxu2 %v6022_v15  ;;  %2231 = vmatmul.bf16.vlgmr.msra.gmra.mxu3 %v1878_v38  ;;  %v1897_v38 = vrot.slane %v6515_v14, 1 }
  0xaf   : > { %2279 = vmatpush.bf16.msrb.mxu3 %v6030_v23  ;;  %v7553_v23 = vshrl.u32 %v6329_v40, 16 }
  0xb0   : > { %2238 = vmatpush.bf16.msrb.mxu0 %v6005_v28  ;;  %v836_v12 = vpop.f32.mrf.mxu2  ;;  %v810_v22 = vpop.f32.mrf.mxu0  ;;  %v6025_v28 = vld [vmem:[%s7547_s1 + $0x5d0] sm:$0xff] }
  0xb1   : > { %2252 = vmatpush.bf16.msrb.mxu1 %v6013_v29  ;;  %v837_v15 = vadd.f32 %v836_v12, %v823_v1  ;;  %v850_v25 = vpop.f32.mrf.mxu3  ;;  %v824_v26 = vpop.f32.mrf.mxu1  ;;  %v1889_v1 = vrot.slane %v6381_v62, 2  ;;  %v1907_v12 = vrot.slane %v6500_v9, 2 }
  0xb2   : > { %2266 = vmatpush.bf16.msrb.mxu2 %v6021_v31  ;;  %v7551_v31 = vshrl.u32 %v6497_v8, 16  ;;  %v825_v32 = vadd.f32 %v824_v26, %v810_v22  ;;  %v6015_v26 = vld [vmem:[%s7547_s1 + $0x580] sm:$0xff] }
  0xb3   : > { %2280 = vmatpush.bf16.msrb.mxu3 %v6029_v37  ;;  %v6950_v29 = vadd.f32 %v850_v25, %v837_v15  ;;  %v6000_v37 = vld [vmem:[%s7547_s1 + $0x508] sm:$0xff]  ;;  %v1912_v15 = vrot.slane %v6526_v19, 2  ;;  %v6007_v25 = vld [vmem:[%s7547_s1 + $0x540] sm:$0xff] }
  0xb4   : > { %2239 = vmatpush.bf16.msrb.mxu0 %v6004_v39  ;;  %v1898_v39 = vrot.slane %v6495_v7, 2 }
  0xb5   : > { %2253 = vmatpush.bf16.msrb.mxu1 %v6012_v44  ;;  %v1902_v44 = vrot.slane %v7554_v18, 1  ;;  %v6054_v18 = vld [vmem:[%s7547_s1 + $0x6b8] sm:$0xff] }
  0xb6   : > { %2267 = vmatpush.bf16.msrb.mxu2 %v6020_v45  ;;  %v1903_v45 = vrot.slane %v6519_v16, 2 }
  0xb7   : > { %2281 = vmatpush.bf16.msrb.mxu3 %v6028_v47  ;;  %v6008_v47 = vld [vmem:[%s7547_s1 + $0x548] sm:$0xff] }
  0xb8   : > { %2240 = vmatpush.bf16.msrb.mxu0 %v6003_v48  ;;  %v6016_v48 = vld [vmem:[%s7547_s1 + $0x588] sm:$0xff] }
  0xb9   : > { %2254 = vmatpush.bf16.msrb.mxu1 %v6011_v53  ;;  %v1880_v53 = vrot.slane %v6332_v41, 2 }
  0xba   : > { %2268 = vmatpush.bf16.msrb.mxu2 %v6019_v54  ;;  %v1884_v54 = vrot.slane %v7553_v23, 1  ;;  %v852_v23 = vpop.f32.mrf.mxu3 }
  0xbb   : > { %2282 = vmatpush.bf16.msrb.mxu3 %v6027_v0  ;;  %v1888_v0 = vrot.slane %v6392_v3, 1 }
  0xbc   : > { %2241 = vmatpush.bf16.msrb.mxu0 %v6002_v2  ;;  %v1893_v2 = vrot.slane %v7552_v27, 1 }
  0xbd   : > { %2255 = vmatpush.bf16.msrb.mxu1 %v6010_v5  ;;  %v1894_v5 = vrot.slane %v6395_v4, 2 }
  0xbe   : > { %2269 = vmatpush.bf16.msrb.mxu2 %v6018_v10  ;;  %v6024_v10 = vld [vmem:[%s7547_s1 + $0x5c8] sm:$0xff] }
  0xbf   : > { %2283 = vmatpush.bf16.msrb.mxu3 %v6026_v11  ;;  %v1906_v11 = vrot.slane %v6522_v17, 1  ;;  %v1895_v27 = vor.u32 %v1894_v5, %v1893_v2  ;;  %v6061_v2 = vld [vmem:[%s7547_s1 + $0x6f0] sm:$0xff]  ;;  %v6052_v5 = vld [vmem:[%s7547_s1 + $0x6a8] sm:$0xff] }
  0xc0   : > { %2242 = vmatpush.bf16.msrb.mxu0 %v6001_v13  ;;  %v1911_v13 = vrot.slane %v7551_v31, 1  ;;  %v1904_v31 = vor.u32 %v1903_v45, %v1902_v44 }
  0xc1   : > { %2256 = vmatpush.bf16.msrb.mxu1 %v6009_v20  ;;  %v838_v20 = vpop.f32.mrf.mxu2 }
  0xc2   : > { %2270 = vmatpush.bf16.msrb.mxu2 %v6017_v21  ;;  %v5999_v21 = vld [vmem:[%s7547_s1 + $0x500] sm:$0xff]  ;;  %v839_v22 = vadd.f32 %v838_v20, %v825_v32  ;;  %v6046_v32 = vld [vmem:[%s7547_s1 + $0x678] sm:$0xff]  ;;  %v1890_v20 = vor.u32 %v1889_v1, %v1888_v0  ;;  %v1913_v44 = vor.u32 %v1912_v15, %v1911_v13  ;;  %v6045_v1 = vld [vmem:[%s7547_s1 + $0x670] sm:$0xff] }
  0xc3   : > { %2284 = vmatpush.bf16.msrb.mxu3 %v6025_v28  ;;  %v1899_v28 = vor.u32 %v1898_v39, %v1897_v38  ;;  %v6023_v38 = vld [vmem:[%s7547_s1 + $0x5c0] sm:$0xff]  ;;  %v1908_v39 = vor.u32 %v1907_v12, %v1906_v11 }
  0xc4   : > { %2243 = vmatpush.bf16.msrb.mxu0 %v6000_v37  ;;  %v6038_v37 = vld [vmem:[%s7547_s1 + $0x638] sm:$0xff]  ;;  %v853_v45 = vadd.f32 %v852_v23, %v839_v22  ;;  %v1896_v0 = vsel %vm1860_vm2, %v1890_v20, %v1895_v27  ;;  %v6044_v27 = vld [vmem:[%s7547_s1 + $0x668] sm:$0xff]  ;;  %v6035_v12 = vld [vmem:[%s7547_s1 + $0x620] sm:$0xff] }
  0xc5   : > { %2257 = vmatpush.bf16.msrb.mxu1 %v6008_v47  ;;  %v1881_v47 = vor.u32 %v1880_v53, %v1879_v50  ;;  %v6062_v50 = vld [vmem:[%s7547_s1 + $0x6f8] sm:$0xff]  ;;  %v1905_v53 = vsel %vm1860_vm2, %v1899_v28, %v1904_v31  ;;  %v1914_v23 = vsel %vm1860_vm2, %v1908_v39, %v1913_v44  ;;  %v6053_v31 = vld [vmem:[%s7547_s1 + $0x6b0] sm:$0xff]  ;;  %v6043_v15 = vld [vmem:[%s7547_s1 + $0x660] sm:$0xff] }
  0xc6   : > { %2271 = vmatpush.bf16.msrb.mxu2 %v6016_v48  ;;  %v1886_v48 = vor.u32 %v1885_v60, %v1884_v54  ;;  %v6037_v60 = vld [vmem:[%s7547_s1 + $0x630] sm:$0xff]  ;;  %v6042_v28 = vld [vmem:[%s7547_s1 + $0x658] sm:$0xff] }
  0xc7   : > { %2285 = vmatpush.bf16.msrb.mxu3 %v6024_v10  ;;  %v6060_v10 = vld [vmem:[%s7547_s1 + $0x6e8] sm:$0xff]  ;;  %v6033_v39 = vld [vmem:[%s7547_s1 + $0x610] sm:$0xff] }
  0xc8   : > { %2244 = vmatpush.bf16.msrb.mxu0 %v5999_v21  ;;  %v1887_v54 = vsel %vm1860_vm2, %v1881_v47, %v1886_v48  ;;  %v864_v11 = vpop.f32.mrf.mxu0  ;;  %v6051_v21 = vld [vmem:[%s7547_s1 + $0x6a0] sm:$0xff]  ;;  %v6058_v47 = vld [vmem:[%s7547_s1 + $0x6d8] sm:$0xff] }
  0xc9   : > { %2258 = vmatpush.bf16.msrb.mxu1 %v6007_v25  ;;  %v865_v13 = vadd.f32 %v864_v11, %v6950_v29  ;;  %v878_v22 = vpop.f32.mrf.mxu1  ;;  %v6059_v25 = vld [vmem:[%s7547_s1 + $0x6e0] sm:$0xff]  ;;  %v6034_v29 = vld [vmem:[%s7547_s1 + $0x618] sm:$0xff] }
  0xca   : > { %2272 = vmatpush.bf16.msrb.mxu2 %v6015_v26 }
  0xcb   : > { %2286 = vmatpush.bf16.msrb.mxu3 %v6023_v38  ;;  %2245 = vmatmul.bf16.vlgmr.msrb.gmra.mxu0 %v1887_v54  ;;  %v879_v26 = vadd.f32 %v878_v22, %v865_v13  ;;  %v6049_v54 = vld [vmem:[%s7547_s1 + $0x690] sm:$0xff]  ;;  %v6047_v13 = vld [vmem:[%s7547_s1 + $0x680] sm:$0xff]  ;;  %v6070_v22 = vld [vmem:[%s7547_s1 + $0x738] sm:$0xff] }
  0xcc   : > { %2705 = vmatpush.bf16.msra.mxu0 %v6038_v37  ;;  %2259 = vmatmul.bf16.vlgmr.msrb.gmra.mxu1 %v1896_v0  ;;  %v6050_v37 = vld [vmem:[%s7547_s1 + $0x698] sm:$0xff]  ;;  %v6057_v0 = vld [vmem:[%s7547_s1 + $0x6d0] sm:$0xff] }
  0xcd   : > { %2719 = vmatpush.bf16.msra.mxu1 %v6046_v32  ;;  %2273 = vmatmul.bf16.vlgmr.msrb.gmra.mxu2 %v1905_v53  ;;  %v6041_v53 = vld [vmem:[%s7547_s1 + $0x650] sm:$0xff] }
  0xce   : > { %2733 = vmatpush.bf16.msra.mxu2 %v6054_v18  ;;  %2287 = vmatmul.bf16.vlgmr.msrb.gmra.mxu3 %v1914_v23  ;;  %v6036_v18 = vld [vmem:[%s7547_s1 + $0x628] sm:$0xff] }
  0xcf   : > { %2747 = vmatpush.bf16.msra.mxu3 %v6062_v50 }
  0xd0   : > { %2706 = vmatpush.bf16.msra.mxu0 %v6037_v60  ;;  %v1180_v32 = vpop.f32.mrf.mxu2  ;;  %v866_v20 = vpop.f32.mrf.mxu0 }
  0xd1   : > { %2720 = vmatpush.bf16.msra.mxu1 %v6045_v1  ;;  %v1181_v48 = vadd.f32 %v1180_v32, %v879_v26  ;;  %v1194_v38 = vpop.f32.mrf.mxu3  ;;  %v867_v44 = vadd.f32 %v866_v20, %v853_v45  ;;  %v880_v60 = vpop.f32.mrf.mxu1  ;;  %v6032_v45 = vld [vmem:[%s7547_s1 + $0x608] sm:$0xff]  ;;  %v2396_v26 = vrot.slane %v6334_v42, 2  ;;  %v6086_v32 = vld [vmem:[%s7547_s1 + $0x7b8] sm:$0xff]  ;;  %v2402_v20 = vrot.slane %v6340_v46, 2 }
  0xd2   : > { %2734 = vmatpush.bf16.msra.mxu2 %v6053_v31  ;;  %v6040_v1 = vld [vmem:[%s7547_s1 + $0x648] sm:$0xff] }
  0xd3   : > { %2748 = vmatpush.bf16.msra.mxu3 %v6061_v2  ;;  %v7065_v50 = vadd.f32 %v1194_v38, %v1181_v48  ;;  %v881_v23 = vadd.f32 %v880_v60, %v867_v44  ;;  %v6048_v31 = vld [vmem:[%s7547_s1 + $0x688] sm:$0xff]  ;;  %v6094_v48 = vld [vmem:[%s7547_s1 + $0x7f8] sm:$0xff]  ;;  %v2403_v38 = vrot.slane %v6371_v58, 2  ;;  %v6069_v44 = vld [vmem:[%s7547_s1 + $0x730] sm:$0xff] }
  0xd4   : > { %2707 = vmatpush.bf16.msra.mxu0 %v6036_v18  ;;  %v6056_v18 = vld [vmem:[%s7547_s1 + $0x6c8] sm:$0xff] }
  0xd5   : > { %2721 = vmatpush.bf16.msra.mxu1 %v6044_v27 }
  0xd6   : > { %2735 = vmatpush.bf16.msra.mxu2 %v6052_v5 }
  0xd7   : > { %2749 = vmatpush.bf16.msra.mxu3 %v6060_v10  ;;  %v6031_v10 = vld [vmem:[%s7547_s1 + $0x600] sm:$0xff] }
  0xd8   : > { %2708 = vmatpush.bf16.msra.mxu0 %v6035_v12  ;;  %v1182_v2 = vpop.f32.mrf.mxu2  ;;  %v6039_v12 = vld [vmem:[%s7547_s1 + $0x640] sm:$0xff] }
  0xd9   : > { %2722 = vmatpush.bf16.msra.mxu1 %v6043_v15  ;;  %v1183_v27 = vadd.f32 %v1182_v2, %v881_v23  ;;  %v1196_v5 = vpop.f32.mrf.mxu3  ;;  %v2393_v15 = vrot.slane %v6303_v24, 2  ;;  %v6093_v23 = vld [vmem:[%s7547_s1 + $0x7f0] sm:$0xff]  ;;  %v6084_v2 = vld [vmem:[%s7547_s1 + $0x7a8] sm:$0xff] }
  0xda   : > { %2736 = vmatpush.bf16.msra.mxu2 %v6051_v21  ;;  %v2394_v21 = vrot.slane %v6322_v35, 2 }
  0xdb   : > { %2750 = vmatpush.bf16.msra.mxu3 %v6059_v25  ;;  %v7091_v11 = vadd.f32 %v1196_v5, %v1183_v27  ;;  %v6078_v25 = vld [vmem:[%s7547_s1 + $0x778] sm:$0xff]  ;;  %v6067_v5 = vld [vmem:[%s7547_s1 + $0x720] sm:$0xff] }
  0xdc   : > { %2709 = vmatpush.bf16.msra.mxu0 %v6034_v29  ;;  %v2397_v29 = vrot.slane %v6336_v43, 2 }
  0xdd   : > { %2723 = vmatpush.bf16.msra.mxu1 %v6042_v28  ;;  %v2399_v28 = vrot.slane %v6317_v33, 2 }
  0xde   : > { %2737 = vmatpush.bf16.msra.mxu2 %v6050_v37  ;;  %v2400_v37 = vrot.slane %v6329_v40, 2 }
  0xdf   : > { %2751 = vmatpush.bf16.msra.mxu3 %v6058_v47  ;;  %v6055_v47 = vld [vmem:[%s7547_s1 + $0x6c0] sm:$0xff] }
  0xe0   : > { %2710 = vmatpush.bf16.msra.mxu0 %v6033_v39  ;;  %v2395_v39 = vsel %vm2392_vm3, %v2393_v15, %v2394_v21  ;;  %v2401_v60 = vsel %vm2392_vm3, %v2399_v28, %v2400_v37  ;;  %v6091_v21 = vld [vmem:[%s7547_s1 + $0x7e0] sm:$0xff]  ;;  %v6090_v28 = vld [vmem:[%s7547_s1 + $0x7d8] sm:$0xff] }
  0xe1   : > { %2724 = vmatpush.bf16.msra.mxu1 %v6041_v53  ;;  %v6077_v53 = vld [vmem:[%s7547_s1 + $0x770] sm:$0xff] }
  0xe2   : > { %2738 = vmatpush.bf16.msra.mxu2 %v6049_v54  ;;  %v2398_v54 = vsel %vm2392_vm3, %v2396_v26, %v2397_v29  ;;  %v6082_v26 = vld [vmem:[%s7547_s1 + $0x798] sm:$0xff] }
  0xe3   : > { %2752 = vmatpush.bf16.msra.mxu3 %v6057_v0  ;;  %v6085_v0 = vld [vmem:[%s7547_s1 + $0x7b0] sm:$0xff] }
  0xe4   : > { %2711 = vmatpush.bf16.msra.mxu0 %v6032_v45  ;;  %v2404_v45 = vsel %vm2392_vm3, %v2402_v20, %v2403_v38  ;;  %v6073_v20 = vld [vmem:[%s7547_s1 + $0x750] sm:$0xff] }
  0xe5   : > { %2725 = vmatpush.bf16.msra.mxu1 %v6040_v1  ;;  %v6068_v1 = vld [vmem:[%s7547_s1 + $0x728] sm:$0xff] }
  0xe6   : > { %2739 = vmatpush.bf16.msra.mxu2 %v6048_v31  ;;  %v6076_v31 = vld [vmem:[%s7547_s1 + $0x768] sm:$0xff] }
  0xe7   : > { %2753 = vmatpush.bf16.msra.mxu3 %v6056_v18  ;;  %v6092_v18 = vld [vmem:[%s7547_s1 + $0x7e8] sm:$0xff] }
  0xe8   : > { %2712 = vmatpush.bf16.msra.mxu0 %v6031_v10  ;;  %v1208_v27 = vpop.f32.mrf.mxu0  ;;  %v6075_v10 = vld [vmem:[%s7547_s1 + $0x760] sm:$0xff] }
  0xe9   : > { %2726 = vmatpush.bf16.msra.mxu1 %v6039_v12  ;;  %v1209_v12 = vadd.f32 %v1208_v27, %v7065_v50  ;;  %v1222_v15 = vpop.f32.mrf.mxu1  ;;  %v6074_v50 = vld [vmem:[%s7547_s1 + $0x758] sm:$0xff]  ;;  %v2893_v27 = vrot.slane %v6353_v51, 3  ;;  %v2897_v51 = vrot.slane %v6356_v52, 3  ;;  %v2409_v52 = vrot.slane %v6497_v8, 2 }
  0xea   : > { %2740 = vmatpush.bf16.msra.mxu2 %v6047_v13  ;;  %v6083_v13 = vld [vmem:[%s7547_s1 + $0x7a0] sm:$0xff] }
  0xeb   : > { %2754 = vmatpush.bf16.msra.mxu3 %v6055_v47  ;;  %2713 = vmatmul.bf16.vlgmr.msra.gmra.mxu0 %v2395_v39 }
  0xec   : > { %2761 = vmatpush.bf16.msrb.mxu0 %v6070_v22  ;;  %2727 = vmatmul.bf16.vlgmr.msra.gmra.mxu1 %v2398_v54  ;;  %v1223_v22 = vadd.f32 %v1222_v15, %v1209_v12  ;;  %v6089_v54 = vld [vmem:[%s7547_s1 + $0x7d0] sm:$0xff]  ;;  %v2406_v12 = vrot.slane %v6492_v6, 2  ;;  %v6063_v15 = vld [vmem:[%s7547_s1 + $0x700] sm:$0xff] }
  0xed   : > { %2775 = vmatpush.bf16.msrb.mxu1 %v6078_v25  ;;  %2741 = vmatmul.bf16.vlgmr.msra.gmra.mxu2 %v2401_v60  ;;  %v6066_v25 = vld [vmem:[%s7547_s1 + $0x718] sm:$0xff] }
  0xee   : > { %3225 = vmatpush.bf16.msrb.mxu2 %v6086_v32  ;;  %2755 = vmatmul.bf16.vlgmr.msra.gmra.mxu3 %v2404_v45 }
  0xef   : > { %3239 = vmatpush.bf16.msrb.mxu3 %v6094_v48  ;;  %v6065_v48 = vld [vmem:[%s7547_s1 + $0x710] sm:$0xff] }
  0xf0   : > { %2762 = vmatpush.bf16.msrb.mxu0 %v6069_v44  ;;  %v1236_v29 = vpop.f32.mrf.mxu2  ;;  %v1210_v32 = vpop.f32.mrf.mxu0  ;;  %v6081_v44 = vld [vmem:[%s7547_s1 + $0x790] sm:$0xff] }
  0xf1   : > { %2776 = vmatpush.bf16.msrb.mxu1 %v6077_v53  ;;  %v1237_v37 = vadd.f32 %v1236_v29, %v1223_v22  ;;  %v1250_v47 = vpop.f32.mrf.mxu3  ;;  %v1211_v38 = vadd.f32 %v1210_v32, %v7091_v11  ;;  %v1224_v53 = vpop.f32.mrf.mxu1  ;;  %v6072_v11 = vld [vmem:[%s7547_s1 + $0x748] sm:$0xff]  ;;  %v6126_v32 = vld [vmem:[%s7547_s1 + $0x8f8] sm:$0xff] }
  0xf2   : > { %3226 = vmatpush.bf16.msrb.mxu2 %v6085_v0  ;;  %v6064_v0 = vld [vmem:[%s7547_s1 + $0x708] sm:$0xff] }
  0xf3   : > { %3240 = vmatpush.bf16.msrb.mxu3 %v6093_v23  ;;  %v7182_v39 = vadd.f32 %v1250_v47, %v1237_v37  ;;  %v1225_v60 = vadd.f32 %v1224_v53, %v1211_v38  ;;  %v6080_v23 = vld [vmem:[%s7547_s1 + $0x788] sm:$0xff]  ;;  %v6101_v38 = vld [vmem:[%s7547_s1 + $0x830] sm:$0xff] }
  0xf4   : > { %2763 = vmatpush.bf16.msrb.mxu0 %v6068_v1  ;;  %v6088_v1 = vld [vmem:[%s7547_s1 + $0x7c8] sm:$0xff]  ;;  %v6117_v53 = vld [vmem:[%s7547_s1 + $0x8b0] sm:$0xff] }
  0xf5   : > { %2777 = vmatpush.bf16.msrb.mxu1 %v6076_v31  ;;  %v2889_v31 = vrot.slane %v6349_v49, 2  ;;  %v2896_v49 = vrot.slane %v6374_v59, 2  ;;  %v2408_v59 = vrot.slane %v6478_v63, 2 }
  0xf6   : > { %3227 = vmatpush.bf16.msrb.mxu2 %v6084_v2  ;;  %v2890_v2 = vrot.slane %v6325_v36, 3  ;;  %v6071_v36 = vld [vmem:[%s7547_s1 + $0x740] sm:$0xff] }
  0xf7   : > { %3241 = vmatpush.bf16.msrb.mxu3 %v6092_v18  ;;  %v2892_v18 = vrot.slane %v1864_v30, 2  ;;  %v2899_v30 = vrot.slane %v1873_v34, 2  ;;  %v6118_v34 = vld [vmem:[%s7547_s1 + $0x8b8] sm:$0xff]  ;;  %v2898_v47 = vor.u32 %v2897_v51, %v2896_v49  ;;  %v6097_v51 = vld [vmem:[%s7547_s1 + $0x810] sm:$0xff] }
  0xf8   : > { %2764 = vmatpush.bf16.msrb.mxu0 %v6067_v5  ;;  %v1238_v45 = vpop.f32.mrf.mxu2  ;;  %v6122_v49 = vld [vmem:[%s7547_s1 + $0x8d8] sm:$0xff] }
  0xf9   : > { %2778 = vmatpush.bf16.msrb.mxu1 %v6075_v10  ;;  %v1239_v5 = vadd.f32 %v1238_v45, %v1225_v60  ;;  %v2405_v10 = vrot.slane %v6476_v56, 2  ;;  %v2894_v29 = vor.u32 %v2893_v27, %v2892_v18  ;;  %v6125_v60 = vld [vmem:[%s7547_s1 + $0x8f0] sm:$0xff]  ;;  %v6116_v45 = vld [vmem:[%s7547_s1 + $0x8a8] sm:$0xff]  ;;  %v6115_v18 = vld [vmem:[%s7547_s1 + $0x8a0] sm:$0xff] }
  0xfa   : > { %3228 = vmatpush.bf16.msrb.mxu2 %v6083_v13  ;;  %v1252_v13 = vpop.f32.mrf.mxu3 }
  0xfb   : > { %3242 = vmatpush.bf16.msrb.mxu3 %v6091_v21  ;;  %v2900_v21 = vrot.slane %v6378_v61, 3  ;;  %v7220_v22 = vadd.f32 %v1252_v13, %v1239_v5  ;;  %v6110_v61 = vld [vmem:[%s7547_s1 + $0x878] sm:$0xff]  ;;  %v2407_v37 = vsel %vm2392_vm3, %v2405_v10, %v2406_v12  ;;  %v6123_v10 = vld [vmem:[%s7547_s1 + $0x8e0] sm:$0xff] }
  0xfc   : > { %2765 = vmatpush.bf16.msrb.mxu0 %v6066_v25  ;;  %v6079_v25 = vld [vmem:[%s7547_s1 + $0x780] sm:$0xff]  ;;  %v6098_v13 = vld [vmem:[%s7547_s1 + $0x818] sm:$0xff] }
  0xfd   : > { %2779 = vmatpush.bf16.msrb.mxu1 %v6074_v50  ;;  %v6102_v50 = vld [vmem:[%s7547_s1 + $0x838] sm:$0xff] }
  0xfe   : > { %3229 = vmatpush.bf16.msrb.mxu2 %v6082_v26  ;;  %v2891_v26 = vor.u32 %v2890_v2, %v2889_v31  ;;  %v6099_v31 = vld [vmem:[%s7547_s1 + $0x820] sm:$0xff] }
  0xff   : > { %3243 = vmatpush.bf16.msrb.mxu3 %v6090_v28  ;;  %v6087_v28 = vld [vmem:[%s7547_s1 + $0x7c0] sm:$0xff] }
 0x100   : > { %2766 = vmatpush.bf16.msrb.mxu0 %v6065_v48  ;;  %v2901_v48 = vor.u32 %v2900_v21, %v2899_v30  ;;  %v6107_v2 = vld [vmem:[%s7547_s1 + $0x860] sm:$0xff]  ;;  %v6105_v21 = vld [vmem:[%s7547_s1 + $0x850] sm:$0xff] }
 0x101   : > { %2780 = vmatpush.bf16.msrb.mxu1 %v6073_v20  ;;  %v2410_v20 = vsel %vm2392_vm3, %v2408_v59, %v2409_v52 }
 0x102   : > { %3230 = vmatpush.bf16.msrb.mxu2 %v6081_v44  ;;  %v6109_v44 = vld [vmem:[%s7547_s1 + $0x870] sm:$0xff] }
 0x103   : > { %3244 = vmatpush.bf16.msrb.mxu3 %v6089_v54  ;;  %v2895_v54 = vsel %vm2888_vm4, %v2891_v26, %v2894_v29 }
 0x104   : > { %2767 = vmatpush.bf16.msrb.mxu0 %v6064_v0  ;;  %v2902_v0 = vsel %vm2888_vm4, %v2898_v47, %v2901_v48  ;;  %v7555_v47 = vshrl.u32 %v6492_v6, 16 }
 0x105   : > { %2781 = vmatpush.bf16.msrb.mxu1 %v6072_v11  ;;  %v6100_v11 = vld [vmem:[%s7547_s1 + $0x828] sm:$0xff] }
 0x106   : > { %3231 = vmatpush.bf16.msrb.mxu2 %v6080_v23  ;;  %v6108_v23 = vld [vmem:[%s7547_s1 + $0x868] sm:$0xff]  ;;  %v2920_v48 = vrot.slane %v7555_v47, 2 }
 0x107   : > { %3245 = vmatpush.bf16.msrb.mxu3 %v6088_v1  ;;  %v6124_v1 = vld [vmem:[%s7547_s1 + $0x8e8] sm:$0xff] }
 0x108   : > { %2768 = vmatpush.bf16.msrb.mxu0 %v6063_v15  ;;  %v1686_v27 = vpop.f32.mrf.mxu0  ;;  %v6106_v15 = vld [vmem:[%s7547_s1 + $0x858] sm:$0xff]  ;;  %v6132_v47 = vld [vmem:[%s7547_s1 + $0x928] sm:$0xff] }
 0x109   : > { %2782 = vmatpush.bf16.msrb.mxu1 %v6071_v36  ;;  %v1700_v5 = vpop.f32.mrf.mxu1  ;;  %v6114_v36 = vld [vmem:[%s7547_s1 + $0x898] sm:$0xff] }
 0x10a   : > { %3232 = vmatpush.bf16.msrb.mxu2 %v6079_v25  ;;  %v1701_v12 = vadd.f32 %v1700_v5, %v1686_v27  ;;  %v6113_v25 = vld [vmem:[%s7547_s1 + $0x890] sm:$0xff]  ;;  %v6142_v5 = vld [vmem:[%s7547_s1 + $0x978] sm:$0xff] }
 0x10b   : > { %3246 = vmatpush.bf16.msrb.mxu3 %v6087_v28  ;;  %2769 = vmatmul.bf16.vlgmr.msrb.gmra.mxu0 %v2407_v37  ;;  %v6096_v28 = vld [vmem:[%s7547_s1 + $0x808] sm:$0xff]  ;;  %v2917_v37 = vrot.slane %v6515_v14, 2  ;;  %v2904_v14 = vrot.slane %v6332_v41, 3  ;;  %v2924_v41 = vrot.slane %v6522_v17, 2 }
 0x10c   : > { %3253 = vmatpush.bf16.msra.mxu0 %v6102_v50  ;;  %2783 = vmatmul.bf16.vlgmr.msrb.gmra.mxu1 %v2410_v20  ;;  %v2921_v20 = vrot.slane %v6519_v16, 3  ;;  %v2910_v16 = vrot.slane %v6392_v3, 2  ;;  %v2928_v3 = vrot.slane %v6526_v19, 3  ;;  %v6134_v19 = vld [vmem:[%s7547_s1 + $0x938] sm:$0xff] }
 0x10d   : > { %3267 = vmatpush.bf16.msra.mxu1 %v6110_v61  ;;  %3233 = vmatmul.bf16.vlgmr.msrb.gmra.mxu2 %v2895_v54 }
 0x10e   : > { %3281 = vmatpush.bf16.msra.mxu2 %v6118_v34  ;;  %3247 = vmatmul.bf16.vlgmr.msrb.gmra.mxu3 %v2902_v0  ;;  %v6121_v34 = vld [vmem:[%s7547_s1 + $0x8d0] sm:$0xff]  ;;  %v2911_v0 = vrot.slane %v6381_v62, 3  ;;  %v6095_v62 = vld [vmem:[%s7547_s1 + $0x800] sm:$0xff] }
 0x10f   : > { %3295 = vmatpush.bf16.msra.mxu3 %v6126_v32  ;;  %v2918_v32 = vrot.slane %v6495_v7, 3  ;;  %v7556_v7 = vshrl.u32 %v6329_v40, 16 }
 0x110   : > { %3254 = vmatpush.bf16.msra.mxu0 %v6101_v38  ;;  %v1714_v30 = vpop.f32.mrf.mxu2  ;;  %v1688_v50 = vpop.f32.mrf.mxu0  ;;  %v6104_v38 = vld [vmem:[%s7547_s1 + $0x848] sm:$0xff] }
 0x111   : > { %3268 = vmatpush.bf16.msra.mxu1 %v6109_v44  ;;  %v1715_v59 = vadd.f32 %v1714_v30, %v1701_v12  ;;  %v1702_v52 = vpop.f32.mrf.mxu1  ;;  %v1728_v61 = vpop.f32.mrf.mxu3  ;;  %v6112_v44 = vld [vmem:[%s7547_s1 + $0x888] sm:$0xff]  ;;  %v2906_v54 = vrot.slane %v7556_v7, 2  ;;  %v2919_v17 = vor.u32 %v2918_v32, %v2917_v37  ;;  %v6149_v37 = vld [vmem:[%s7547_s1 + $0x9b0] sm:$0xff]  ;;  %v6139_v7 = vld [vmem:[%s7547_s1 + $0x960] sm:$0xff] }
 0x112   : > { %3282 = vmatpush.bf16.msra.mxu2 %v6117_v53  ;;  %v1703_v26 = vadd.f32 %v1702_v52, %v1688_v50  ;;  %v2903_v53 = vrot.slane %v6365_v55, 2  ;;  %v6120_v55 = vld [vmem:[%s7547_s1 + $0x8c8] sm:$0xff]  ;;  %v6158_v50 = vld [vmem:[%s7547_s1 + $0x9f8] sm:$0xff]  ;;  %v6157_v32 = vld [vmem:[%s7547_s1 + $0x9f0] sm:$0xff] }
 0x113   : > { %3296 = vmatpush.bf16.msra.mxu3 %v6125_v60  ;;  %v7306_v29 = vadd.f32 %v1728_v61, %v1715_v59  ;;  %v2907_v60 = vrot.slane %v6369_v57, 3  ;;  %v7558_v57 = vshrl.u32 %v6497_v8, 16  ;;  %v6133_v61 = vld [vmem:[%s7547_s1 + $0x930] sm:$0xff] }
 0x114   : > { %3255 = vmatpush.bf16.msra.mxu0 %v6100_v11  ;;  %v7557_v11 = vshrl.u32 %v6371_v58, 16 }
 0x115   : > { %3269 = vmatpush.bf16.msra.mxu1 %v6108_v23  ;;  %v2908_v12 = vor.u32 %v2907_v60, %v2906_v54  ;;  %v6147_v60 = vld [vmem:[%s7547_s1 + $0x9a0] sm:$0xff] }
 0x116   : > { %3283 = vmatpush.bf16.msra.mxu2 %v6116_v45  ;;  %v2913_v23 = vrot.slane %v7557_v11, 2  ;;  %v2914_v45 = vrot.slane %v6395_v4, 3 }
 0x117   : > { %3297 = vmatpush.bf16.msra.mxu3 %v6124_v1  ;;  %v2925_v1 = vrot.slane %v6500_v9, 3  ;;  %v6111_v9 = vld [vmem:[%s7547_s1 + $0x880] sm:$0xff] }
 0x118   : > { %3256 = vmatpush.bf16.msra.mxu0 %v6099_v31  ;;  %v2927_v31 = vrot.slane %v7558_v57, 2  ;;  %v1716_v4 = vpop.f32.mrf.mxu2 }
 0x119   : > { %3270 = vmatpush.bf16.msra.mxu1 %v6107_v2  ;;  %v6103_v2 = vld [vmem:[%s7547_s1 + $0x840] sm:$0xff]  ;;  %v1717_v27 = vadd.f32 %v1716_v4, %v1703_v26  ;;  %v2926_v30 = vor.u32 %v2925_v1, %v2924_v41  ;;  %v6153_v4 = vld [vmem:[%s7547_s1 + $0x9d0] sm:$0xff] }
 0x11a   : > { %3284 = vmatpush.bf16.msra.mxu2 %v6115_v18  ;;  %v2922_v18 = vor.u32 %v2921_v20, %v2920_v48  ;;  %v6140_v48 = vld [vmem:[%s7547_s1 + $0x968] sm:$0xff] }
 0x11b   : > { %3298 = vmatpush.bf16.msra.mxu3 %v6123_v10  ;;  %v2905_v10 = vor.u32 %v2904_v14, %v2903_v53  ;;  %v6148_v20 = vld [vmem:[%s7547_s1 + $0x9a8] sm:$0xff]  ;;  %v6131_v53 = vld [vmem:[%s7547_s1 + $0x920] sm:$0xff] }
 0x11c   : > { %3257 = vmatpush.bf16.msra.mxu0 %v6098_v13  ;;  %v2912_v13 = vor.u32 %v2911_v0, %v2910_v16  ;;  %v2923_v59 = vsel %vm2888_vm4, %v2919_v17, %v2922_v18  ;;  %v6155_v16 = vld [vmem:[%s7547_s1 + $0x9e0] sm:$0xff]  ;;  %v6128_v18 = vld [vmem:[%s7547_s1 + $0x908] sm:$0xff] }
 0x11d   : > { %3271 = vmatpush.bf16.msra.mxu1 %v6106_v15  ;;  %v2915_v15 = vor.u32 %v2914_v45, %v2913_v23  ;;  %v2909_v52 = vsel %vm2888_vm4, %v2905_v10, %v2908_v12  ;;  %v6138_v23 = vld [vmem:[%s7547_s1 + $0x958] sm:$0xff]  ;;  %v6152_v10 = vld [vmem:[%s7547_s1 + $0x9c8] sm:$0xff]  ;;  %v3409_v12 = vrot.slane %v6303_v24, 3  ;;  %v3413_v24 = vrot.slane %v6336_v43, 3 }
 0x11e   : > { %3285 = vmatpush.bf16.msra.mxu2 %v6114_v36  ;;  %v1730_v36 = vpop.f32.mrf.mxu3  ;;  %v6146_v45 = vld [vmem:[%s7547_s1 + $0x998] sm:$0xff]  ;;  %v3419_v43 = vrot.slane %v6371_v58, 3 }
 0x11f   : > { %3299 = vmatpush.bf16.msra.mxu3 %v6122_v49  ;;  %v6119_v49 = vld [vmem:[%s7547_s1 + $0x8c0] sm:$0xff] }
 0x120   : > { %3258 = vmatpush.bf16.msra.mxu0 %v6097_v51  ;;  %v6150_v51 = vld [vmem:[%s7547_s1 + $0x9b8] sm:$0xff] }
 0x121   : > { %3272 = vmatpush.bf16.msra.mxu1 %v6105_v21  ;;  %v2929_v21 = vor.u32 %v2928_v3, %v2927_v31  ;;  %v6137_v31 = vld [vmem:[%s7547_s1 + $0x950] sm:$0xff] }
 0x122   : > { %3286 = vmatpush.bf16.msra.mxu2 %v6113_v25  ;;  %v1731_v25 = vadd.f32 %v1730_v36, %v1717_v27  ;;  %v6143_v36 = vld [vmem:[%s7547_s1 + $0x980] sm:$0xff] }
 0x123   : > { %3300 = vmatpush.bf16.msra.mxu3 %v6121_v34  ;;  %v2916_v34 = vsel %vm2888_vm4, %v2912_v13, %v2915_v15  ;;  %v2930_v26 = vsel %vm2888_vm4, %v2926_v30, %v2929_v21  ;;  %v3410_v13 = vrot.slane %v6322_v35, 3  ;;  %v6135_v15 = vld [vmem:[%s7547_s1 + $0x940] sm:$0xff]  ;;  %v3412_v30 = vrot.slane %v6334_v42, 3  ;;  %v6166_v35 = vld [vmem:[%s7547_s1 + $0xa38] sm:$0xff] }
 0x124   : > { %3259 = vmatpush.bf16.msra.mxu0 %v6096_v28  ;;  %v6141_v28 = vld [vmem:[%s7547_s1 + $0x970] sm:$0xff]  ;;  %v6174_v21 = vld [vmem:[%s7547_s1 + $0xa78] sm:$0xff]  ;;  %v3418_v42 = vrot.slane %v6340_v46, 3 }
 0x125   : > { %3273 = vmatpush.bf16.msra.mxu1 %v6104_v38  ;;  %v6156_v38 = vld [vmem:[%s7547_s1 + $0x9e8] sm:$0xff]  ;;  %v6173_v46 = vld [vmem:[%s7547_s1 + $0xa70] sm:$0xff] }
 0x126   : > { %3287 = vmatpush.bf16.msra.mxu2 %v6112_v44  ;;  %v3420_v58 = vsel %vm3408_vm5, %v3418_v42, %v3419_v43 }
 0x127   : > { %3301 = vmatpush.bf16.msra.mxu3 %v6120_v55  ;;  %v6154_v55 = vld [vmem:[%s7547_s1 + $0x9d8] sm:$0xff] }
 0x128   : > { %3260 = vmatpush.bf16.msra.mxu0 %v6095_v62  ;;  %v1742_v44 = vpop.f32.mrf.mxu0  ;;  %v6145_v62 = vld [vmem:[%s7547_s1 + $0x990] sm:$0xff] }
 0x129   : > { %3274 = vmatpush.bf16.msra.mxu1 %v6103_v2  ;;  %v1743_v14 = vadd.f32 %v1742_v44, %v7306_v29  ;;  %v1756_v54 = vpop.f32.mrf.mxu1  ;;  %v6130_v29 = vld [vmem:[%s7547_s1 + $0x918] sm:$0xff] }
 0x12a   : > { %3288 = vmatpush.bf16.msra.mxu2 %v6111_v9  ;;  %v6162_v44 = vld [vmem:[%s7547_s1 + $0xa18] sm:$0xff] }
 0x12b   : > { %3302 = vmatpush.bf16.msra.mxu3 %v6119_v49  ;;  %3261 = vmatmul.bf16.vlgmr.msra.gmra.mxu0 %v2909_v52  ;;  %v1757_v0 = vadd.f32 %v1756_v54, %v1743_v14  ;;  %v3415_v49 = vrot.slane %v6317_v33, 3  ;;  %v6151_v33 = vld [vmem:[%s7547_s1 + $0x9c0] sm:$0xff] }
 0x12c   : > { %3721 = vmatpush.bf16.msrb.mxu0 %v6134_v19  ;;  %3275 = vmatmul.bf16.vlgmr.msra.gmra.mxu1 %v2916_v34  ;;  %v6136_v19 = vld [vmem:[%s7547_s1 + $0x948] sm:$0xff]  ;;  %v6165_v34 = vld [vmem:[%s7547_s1 + $0xa30] sm:$0xff] }
 0x12d   : > { %3735 = vmatpush.bf16.msrb.mxu1 %v6142_v5  ;;  %3289 = vmatmul.bf16.vlgmr.msra.gmra.mxu2 %v2923_v59  ;;  %v7409_v11 = vadd.f32 %v1757_v0, %v7182_v39  ;;  %v6129_v39 = vld [vmem:[%s7547_s1 + $0x910] sm:$0xff]  ;;  %v6144_v5 = vld [vmem:[%s7547_s1 + $0x988] sm:$0xff]  ;;  %v3411_v59 = vsel %vm3408_vm5, %v3409_v12, %v3410_v13 }
 0x12e   : > { %3749 = vmatpush.bf16.msrb.mxu2 %v6150_v51  ;;  %3303 = vmatmul.bf16.vlgmr.msra.gmra.mxu3 %v2930_v26  ;;  %v3416_v51 = vrot.slane %v6329_v40, 3  ;;  %v6164_v26 = vld [vmem:[%s7547_s1 + $0xa28] sm:$0xff] }
 0x12f   : > { %3763 = vmatpush.bf16.msrb.mxu3 %v6158_v50 }
 0x130   : > { %3722 = vmatpush.bf16.msrb.mxu0 %v6133_v61  ;;  %v1744_v41 = vpop.f32.mrf.mxu0  ;;  %v2218_v1 = vpop.f32.mrf.mxu2  ;;  %v3417_v52 = vsel %vm3408_vm5, %v3415_v49, %v3416_v51  ;;  %v3414_v61 = vsel %vm3408_vm5, %v3412_v30, %v3413_v24 }
 0x131   : > { %3736 = vmatpush.bf16.msrb.mxu1 %v6141_v28  ;;  %v1745_v57 = vadd.f32 %v1744_v41, %v1731_v25  ;;  %v1758_v3 = vpop.f32.mrf.mxu1  ;;  %v2232_v2 = vpop.f32.mrf.mxu3  ;;  %v6172_v28 = vld [vmem:[%s7547_s1 + $0xa68] sm:$0xff] }
 0x132   : > { %3750 = vmatpush.bf16.msrb.mxu2 %v6149_v37  ;;  %v2233_v17 = vadd.f32 %v2232_v2, %v2218_v1  ;;  %v6163_v37 = vld [vmem:[%s7547_s1 + $0xa20] sm:$0xff]  ;;  %v6168_v1 = vld [vmem:[%s7547_s1 + $0xa48] sm:$0xff]  ;;  %v3422_v2 = vrot.slane %v6492_v6, 3 }
 0x133   : > { %3764 = vmatpush.bf16.msrb.mxu3 %v6157_v32  ;;  %v1759_v9 = vadd.f32 %v1758_v3, %v1745_v57  ;;  %v6171_v32 = vld [vmem:[%s7547_s1 + $0xa60] sm:$0xff] }
 0x134   : > { %3723 = vmatpush.bf16.msrb.mxu0 %v6132_v47 }
 0x135   : > { %3737 = vmatpush.bf16.msrb.mxu1 %v6140_v48  ;;  %v7436_v27 = vadd.f32 %v1759_v9, %v7220_v22  ;;  %v6127_v22 = vld [vmem:[%s7547_s1 + $0x900] sm:$0xff]  ;;  %v3424_v9 = vrot.slane %v6478_v63, 3 }
 0x136   : > { %3751 = vmatpush.bf16.msrb.mxu2 %v6148_v20 }
 0x137   : > { %3765 = vmatpush.bf16.msrb.mxu3 %v6156_v38 }
 0x138   : > { %3724 = vmatpush.bf16.msrb.mxu0 %v6131_v53  ;;  %v2220_v25 = vpop.f32.mrf.mxu2  ;;  %v6170_v53 = vld [vmem:[%s7547_s1 + $0xa58] sm:$0xff] }
 0x139   : > { %3738 = vmatpush.bf16.msrb.mxu1 %v6139_v7  ;;  %v2234_v50 = vpop.f32.mrf.mxu3 }
 0x13a   : > { %3752 = vmatpush.bf16.msrb.mxu2 %v6147_v60  ;;  %v2235_v40 = vadd.f32 %v2234_v50, %v2220_v25  ;;  %v6161_v60 = vld [vmem:[%s7547_s1 + $0xa10] sm:$0xff] }
 0x13b   : > { %3766 = vmatpush.bf16.msrb.mxu3 %v6155_v16  ;;  %v6169_v16 = vld [vmem:[%s7547_s1 + $0xa50] sm:$0xff] }
 0x13c   : > { %3725 = vmatpush.bf16.msrb.mxu0 %v6130_v29 }
 0x13d   : > { %3739 = vmatpush.bf16.msrb.mxu1 %v6138_v23 }
 0x13e   : > { %3753 = vmatpush.bf16.msrb.mxu2 %v6146_v45 }
 0x13f   : > { %3767 = vmatpush.bf16.msrb.mxu3 %v6154_v55 }
 0x140   : > { %3726 = vmatpush.bf16.msrb.mxu0 %v6129_v39  ;;  %v6160_v39 = vld [vmem:[%s7547_s1 + $0xa08] sm:$0xff] }
 0x141   : > { %3740 = vmatpush.bf16.msrb.mxu1 %v6137_v31 }
 0x142   : > { %3754 = vmatpush.bf16.msrb.mxu2 %v6145_v62  ;;  %v6167_v62 = vld [vmem:[%s7547_s1 + $0xa40] sm:$0xff] }
 0x143   : > { %3768 = vmatpush.bf16.msrb.mxu3 %v6153_v4  ;;  %v3421_v4 = vrot.slane %v6476_v56, 3 }
 0x144   : > { %3727 = vmatpush.bf16.msrb.mxu0 %v6128_v18 }
 0x145   : > { %3741 = vmatpush.bf16.msrb.mxu1 %v6136_v19 }
 0x146   : > { %3755 = vmatpush.bf16.msrb.mxu2 %v6144_v5  ;;  %v3423_v5 = vsel %vm3408_vm5, %v3421_v4, %v3422_v2 }
 0x147   : > { %3769 = vmatpush.bf16.msrb.mxu3 %v6152_v10 }
 0x148   : > { %3728 = vmatpush.bf16.msrb.mxu0 %v6127_v22  ;;  %v2246_v47 = vpop.f32.mrf.mxu0 }
 0x149   : > { %3742 = vmatpush.bf16.msrb.mxu1 %v6135_v15  ;;  %v2260_v48 = vpop.f32.mrf.mxu1  ;;  %v2247_v20 = vadd.f32 %v2246_v47, %v2233_v17  ;;  %v3425_v17 = vrot.slane %v6497_v8, 3 }
 0x14a   : > { %3756 = vmatpush.bf16.msrb.mxu2 %v6143_v36 }
 0x14b   : > { %3770 = vmatpush.bf16.msrb.mxu3 %v6151_v33  ;;  %3729 = vmatmul.bf16.vlgmr.msrb.gmra.mxu0 %v3411_v59  ;;  %v2261_v38 = vadd.f32 %v2260_v48, %v2247_v20  ;;  %v3426_v10 = vsel %vm3408_vm5, %v3424_v9, %v3425_v17 }
 0x14c   : > { %3777 = vmatpush.bf16.msra.mxu0 %v6166_v35  ;;  %3743 = vmatmul.bf16.vlgmr.msrb.gmra.mxu1 %v3414_v61 }
 0x14d   : > { %3791 = vmatpush.bf16.msra.mxu1 %v6174_v21  ;;  %3757 = vmatmul.bf16.vlgmr.msrb.gmra.mxu2 %v3417_v52 }
 0x14e   : > { %3771 = vmatmul.bf16.vlgmr.msrb.gmra.mxu3 %v3420_v58 }
 0x150   : > { %3778 = vmatpush.bf16.msra.mxu0 %v6165_v34  ;;  %v2274_v14 = vpop.f32.mrf.mxu2  ;;  %v2248_v29 = vpop.f32.mrf.mxu0 }
 0x151   : > { %3792 = vmatpush.bf16.msra.mxu1 %v6173_v46  ;;  %v2275_v7 = vadd.f32 %v2274_v14, %v2261_v38  ;;  %v2288_v54 = vpop.f32.mrf.mxu3  ;;  %v2262_v23 = vpop.f32.mrf.mxu1  ;;  %v2249_v45 = vadd.f32 %v2248_v29, %v2235_v40 }
 0x153   : > { %v2289_v0 = vadd.f32 %v2288_v54, %v2275_v7  ;;  %v2263_v41 = vadd.f32 %v2262_v23, %v2249_v45 }
 0x154   : > { %3779 = vmatpush.bf16.msra.mxu0 %v6164_v26 }
 0x155   : > { %3793 = vmatpush.bf16.msra.mxu1 %v6172_v28  ;;  %v7508_v55 = vadd.f32 %v2289_v0, %v7409_v11  ;;  %v6159_v11 = vld [vmem:[%s7547_s1 + $0xa00] sm:$0xff] }
 0x158   : > { %3780 = vmatpush.bf16.msra.mxu0 %v6163_v37  ;;  %v2276_v57 = vpop.f32.mrf.mxu2 }
 0x159   : > { %3794 = vmatpush.bf16.msra.mxu1 %v6171_v32  ;;  %v2277_v31 = vadd.f32 %v2276_v57, %v2263_v41  ;;  %v2290_v3 = vpop.f32.mrf.mxu3 }
 0x15b   : > { %v2291_v18 = vadd.f32 %v2290_v3, %v2277_v31 }
 0x15c   : > { %3781 = vmatpush.bf16.msra.mxu0 %v6162_v44 }
 0x15d   : > { %3795 = vmatpush.bf16.msra.mxu1 %v6170_v53  ;;  %v7527_v19 = vadd.f32 %v2291_v18, %v7436_v27 }
 0x160   : > { %3782 = vmatpush.bf16.msra.mxu0 %v6161_v60 }
 0x161   : > { %3796 = vmatpush.bf16.msra.mxu1 %v6169_v16 }
 0x164   : > { %3783 = vmatpush.bf16.msra.mxu0 %v6160_v39 }
 0x165   : > { %3797 = vmatpush.bf16.msra.mxu1 %v6168_v1 }
 0x168   : > { %3784 = vmatpush.bf16.msra.mxu0 %v6159_v11  ;;  %v2714_v22 = vpop.f32.mrf.mxu0 }
 0x169   : > { %3798 = vmatpush.bf16.msra.mxu1 %v6167_v62  ;;  %v2728_v56 = vpop.f32.mrf.mxu1 }
 0x16a   : > { %v2729_v34 = vadd.f32 %v2728_v56, %v2714_v22 }
 0x16b   : > { %3785 = vmatmul.bf16.vlgmr.msra.gmra.mxu0 %v3423_v5 }
 0x16c   : > { %3799 = vmatmul.bf16.vlgmr.msra.gmra.mxu1 %v3426_v10 }
 0x170   : > { %v2742_v12 = vpop.f32.mrf.mxu2  ;;  %v2716_v6 = vpop.f32.mrf.mxu0 }
 0x171   : > { %v2730_v13 = vpop.f32.mrf.mxu1  ;;  %v2756_v63 = vpop.f32.mrf.mxu3  ;;  %v2743_v26 = vadd.f32 %v2742_v12, %v2729_v34 }
 0x172   : > { %v2731_v32 = vadd.f32 %v2730_v13, %v2716_v6  ;;  %v6189_v6 = vld [vmem:[%s7548_s2] ss:$0 sm:$0xff] }
 0x173   : > { %v2757_v47 = vadd.f32 %v2756_v63, %v2743_v26 }
 0x178   : > { %v2744_v15 = vpop.f32.mrf.mxu2 }
 0x179   : > { %v2758_v49 = vpop.f32.mrf.mxu3  ;;  %v2745_v14 = vadd.f32 %v2744_v15, %v2731_v32 }
 0x17b   : > { %v2759_v29 = vadd.f32 %v2758_v49, %v2745_v14  ;;  %v6190_v49 = vld [vmem:[%s7549_s3] ss:$0 sm:$0xff] }
 0x188   : > { %v2770_v8 = vpop.f32.mrf.mxu0 }
 0x189   : > { %v2784_v36 = vpop.f32.mrf.mxu1  ;;  %v2771_v54 = vadd.f32 %v2770_v8, %v2757_v47 }
 0x18b   : > { %v2785_v23 = vadd.f32 %v2784_v36, %v2771_v54 }
 0x18d   : > { %v2789_v4 = vadd.f32 %v2785_v23, %v7508_v55 }
 0x190   : > { %v3234_v27 = vpop.f32.mrf.mxu2  ;;  %v2772_v51 = vpop.f32.mrf.mxu0 }
 0x191   : > { %v2786_v30 = vpop.f32.mrf.mxu1  ;;  %v3248_v24 = vpop.f32.mrf.mxu3  ;;  %v2773_v3 = vadd.f32 %v2772_v51, %v2759_v29 }
 0x192   : > { %v3249_v46 = vadd.f32 %v3248_v24, %v3234_v27 }
 0x193   : > { %v2787_v5 = vadd.f32 %v2786_v30, %v2773_v3 }
 0x195   : > { %v2790_v63 = vadd.f32 %v2787_v5, %v7527_v19 }
 0x198   : > { %v3236_v35 = vpop.f32.mrf.mxu2 }
 0x199   : > { %v3250_v50 = vpop.f32.mrf.mxu3 }
 0x19a   : > { %v3251_v48 = vadd.f32 %v3250_v50, %v3236_v35 }
 0x1a8   : > { %v3262_v21 = vpop.f32.mrf.mxu0 }
 0x1a9   : > { %v3276_v25 = vpop.f32.mrf.mxu1  ;;  %v3263_v28 = vadd.f32 %v3262_v21, %v3249_v46 }
 0x1ab   : > { %v3277_v53 = vadd.f32 %v3276_v25, %v3263_v28 }
 0x1b0   : > { %v3290_v33 = vpop.f32.mrf.mxu2  ;;  %v3264_v40 = vpop.f32.mrf.mxu0 }
 0x1b1   : > { %v3278_v42 = vpop.f32.mrf.mxu1  ;;  %v3304_v43 = vpop.f32.mrf.mxu3  ;;  %v3265_v60 = vadd.f32 %v3264_v40, %v3251_v48  ;;  %v3291_v0 = vadd.f32 %v3290_v33, %v3277_v53 }
 0x1b3   : > { %v3279_v45 = vadd.f32 %v3278_v42, %v3265_v60  ;;  %v3305_v11 = vadd.f32 %v3304_v43, %v3291_v0 }
 0x1b5   : > { %v3309_v10 = vadd.f32 %v3305_v11, %v2789_v4 }
 0x1b8   : > { %v3292_v59 = vpop.f32.mrf.mxu2 }
 0x1b9   : > { %v3306_v58 = vpop.f32.mrf.mxu3  ;;  %v3293_v2 = vadd.f32 %v3292_v59, %v3279_v45 }
 0x1bb   : > { %v3307_v22 = vadd.f32 %v3306_v58, %v3293_v2 }
 0x1bd   : > { %v3310_v55 = vadd.f32 %v3307_v22, %v2790_v63 }
 0x1c8   : > { %v3730_v52 = vpop.f32.mrf.mxu0 }
 0x1c9   : > { %v3744_v61 = vpop.f32.mrf.mxu1 }
 0x1ca   : > { %v3745_v20 = vadd.f32 %v3744_v61, %v3730_v52 }
 0x1d0   : > { %v3758_v37 = vpop.f32.mrf.mxu2  ;;  %v3732_v38 = vpop.f32.mrf.mxu0 }
 0x1d1   : > { %v3746_v44 = vpop.f32.mrf.mxu1  ;;  %v3772_v7 = vpop.f32.mrf.mxu3  ;;  %v3759_v16 = vadd.f32 %v3758_v37, %v3745_v20 }
 0x1d2   : > { %v3747_v39 = vadd.f32 %v3746_v44, %v3732_v38 }
 0x1d3   : > { %v3773_v41 = vadd.f32 %v3772_v7, %v3759_v16 }
 0x1d8   : > { %v3760_v1 = vpop.f32.mrf.mxu2 }
 0x1d9   : > { %v3761_v9 = vadd.f32 %v3760_v1, %v3747_v39  ;;  %v3774_v18 = vpop.f32.mrf.mxu3 }
 0x1db   : > { %v3775_v56 = vadd.f32 %v3774_v18, %v3761_v9 }
 0x1e8   : > { %v3786_v57 = vpop.f32.mrf.mxu0 }
 0x1e9   : > { %v3800_v31 = vpop.f32.mrf.mxu1  ;;  %v3787_v62 = vadd.f32 %v3786_v57, %v3773_v41 }
 0x1eb   : > { %v3801_v17 = vadd.f32 %v3800_v31, %v3787_v62 }
 0x1ed   : > { %v3805_v12 = vadd.f32 %v3801_v17, %v3309_v10 }
 0x1ef   : > { %v3810_v36 = vmul.f32 %v6189_v6, %v3805_v12 }
 0x1f0   : > { %v3788_v13 = vpop.f32.mrf.mxu0 }
 0x1f1   : > { %v3789_v15 = vadd.f32 %v3788_v13, %v3775_v56  ;;  %v3802_v8 = vpop.f32.mrf.mxu1  ;;  %v3815_v30 = vadd.f32 %v6190_v49, %v3810_v36 }
 0x1f3   : > { %v3803_v27 = vadd.f32 %v3802_v8, %v3789_v15  ;;  %v3817_v21 = vmax.f32 %v3815_v30, 0.0 }
 0x1f5   : > { %v3806_v51 = vadd.f32 %v3803_v27, %v3310_v55 }
 0x1f7   : > { %v3811_v24 = vmul.f32 %v6189_v6, %v3806_v51 }
 0x1f9   : > { %v3816_v35 = vadd.f32 %v6190_v49, %v3811_v24 }
 0x1fb   : > { %v3818_v25 = vmax.f32 %v3816_v35, 0.0 }
 0x1fd   : > { %v6178_v19 = vpack.c.bf16 %v3818_v25, %v3817_v21 }
 0x1ff   : > { %6179 = vst [vmem:[%s197_s30] sm:$0xff] %v6178_v19  }
 0x200 PF: > { %s14_s15 = sadd.s32 1, %s6197_s15  }
 0x201   : > { %p11_p4 = scmp.ge.s32.totalorder %s14_s15, 4  }
 0x203   :  { %13 = sbr.rel (!%p11_p4) target bundleno = 1 (0x1), region = 72 }

</bundles_post_ra>
